<compile_context>
chip_gen: v5e
topology: v5e:2x2
jax: 0.10.0
libtpu: 0.0.40
codegen_flags: <defaults>
</compile_context>

<pallas_src>
import jax
import jax.numpy as jnp
import numpy as np
from jax.experimental import pallas as pl
from jax.experimental.pallas import tpu as pltpu

EPS = 1e-5


def basic_block_kernel(x_ref, w1_ref, g1_ref, b1_ref,
                       w2_ref, g2_ref, b2_ref,
                       o_ref, pad_ref):
    N, H, W, C = x_ref.shape
    M = N * H * W
    K9 = w1_ref.shape[0]          # 9 * C

    x = x_ref[...]                # (N, H, W, C) f32, kept for the residual

    # Zero the padded scratch ONCE. Both convs only overwrite the interior,
    # so the 1-pixel zero halo is reused for both.
    pad_ref[...] = jnp.zeros_like(pad_ref)

    def conv3x3_bn(inp_nhwc, w_ref, g_ref, b_ref, relu):
        # Write interior into the persistent zero-haloed scratch.
        pad_ref[:, 1:H + 1, 1:W + 1, :] = inp_nhwc
        # im2col: gather the 9 taps once, concatenated along the lane
        # (channel) axis, then a single K=9*C matmul (bf16 in, f32 acc).
        taps = [pad_ref[:, dy:dy + H, dx:dx + W, :]
                for dy in range(3) for dx in range(3)]
        patches = jnp.concatenate(taps, axis=-1).reshape(M, K9)
        patches = patches.astype(jnp.bfloat16)
        y = jnp.dot(patches, w_ref[...], preferred_element_type=jnp.float32)

        # BatchNorm2d (training mode): one-pass batch stats (biased variance),
        # folded into a single per-channel scale/shift FMA. All f32.
        s1 = jnp.sum(y, axis=0, keepdims=True)
        s2 = jnp.sum(y * y, axis=0, keepdims=True)
        mean = s1 * (1.0 / M)
        var = s2 * (1.0 / M) - mean * mean
        scale = g_ref[...] * jax.lax.rsqrt(var + EPS)
        shift = b_ref[...] - mean * scale
        y = y * scale + shift
        if relu:
            y = jnp.maximum(y, 0.0)
        return y                  # (M, C) f32

    y1 = conv3x3_bn(x, w1_ref, g1_ref, b1_ref, relu=True)
    y2 = conv3x3_bn(y1.reshape(N, H, W, C), w2_ref, g2_ref, b2_ref, relu=False)
    out = jnp.maximum(y2 + x.reshape(M, C), 0.0)
    o_ref[...] = out.reshape(N, H, W, C).astype(o_ref.dtype)


def basic_block(x, params):
    """x: (N, H, W, C) float32, params from make_params. Returns (N, H, W, C)."""
    w1, g1, b1, w2, g2, b2 = params
    N, H, W, C = x.shape
    # stride=1 and downsample=None => identity residual requires in == out chans.
    assert w1.shape == (3, 3, C, C) and w2.shape == (3, 3, C, C), \
        "BasicBlock with stride=1 / downsample=None requires inplanes == planes"

    # Pre-pack conv weights for the im2col matmul: HWIO -> (9*C, C), bf16.
    w1k = w1.reshape(9 * C, C).astype(jnp.bfloat16)
    w2k = w2.reshape(9 * C, C).astype(jnp.bfloat16)
    g1k, b1k = g1.reshape(1, C), b1.reshape(1, C)
    g2k, b2k = g2.reshape(1, C), b2.reshape(1, C)

    vmem = pl.BlockSpec(memory_space=pltpu.MemorySpace.VMEM)
    return pl.pallas_call(
        basic_block_kernel,
        out_shape=jax.ShapeDtypeStruct((N, H, W, C), x.dtype),
        in_specs=[vmem] * 7,
        out_specs=vmem,
        # Padded activation scratch shared by both convs (f32; bf16 is a
        # further VMEM saving at real sizes, see TODO above).
        scratch_shapes=[pltpu.VMEM((N, H + 2, W + 2, C), jnp.float32)],
        compiler_params=pltpu.CompilerParams(
            vmem_limit_bytes=32 * 1024 * 1024),
    )(x, w1k, g1k, b1k, w2k, g2k, b2k)


def make_params(key, planes):
    """Deterministic synthetic parameters, shapes per BasicBlock.__init__.
    Conv weights stored HWIO (3, 3, Cin, Cout); BN gamma/beta as (C,)."""
    ks = jax.random.split(key, 6)
    std = (2.0 / (9 * planes)) ** 0.5
    w1 = jax.random.normal(ks[0], (3, 3, planes, planes), jnp.float32) * std
    g1 = 1.0 + 0.1 * jax.random.normal(ks[1], (planes,), jnp.float32)
    b1 = 0.1 * jax.random.normal(ks[2], (planes,), jnp.float32)
    w2 = jax.random.normal(ks[3], (3, 3, planes, planes), jnp.float32) * std
    g2 = 1.0 + 0.1 * jax.random.normal(ks[4], (planes,), jnp.float32)
    b2 = 0.1 * jax.random.normal(ks[5], (planes,), jnp.float32)
    return (w1, g1, b1, w2, g2, b2)


def basic_block_ref(x, params):
    """Pure-JAX reference (same semantics, same bf16 conv precision)."""
    w1, g1, b1, w2, g2, b2 = params

    def conv_bn(inp, w, g, b, relu):
        y = jax.lax.conv_general_dilated(
            inp.astype(jnp.bfloat16), w.astype(jnp.bfloat16),
            window_strides=(1, 1), padding=((1, 1), (1, 1)),
            dimension_numbers=('NHWC', 'HWIO', 'NHWC'),
            preferred_element_type=jnp.float32)
        mean = jnp.mean(y, axis=(0, 1, 2), keepdims=True)
        var = jnp.mean((y - mean) ** 2, axis=(0, 1, 2), keepdims=True)
        y = (y - mean) * jax.lax.rsqrt(var + EPS) * g.reshape(1, 1, 1, -1) \
            + b.reshape(1, 1, 1, -1)
        return jax.nn.relu(y) if relu else y

    y = conv_bn(x, w1, g1, b1, relu=True)
    y = conv_bn(y, w2, g2, b2, relu=False)
    return jax.nn.relu(y + x)


if __name__ == "__main__":
    # Small but lane-dense shapes: batch=2, 16x16 spatial, 128 channels
    # (a realistic ResNet BasicBlock channel count; fills the 128-lane vregs).
    N, Hh, Ww, planes = 2, 16, 16, 128

    key = jax.random.PRNGKey(0)
    kx, kp = jax.random.split(key)
    x = jax.random.normal(kx, (N, Hh, Ww, planes), jnp.float32)
    params = make_params(kp, planes)

    out = jax.block_until_ready(basic_block(x, params))
    ref = jax.block_until_ready(basic_block_ref(x, params))

    assert out.shape == (N, Hh, Ww, planes)
    np.testing.assert_allclose(np.asarray(out), np.asarray(ref),
                               rtol=1e-2, atol=1e-2)
    print("KERNEL_OK")
</pallas_src>

<mosaic_0001>
module attributes {stable_mosaic.version = 11 : i64} {
  func.func @basic_block_kernel(%arg0: memref<2x16x16x128xf32, #tpu.memory_space<vmem>>, %arg1: memref<1152x128xbf16, #tpu.memory_space<vmem>>, %arg2: memref<1x128xf32, #tpu.memory_space<vmem>>, %arg3: memref<1x128xf32, #tpu.memory_space<vmem>>, %arg4: memref<1152x128xbf16, #tpu.memory_space<vmem>>, %arg5: memref<1x128xf32, #tpu.memory_space<vmem>>, %arg6: memref<1x128xf32, #tpu.memory_space<vmem>>, %arg7: memref<2x16x16x128xf32, #tpu.memory_space<vmem>>, %arg8: memref<2x18x18x128xf32, #tpu.memory_space<vmem>>) attributes {dimension_semantics = [], scalar_prefetch = 0 : i64, scratch_operands = 1 : i64, tpu.core_type = #tpu.core_type<tc>} {
    %c0 = arith.constant 0 : index
    %c0_0 = arith.constant 0 : index
    %c0_1 = arith.constant 0 : index
    %c0_2 = arith.constant 0 : index
    %0 = vector.load %arg0[%c0, %c0_0, %c0_1, %c0_2] : memref<2x16x16x128xf32, #tpu.memory_space<vmem>>, vector<2x16x16x128xf32>
    %cst = arith.constant 0.000000e+00 : f32
    %1 = vector.broadcast %cst : f32 to vector<2x18x18x128xf32>
    %c0_3 = arith.constant 0 : index
    %c0_4 = arith.constant 0 : index
    %c0_5 = arith.constant 0 : index
    %c0_6 = arith.constant 0 : index
    %2 = vector.load %arg8[%c0_3, %c0_4, %c0_5, %c0_6] : memref<2x18x18x128xf32, #tpu.memory_space<vmem>>, vector<2x18x18x128xf32>
    tpu.vector_store %arg8[%c0_3, %c0_4, %c0_5, %c0_6], %1 {strides = array<i32>} : memref<2x18x18x128xf32, #tpu.memory_space<vmem>>, vector<2x18x18x128xf32>,
    %c0_7 = arith.constant 0 : index
    %c1 = arith.constant 1 : index
    %c1_8 = arith.constant 1 : index
    %c0_9 = arith.constant 0 : index
    %3 = vector.load %arg8[%c0_7, %c1, %c1_8, %c0_9] : memref<2x18x18x128xf32, #tpu.memory_space<vmem>>, vector<2x16x16x128xf32>
    tpu.vector_store %arg8[%c0_7, %c1, %c1_8, %c0_9], %0 {strides = array<i32>} : memref<2x18x18x128xf32, #tpu.memory_space<vmem>>, vector<2x16x16x128xf32>,
    %c0_10 = arith.constant 0 : index
    %c0_11 = arith.constant 0 : index
    %c0_12 = arith.constant 0 : index
    %c0_13 = arith.constant 0 : index
    %4 = vector.load %arg8[%c0_10, %c0_11, %c0_12, %c0_13] : memref<2x18x18x128xf32, #tpu.memory_space<vmem>>, vector<2x16x16x128xf32>
    %c0_14 = arith.constant 0 : index
    %c0_15 = arith.constant 0 : index
    %c1_16 = arith.constant 1 : index
    %c0_17 = arith.constant 0 : index
    %5 = vector.load %arg8[%c0_14, %c0_15, %c1_16, %c0_17] : memref<2x18x18x128xf32, #tpu.memory_space<vmem>>, vector<2x16x16x128xf32>
    %c0_18 = arith.constant 0 : index
    %c0_19 = arith.constant 0 : index
    %c2 = arith.constant 2 : index
    %c0_20 = arith.constant 0 : index
    %6 = vector.load %arg8[%c0_18, %c0_19, %c2, %c0_20] : memref<2x18x18x128xf32, #tpu.memory_space<vmem>>, vector<2x16x16x128xf32>
    %c0_21 = arith.constant 0 : index
    %c1_22 = arith.constant 1 : index
    %c0_23 = arith.constant 0 : index
    %c0_24 = arith.constant 0 : index
    %7 = vector.load %arg8[%c0_21, %c1_22, %c0_23, %c0_24] : memref<2x18x18x128xf32, #tpu.memory_space<vmem>>, vector<2x16x16x128xf32>
    %c0_25 = arith.constant 0 : index
    %c1_26 = arith.constant 1 : index
    %c1_27 = arith.constant 1 : index
    %c0_28 = arith.constant 0 : index
    %8 = vector.load %arg8[%c0_25, %c1_26, %c1_27, %c0_28] : memref<2x18x18x128xf32, #tpu.memory_space<vmem>>, vector<2x16x16x128xf32>
    %c0_29 = arith.constant 0 : index
    %c1_30 = arith.constant 1 : index
    %c2_31 = arith.constant 2 : index
    %c0_32 = arith.constant 0 : index
    %9 = vector.load %arg8[%c0_29, %c1_30, %c2_31, %c0_32] : memref<2x18x18x128xf32, #tpu.memory_space<vmem>>, vector<2x16x16x128xf32>
    %c0_33 = arith.constant 0 : index
    %c2_34 = arith.constant 2 : index
    %c0_35 = arith.constant 0 : index
    %c0_36 = arith.constant 0 : index
    %10 = vector.load %arg8[%c0_33, %c2_34, %c0_35, %c0_36] : memref<2x18x18x128xf32, #tpu.memory_space<vmem>>, vector<2x16x16x128xf32>
    %c0_37 = arith.constant 0 : index
    %c2_38 = arith.constant 2 : index
    %c1_39 = arith.constant 1 : index
    %c0_40 = arith.constant 0 : index
    %11 = vector.load %arg8[%c0_37, %c2_38, %c1_39, %c0_40] : memref<2x18x18x128xf32, #tpu.memory_space<vmem>>, vector<2x16x16x128xf32>
    %c0_41 = arith.constant 0 : index
    %c2_42 = arith.constant 2 : index
    %c2_43 = arith.constant 2 : index
    %c0_44 = arith.constant 0 : index
    %12 = vector.load %arg8[%c0_41, %c2_42, %c2_43, %c0_44] : memref<2x18x18x128xf32, #tpu.memory_space<vmem>>, vector<2x16x16x128xf32>
    %13 = tpu.concatenate %4, %5, %6, %7, %8, %9, %10, %11, %12 in 3 : vector<2x16x16x128xf32>, vector<2x16x16x128xf32>, vector<2x16x16x128xf32>, vector<2x16x16x128xf32>, vector<2x16x16x128xf32>, vector<2x16x16x128xf32>, vector<2x16x16x128xf32>, vector<2x16x16x128xf32>, vector<2x16x16x128xf32> -> vector<2x16x16x1152xf32>
    %14 = vector.shape_cast %13 : vector<2x16x16x1152xf32> to vector<512x1152xf32>
    %15 = arith.truncf %14 : vector<512x1152xf32> to vector<512x1152xbf16>
    %c0_45 = arith.constant 0 : index
    %c0_46 = arith.constant 0 : index
    %16 = vector.load %arg1[%c0_45, %c0_46] : memref<1152x128xbf16, #tpu.memory_space<vmem>>, vector<1152x128xbf16>
    %cst_47 = arith.constant dense<0.000000e+00> : vector<512x128xf32>
    %17 = tpu.matmul %15, %16, %cst_47 {dimension_numbers = #tpu.dot_dimension_numbers<[1], [0], [0], [1], [0, 0, 1, 1], [], []>} : vector<512x1152xbf16>, vector<1152x128xbf16>, vector<512x128xf32> -> vector<512x128xf32>
    %cst_48 = arith.constant dense<0.000000e+00> : vector<128xf32>
    %18 = vector.multi_reduction <add>, %17, %cst_48 [0] : vector<512x128xf32> to vector<128xf32>
    %19 = vector.shape_cast %18 : vector<128xf32> to vector<1x128xf32>
    %20 = arith.mulf %17, %17 : vector<512x128xf32>
    %cst_49 = arith.constant dense<0.000000e+00> : vector<128xf32>
    %21 = vector.multi_reduction <add>, %20, %cst_49 [0] : vector<512x128xf32> to vector<128xf32>
    %22 = vector.shape_cast %21 : vector<128xf32> to vector<1x128xf32>
    %cst_50 = arith.constant 0.001953125 : f32
    %23 = vector.broadcast %cst_50 : f32 to vector<1x128xf32>
    %24 = arith.mulf %19, %23 : vector<1x128xf32>
    %cst_51 = arith.constant 0.001953125 : f32
    %25 = vector.broadcast %cst_51 : f32 to vector<1x128xf32>
    %26 = arith.mulf %22, %25 : vector<1x128xf32>
    %27 = arith.mulf %24, %24 : vector<1x128xf32>
    %28 = arith.subf %26, %27 : vector<1x128xf32>
    %c0_52 = arith.constant 0 : index
    %c0_53 = arith.constant 0 : index
    %29 = vector.load %arg2[%c0_52, %c0_53] : memref<1x128xf32, #tpu.memory_space<vmem>>, vector<1x128xf32>
    %cst_54 = arith.constant 9.99999974E-6 : f32
    %30 = vector.broadcast %cst_54 : f32 to vector<1x128xf32>
    %31 = arith.addf %28, %30 : vector<1x128xf32>
    %32 = math.rsqrt %31 : vector<1x128xf32>
    %33 = arith.mulf %29, %32 : vector<1x128xf32>
    %c0_55 = arith.constant 0 : index
    %c0_56 = arith.constant 0 : index
    %34 = vector.load %arg3[%c0_55, %c0_56] : memref<1x128xf32, #tpu.memory_space<vmem>>, vector<1x128xf32>
    %35 = arith.mulf %24, %33 : vector<1x128xf32>
    %36 = arith.subf %34, %35 : vector<1x128xf32>
    %37 = vector.broadcast %33 : vector<1x128xf32> to vector<512x128xf32>
    %38 = arith.mulf %17, %37 : vector<512x128xf32>
    %39 = vector.broadcast %36 : vector<1x128xf32> to vector<512x128xf32>
    %40 = arith.addf %38, %39 : vector<512x128xf32>
    %cst_57 = arith.constant 0.000000e+00 : f32
    %41 = vector.broadcast %cst_57 : f32 to vector<512x128xf32>
    %42 = arith.maximumf %40, %41 : vector<512x128xf32>
    %43 = vector.shape_cast %42 : vector<512x128xf32> to vector<2x16x16x128xf32>
    %c0_58 = arith.constant 0 : index
    %c1_59 = arith.constant 1 : index
    %c1_60 = arith.constant 1 : index
    %c0_61 = arith.constant 0 : index
    %44 = vector.load %arg8[%c0_58, %c1_59, %c1_60, %c0_61] : memref<2x18x18x128xf32, #tpu.memory_space<vmem>>, vector<2x16x16x128xf32>
    tpu.vector_store %arg8[%c0_58, %c1_59, %c1_60, %c0_61], %43 {strides = array<i32>} : memref<2x18x18x128xf32, #tpu.memory_space<vmem>>, vector<2x16x16x128xf32>,
    %c0_62 = arith.constant 0 : index
    %c0_63 = arith.constant 0 : index
    %c0_64 = arith.constant 0 : index
    %c0_65 = arith.constant 0 : index
    %45 = vector.load %arg8[%c0_62, %c0_63, %c0_64, %c0_65] : memref<2x18x18x128xf32, #tpu.memory_space<vmem>>, vector<2x16x16x128xf32>
    %c0_66 = arith.constant 0 : index
    %c0_67 = arith.constant 0 : index
    %c1_68 = arith.constant 1 : index
    %c0_69 = arith.constant 0 : index
    %46 = vector.load %arg8[%c0_66, %c0_67, %c1_68, %c0_69] : memref<2x18x18x128xf32, #tpu.memory_space<vmem>>, vector<2x16x16x128xf32>
    %c0_70 = arith.constant 0 : index
    %c0_71 = arith.constant 0 : index
    %c2_72 = arith.constant 2 : index
    %c0_73 = arith.constant 0 : index
    %47 = vector.load %arg8[%c0_70, %c0_71, %c2_72, %c0_73] : memref<2x18x18x128xf32, #tpu.memory_space<vmem>>, vector<2x16x16x128xf32>
    %c0_74 = arith.constant 0 : index
    %c1_75 = arith.constant 1 : index
    %c0_76 = arith.constant 0 : index
    %c0_77 = arith.constant 0 : index
    %48 = vector.load %arg8[%c0_74, %c1_75, %c0_76, %c0_77] : memref<2x18x18x128xf32, #tpu.memory_space<vmem>>, vector<2x16x16x128xf32>
    %c0_78 = arith.constant 0 : index
    %c1_79 = arith.constant 1 : index
    %c1_80 = arith.constant 1 : index
    %c0_81 = arith.constant 0 : index
    %49 = vector.load %arg8[%c0_78, %c1_79, %c1_80, %c0_81] : memref<2x18x18x128xf32, #tpu.memory_space<vmem>>, vector<2x16x16x128xf32>
    %c0_82 = arith.constant 0 : index
    %c1_83 = arith.constant 1 : index
    %c2_84 = arith.constant 2 : index
    %c0_85 = arith.constant 0 : index
    %50 = vector.load %arg8[%c0_82, %c1_83, %c2_84, %c0_85] : memref<2x18x18x128xf32, #tpu.memory_space<vmem>>, vector<2x16x16x128xf32>
    %c0_86 = arith.constant 0 : index
    %c2_87 = arith.constant 2 : index
    %c0_88 = arith.constant 0 : index
    %c0_89 = arith.constant 0 : index
    %51 = vector.load %arg8[%c0_86, %c2_87, %c0_88, %c0_89] : memref<2x18x18x128xf32, #tpu.memory_space<vmem>>, vector<2x16x16x128xf32>
    %c0_90 = arith.constant 0 : index
    %c2_91 = arith.constant 2 : index
    %c1_92 = arith.constant 1 : index
    %c0_93 = arith.constant 0 : index
    %52 = vector.load %arg8[%c0_90, %c2_91, %c1_92, %c0_93] : memref<2x18x18x128xf32, #tpu.memory_space<vmem>>, vector<2x16x16x128xf32>
    %c0_94 = arith.constant 0 : index
    %c2_95 = arith.constant 2 : index
    %c2_96 = arith.constant 2 : index
    %c0_97 = arith.constant 0 : index
    %53 = vector.load %arg8[%c0_94, %c2_95, %c2_96, %c0_97] : memref<2x18x18x128xf32, #tpu.memory_space<vmem>>, vector<2x16x16x128xf32>
    %54 = tpu.concatenate %45, %46, %47, %48, %49, %50, %51, %52, %53 in 3 : vector<2x16x16x128xf32>, vector<2x16x16x128xf32>, vector<2x16x16x128xf32>, vector<2x16x16x128xf32>, vector<2x16x16x128xf32>, vector<2x16x16x128xf32>, vector<2x16x16x128xf32>, vector<2x16x16x128xf32>, vector<2x16x16x128xf32> -> vector<2x16x16x1152xf32>
    %55 = vector.shape_cast %54 : vector<2x16x16x1152xf32> to vector<512x1152xf32>
    %56 = arith.truncf %55 : vector<512x1152xf32> to vector<512x1152xbf16>
    %c0_98 = arith.constant 0 : index
    %c0_99 = arith.constant 0 : index
    %57 = vector.load %arg4[%c0_98, %c0_99] : memref<1152x128xbf16, #tpu.memory_space<vmem>>, vector<1152x128xbf16>
    %cst_100 = arith.constant dense<0.000000e+00> : vector<512x128xf32>
    %58 = tpu.matmul %56, %57, %cst_100 {dimension_numbers = #tpu.dot_dimension_numbers<[1], [0], [0], [1], [0, 0, 1, 1], [], []>} : vector<512x1152xbf16>, vector<1152x128xbf16>, vector<512x128xf32> -> vector<512x128xf32>
    %cst_101 = arith.constant dense<0.000000e+00> : vector<128xf32>
    %59 = vector.multi_reduction <add>, %58, %cst_101 [0] : vector<512x128xf32> to vector<128xf32>
    %60 = vector.shape_cast %59 : vector<128xf32> to vector<1x128xf32>
    %61 = arith.mulf %58, %58 : vector<512x128xf32>
    %cst_102 = arith.constant dense<0.000000e+00> : vector<128xf32>
    %62 = vector.multi_reduction <add>, %61, %cst_102 [0] : vector<512x128xf32> to vector<128xf32>
    %63 = vector.shape_cast %62 : vector<128xf32> to vector<1x128xf32>
    %cst_103 = arith.constant 0.001953125 : f32
    %64 = vector.broadcast %cst_103 : f32 to vector<1x128xf32>
    %65 = arith.mulf %60, %64 : vector<1x128xf32>
    %cst_104 = arith.constant 0.001953125 : f32
    %66 = vector.broadcast %cst_104 : f32 to vector<1x128xf32>
    %67 = arith.mulf %63, %66 : vector<1x128xf32>
    %68 = arith.mulf %65, %65 : vector<1x128xf32>
    %69 = arith.subf %67, %68 : vector<1x128xf32>
    %c0_105 = arith.constant 0 : index
    %c0_106 = arith.constant 0 : index
    %70 = vector.load %arg5[%c0_105, %c0_106] : memref<1x128xf32, #tpu.memory_space<vmem>>, vector<1x128xf32>
    %cst_107 = arith.constant 9.99999974E-6 : f32
    %71 = vector.broadcast %cst_107 : f32 to vector<1x128xf32>
    %72 = arith.addf %69, %71 : vector<1x128xf32>
    %73 = math.rsqrt %72 : vector<1x128xf32>
    %74 = arith.mulf %70, %73 : vector<1x128xf32>
    %c0_108 = arith.constant 0 : index
    %c0_109 = arith.constant 0 : index
    %75 = vector.load %arg6[%c0_108, %c0_109] : memref<1x128xf32, #tpu.memory_space<vmem>>, vector<1x128xf32>
    %76 = arith.mulf %65, %74 : vector<1x128xf32>
    %77 = arith.subf %75, %76 : vector<1x128xf32>
    %78 = vector.broadcast %74 : vector<1x128xf32> to vector<512x128xf32>
    %79 = arith.mulf %58, %78 : vector<512x128xf32>
    %80 = vector.broadcast %77 : vector<1x128xf32> to vector<512x128xf32>
    %81 = arith.addf %79, %80 : vector<512x128xf32>
    %82 = vector.shape_cast %0 : vector<2x16x16x128xf32> to vector<512x128xf32>
    %83 = arith.addf %81, %82 : vector<512x128xf32>
    %cst_110 = arith.constant 0.000000e+00 : f32
    %84 = vector.broadcast %cst_110 : f32 to vector<512x128xf32>
    %85 = arith.maximumf %83, %84 : vector<512x128xf32>
    %86 = vector.shape_cast %85 : vector<512x128xf32> to vector<2x16x16x128xf32>
    %c0_111 = arith.constant 0 : index
    %c0_112 = arith.constant 0 : index
    %c0_113 = arith.constant 0 : index
    %c0_114 = arith.constant 0 : index
    %87 = vector.load %arg7[%c0_111, %c0_112, %c0_113, %c0_114] : memref<2x16x16x128xf32, #tpu.memory_space<vmem>>, vector<2x16x16x128xf32>
    tpu.vector_store %arg7[%c0_111, %c0_112, %c0_113, %c0_114], %86 {strides = array<i32>} : memref<2x16x16x128xf32, #tpu.memory_space<vmem>>, vector<2x16x16x128xf32>,
    return
  }
}

</mosaic_0001>

<bundles_post_ra>
// kernel: tpu_custom_call.1
= control target key start
LH: loop header
LB: loop body
LE: loop exit
PB: predicated region body
PF: predicated region fallthrough
CT: control target
= control target key end

     0   :  { %12 = vsyncpa [#allocation4], 0  ;;  %s11506_s0 = inlined_call_operand.hbm [shape: f32[2,16,16,128], index: 0, kind: input, shape index: {}]   ;;  %s11507_s1 = inlined_call_operand.hbm [shape: bf16[1152,128], index: 1, kind: input, shape index: {}]   ;;  %s11508_s2 = inlined_call_operand.vmem [shape: f32[1,128], index: 2, kind: input, shape index: {}]   ;;  %s11509_s3 = inlined_call_operand.vmem [shape: f32[1,128], index: 3, kind: input, shape index: {}]   ;;  %s11510_s4 = inlined_call_operand.hbm [shape: bf16[1152,128], index: 4, kind: input, shape index: {}]   ;;  %s11511_s5 = inlined_call_operand.vmem [shape: f32[1,128], index: 5, kind: input, shape index: {}]   ;;  %s11512_s6 = inlined_call_operand.vmem [shape: f32[1,128], index: 6, kind: input, shape index: {}]   ;;  %s11513_s7 = inlined_call_operand.hbm [shape: f32[2,16,16,128], index: 7, kind: output, shape index: {}]  }
   0x1   :  { %13 = vsyncpa [#allocation7], 0  ;;  %s32_s26 = sshll.u32 %s11507_s1, 4  ;;  %s33_s26 = int_to_ptr.hbm [resolvable:$true] %s32_s26 }
   0x2   :  { %14 = vsyncpa [#allocation5], 0  ;;  %s8140_s27 = smov [#allocation6]   ;;  %s19_s8 = sshll.u32 %s11506_s0, 4  ;;  %s20_s8 = int_to_ptr.hbm [resolvable:$true] %s19_s8 }
   0x3   :  { %s34_s28 = sshll.u32 %s8140_s27, 4  ;;  %s8141_s9 = smov 64   ;;  %s35_s28 = int_to_ptr.vmem [resolvable:$true] %s34_s28 }
   0x4   :  { %s8142_s10 = smov 4   ;;  %s8143_s11 = smov [#allocation3]  }
   0x5   :  { %40 = dma.hbm_to_vmem [thread:$0]  %s33_s26, 9216, %s35_s28, [#allocation7], %s8141_s9, %s8141_s9, %s8142_s10  }
   0x6   :  { %s21_s12 = sshll.u32 %s8143_s11, 4  ;;  %s8144_s13 = smov 128   ;;  %s22_s12 = int_to_ptr.vmem [resolvable:$true] %s21_s12 }
   0x7   :  { %s8145_s14 = smov 8   ;;  %s49_s16 = sshll.u32 %s11510_s4, 4  ;;  %s50_s16 = int_to_ptr.hbm [resolvable:$true] %s49_s16 }
   0x8   :  { %27 = dma.hbm_to_vmem [thread:$0]  %s20_s8, 8192, %s22_s12, [#allocation4], %s8144_s13, %s8144_s13, %s8145_s14  }
   0x9   :  { %s8146_s17 = smov [#allocation8]  }
   0xa   :  { %s51_s0 = sshll.u32 %s8146_s17, 4  ;;  %s52_s0 = int_to_ptr.vmem [resolvable:$true] %s51_s0 }
   0xb   :  { %57 = dma.hbm_to_vmem [thread:$0]  %s50_s16, 9216, %s52_s0, [#allocation7], %s8141_s9, %s8141_s9, %s8142_s10  }
   0xc   :  { %8134 = dma.done.wait [#allocation4], 8192  }
   0xd   :  { %8135 = vsyncadd [#allocation4], 4294959104 }
   0xe   :  { %8136 = dma.done.wait [#allocation7], 18432  }
   0xf   :  { %8137 = vsyncadd [#allocation7], 4294948864  ;;  %v8147_v0 = vmov 0.0   ;;  %v7869_v1 = vld [vmem:[#allocation6 + $0x38] sm:$0xff]  ;;  %v7868_v3 = vld [vmem:[#allocation6 + $0x30] sm:$0xff]  ;;  %v8148_v20 = vmov 0.0|0.0  }
  0x10   :  { %192 = vst [vmem:[#allocation2 + $0x1b0] sm:$0xff] %v8147_v0  ;;  %v7877_v2 = vld [vmem:[#allocation6 + $0x78] sm:$0xff]  ;;  %8006 = vmatpush.bf16.msra.mxu2 %v7869_v1  ;;  %v7876_v4 = vld [vmem:[#allocation6 + $0x70] sm:$0xff]  ;;  %1752 = vmatpush.bf16.msra.mxu0 %v7869_v1  ;;  %v7867_v5 = vld [vmem:[#allocation6 + $0x28] sm:$0xff]  ;;  %s7272_s25 = sshll.u32 %s11513_s7, 4  ;;  %s7273_s25 = int_to_ptr.hbm [resolvable:$true] %s7272_s25 }
  0x11   :  { %193 = vst [vmem:[#allocation2 + $0x1b8] sm:$0xff] %v8147_v0  ;;  %8014 = vmatpush.bf16.msra.mxu3 %v7877_v2  ;;  %1921 = vmatpush.bf16.msra.mxu1 %v7877_v2  ;;  %v7875_v6 = vld [vmem:[#allocation6 + $0x68] sm:$0xff]  ;;  %v7866_v7 = vld [vmem:[#allocation6 + $0x20] sm:$0xff]  ;;  %v7865_v9 = vld [vmem:[#allocation6 + $0x18] sm:$0xff] }
  0x12   :  { %138 = vst [vmem:[#allocation2] sm:$0xff] %v8147_v0  ;;  %v7874_v8 = vld [vmem:[#allocation6 + $0x60] sm:$0xff]  ;;  %v7873_v10 = vld [vmem:[#allocation6 + $0x58] sm:$0xff]  ;;  %v7864_v11 = vld [vmem:[#allocation6 + $0x10] sm:$0xff] }
  0x13   :  { %139 = vst [vmem:[#allocation2 + $0x8] sm:$0xff] %v8147_v0  ;;  %v7872_v12 = vld [vmem:[#allocation6 + $0x50] sm:$0xff]  ;;  %v7863_v13 = vld [vmem:[#allocation6 + $0x8] sm:$0xff]  ;;  %v7862_v15 = vld [vmem:[#allocation6] sm:$0xff] }
  0x14   :  { %140 = vst [vmem:[#allocation2 + $0x10] sm:$0x3] %v8147_v0  ;;  %8007 = vmatpush.bf16.msra.mxu2 %v7868_v3  ;;  %1753 = vmatpush.bf16.msra.mxu0 %v7868_v3  ;;  %v7871_v14 = vld [vmem:[#allocation6 + $0x48] sm:$0xff]  ;;  %v7870_v16 = vld [vmem:[#allocation6 + $0x40] sm:$0xff]  ;;  %v7885_v24 = vld [vmem:[#allocation6 + $0xb8] sm:$0xff] }
  0x15   :  { %141 = vst [vmem:[#allocation2 + $0x18] sm:$0xff] %v8147_v0  ;;  %8015 = vmatpush.bf16.msra.mxu3 %v7876_v4  ;;  %1922 = vmatpush.bf16.msra.mxu1 %v7876_v4  ;;  %v7893_v25 = vld [vmem:[#allocation6 + $0xf8] sm:$0xff]  ;;  %v8287_v27 = vld [vmem:[#allocation3 + $0x100] sm:$0xff]  ;;  %v8289_v28 = vld [vmem:[#allocation3 + $0x108] sm:$0xff] }
  0x16   :  { %142 = vst [vmem:[#allocation2 + $0x20] sm:$0xff] %v8147_v0  ;;  %v7901_v26 = vld [vmem:[#allocation6 + $0x138] sm:$0xff]  ;;  %v1042_v29 = vpack.c.bf16 %v8289_v28, %v8287_v27  ;;  %v8295_v30 = vld [vmem:[#allocation3] sm:$0xff]  ;;  %v8297_v31 = vld [vmem:[#allocation3 + $0x8] sm:$0xff] }
  0x17   :  { %143 = vst [vmem:[#allocation2 + $0x28] sm:$0x3] %v8147_v0  ;;  %v898_v32 = vpack.c.bf16 %v8297_v31, %v8295_v30  ;;  %v8315_v33 = vld [vmem:[#allocation3 + $0x110] sm:$0xff]  ;;  %v8317_v34 = vld [vmem:[#allocation3 + $0x118] sm:$0xff]  ;;  %v8340_v42 = vld [vmem:[#allocation3 + $0x120] sm:$0xff] }
  0x18   :  { %144 = vst [vmem:[#allocation2 + $0x30] sm:$0xff] %v8147_v0  ;;  %8008 = vmatpush.bf16.msra.mxu2 %v7867_v5  ;;  %1754 = vmatpush.bf16.msra.mxu0 %v7867_v5  ;;  %v407_v21 = vld [vmem:[#allocation2 + $0x1b1] sm:$0xff]  ;;  %v1051_v35 = vpack.c.bf16 %v8317_v34, %v8315_v33  ;;  %v8343_v43 = vld [vmem:[#allocation3 + $0x128] sm:$0xff]  ;;  %v8346_v45 = vld [vmem:[#allocation3 + $0x20] sm:$0xff] }
  0x19   :  { %145 = vst [vmem:[#allocation2 + $0x38] sm:$0xff] %v8147_v0  ;;  %8016 = vmatpush.bf16.msra.mxu3 %v7875_v6  ;;  %1923 = vmatpush.bf16.msra.mxu1 %v7875_v6  ;;  %v8323_v36 = vld [vmem:[#allocation3 + $0x10] sm:$0xff]  ;;  %v8325_v37 = vld [vmem:[#allocation3 + $0x18] sm:$0xff]  ;;  %v8349_v47 = vld [vmem:[#allocation3 + $0x28] sm:$0xff]  ;;  %v1060_v50 = vpack.c.bf16 %v8343_v43, %v8340_v42 }
  0x1a   :  { %146 = vst [vmem:[#allocation2 + $0x40] sm:$0x3] %v8147_v0  ;;  %v375_v17 = vld [vmem:[#allocation2 + $0x1] sm:$0xff]  ;;  %v7884_v38 = vld [vmem:[#allocation6 + $0xb0] sm:$0xff]  ;;  %v907_v39 = vpack.c.bf16 %v8325_v37, %v8323_v36  ;;  %v916_v53 = vpack.c.bf16 %v8349_v47, %v8346_v45  ;;  %v8360_v55 = vld [vmem:[#allocation3 + $0x138] sm:$0xff] }
  0x1b   :  { %147 = vst [vmem:[#allocation2 + $0x48] sm:$0xff] %v8147_v0  ;;  %v376_v18 = vld [vmem:[#allocation2 + $0x9] sm:$0xff]  ;;  %v8366_v57 = vld [vmem:[#allocation3 + $0x38] sm:$0xff]  ;;  %v8374_v5 = vld [vmem:[#allocation3 + $0x140] sm:$0xff] }
  0x1c   :  { %148 = vst [vmem:[#allocation2 + $0x50] sm:$0xff] %v8147_v0  ;;  %8009 = vmatpush.bf16.msra.mxu2 %v7866_v7  ;;  %1755 = vmatpush.bf16.msra.mxu0 %v7866_v7  ;;  %v889_v19 = vpack.c.bf16 %v376_v18, %v375_v17  ;;  %v7892_v40 = vld [vmem:[#allocation6 + $0xf0] sm:$0xff]  ;;  %v7883_v1 = vld [vmem:[#allocation6 + $0xa8] sm:$0xff]  ;;  %v8380_v7 = vld [vmem:[#allocation3 + $0x40] sm:$0xff] }
  0x1d   :  { %149 = vst [vmem:[#allocation2 + $0x58] sm:$0x3] %v8147_v0  ;;  %8017 = vmatpush.bf16.msra.mxu3 %v7874_v8  ;;  %1924 = vmatpush.bf16.msra.mxu1 %v7874_v8  ;;  %v7900_v41 = vld [vmem:[#allocation6 + $0x130] sm:$0xff]  ;;  %v7891_v3 = vld [vmem:[#allocation6 + $0xe8] sm:$0xff]  ;;  %v8392_v18 = vld [vmem:[#allocation3 + $0x158] sm:$0xff] }
  0x1e   :  { %150 = vst [vmem:[#allocation2 + $0x60] sm:$0xff] %v8147_v0  ;;  %v8358_v54 = vld [vmem:[#allocation3 + $0x130] sm:$0xff]  ;;  %v7899_v4 = vld [vmem:[#allocation6 + $0x128] sm:$0xff] }
  0x1f   :  { %151 = vst [vmem:[#allocation2 + $0x68] sm:$0xff] %v8147_v0  ;;  %v8364_v56 = vld [vmem:[#allocation3 + $0x30] sm:$0xff]  ;;  %v8376_v6 = vld [vmem:[#allocation3 + $0x148] sm:$0xff] }
  0x20   :  { %152 = vst [vmem:[#allocation2 + $0x70] sm:$0x3] %v8147_v0  ;;  %8010 = vmatpush.bf16.msra.mxu2 %v7865_v9  ;;  %1756 = vmatpush.bf16.msra.mxu0 %v7865_v9  ;;  %v925_v2 = vpack.c.bf16 %v8366_v57, %v8364_v56  ;;  %v8382_v8 = vld [vmem:[#allocation3 + $0x48] sm:$0xff]  ;;  %v8390_v17 = vld [vmem:[#allocation3 + $0x150] sm:$0xff] }
  0x21   :  { %153 = vst [vmem:[#allocation2 + $0x78] sm:$0xff] %v8147_v0  ;;  %8018 = vmatpush.bf16.msra.mxu3 %v7873_v10  ;;  %1925 = vmatpush.bf16.msra.mxu1 %v7873_v10 }
  0x22   :  { %154 = vst [vmem:[#allocation2 + $0x80] sm:$0xff] %v8147_v0 }
  0x23   :  { %155 = vst [vmem:[#allocation2 + $0x88] sm:$0x3] %v8147_v0 }
  0x24   :  { %156 = vst [vmem:[#allocation2 + $0x90] sm:$0xff] %v8147_v0  ;;  %8011 = vmatpush.bf16.msra.mxu2 %v7864_v11  ;;  %1757 = vmatpush.bf16.msra.mxu0 %v7864_v11 }
  0x25   :  { %157 = vst [vmem:[#allocation2 + $0x98] sm:$0xff] %v8147_v0  ;;  %8019 = vmatpush.bf16.msra.mxu3 %v7872_v12  ;;  %1926 = vmatpush.bf16.msra.mxu1 %v7872_v12 }
  0x26   :  { %158 = vst [vmem:[#allocation2 + $0xa0] sm:$0x3] %v8147_v0 }
  0x27   :  { %159 = vst [vmem:[#allocation2 + $0xa8] sm:$0xff] %v8147_v0 }
  0x28   :  { %160 = vst [vmem:[#allocation2 + $0xb0] sm:$0xff] %v8147_v0  ;;  %8012 = vmatpush.bf16.msra.mxu2 %v7863_v13  ;;  %1758 = vmatpush.bf16.msra.mxu0 %v7863_v13 }
  0x29   :  { %161 = vst [vmem:[#allocation2 + $0xb8] sm:$0x3] %v8147_v0  ;;  %8020 = vmatpush.bf16.msra.mxu3 %v7871_v14  ;;  %1927 = vmatpush.bf16.msra.mxu1 %v7871_v14 }
  0x2a   :  { %162 = vst [vmem:[#allocation2 + $0xc0] sm:$0xff] %v8147_v0 }
  0x2b   :  { %163 = vst [vmem:[#allocation2 + $0xc8] sm:$0xff] %v8147_v0 }
  0x2c   :  { %164 = vst [vmem:[#allocation2 + $0xd0] sm:$0x3] %v8147_v0  ;;  %8013 = vmatpush.bf16.msra.mxu2 %v7862_v15  ;;  %1759 = vmatpush.bf16.msra.mxu0 %v7862_v15  ;;  %v1078_v15 = vpack.c.bf16 %v8376_v6, %v8374_v5 }
  0x2d   :  { %165 = vst [vmem:[#allocation2 + $0xd8] sm:$0xff] %v8147_v0  ;;  %8021 = vmatpush.bf16.msra.mxu3 %v7870_v16  ;;  %1928 = vmatpush.bf16.msra.mxu1 %v7870_v16  ;;  %v934_v16 = vpack.c.bf16 %v8382_v8, %v8380_v7 }
  0x2e   :  { %166 = vst [vmem:[#allocation2 + $0xe0] sm:$0xff] %v8147_v0 }
  0x2f   :  { %167 = vst [vmem:[#allocation2 + $0xe8] sm:$0x3] %v8147_v0  ;;  %1840 = vmatmul.bf16.vlgmr.msra.gmra.mxu2 %v8148_v20  ;;  %1760 = vmatmul.bf16.vlgmr.msra.gmra.mxu0 %v8148_v20  ;;  %v8398_v20 = vld [vmem:[#allocation3 + $0x58] sm:$0xff] }
  0x30   :  { %168 = vst [vmem:[#allocation2 + $0xf0] sm:$0xff] %v8147_v0  ;;  %1929 = vmatmul.bf16.vlgmr.msra.gmra.mxu1 %v889_v19  ;;  %2090 = vmatpush.bf16.msrb.mxu2 %v7885_v24  ;;  %v8396_v19 = vld [vmem:[#allocation3 + $0x50] sm:$0xff] }
  0x31   :  { %169 = vst [vmem:[#allocation2 + $0xf8] sm:$0xff] %v8147_v0  ;;  %2259 = vmatpush.bf16.msrb.mxu3 %v7893_v25  ;;  %2428 = vmatpush.bf16.msrb.mxu0 %v7901_v26 }
  0x32   :  { %170 = vst [vmem:[#allocation2 + $0x100] sm:$0x3] %v8147_v0 }
  0x33   :  { %171 = vst [vmem:[#allocation2 + $0x108] sm:$0xff] %v8147_v0 }
  0x34   :  { %172 = vst [vmem:[#allocation2 + $0x110] sm:$0xff] %v8147_v0  ;;  %2091 = vmatpush.bf16.msrb.mxu2 %v7884_v38  ;;  %v7890_v38 = vld [vmem:[#allocation6 + $0xe0] sm:$0xff] }
  0x35   :  { %173 = vst [vmem:[#allocation2 + $0x118] sm:$0x3] %v8147_v0  ;;  %2260 = vmatpush.bf16.msrb.mxu3 %v7892_v40  ;;  %2429 = vmatpush.bf16.msrb.mxu0 %v7900_v41  ;;  %v8406_v40 = vld [vmem:[#allocation3 + $0x160] sm:$0xff]  ;;  %v8408_v41 = vld [vmem:[#allocation3 + $0x168] sm:$0xff] }
  0x36   :  { %174 = vst [vmem:[#allocation2 + $0x120] sm:$0xff] %v8147_v0 }
  0x37   :  { %175 = vst [vmem:[#allocation2 + $0x128] sm:$0xff] %v8147_v0 }
  0x38   :  { %176 = vst [vmem:[#allocation2 + $0x130] sm:$0x3] %v8147_v0  ;;  %2092 = vmatpush.bf16.msrb.mxu2 %v7883_v1  ;;  %v8430_v1 = vld [vmem:[#allocation3 + $0x70] sm:$0xff] }
  0x39   :  { %177 = vst [vmem:[#allocation2 + $0x138] sm:$0xff] %v8147_v0  ;;  %2261 = vmatpush.bf16.msrb.mxu3 %v7891_v3  ;;  %2430 = vmatpush.bf16.msrb.mxu0 %v7899_v4 }
  0x3a   :  { %178 = vst [vmem:[#allocation2 + $0x140] sm:$0xff] %v8147_v0 }
  0x3b   :  { %179 = vst [vmem:[#allocation2 + $0x148] sm:$0x3] %v8147_v0 }
  0x3c   :  { %180 = vst [vmem:[#allocation2 + $0x150] sm:$0xff] %v8147_v0 }
  0x3d   :  { %181 = vst [vmem:[#allocation2 + $0x158] sm:$0xff] %v8147_v0  ;;  %2262 = vmatpush.bf16.msrb.mxu3 %v7890_v38 }
  0x3e   :  { %182 = vst [vmem:[#allocation2 + $0x160] sm:$0x3] %v8147_v0 }
  0x3f   :  { %183 = vst [vmem:[#allocation2 + $0x168] sm:$0xff] %v8147_v0 }
  0x40   :  { %184 = vst [vmem:[#allocation2 + $0x170] sm:$0xff] %v8147_v0  ;;  %1934 = vmatmul.bf16.gmra.mxu1 %v898_v32  ;;  %v7882_v32 = vld [vmem:[#allocation6 + $0xa0] sm:$0xff] }
  0x41   :  { %185 = vst [vmem:[#allocation2 + $0x178] sm:$0x3] %v8147_v0  ;;  %2093 = vmatpush.bf16.msrb.mxu2 %v7882_v32  ;;  %v8450_v32 = vld [vmem:[#allocation3 + $0x80] sm:$0xff] }
  0x42   :  { %186 = vst [vmem:[#allocation2 + $0x180] sm:$0xff] %v8147_v0 }
  0x43   :  { %187 = vst [vmem:[#allocation2 + $0x188] sm:$0xff] %v8147_v0 }
  0x44   :  { %188 = vst [vmem:[#allocation2 + $0x190] sm:$0x3] %v8147_v0 }
  0x45   :  { %189 = vst [vmem:[#allocation2 + $0x198] sm:$0xff] %v8147_v0 }
  0x46   :  { %190 = vst [vmem:[#allocation2 + $0x1a0] sm:$0xff] %v8147_v0 }
  0x47   :  { %191 = vst [vmem:[#allocation2 + $0x1a8] sm:$0x3] %v8147_v0 }
  0x48   :  { %194 = vst [vmem:[#allocation2 + $0x1c0] sm:$0x3] %v8147_v0 }
  0x49   :  { %195 = vst [vmem:[#allocation2 + $0x1c8] sm:$0xff] %v8147_v0 }
  0x4a   :  { %196 = vst [vmem:[#allocation2 + $0x1d0] sm:$0xff] %v8147_v0 }
  0x4b   :  { %197 = vst [vmem:[#allocation2 + $0x1d8] sm:$0x3] %v8147_v0 }
  0x4c   :  { %198 = vst [vmem:[#allocation2 + $0x1e0] sm:$0xff] %v8147_v0 }
  0x4d   :  { %199 = vst [vmem:[#allocation2 + $0x1e8] sm:$0xff] %v8147_v0 }
  0x4e   :  { %200 = vst [vmem:[#allocation2 + $0x1f0] sm:$0x3] %v8147_v0 }
  0x4f   :  { %201 = vst [vmem:[#allocation2 + $0x1f8] sm:$0xff] %v8147_v0  ;;  %v408_v22 = vld [vmem:[#allocation2 + $0x1b9] sm:$0xff] }
  0x50   :  { %202 = vst [vmem:[#allocation2 + $0x200] sm:$0xff] %v8147_v0  ;;  %v1033_v23 = vpack.c.bf16 %v408_v22, %v407_v21  ;;  %1939 = vmatmul.bf16.gmra.mxu1 %v907_v39  ;;  %v7898_v39 = vld [vmem:[#allocation6 + $0x120] sm:$0xff] }
  0x51   :  { %203 = vst [vmem:[#allocation2 + $0x208] sm:$0x3] %v8147_v0  ;;  %2431 = vmatpush.bf16.msrb.mxu0 %v7898_v39 }
  0x52   :  { %204 = vst [vmem:[#allocation2 + $0x210] sm:$0xff] %v8147_v0  ;;  %2009 = vmatmul.bf16.vlgmr.msra.gmra.mxu3 %v1033_v23 }
  0x53   :  { %205 = vst [vmem:[#allocation2 + $0x218] sm:$0xff] %v8147_v0 }
  0x54   :  { %206 = vst [vmem:[#allocation2 + $0x220] sm:$0x3] %v8147_v0 }
  0x55   :  { %207 = vst [vmem:[#allocation2 + $0x228] sm:$0xff] %v8147_v0 }
  0x56   :  { %208 = vst [vmem:[#allocation2 + $0x230] sm:$0xff] %v8147_v0 }
  0x57   :  { %209 = vst [vmem:[#allocation2 + $0x238] sm:$0x3] %v8147_v0 }
  0x58   :  { %210 = vst [vmem:[#allocation2 + $0x240] sm:$0xff] %v8147_v0 }
  0x59   :  { %211 = vst [vmem:[#allocation2 + $0x248] sm:$0xff] %v8147_v0 }
  0x5a   :  { %212 = vst [vmem:[#allocation2 + $0x250] sm:$0x3] %v8147_v0 }
  0x5b   :  { %213 = vst [vmem:[#allocation2 + $0x258] sm:$0xff] %v8147_v0 }
  0x5c   :  { %214 = vst [vmem:[#allocation2 + $0x260] sm:$0xff] %v8147_v0 }
  0x5d   :  { %215 = vst [vmem:[#allocation2 + $0x268] sm:$0x3] %v8147_v0 }
  0x5e   :  { %216 = vst [vmem:[#allocation2 + $0x270] sm:$0xff] %v8147_v0 }
  0x5f   :  { %217 = vst [vmem:[#allocation2 + $0x278] sm:$0xff] %v8147_v0 }
  0x60   :  { %218 = vst [vmem:[#allocation2 + $0x280] sm:$0x3] %v8147_v0  ;;  %1944 = vmatmul.bf16.gmra.mxu1 %v916_v53 }
  0x61   :  { %219 = vst [vmem:[#allocation2 + $0x288] sm:$0xff] %v8147_v0 }
  0x62   :  { %220 = vst [vmem:[#allocation2 + $0x290] sm:$0xff] %v8147_v0  ;;  %2014 = vmatmul.bf16.gmra.mxu3 %v1042_v29  ;;  %v1087_v29 = vpack.c.bf16 %v8392_v18, %v8390_v17 }
  0x63   :  { %221 = vst [vmem:[#allocation2 + $0x298] sm:$0x3] %v8147_v0 }
  0x64   :  { %222 = vst [vmem:[#allocation2 + $0x2a0] sm:$0xff] %v8147_v0 }
  0x65   :  { %11681 = vst [vmem:[#allocation13_spill] sm:$0xff] %v8287_v27 }
  0x66   :  { %11682 = vst [vmem:[#allocation14_spill] sm:$0xff] %v8289_v28 }
  0x67   :  { %223 = vst [vmem:[#allocation2 + $0x2a8] sm:$0xff] %v8147_v0 }
  0x68   :  { %224 = vst [vmem:[#allocation2 + $0x2b0] sm:$0x3] %v8147_v0 }
  0x69   :  { %11683 = vst [vmem:[#allocation15_spill] sm:$0xff] %v8295_v30 }
  0x6a   :  { %11684 = vst [vmem:[#allocation16_spill] sm:$0xff] %v8297_v31 }
  0x6b   :  { %225 = vst [vmem:[#allocation2 + $0x2b8] sm:$0xff] %v8147_v0 }
  0x6c   :  { %226 = vst [vmem:[#allocation2 + $0x2c0] sm:$0xff] %v8147_v0 }
  0x6d   :  { %227 = vst [vmem:[#allocation2 + $0x2c8] sm:$0x3] %v8147_v0 }
  0x6e   :  { %228 = vst [vmem:[#allocation2 + $0x2d0] sm:$0xff] %v8147_v0 }
  0x6f   :  { %229 = vst [vmem:[#allocation2 + $0x2d8] sm:$0xff] %v8147_v0 }
  0x70   :  { %230 = vst [vmem:[#allocation2 + $0x2e0] sm:$0x3] %v8147_v0  ;;  %1949 = vmatmul.bf16.gmra.mxu1 %v925_v2  ;;  %v8432_v2 = vld [vmem:[#allocation3 + $0x78] sm:$0xff] }
  0x71   :  { %231 = vst [vmem:[#allocation2 + $0x2e8] sm:$0xff] %v8147_v0 }
  0x72   :  { %232 = vst [vmem:[#allocation2 + $0x2f0] sm:$0xff] %v8147_v0  ;;  %2019 = vmatmul.bf16.gmra.mxu3 %v1051_v35  ;;  %v943_v35 = vpack.c.bf16 %v8398_v20, %v8396_v19 }
  0x73   :  { %233 = vst [vmem:[#allocation2 + $0x2f8] sm:$0x3] %v8147_v0 }
  0x74   :  { %234 = vst [vmem:[#allocation2 + $0x300] sm:$0xff] %v8147_v0 }
  0x75   :  { %235 = vst [vmem:[#allocation2 + $0x308] sm:$0xff] %v8147_v0 }
  0x76   :  { %236 = vst [vmem:[#allocation2 + $0x310] sm:$0x3] %v8147_v0 }
  0x77   :  { %237 = vst [vmem:[#allocation2 + $0x318] sm:$0xff] %v8147_v0 }
  0x78   :  { %238 = vst [vmem:[#allocation2 + $0x320] sm:$0xff] %v8147_v0 }
  0x79   :  { %11685 = vst [vmem:[#allocation17_spill] sm:$0xff] %v8315_v33 }
  0x7a   :  { %11686 = vst [vmem:[#allocation18_spill] sm:$0xff] %v8317_v34 }
  0x7b   :  { %239 = vst [vmem:[#allocation2 + $0x328] sm:$0x3] %v8147_v0 }
  0x7c   :  { %240 = vst [vmem:[#allocation2 + $0x330] sm:$0xff] %v8147_v0 }
  0x7d   :  { %11687 = vst [vmem:[#allocation19_spill] sm:$0xff] %v8323_v36 }
  0x7e   :  { %11688 = vst [vmem:[#allocation20_spill] sm:$0xff] %v8325_v37 }
  0x7f   :  { %241 = vst [vmem:[#allocation2 + $0x338] sm:$0xff] %v8147_v0 }
  0x80   :  { %242 = vst [vmem:[#allocation2 + $0x340] sm:$0x3] %v8147_v0  ;;  %1954 = vmatmul.bf16.gmra.mxu1 %v934_v16  ;;  %v7889_v16 = vld [vmem:[#allocation6 + $0xd8] sm:$0xff] }
  0x81   :  { %243 = vst [vmem:[#allocation2 + $0x348] sm:$0xff] %v8147_v0  ;;  %2263 = vmatpush.bf16.msrb.mxu3 %v7889_v16 }
  0x82   :  { %244 = vst [vmem:[#allocation2 + $0x350] sm:$0xff] %v8147_v0  ;;  %2024 = vmatmul.bf16.gmra.mxu3 %v1060_v50 }
  0x83   :  { %245 = vst [vmem:[#allocation2 + $0x358] sm:$0x3] %v8147_v0  ;;  %v1069_v0 = vpack.c.bf16 %v8360_v55, %v8358_v54 }
  0x84   :  { %279 = vst [vmem:[#allocation2 + $0x1c9] sm:$0xff] %v8287_v27 }
  0x85   :  { %280 = vst [vmem:[#allocation2 + $0x1d1] sm:$0xff] %v8289_v28 }
  0x86   :  { %247 = vst [vmem:[#allocation2 + $0x19] sm:$0xff] %v8295_v30 }
  0x87   :  { %248 = vst [vmem:[#allocation2 + $0x21] sm:$0xff] %v8297_v31 }
  0x88   :  { %281 = vst [vmem:[#allocation2 + $0x1e1] sm:$0xff] %v8315_v33 }
  0x89   :  { %282 = vst [vmem:[#allocation2 + $0x1e9] sm:$0xff] %v8317_v34 }
  0x8a   :  { %11689 = vst [vmem:[#allocation21_spill] sm:$0xff] %v8340_v42 }
  0x8b   :  { %249 = vst [vmem:[#allocation2 + $0x31] sm:$0xff] %v8323_v36  ;;  %v345_v44 = vld [vmem:[#allocation2 + $0x1c8] sm:$0xff] }
  0x8c   :  { %11690 = vst [vmem:[#allocation22_spill] sm:$0xff] %v8343_v43  ;;  %v346_v46 = vld [vmem:[#allocation2 + $0x1d0] sm:$0xff] }
  0x8d   :  { %250 = vst [vmem:[#allocation2 + $0x39] sm:$0xff] %v8325_v37  ;;  %v1041_v48 = vpack.c.bf16 %v346_v46, %v345_v44  ;;  %v313_v49 = vld [vmem:[#allocation2 + $0x18] sm:$0xff]  ;;  %v8412_v44 = vld [vmem:[#allocation3 + $0x60] sm:$0xff]  ;;  %v8414_v46 = vld [vmem:[#allocation3 + $0x68] sm:$0xff] }
  0x8e   :  { %11691 = vst [vmem:[#allocation23_spill] sm:$0xff] %v8346_v45  ;;  %v314_v51 = vld [vmem:[#allocation2 + $0x20] sm:$0xff] }
  0x8f   :  { %283 = vst [vmem:[#allocation2 + $0x1f9] sm:$0xff] %v8340_v42  ;;  %1845 = vmatmul.bf16.gmra.mxu2 %v1041_v48  ;;  %v897_v52 = vpack.c.bf16 %v314_v51, %v313_v49  ;;  %v347_v58 = vld [vmem:[#allocation2 + $0x1e0] sm:$0xff] }
  0x90   :  { %11692 = vst [vmem:[#allocation24_spill] sm:$0xff] %v8349_v47  ;;  %v348_v59 = vld [vmem:[#allocation2 + $0x1e8] sm:$0xff]  ;;  %1959 = vmatmul.bf16.gmra.mxu1 %v943_v35 }
  0x91   :  { %284 = vst [vmem:[#allocation2 + $0x201] sm:$0xff] %v8343_v43  ;;  %1765 = vmatmul.bf16.gmra.mxu0 %v897_v52  ;;  %v1050_v62 = vpack.c.bf16 %v348_v59, %v347_v58  ;;  %v1096_v58 = vpack.c.bf16 %v8408_v41, %v8406_v40  ;;  %v952_v59 = vpack.c.bf16 %v8414_v46, %v8412_v44  ;;  %v8452_v35 = vld [vmem:[#allocation3 + $0x88] sm:$0xff] }
  0x92   :  { %251 = vst [vmem:[#allocation2 + $0x49] sm:$0xff] %v8346_v45  ;;  %v315_v60 = vld [vmem:[#allocation2 + $0x30] sm:$0xff]  ;;  %2029 = vmatmul.bf16.gmra.mxu3 %v1069_v0 }
  0x93   :  { %252 = vst [vmem:[#allocation2 + $0x51] sm:$0xff] %v8349_v47 }
  0x94   :  { %11693 = vst [vmem:[#allocation25_spill] sm:$0xff] %v8358_v54  ;;  %v316_v61 = vld [vmem:[#allocation2 + $0x38] sm:$0xff] }
  0x95   :  { %11694 = vst [vmem:[#allocation26_spill] sm:$0xff] %v8360_v55  ;;  %v906_v63 = vpack.c.bf16 %v316_v61, %v315_v60 }
  0x96   :  { %285 = vst [vmem:[#allocation2 + $0x211] sm:$0xff] %v8358_v54  ;;  %v349_v9 = vld [vmem:[#allocation2 + $0x1f8] sm:$0xff] }
  0x97   :  { %286 = vst [vmem:[#allocation2 + $0x219] sm:$0xff] %v8360_v55  ;;  %v7879_v55 = vld [vmem:[#allocation6 + $0x88] sm:$0xff] }
  0x98   :  { %11695 = vst [vmem:[#allocation27_spill] sm:$0xff] %v8364_v56  ;;  %v350_v10 = vld [vmem:[#allocation2 + $0x200] sm:$0xff] }
  0x99   :  { %11696 = vst [vmem:[#allocation28_spill] sm:$0xff] %v8366_v57  ;;  %v317_v11 = vld [vmem:[#allocation2 + $0x48] sm:$0xff]  ;;  %v1059_v13 = vpack.c.bf16 %v350_v10, %v349_v9 }
  0x9a   :  { %253 = vst [vmem:[#allocation2 + $0x61] sm:$0xff] %v8364_v56  ;;  %v318_v12 = vld [vmem:[#allocation2 + $0x50] sm:$0xff] }
  0x9b   :  { %254 = vst [vmem:[#allocation2 + $0x69] sm:$0xff] %v8366_v57  ;;  %v915_v14 = vpack.c.bf16 %v318_v12, %v317_v11  ;;  %v635_v36 = vld [vmem:[#allocation2 + $0x4a] sm:$0xff] }
  0x9c   :  { %11697 = vst [vmem:[#allocation29_spill] sm:$0xff] %v8374_v5 }
  0x9d   :  { %11698 = vst [vmem:[#allocation30_spill] sm:$0xff] %v8376_v6  ;;  %v351_v21 = vld [vmem:[#allocation2 + $0x210] sm:$0xff] }
  0x9e   :  { %287 = vst [vmem:[#allocation2 + $0x229] sm:$0xff] %v8374_v5  ;;  %v352_v22 = vld [vmem:[#allocation2 + $0x218] sm:$0xff] }
  0x9f   :  { %1850 = vmatmul.bf16.gmra.mxu2 %v1050_v62  ;;  %288 = vst [vmem:[#allocation2 + $0x231] sm:$0xff] %v8376_v6  ;;  %v1068_v25 = vpack.c.bf16 %v352_v22, %v351_v21  ;;  %v8422_v62 = vld [vmem:[#allocation3 + $0x170] sm:$0xff] }
  0xa0   :  { %11699 = vst [vmem:[#allocation31_spill] sm:$0xff] %v8380_v7  ;;  %1964 = vmatmul.bf16.gmra.mxu1 %v952_v59  ;;  %v970_v59 = vpack.c.bf16 %v8452_v35, %v8450_v32 }
  0xa1   :  { %1770 = vmatmul.bf16.gmra.mxu0 %v906_v63  ;;  %11700 = vst [vmem:[#allocation32_spill] sm:$0xff] %v8382_v8  ;;  %v319_v23 = vld [vmem:[#allocation2 + $0x60] sm:$0xff]  ;;  %v8424_v63 = vld [vmem:[#allocation3 + $0x178] sm:$0xff] }
  0xa2   :  { %255 = vst [vmem:[#allocation2 + $0x79] sm:$0xff] %v8380_v7  ;;  %2034 = vmatmul.bf16.gmra.mxu3 %v1078_v15  ;;  %v320_v24 = vld [vmem:[#allocation2 + $0x68] sm:$0xff]  ;;  %v961_v15 = vpack.c.bf16 %v8432_v2, %v8430_v1 }
  0xa3   :  { %256 = vst [vmem:[#allocation2 + $0x81] sm:$0xff] %v8382_v8  ;;  %v924_v26 = vpack.c.bf16 %v320_v24, %v319_v23  ;;  %v7897_v23 = vld [vmem:[#allocation6 + $0x118] sm:$0xff]  ;;  %v568_v8 = vld [vmem:[#allocation2 + $0x21] sm:$0xff] }
  0xa4   :  { %11701 = vst [vmem:[#allocation33_spill] sm:$0xff] %v8390_v17  ;;  %2432 = vmatpush.bf16.msrb.mxu0 %v7897_v23 }
  0xa5   :  { %11702 = vst [vmem:[#allocation34_spill] sm:$0xff] %v8392_v18  ;;  %v353_v48 = vld [vmem:[#allocation2 + $0x228] sm:$0xff] }
  0xa6   :  { %289 = vst [vmem:[#allocation2 + $0x241] sm:$0xff] %v8390_v17  ;;  %v354_v49 = vld [vmem:[#allocation2 + $0x230] sm:$0xff] }
  0xa7   :  { %290 = vst [vmem:[#allocation2 + $0x249] sm:$0xff] %v8392_v18  ;;  %v1077_v52 = vpack.c.bf16 %v354_v49, %v353_v48 }
  0xa8   :  { %11703 = vst [vmem:[#allocation35_spill] sm:$0xff] %v8396_v19 }
  0xa9   :  { %11704 = vst [vmem:[#allocation36_spill] sm:$0xff] %v8398_v20  ;;  %v321_v50 = vld [vmem:[#allocation2 + $0x78] sm:$0xff] }
  0xaa   :  { %257 = vst [vmem:[#allocation2 + $0x91] sm:$0xff] %v8396_v19  ;;  %v322_v51 = vld [vmem:[#allocation2 + $0x80] sm:$0xff] }
  0xab   :  { %258 = vst [vmem:[#allocation2 + $0x99] sm:$0xff] %v8398_v20  ;;  %v933_v53 = vpack.c.bf16 %v322_v51, %v321_v50 }
  0xac   :  { %11705 = vst [vmem:[#allocation37_spill] sm:$0xff] %v8406_v40  ;;  %v1761_v60 = vpop.f32.mrf.mxu0 }
  0xad   :  { %11706 = vst [vmem:[#allocation38_spill] sm:$0xff] %v8408_v41  ;;  %v1930_v61 = vpop.f32.mrf.mxu1  ;;  %v355_v3 = vld [vmem:[#allocation2 + $0x240] sm:$0xff] }
  0xae   :  { %291 = vst [vmem:[#allocation2 + $0x259] sm:$0xff] %v8406_v40  ;;  %v8426_v0 = vadd.f32 %v1930_v61, %v1761_v60  ;;  %v356_v4 = vld [vmem:[#allocation2 + $0x248] sm:$0xff]  ;;  %v8462_v61 = vld [vmem:[#allocation3 + $0x190] sm:$0xff] }
  0xaf   :  { %1855 = vmatmul.bf16.gmra.mxu2 %v1059_v13  ;;  %292 = vst [vmem:[#allocation2 + $0x261] sm:$0xff] %v8408_v41  ;;  %v1086_v11 = vpack.c.bf16 %v356_v4, %v355_v3  ;;  %v1105_v13 = vpack.c.bf16 %v8424_v63, %v8422_v62  ;;  %v8464_v3 = vld [vmem:[#allocation3 + $0x198] sm:$0xff] }
  0xb0   :  { %11707 = vst [vmem:[#allocation39_spill] sm:$0xff] %v8412_v44  ;;  %1969 = vmatmul.bf16.gmra.mxu1 %v961_v15 }
  0xb1   :  { %1775 = vmatmul.bf16.gmra.mxu0 %v915_v14  ;;  %11708 = vst [vmem:[#allocation40_spill] sm:$0xff] %v8414_v46  ;;  %v323_v9 = vld [vmem:[#allocation2 + $0x90] sm:$0xff]  ;;  %v7881_v14 = vld [vmem:[#allocation6 + $0x98] sm:$0xff] }
  0xb2   :  { %2039 = vmatmul.bf16.gmra.mxu3 %v1087_v29  ;;  %259 = vst [vmem:[#allocation2 + $0xa9] sm:$0xff] %v8412_v44  ;;  %v324_v10 = vld [vmem:[#allocation2 + $0x98] sm:$0xff]  ;;  %2094 = vmatpush.bf16.msrb.mxu2 %v7881_v14  ;;  %v1841_v21 = vpop.f32.mrf.mxu2  ;;  %v8446_v29 = vld [vmem:[#allocation3 + $0x188] sm:$0xff] }
  0xb3   :  { %260 = vst [vmem:[#allocation2 + $0xb1] sm:$0xff] %v8414_v46  ;;  %v942_v12 = vpack.c.bf16 %v324_v10, %v323_v9  ;;  %v8470_v9 = vld [vmem:[#allocation3 + $0x90] sm:$0xff]  ;;  %v8472_v10 = vld [vmem:[#allocation3 + $0x98] sm:$0xff] }
  0xb4   :  { %11709 = vst [vmem:[#allocation41_spill] sm:$0xff] %v8422_v62  ;;  %v7917_v46 = vld [vmem:[#allocation6 + $0x1b8] sm:$0xff] }
  0xb5   :  { %11710 = vst [vmem:[#allocation42_spill] sm:$0xff] %v8424_v63  ;;  %v357_v38 = vld [vmem:[#allocation2 + $0x258] sm:$0xff] }
  0xb6   :  { %293 = vst [vmem:[#allocation2 + $0x271] sm:$0xff] %v8422_v62  ;;  %v358_v39 = vld [vmem:[#allocation2 + $0x260] sm:$0xff] }
  0xb7   :  { %294 = vst [vmem:[#allocation2 + $0x279] sm:$0xff] %v8424_v63  ;;  %v1095_v51 = vpack.c.bf16 %v358_v39, %v357_v38  ;;  %v7880_v38 = vld [vmem:[#allocation6 + $0x90] sm:$0xff]  ;;  %v979_v39 = vpack.c.bf16 %v8472_v10, %v8470_v9 }
  0xb8   :  { %11711 = vst [vmem:[#allocation43_spill] sm:$0xff] %v8430_v1  ;;  %2095 = vmatpush.bf16.msrb.mxu2 %v7880_v38 }
  0xb9   :  { %11712 = vst [vmem:[#allocation44_spill] sm:$0xff] %v8432_v2  ;;  %v325_v49 = vld [vmem:[#allocation2 + $0xa8] sm:$0xff] }
  0xba   :  { %261 = vst [vmem:[#allocation2 + $0xc1] sm:$0xff] %v8430_v1  ;;  %v326_v50 = vld [vmem:[#allocation2 + $0xb0] sm:$0xff] }
  0xbb   :  { %262 = vst [vmem:[#allocation2 + $0xc9] sm:$0xff] %v8432_v2 }
  0xbc   :  { %11714 = vst [vmem:[#allocation46_spill] sm:$0xff] %v8446_v29  ;;  %2096 = vmatpush.bf16.msrb.mxu2 %v7879_v55  ;;  %v8562_v55 = vld [vmem:[#allocation3 + $0xc8] sm:$0xff] }
  0xbd   :  { %296 = vst [vmem:[#allocation2 + $0x291] sm:$0xff] %v8446_v29 }
  0xbe   :  { %11715 = vst [vmem:[#allocation47_spill] sm:$0xff] %v8450_v32 }
  0xbf   :  { %1860 = vmatmul.bf16.gmra.mxu2 %v1068_v25  ;;  %v8442_v25 = vpop.f32.mrf.mxu1  ;;  %11716 = vst [vmem:[#allocation48_spill] sm:$0xff] %v8452_v35 }
  0xc0   :  { %263 = vst [vmem:[#allocation2 + $0xd9] sm:$0xff] %v8450_v32  ;;  %1974 = vmatmul.bf16.gmra.mxu1 %v970_v59 }
  0xc1   :  { %1780 = vmatmul.bf16.gmra.mxu0 %v924_v26  ;;  %v8444_v26 = vld [vmem:[#allocation3 + $0x180] sm:$0xff]  ;;  %264 = vst [vmem:[#allocation2 + $0xe1] sm:$0xff] %v8452_v35  ;;  %v7908_v35 = vld [vmem:[#allocation6 + $0x170] sm:$0xff] }
  0xc2   :  { %2044 = vmatmul.bf16.gmra.mxu3 %v1096_v58  ;;  %11713 = vst [vmem:[#allocation45_spill] sm:$0xff] %v8444_v26  ;;  %v328_v14 = vld [vmem:[#allocation2 + $0xc8] sm:$0xff] }
  0xc3   :  { %295 = vst [vmem:[#allocation2 + $0x289] sm:$0xff] %v8444_v26 }
  0xc4   :  { %11718 = vst [vmem:[#allocation50_spill] sm:$0xff] %v8462_v61 }
  0xc5   :  { %11719 = vst [vmem:[#allocation51_spill] sm:$0xff] %v8464_v3 }
  0xc6   :  { %297 = vst [vmem:[#allocation2 + $0x2a1] sm:$0xff] %v8462_v61 }
  0xc7   :  { %v1935_v58 = vpop.f32.mrf.mxu1  ;;  %298 = vst [vmem:[#allocation2 + $0x2a9] sm:$0xff] %v8464_v3 }
  0xc8   :  { %11720 = vst [vmem:[#allocation52_spill] sm:$0xff] %v8470_v9  ;;  %v330_v38 = vld [vmem:[#allocation2 + $0xe0] sm:$0xff] }
  0xc9   :  { %11721 = vst [vmem:[#allocation53_spill] sm:$0xff] %v8472_v10 }
  0xca   :  { %265 = vst [vmem:[#allocation2 + $0xf1] sm:$0xff] %v8470_v9 }
  0xcb   :  { %266 = vst [vmem:[#allocation2 + $0xf9] sm:$0xff] %v8472_v10 }
  0xcc   :  { %11736 = vst [vmem:[#allocation68_spill] sm:$0xff] %v8562_v55 }
  0xcd   :  { %272 = vst [vmem:[#allocation2 + $0x141] sm:$0xff] %v8562_v55 }
  0xcf   :  { %1865 = vmatmul.bf16.gmra.mxu2 %v1077_v52  ;;  %v951_v52 = vpack.c.bf16 %v326_v50, %v325_v49  ;;  %v8467_v4 = vpop.f32.mrf.mxu1  ;;  %v7888_v49 = vld [vmem:[#allocation6 + $0xd0] sm:$0xff] }
  0xd0   :  { %1979 = vmatmul.bf16.gmra.mxu1 %v979_v39  ;;  %2264 = vmatpush.bf16.msrb.mxu3 %v7888_v49 }
  0xd1   :  { %1785 = vmatmul.bf16.gmra.mxu0 %v933_v53  ;;  %v1114_v53 = vpack.c.bf16 %v8446_v29, %v8444_v26 }
  0xd2   :  { %2049 = vmatmul.bf16.gmra.mxu3 %v1105_v13  ;;  %v327_v13 = vld [vmem:[#allocation2 + $0xc0] sm:$0xff] }
  0xd5   :  { %v2010_v22 = vpop.f32.mrf.mxu3 }
  0xd6   :  { %v8440_v24 = vadd.f32 %v2010_v22, %v1841_v21  ;;  %v960_v21 = vpack.c.bf16 %v328_v14, %v327_v13  ;;  %v1123_v22 = vpack.c.bf16 %v8464_v3, %v8462_v61  ;;  %v7896_v13 = vld [vmem:[#allocation6 + $0x110] sm:$0xff]  ;;  %v8501_v14 = vpop.f32.mrf.mxu2 }
  0xd7   :  { %v8480_v23 = vpop.f32.mrf.mxu1  ;;  %2433 = vmatpush.bf16.msrb.mxu0 %v7896_v13 }
  0xdd   :  { %v8456_v48 = vpop.f32.mrf.mxu3 }
  0xde   :  { %11717 = vst [vmem:[#allocation49_spill] sm:$0xff] %v8456_v48 }
  0xdf   :  { %1870 = vmatmul.bf16.gmra.mxu2 %v1086_v11  ;;  %v359_v11 = vld [vmem:[#allocation2 + $0x270] sm:$0xff]  ;;  %v8493_v59 = vpop.f32.mrf.mxu1 }
  0xe1   :  { %1790 = vmatmul.bf16.gmra.mxu0 %v942_v12  ;;  %v360_v12 = vld [vmem:[#allocation2 + $0x278] sm:$0xff] }
  0xe2   :  { %2054 = vmatmul.bf16.gmra.mxu3 %v1114_v53  ;;  %v1104_v16 = vpack.c.bf16 %v360_v12, %v359_v11  ;;  %v8490_v53 = vld [vmem:[#allocation3 + $0x1a8] sm:$0xff]  ;;  %v8496_v11 = vld [vmem:[#allocation3 + $0xa0] sm:$0xff] }
  0xe3   :  { %11723 = vst [vmem:[#allocation55_spill] sm:$0xff] %v8490_v53  ;;  %v8498_v12 = vld [vmem:[#allocation3 + $0xa8] sm:$0xff] }
  0xe4   :  { %300 = vst [vmem:[#allocation2 + $0x2c1] sm:$0xff] %v8490_v53  ;;  %v988_v62 = vpack.c.bf16 %v8498_v12, %v8496_v11 }
  0xe5   :  { %v2015_v60 = vpop.f32.mrf.mxu3  ;;  %11724 = vst [vmem:[#allocation56_spill] sm:$0xff] %v8496_v11 }
  0xe6   :  { %11725 = vst [vmem:[#allocation57_spill] sm:$0xff] %v8498_v12  ;;  %1984 = vmatmul.bf16.gmra.mxu1 %v988_v62 }
  0xe7   :  { %267 = vst [vmem:[#allocation2 + $0x109] sm:$0xff] %v8496_v11  ;;  %v8508_v26 = vpop.f32.mrf.mxu1 }
  0xe8   :  { %268 = vst [vmem:[#allocation2 + $0x111] sm:$0xff] %v8498_v12  ;;  %v7878_v12 = vld [vmem:[#allocation6 + $0x80] sm:$0xff] }
  0xe9   :  { %2097 = vmatpush.bf16.msrb.mxu2 %v7878_v12  ;;  %v8634_v12 = vld [vmem:[#allocation3 + $0xe8] sm:$0xff] }
  0xea   :  { %11748 = vst [vmem:[#allocation80_spill] sm:$0xff] %v8634_v12 }
  0xeb   :  { %276 = vst [vmem:[#allocation2 + $0x171] sm:$0xff] %v8634_v12 }
  0xed   :  { %v8476_v15 = vpop.f32.mrf.mxu3  ;;  %2766 = vmatpush.bf16.msra.mxu2 %v7917_v46  ;;  %v631_v46 = vld [vmem:[#allocation2 + $0x1a] sm:$0xff] }
  0xef   :  { %1875 = vmatmul.bf16.gmra.mxu2 %v1095_v51  ;;  %v8486_v51 = vpop.f32.mrf.mxu0 }
  0xf1   :  { %1795 = vmatmul.bf16.gmra.mxu0 %v951_v52  ;;  %v8488_v52 = vld [vmem:[#allocation3 + $0x1a0] sm:$0xff] }
  0xf2   :  { %2059 = vmatmul.bf16.gmra.mxu3 %v1123_v22  ;;  %11722 = vst [vmem:[#allocation54_spill] sm:$0xff] %v8488_v52  ;;  %v329_v22 = vld [vmem:[#allocation2 + $0xd8] sm:$0xff]  ;;  %v1132_v61 = vpack.c.bf16 %v8490_v53, %v8488_v52 }
  0xf3   :  { %299 = vst [vmem:[#allocation2 + $0x2b9] sm:$0xff] %v8488_v52  ;;  %v969_v3 = vpack.c.bf16 %v330_v38, %v329_v22  ;;  %v8520_v22 = vld [vmem:[#allocation3 + $0x1b8] sm:$0xff]  ;;  %v364_v38 = vld [vmem:[#allocation2 + $0x2a8] sm:$0xff] }
  0xf4   :  { %11728 = vst [vmem:[#allocation60_spill] sm:$0xff] %v8520_v22  ;;  %v332_v53 = vld [vmem:[#allocation2 + $0xf8] sm:$0xff] }
  0xf5   :  { %v8484_v50 = vpop.f32.mrf.mxu3  ;;  %302 = vst [vmem:[#allocation2 + $0x2d9] sm:$0xff] %v8520_v22 }
  0xfd   :  { %v8504_v39 = vpop.f32.mrf.mxu3 }
  0xff   :  { %1880 = vmatmul.bf16.gmra.mxu2 %v1104_v16  ;;  %v361_v16 = vld [vmem:[#allocation2 + $0x288] sm:$0xff] }
 0x101   :  { %1800 = vmatmul.bf16.gmra.mxu0 %v960_v21  ;;  %v362_v21 = vld [vmem:[#allocation2 + $0x290] sm:$0xff] }
 0x102   :  { %v1113_v49 = vpack.c.bf16 %v362_v21, %v361_v16  ;;  %2064 = vmatmul.bf16.gmra.mxu3 %v1132_v61  ;;  %v8518_v21 = vld [vmem:[#allocation3 + $0x1b0] sm:$0xff] }
 0x103   :  { %11727 = vst [vmem:[#allocation59_spill] sm:$0xff] %v8518_v21  ;;  %v8526_v61 = vld [vmem:[#allocation3 + $0xb0] sm:$0xff] }
 0x104   :  { %301 = vst [vmem:[#allocation2 + $0x2d1] sm:$0xff] %v8518_v21 }
 0x105   :  { %v8514_v41 = vpop.f32.mrf.mxu3  ;;  %11729 = vst [vmem:[#allocation61_spill] sm:$0xff] %v8526_v61 }
 0x106   :  { %269 = vst [vmem:[#allocation2 + $0x121] sm:$0xff] %v8526_v61 }
 0x10d   :  { %v8535_v52 = vpop.f32.mrf.mxu3 }
 0x10e   :  { %v1766_v29 = vpop.f32.mrf.mxu0 }
 0x10f   :  { %v8510_v63 = vadd.f32 %v1935_v58, %v1766_v29  ;;  %1885 = vmatmul.bf16.gmra.mxu2 %v1113_v49  ;;  %v8523_v58 = vpop.f32.mrf.mxu1 }
 0x111   :  { %1805 = vmatmul.bf16.gmra.mxu0 %v969_v3  ;;  %v8528_v3 = vld [vmem:[#allocation3 + $0xb8] sm:$0xff] }
 0x112   :  { %v1846_v13 = vpop.f32.mrf.mxu2  ;;  %11730 = vst [vmem:[#allocation62_spill] sm:$0xff] %v8528_v3  ;;  %v997_v54 = vpack.c.bf16 %v8528_v3, %v8526_v61 }
 0x113   :  { %v8516_v16 = vadd.f32 %v2015_v60, %v1846_v13  ;;  %v363_v60 = vld [vmem:[#allocation2 + $0x2a0] sm:$0xff]  ;;  %270 = vst [vmem:[#allocation2 + $0x129] sm:$0xff] %v8528_v3  ;;  %v331_v13 = vld [vmem:[#allocation2 + $0xf0] sm:$0xff] }
 0x114   :  { %v1122_v18 = vpack.c.bf16 %v364_v38, %v363_v60  ;;  %v978_v17 = vpack.c.bf16 %v332_v53, %v331_v13  ;;  %1989 = vmatmul.bf16.gmra.mxu1 %v997_v54 }
 0x115   :  { %11726 = vst [vmem:[#allocation58_spill] sm:$0xff] %v8516_v16  ;;  %v8549_v53 = vpop.f32.mrf.mxu3  ;;  %v652_v16 = vld [vmem:[#allocation2 + $0x112] sm:$0xff] }
 0x116   :  { %v1768_v29 = vpop.f32.mrf.mxu0 }
 0x117   :  { %v8531_v62 = vadd.f32 %v8467_v4, %v1768_v29  ;;  %v1141_v4 = vpack.c.bf16 %v8520_v22, %v8518_v21  ;;  %v8545_v5 = vpop.f32.mrf.mxu1  ;;  %v334_v22 = vld [vmem:[#allocation2 + $0x110] sm:$0xff] }
 0x119   :  { %2069 = vmatmul.bf16.gmra.mxu3 %v1141_v4  ;;  %v365_v4 = vld [vmem:[#allocation2 + $0x2b8] sm:$0xff] }
 0x11a   :  { %v1848_v49 = vpop.f32.mrf.mxu2 }
 0x11b   :  { %v8538_v40 = vadd.f32 %v8476_v15, %v1848_v49  ;;  %v7887_v15 = vld [vmem:[#allocation6 + $0xc8] sm:$0xff] }
 0x11c   :  { %2265 = vmatpush.bf16.msrb.mxu3 %v7887_v15 }
 0x11d   :  { %11731 = vst [vmem:[#allocation63_spill] sm:$0xff] %v8538_v40  ;;  %v8571_v21 = vpop.f32.mrf.mxu3  ;;  %v651_v40 = vld [vmem:[#allocation2 + $0x10a] sm:$0xff] }
 0x11e   :  { %v1771_v29 = vpop.f32.mrf.mxu0 }
 0x11f   :  { %v8543_v6 = vadd.f32 %v8480_v23, %v1771_v29  ;;  %1890 = vmatmul.bf16.gmra.mxu2 %v1122_v18  ;;  %v8554_v23 = vld [vmem:[#allocation3 + $0x1c0] sm:$0xff]  ;;  %v8556_v18 = vld [vmem:[#allocation3 + $0x1c8] sm:$0xff]  ;;  %v8567_v13 = vpop.f32.mrf.mxu1 }
 0x120   :  { %11733 = vst [vmem:[#allocation65_spill] sm:$0xff] %v8554_v23  ;;  %v366_v29 = vld [vmem:[#allocation2 + $0x2c0] sm:$0xff]  ;;  %v1150_v42 = vpack.c.bf16 %v8556_v18, %v8554_v23 }
 0x121   :  { %1810 = vmatmul.bf16.gmra.mxu0 %v978_v17  ;;  %11734 = vst [vmem:[#allocation66_spill] sm:$0xff] %v8556_v18  ;;  %v8560_v17 = vld [vmem:[#allocation3 + $0xc0] sm:$0xff] }
 0x122   :  { %v1851_v60 = vpop.f32.mrf.mxu2  ;;  %303 = vst [vmem:[#allocation2 + $0x2e9] sm:$0xff] %v8554_v23 }
 0x123   :  { %v8552_v38 = vadd.f32 %v8484_v50, %v1851_v60  ;;  %304 = vst [vmem:[#allocation2 + $0x2f1] sm:$0xff] %v8556_v18  ;;  %v7895_v50 = vld [vmem:[#allocation6 + $0x108] sm:$0xff] }
 0x124   :  { %11735 = vst [vmem:[#allocation67_spill] sm:$0xff] %v8560_v17  ;;  %2434 = vmatpush.bf16.msrb.mxu0 %v7895_v50  ;;  %v333_v60 = vld [vmem:[#allocation2 + $0x108] sm:$0xff]  ;;  %v1006_v50 = vpack.c.bf16 %v8562_v55, %v8560_v17 }
 0x125   :  { %11732 = vst [vmem:[#allocation64_spill] sm:$0xff] %v8552_v38  ;;  %v650_v38 = vld [vmem:[#allocation2 + $0xfa] sm:$0xff] }
 0x126   :  { %v1773_v49 = vpop.f32.mrf.mxu0  ;;  %271 = vst [vmem:[#allocation2 + $0x139] sm:$0xff] %v8560_v17  ;;  %1994 = vmatmul.bf16.gmra.mxu1 %v1006_v50  ;;  %v336_v50 = vld [vmem:[#allocation2 + $0x128] sm:$0xff] }
 0x127   :  { %v8565_v54 = vadd.f32 %v8493_v59, %v1773_v49  ;;  %v1131_v59 = vpack.c.bf16 %v366_v29, %v365_v4  ;;  %v987_v49 = vpack.c.bf16 %v334_v22, %v333_v60  ;;  %v8581_v28 = vpop.f32.mrf.mxu1  ;;  %v8590_v4 = vld [vmem:[#allocation3 + $0x1d0] sm:$0xff]  ;;  %v8592_v29 = vld [vmem:[#allocation3 + $0x1d8] sm:$0xff] }
 0x128   :  { %11739 = vst [vmem:[#allocation71_spill] sm:$0xff] %v8590_v4 }
 0x129   :  { %2074 = vmatmul.bf16.gmra.mxu3 %v1150_v42  ;;  %11740 = vst [vmem:[#allocation72_spill] sm:$0xff] %v8592_v29  ;;  %v8596_v42 = vld [vmem:[#allocation3 + $0xd0] sm:$0xff] }
 0x12a   :  { %v1853_v15 = vpop.f32.mrf.mxu2  ;;  %305 = vst [vmem:[#allocation2 + $0x301] sm:$0xff] %v8590_v4 }
 0x12b   :  { %v8574_v43 = vadd.f32 %v8504_v39, %v1853_v15  ;;  %v8585_v39 = vpop.f32.mrf.mxu3  ;;  %306 = vst [vmem:[#allocation2 + $0x309] sm:$0xff] %v8592_v29 }
 0x12c   :  { %11741 = vst [vmem:[#allocation73_spill] sm:$0xff] %v8596_v42 }
 0x12d   :  { %11737 = vst [vmem:[#allocation69_spill] sm:$0xff] %v8574_v43  ;;  %v649_v43 = vld [vmem:[#allocation2 + $0xf2] sm:$0xff] }
 0x12e   :  { %v1776_v34 = vpop.f32.mrf.mxu0  ;;  %273 = vst [vmem:[#allocation2 + $0x151] sm:$0xff] %v8596_v42 }
 0x12f   :  { %v8579_v33 = vadd.f32 %v8508_v26, %v1776_v34  ;;  %1895 = vmatmul.bf16.gmra.mxu2 %v1131_v59  ;;  %v8598_v26 = vld [vmem:[#allocation3 + $0xd8] sm:$0xff]  ;;  %v8603_v60 = vpop.f32.mrf.mxu1 }
 0x130   :  { %11742 = vst [vmem:[#allocation74_spill] sm:$0xff] %v8598_v26  ;;  %v1015_v11 = vpack.c.bf16 %v8598_v26, %v8596_v42 }
 0x131   :  { %1815 = vmatmul.bf16.gmra.mxu0 %v987_v49  ;;  %274 = vst [vmem:[#allocation2 + $0x159] sm:$0xff] %v8598_v26  ;;  %v335_v49 = vld [vmem:[#allocation2 + $0x120] sm:$0xff]  ;;  %v7909_v26 = vld [vmem:[#allocation6 + $0x178] sm:$0xff] }
 0x132   :  { %v1856_v27 = vpop.f32.mrf.mxu2  ;;  %v996_v17 = vpack.c.bf16 %v336_v50, %v335_v49  ;;  %2597 = vmatpush.bf16.msrb.mxu1 %v7909_v26  ;;  %v7907_v26 = vld [vmem:[#allocation6 + $0x168] sm:$0xff] }
 0x133   :  { %v8588_v22 = vadd.f32 %v8514_v41, %v1856_v27  ;;  %v367_v27 = vld [vmem:[#allocation2 + $0x2d0] sm:$0xff]  ;;  %v368_v41 = vld [vmem:[#allocation2 + $0x2d8] sm:$0xff]  ;;  %v8607_v18 = vpop.f32.mrf.mxu3 }
 0x134   :  { %v1140_v55 = vpack.c.bf16 %v368_v41, %v367_v27 }
 0x135   :  { %11738 = vst [vmem:[#allocation70_spill] sm:$0xff] %v8588_v22 }
 0x136   :  { %v1778_v34 = vpop.f32.mrf.mxu0  ;;  %1999 = vmatmul.bf16.gmra.mxu1 %v1015_v11 }
 0x137   :  { %v8601_v15 = vadd.f32 %v8523_v58, %v1778_v34  ;;  %v1159_v58 = vpack.c.bf16 %v8592_v29, %v8590_v4  ;;  %v8617_v61 = vpop.f32.mrf.mxu1  ;;  %v338_v29 = vld [vmem:[#allocation2 + $0x140] sm:$0xff]  ;;  %2598 = vmatpush.bf16.msrb.mxu1 %v7908_v35 }
 0x139   :  { %2079 = vmatmul.bf16.gmra.mxu3 %v1159_v58  ;;  %v369_v58 = vld [vmem:[#allocation2 + $0x2e8] sm:$0xff] }
 0x13a   :  { %v1858_v59 = vpop.f32.mrf.mxu2 }
 0x13b   :  { %v8610_v23 = vadd.f32 %v8535_v52, %v1858_v59  ;;  %v7886_v52 = vld [vmem:[#allocation6 + $0xc0] sm:$0xff]  ;;  %v8621_v41 = vpop.f32.mrf.mxu3  ;;  %2599 = vmatpush.bf16.msrb.mxu1 %v7907_v26  ;;  %v503_v26 = vld [vmem:[#allocation2 + $0x18] sm:$0xff] }
 0x13c   :  { %2266 = vmatpush.bf16.msrb.mxu3 %v7886_v52 }
 0x13d   :  { %11743 = vst [vmem:[#allocation75_spill] sm:$0xff] %v8610_v23 }
 0x13e   :  { %v1781_v34 = vpop.f32.mrf.mxu0 }
 0x13f   :  { %v8615_v3 = vadd.f32 %v8545_v5, %v1781_v34  ;;  %1900 = vmatmul.bf16.gmra.mxu2 %v1140_v55  ;;  %v8626_v5 = vld [vmem:[#allocation3 + $0x1e0] sm:$0xff]  ;;  %v8628_v55 = vld [vmem:[#allocation3 + $0x1e8] sm:$0xff]  ;;  %v8639_v50 = vpop.f32.mrf.mxu1  ;;  %v370_v34 = vld [vmem:[#allocation2 + $0x2f0] sm:$0xff] }
 0x140   :  { %11745 = vst [vmem:[#allocation77_spill] sm:$0xff] %v8626_v5  ;;  %v1168_v10 = vpack.c.bf16 %v8628_v55, %v8626_v5 }
 0x141   :  { %1820 = vmatmul.bf16.gmra.mxu0 %v996_v17  ;;  %11746 = vst [vmem:[#allocation78_spill] sm:$0xff] %v8628_v55  ;;  %v8632_v17 = vld [vmem:[#allocation3 + $0xe0] sm:$0xff] }
 0x142   :  { %v1861_v27 = vpop.f32.mrf.mxu2  ;;  %307 = vst [vmem:[#allocation2 + $0x319] sm:$0xff] %v8626_v5  ;;  %v1024_v2 = vpack.c.bf16 %v8634_v12, %v8632_v17 }
 0x143   :  { %v8624_v59 = vadd.f32 %v8549_v53, %v1861_v27  ;;  %308 = vst [vmem:[#allocation2 + $0x321] sm:$0xff] %v8628_v55  ;;  %v7894_v53 = vld [vmem:[#allocation6 + $0x100] sm:$0xff]  ;;  %v337_v27 = vld [vmem:[#allocation2 + $0x138] sm:$0xff]  ;;  %v8643_v4 = vpop.f32.mrf.mxu3 }
 0x144   :  { %11747 = vst [vmem:[#allocation79_spill] sm:$0xff] %v8632_v17  ;;  %2435 = vmatpush.bf16.msrb.mxu0 %v7894_v53  ;;  %v7905_v55 = vld [vmem:[#allocation6 + $0x158] sm:$0xff] }
 0x145   :  { %11744 = vst [vmem:[#allocation76_spill] sm:$0xff] %v8624_v59  ;;  %v646_v59 = vld [vmem:[#allocation2 + $0xca] sm:$0xff] }
 0x146   :  { %v1783_v49 = vpop.f32.mrf.mxu0  ;;  %275 = vst [vmem:[#allocation2 + $0x169] sm:$0xff] %v8632_v17  ;;  %2004 = vmatmul.bf16.gmra.mxu1 %v1024_v2  ;;  %v340_v2 = vld [vmem:[#allocation2 + $0x158] sm:$0xff]  ;;  %v7904_v17 = vld [vmem:[#allocation6 + $0x150] sm:$0xff] }
 0x147   :  { %v8637_v11 = vadd.f32 %v8567_v13, %v1783_v49  ;;  %v1149_v13 = vpack.c.bf16 %v370_v34, %v369_v58  ;;  %v1005_v49 = vpack.c.bf16 %v338_v29, %v337_v27  ;;  %v8653_v53 = vpop.f32.mrf.mxu1  ;;  %v372_v27 = vld [vmem:[#allocation2 + $0x308] sm:$0xff] }
 0x149   :  { %2084 = vmatmul.bf16.gmra.mxu3 %v1168_v10 }
 0x14a   :  { %v1863_v52 = vpop.f32.mrf.mxu2 }
 0x14b   :  { %v8646_v42 = vadd.f32 %v8571_v21, %v1863_v52  ;;  %v8657_v29 = vpop.f32.mrf.mxu3  ;;  %v371_v52 = vld [vmem:[#allocation2 + $0x300] sm:$0xff] }
 0x14d   :  { %11749 = vst [vmem:[#allocation81_spill] sm:$0xff] %v8646_v42 }
 0x14e   :  { %v1786_v9 = vpop.f32.mrf.mxu0 }
 0x14f   :  { %v8651_v32 = vadd.f32 %v8581_v28, %v1786_v9  ;;  %1905 = vmatmul.bf16.gmra.mxu2 %v1149_v13  ;;  %v7906_v9 = vld [vmem:[#allocation6 + $0x160] sm:$0xff]  ;;  %v8665_v10 = vpop.f32.mrf.mxu1  ;;  %v339_v13 = vld [vmem:[#allocation2 + $0x150] sm:$0xff] }
 0x150   :  { %2600 = vmatpush.bf16.msrb.mxu1 %v7906_v9  ;;  %v1014_v5 = vpack.c.bf16 %v340_v2, %v339_v13  ;;  %v7902_v13 = vld [vmem:[#allocation6 + $0x140] sm:$0xff] }
 0x151   :  { %1825 = vmatmul.bf16.gmra.mxu0 %v1005_v49 }
 0x152   :  { %v1866_v21 = vpop.f32.mrf.mxu2 }
 0x153   :  { %v8660_v58 = vadd.f32 %v8585_v39, %v1866_v21  ;;  %v8667_v49 = vpop.f32.mrf.mxu3  ;;  %v1158_v21 = vpack.c.bf16 %v372_v27, %v371_v52  ;;  %v7903_v27 = vld [vmem:[#allocation6 + $0x148] sm:$0xff] }
 0x154   :  { %2601 = vmatpush.bf16.msrb.mxu1 %v7905_v55 }
 0x155   :  { %11750 = vst [vmem:[#allocation82_spill] sm:$0xff] %v8660_v58 }
 0x156   :  { %v1788_v28 = vpop.f32.mrf.mxu0 }
 0x157   :  { %v8663_v34 = vadd.f32 %v8603_v60, %v1788_v28  ;;  %v504_v60 = vld [vmem:[#allocation2 + $0x20] sm:$0xff]  ;;  %v8675_v9 = vpop.f32.mrf.mxu1 }
 0x158   :  { %v891_v12 = vpack.c.bf16 %v504_v60, %v503_v26  ;;  %2602 = vmatpush.bf16.msrb.mxu1 %v7904_v17  ;;  %v7933_v17 = vld [vmem:[#allocation6 + $0x238] sm:$0xff]  ;;  %v632_v26 = vld [vmem:[#allocation2 + $0x22] sm:$0xff] }
 0x159   :  { %3104 = vmatpush.bf16.msra.mxu0 %v7933_v17  ;;  %v8685_v60 = vpack.c.bf16 %v632_v26, %v631_v46 }
 0x15a   :  { %v1868_v35 = vpop.f32.mrf.mxu2  ;;  %2267 = vmatmul.bf16.vlgmr.msrb.gmra.mxu3 %v891_v12 }
 0x15b   :  { %v8670_v39 = vadd.f32 %v8607_v18, %v1868_v35  ;;  %v7925_v18 = vld [vmem:[#allocation6 + $0x1f8] sm:$0xff]  ;;  %v8677_v55 = vpop.f32.mrf.mxu3 }
 0x15c   :  { %2935 = vmatpush.bf16.msra.mxu3 %v7925_v18  ;;  %2603 = vmatpush.bf16.msrb.mxu1 %v7903_v27 }
 0x15d   :  { %11751 = vst [vmem:[#allocation83_spill] sm:$0xff] %v8670_v39  ;;  %v642_v39 = vld [vmem:[#allocation2 + $0x9a] sm:$0xff] }
 0x15e   :  { %v1791_v28 = vpop.f32.mrf.mxu0 }
 0x15f   :  { %v8673_v1 = vadd.f32 %v8617_v61, %v1791_v28  ;;  %1910 = vmatmul.bf16.gmra.mxu2 %v1158_v21  ;;  %v373_v21 = vld [vmem:[#allocation2 + $0x318] sm:$0xff]  ;;  %v1972_v12 = vpop.f32.mrf.mxu1 }
 0x160   :  { %2604 = vmatpush.bf16.msrb.mxu1 %v7902_v13 }
 0x161   :  { %1830 = vmatmul.bf16.gmra.mxu0 %v1014_v5  ;;  %v374_v5 = vld [vmem:[#allocation2 + $0x320] sm:$0xff] }
 0x162   :  { %v1871_v52 = vpop.f32.mrf.mxu2  ;;  %v1167_v44 = vpack.c.bf16 %v374_v5, %v373_v21 }
 0x163   :  { %v8680_v35 = vadd.f32 %v8621_v41, %v1871_v52  ;;  %v341_v41 = vld [vmem:[#allocation2 + $0x168] sm:$0xff]  ;;  %v342_v52 = vld [vmem:[#allocation2 + $0x170] sm:$0xff]  ;;  %v2052_v18 = vpop.f32.mrf.mxu3  ;;  %2605 = vmatmul.bf16.vlgmr.msrb.gmra.mxu1 %v8685_v60 }
 0x164   :  { %v8691_v20 = vpack.c.bf16 %v342_v52, %v341_v41  ;;  %v439_v41 = vld [vmem:[#allocation2 + $0x2] sm:$0xff] }
 0x165   :  { %11752 = vst [vmem:[#allocation84_spill] sm:$0xff] %v8680_v35  ;;  %v641_v35 = vld [vmem:[#allocation2 + $0x92] sm:$0xff] }
 0x166   :  { %v1793_v61 = vpop.f32.mrf.mxu0 }
 0x167   :  { %v8683_v2 = vadd.f32 %v8639_v50, %v1793_v61  ;;  %v505_v50 = vld [vmem:[#allocation2 + $0x30] sm:$0xff]  ;;  %v506_v61 = vld [vmem:[#allocation2 + $0x38] sm:$0xff]  ;;  %v1975_v46 = vpop.f32.mrf.mxu1 }
 0x168   :  { %v900_v13 = vpack.c.bf16 %v506_v61, %v505_v50  ;;  %v440_v50 = vld [vmem:[#allocation2 + $0xa] sm:$0xff]  ;;  %v633_v61 = vld [vmem:[#allocation2 + $0x32] sm:$0xff] }
 0x16a   :  { %v1873_v28 = vpop.f32.mrf.mxu2  ;;  %2272 = vmatmul.bf16.gmra.mxu3 %v900_v13  ;;  %v567_v13 = vld [vmem:[#allocation2 + $0x19] sm:$0xff] }
 0x16b   :  { %v8688_v27 = vadd.f32 %v8643_v4, %v1873_v28  ;;  %v2055_v4 = vpop.f32.mrf.mxu3 }
 0x16d   :  { %11753 = vst [vmem:[#allocation85_spill] sm:$0xff] %v8688_v27 }
 0x16e   :  { %v1796_v19 = vpop.f32.mrf.mxu0 }
 0x16f   :  { %v8694_v17 = vadd.f32 %v8653_v53, %v1796_v19  ;;  %1915 = vmatmul.bf16.gmra.mxu2 %v1167_v44  ;;  %v1977_v52 = vpop.f32.mrf.mxu1  ;;  %v634_v19 = vld [vmem:[#allocation2 + $0x3a] sm:$0xff] }
 0x170   :  { %v8703_v53 = vpack.c.bf16 %v634_v19, %v633_v61 }
 0x171   :  { %1835 = vmatmul.bf16.gmra.mxu0 %v8691_v20 }
 0x172   :  { %v1876_v26 = vpop.f32.mrf.mxu2 }
 0x173   :  { %v8698_v21 = vadd.f32 %v8657_v29, %v1876_v26  ;;  %v2057_v7 = vpop.f32.mrf.mxu3  ;;  %v890_v29 = vpack.c.bf16 %v440_v50, %v439_v41  ;;  %2610 = vmatmul.bf16.gmra.mxu1 %v8703_v53  ;;  %v507_v26 = vld [vmem:[#allocation2 + $0x48] sm:$0xff] }
 0x175   :  { %11754 = vst [vmem:[#allocation86_spill] sm:$0xff] %v8698_v21 }
 0x176   :  { %v1798_v5 = vpop.f32.mrf.mxu0 }
 0x177   :  { %v8701_v28 = vadd.f32 %v8665_v10, %v1798_v5  ;;  %v508_v10 = vld [vmem:[#allocation2 + $0x50] sm:$0xff]  ;;  %v892_v5 = vpack.c.bf16 %v568_v8, %v567_v13  ;;  %v1980_v61 = vpop.f32.mrf.mxu1 }
 0x178   :  { %v909_v56 = vpack.c.bf16 %v508_v10, %v507_v26  ;;  %v636_v8 = vld [vmem:[#allocation2 + $0x52] sm:$0xff] }
 0x179   :  { %v8717_v13 = vpack.c.bf16 %v636_v8, %v635_v36 }
 0x17a   :  { %v1878_v44 = vpop.f32.mrf.mxu2  ;;  %2277 = vmatmul.bf16.gmra.mxu3 %v909_v56  ;;  %v509_v56 = vld [vmem:[#allocation2 + $0x60] sm:$0xff] }
 0x17b   :  { %v8706_v57 = vadd.f32 %v8667_v49, %v1878_v44  ;;  %v2060_v37 = vpop.f32.mrf.mxu3 }
 0x17d   :  { %11755 = vst [vmem:[#allocation87_spill] sm:$0xff] %v8706_v57  ;;  %v638_v57 = vld [vmem:[#allocation2 + $0x6a] sm:$0xff] }
 0x17e   :  { %v1801_v47 = vpop.f32.mrf.mxu0 }
 0x17f   :  { %v8710_v45 = vadd.f32 %v8675_v9, %v1801_v47  ;;  %2098 = vmatmul.bf16.vlgmr.msrb.gmra.mxu2 %v890_v29  ;;  %v1982_v44 = vpop.f32.mrf.mxu1  ;;  %v569_v47 = vld [vmem:[#allocation2 + $0x31] sm:$0xff]  ;;  %v570_v9 = vld [vmem:[#allocation2 + $0x39] sm:$0xff] }
 0x181   :  { %2436 = vmatmul.bf16.vlgmr.msrb.gmra.mxu0 %v892_v5  ;;  %v510_v5 = vld [vmem:[#allocation2 + $0x68] sm:$0xff] }
 0x182   :  { %v1881_v19 = vpop.f32.mrf.mxu2 }
 0x183   :  { %v8713_v49 = vadd.f32 %v8677_v55, %v1881_v19  ;;  %v2062_v29 = vpop.f32.mrf.mxu3  ;;  %2615 = vmatmul.bf16.gmra.mxu1 %v8717_v13  ;;  %v901_v55 = vpack.c.bf16 %v570_v9, %v569_v47  ;;  %v918_v19 = vpack.c.bf16 %v510_v5, %v509_v56  ;;  %v511_v5 = vld [vmem:[#allocation2 + $0x78] sm:$0xff] }
 0x185   :  { %11756 = vst [vmem:[#allocation88_spill] sm:$0xff] %v8713_v49  ;;  %v637_v49 = vld [vmem:[#allocation2 + $0x62] sm:$0xff] }
 0x186   :  { %v1803_v41 = vpop.f32.mrf.mxu0  ;;  %v8729_v47 = vpack.c.bf16 %v638_v57, %v637_v49  ;;  %v7916_v57 = vld [vmem:[#allocation6 + $0x1b0] sm:$0xff] }
 0x187   :  { %v8715_v50 = vadd.f32 %v1972_v12, %v1803_v41  ;;  %v1985_v41 = vpop.f32.mrf.mxu1  ;;  %2767 = vmatpush.bf16.msra.mxu2 %v7916_v57  ;;  %v7924_v49 = vld [vmem:[#allocation6 + $0x1f0] sm:$0xff] }
 0x188   :  { %2936 = vmatpush.bf16.msra.mxu3 %v7924_v49 }
 0x18a   :  { %v1883_v26 = vpop.f32.mrf.mxu2  ;;  %2282 = vmatmul.bf16.gmra.mxu3 %v918_v19 }
 0x18b   :  { %v8719_v10 = vadd.f32 %v2052_v18, %v1883_v26  ;;  %v2065_v8 = vpop.f32.mrf.mxu3 }
 0x18d   :  { %11757 = vst [vmem:[#allocation89_spill] sm:$0xff] %v8719_v10 }
 0x18e   :  { %v1806_v31 = vpop.f32.mrf.mxu0 }
 0x18f   :  { %v8722_v12 = vadd.f32 %v1975_v46, %v1806_v31  ;;  %2103 = vmatmul.bf16.gmra.mxu2 %v8685_v60  ;;  %v1987_v10 = vpop.f32.mrf.mxu1  ;;  %v571_v31 = vld [vmem:[#allocation2 + $0x49] sm:$0xff]  ;;  %v572_v46 = vld [vmem:[#allocation2 + $0x51] sm:$0xff] }
 0x191   :  { %2441 = vmatmul.bf16.gmra.mxu0 %v901_v55  ;;  %v512_v55 = vld [vmem:[#allocation2 + $0x80] sm:$0xff] }
 0x192   :  { %v1886_v36 = vpop.f32.mrf.mxu2  ;;  %v927_v19 = vpack.c.bf16 %v512_v55, %v511_v5  ;;  %v640_v5 = vld [vmem:[#allocation2 + $0x82] sm:$0xff] }
 0x193   :  { %v8725_v30 = vadd.f32 %v2055_v4, %v1886_v36  ;;  %v2067_v56 = vpop.f32.mrf.mxu3  ;;  %2620 = vmatmul.bf16.gmra.mxu1 %v8729_v47  ;;  %v910_v4 = vpack.c.bf16 %v572_v46, %v571_v31  ;;  %v7932_v46 = vld [vmem:[#allocation6 + $0x230] sm:$0xff] }
 0x194   :  { %3105 = vmatpush.bf16.msra.mxu0 %v7932_v46 }
 0x195   :  { %11758 = vst [vmem:[#allocation90_spill] sm:$0xff] %v8725_v30 }
 0x196   :  { %v1808_v18 = vpop.f32.mrf.mxu0 }
 0x197   :  { %v8727_v26 = vadd.f32 %v1977_v52, %v1808_v18  ;;  %v1990_v18 = vpop.f32.mrf.mxu1 }
 0x19a   :  { %v1888_v9 = vpop.f32.mrf.mxu2  ;;  %2287 = vmatmul.bf16.gmra.mxu3 %v927_v19  ;;  %v573_v19 = vld [vmem:[#allocation2 + $0x61] sm:$0xff] }
 0x19b   :  { %v8731_v60 = vadd.f32 %v2057_v7, %v1888_v9 }
 0x19c   :  { %v2070_v7 = vpop.f32.mrf.mxu3 }
 0x19d   :  { %11759 = vst [vmem:[#allocation91_spill] sm:$0xff] %v8731_v60 }
 0x19e   :  { %v1811_v36 = vpop.f32.mrf.mxu0 }
 0x19f   :  { %v8734_v52 = vadd.f32 %v1980_v61, %v1811_v36  ;;  %2108 = vmatmul.bf16.gmra.mxu2 %v8703_v53  ;;  %v1992_v31 = vpop.f32.mrf.mxu1  ;;  %v639_v61 = vld [vmem:[#allocation2 + $0x7a] sm:$0xff] }
 0x1a0   :  { %v8741_v53 = vpack.c.bf16 %v640_v5, %v639_v61 }
 0x1a1   :  { %2446 = vmatmul.bf16.gmra.mxu0 %v910_v4  ;;  %v574_v4 = vld [vmem:[#allocation2 + $0x69] sm:$0xff] }
 0x1a2   :  { %v1891_v30 = vpop.f32.mrf.mxu2  ;;  %v919_v49 = vpack.c.bf16 %v574_v4, %v573_v19  ;;  %v938_v19 = vpack.c.bf16 %v642_v39, %v641_v35 }
 0x1a3   :  { %v8737_v9 = vadd.f32 %v2060_v37, %v1891_v30  ;;  %2625 = vmatmul.bf16.gmra.mxu1 %v8741_v53  ;;  %v513_v30 = vld [vmem:[#allocation2 + $0x90] sm:$0xff]  ;;  %v514_v37 = vld [vmem:[#allocation2 + $0x98] sm:$0xff] }
 0x1a4   :  { %v2072_v36 = vpop.f32.mrf.mxu3 }
 0x1a5   :  { %11760 = vst [vmem:[#allocation92_spill] sm:$0xff] %v8737_v9 }
 0x1a6   :  { %v1813_v60 = vpop.f32.mrf.mxu0 }
 0x1a7   :  { %v8739_v21 = vadd.f32 %v1982_v44, %v1813_v60  ;;  %v936_v44 = vpack.c.bf16 %v514_v37, %v513_v30  ;;  %v1995_v46 = vpop.f32.mrf.mxu1  ;;  %v575_v30 = vld [vmem:[#allocation2 + $0x79] sm:$0xff] }
 0x1aa   :  { %v1893_v55 = vpop.f32.mrf.mxu2  ;;  %2292 = vmatmul.bf16.gmra.mxu3 %v936_v44 }
 0x1ab   :  { %v8743_v57 = vadd.f32 %v2062_v29, %v1893_v55 }
 0x1ac   :  { %v2075_v5 = vpop.f32.mrf.mxu3 }
 0x1ad   :  { %11761 = vst [vmem:[#allocation93_spill] sm:$0xff] %v8743_v57 }
 0x1ae   :  { %v1816_v60 = vpop.f32.mrf.mxu0 }
 0x1af   :  { %v8746_v9 = vadd.f32 %v1985_v41, %v1816_v60  ;;  %2113 = vmatmul.bf16.gmra.mxu2 %v8717_v13  ;;  %v1997_v57 = vpop.f32.mrf.mxu1  ;;  %v576_v41 = vld [vmem:[#allocation2 + $0x81] sm:$0xff] }
 0x1b0   :  { %v515_v13 = vld [vmem:[#allocation2 + $0xa8] sm:$0xff]  ;;  %v928_v44 = vpack.c.bf16 %v576_v41, %v575_v30  ;;  %v577_v41 = vld [vmem:[#allocation2 + $0x91] sm:$0xff] }
 0x1b1   :  { %2451 = vmatmul.bf16.gmra.mxu0 %v919_v49  ;;  %v516_v49 = vld [vmem:[#allocation2 + $0xb0] sm:$0xff] }
 0x1b2   :  { %v1896_v61 = vpop.f32.mrf.mxu2  ;;  %v945_v58 = vpack.c.bf16 %v516_v49, %v515_v13 }
 0x1b3   :  { %v8749_v27 = vadd.f32 %v2065_v8, %v1896_v61  ;;  %2630 = vmatmul.bf16.gmra.mxu1 %v938_v19 }
 0x1b4   :  { %v2077_v37 = vpop.f32.mrf.mxu3 }
 0x1b5   :  { %11762 = vst [vmem:[#allocation94_spill] sm:$0xff] %v8749_v27 }
 0x1b6   :  { %v1818_v29 = vpop.f32.mrf.mxu0 }
 0x1b7   :  { %v8751_v55 = vadd.f32 %v1987_v10, %v1818_v29  ;;  %v2000_v10 = vpop.f32.mrf.mxu1 }
 0x1ba   :  { %v1898_v4 = vpop.f32.mrf.mxu2  ;;  %2297 = vmatmul.bf16.gmra.mxu3 %v945_v58 }
 0x1bb   :  { %v8753_v60 = vadd.f32 %v2067_v56, %v1898_v4  ;;  %v643_v4 = vld [vmem:[#allocation2 + $0xaa] sm:$0xff] }
 0x1bc   :  { %v2080_v35 = vpop.f32.mrf.mxu3 }
 0x1bd   :  { %11763 = vst [vmem:[#allocation95_spill] sm:$0xff] %v8753_v60  ;;  %v644_v60 = vld [vmem:[#allocation2 + $0xb2] sm:$0xff] }
 0x1be   :  { %v1821_v8 = vpop.f32.mrf.mxu0  ;;  %v8762_v42 = vpack.c.bf16 %v644_v60, %v643_v4 }
 0x1bf   :  { %v8755_v61 = vadd.f32 %v1990_v18, %v1821_v8  ;;  %2118 = vmatmul.bf16.gmra.mxu2 %v8729_v47  ;;  %v578_v18 = vld [vmem:[#allocation2 + $0x99] sm:$0xff]  ;;  %v2002_v58 = vpop.f32.mrf.mxu1 }
 0x1c0   :  { %v517_v47 = vld [vmem:[#allocation2 + $0xc0] sm:$0xff] }
 0x1c1   :  { %2456 = vmatmul.bf16.gmra.mxu0 %v928_v44  ;;  %v518_v44 = vld [vmem:[#allocation2 + $0xc8] sm:$0xff] }
 0x1c2   :  { %v1901_v39 = vpop.f32.mrf.mxu2  ;;  %v954_v8 = vpack.c.bf16 %v518_v44, %v517_v47 }
 0x1c3   :  { %v8758_v29 = vadd.f32 %v2070_v7, %v1901_v39  ;;  %2635 = vmatmul.bf16.gmra.mxu1 %v8762_v42  ;;  %v937_v7 = vpack.c.bf16 %v578_v18, %v577_v41  ;;  %v579_v18 = vld [vmem:[#allocation2 + $0xa9] sm:$0xff] }
 0x1c4   :  { %v2082_v13 = vpop.f32.mrf.mxu3 }
 0x1c5   :  { %11764 = vst [vmem:[#allocation96_spill] sm:$0xff] %v8758_v29  ;;  %v645_v29 = vld [vmem:[#allocation2 + $0xc2] sm:$0xff] }
 0x1c6   :  { %v1823_v27 = vpop.f32.mrf.mxu0  ;;  %v8774_v23 = vpack.c.bf16 %v646_v59, %v645_v29  ;;  %v7923_v59 = vld [vmem:[#allocation6 + $0x1e8] sm:$0xff] }
 0x1c7   :  { %v8760_v56 = vadd.f32 %v1992_v31, %v1823_v27  ;;  %2937 = vmatpush.bf16.msra.mxu3 %v7923_v59  ;;  %v522_v59 = vld [vmem:[#allocation2 + $0xf8] sm:$0xff] }
 0x1ca   :  { %v1903_v30 = vpop.f32.mrf.mxu2  ;;  %2302 = vmatmul.bf16.gmra.mxu3 %v954_v8 }
 0x1cb   :  { %v8764_v49 = vadd.f32 %v2072_v36, %v1903_v30  ;;  %v2005_v30 = vpop.f32.mrf.mxu1 }
 0x1cc   :  { %v2085_v60 = vpop.f32.mrf.mxu3 }
 0x1cd   :  { %11765 = vst [vmem:[#allocation97_spill] sm:$0xff] %v8764_v49 }
 0x1ce   :  { %v1826_v39 = vpop.f32.mrf.mxu0 }
 0x1cf   :  { %v8767_v27 = vadd.f32 %v1995_v46, %v1826_v39  ;;  %2123 = vmatmul.bf16.gmra.mxu2 %v8741_v53  ;;  %v580_v46 = vld [vmem:[#allocation2 + $0xb1] sm:$0xff] }
 0x1d0   :  { %v519_v53 = vld [vmem:[#allocation2 + $0xd8] sm:$0xff] }
 0x1d1   :  { %2461 = vmatmul.bf16.gmra.mxu0 %v937_v7  ;;  %v520_v7 = vld [vmem:[#allocation2 + $0xe0] sm:$0xff] }
 0x1d2   :  { %v1906_v31 = vpop.f32.mrf.mxu2  ;;  %v963_v8 = vpack.c.bf16 %v520_v7, %v519_v53  ;;  %v648_v53 = vld [vmem:[#allocation2 + $0xe2] sm:$0xff] }
 0x1d3   :  { %v8770_v4 = vadd.f32 %v2075_v5, %v1906_v31  ;;  %2640 = vmatmul.bf16.gmra.mxu1 %v8774_v23  ;;  %v946_v5 = vpack.c.bf16 %v580_v46, %v579_v18  ;;  %v647_v46 = vld [vmem:[#allocation2 + $0xda] sm:$0xff] }
 0x1d4   :  { %v2087_v47 = vpop.f32.mrf.mxu3  ;;  %v8785_v7 = vpack.c.bf16 %v648_v53, %v647_v46 }
 0x1d5   :  { %11766 = vst [vmem:[#allocation98_spill] sm:$0xff] %v8770_v4 }
 0x1d6   :  { %v1828_v36 = vpop.f32.mrf.mxu0 }
 0x1d7   :  { %v8772_v49 = vadd.f32 %v1997_v57, %v1828_v36  ;;  %v7915_v57 = vld [vmem:[#allocation6 + $0x1a8] sm:$0xff]  ;;  %v2007_v36 = vpop.f32.mrf.mxu1 }
 0x1d8   :  { %2768 = vmatpush.bf16.msra.mxu2 %v7915_v57 }
 0x1da   :  { %v1908_v41 = vpop.f32.mrf.mxu2  ;;  %2307 = vmatmul.bf16.gmra.mxu3 %v963_v8  ;;  %v582_v8 = vld [vmem:[#allocation2 + $0xc9] sm:$0xff] }
 0x1db   :  { %v8776_v44 = vadd.f32 %v2077_v37, %v1908_v41 }
 0x1dd   :  { %11767 = vst [vmem:[#allocation99_spill] sm:$0xff] %v8776_v44  ;;  %v2268_v37 = vpop.f32.mrf.mxu3 }
 0x1de   :  { %v1831_v39 = vpop.f32.mrf.mxu0 }
 0x1df   :  { %v8779_v31 = vadd.f32 %v2000_v10, %v1831_v39  ;;  %2128 = vmatmul.bf16.gmra.mxu2 %v938_v19  ;;  %v7931_v10 = vld [vmem:[#allocation6 + $0x228] sm:$0xff] }
 0x1e0   :  { %v2606_v18 = vpop.f32.mrf.mxu1  ;;  %v581_v39 = vld [vmem:[#allocation2 + $0xc1] sm:$0xff]  ;;  %3106 = vmatpush.bf16.msra.mxu0 %v7931_v10 }
 0x1e1   :  { %2466 = vmatmul.bf16.gmra.mxu0 %v946_v5 }
 0x1e2   :  { %v1911_v29 = vpop.f32.mrf.mxu2 }
 0x1e3   :  { %v8781_v4 = vadd.f32 %v2080_v35, %v1911_v29  ;;  %2645 = vmatmul.bf16.gmra.mxu1 %v8785_v7  ;;  %v521_v35 = vld [vmem:[#allocation2 + $0xf0] sm:$0xff]  ;;  %v955_v29 = vpack.c.bf16 %v582_v8, %v581_v39  ;;  %v8797_v39 = vpack.c.bf16 %v650_v38, %v649_v43 }
 0x1e5   :  { %11768 = vst [vmem:[#allocation100_spill] sm:$0xff] %v8781_v4  ;;  %v2270_v57 = vpop.f32.mrf.mxu3 }
 0x1e6   :  { %v1833_v41 = vpop.f32.mrf.mxu0 }
 0x1e7   :  { %v8783_v44 = vadd.f32 %v2002_v58, %v1833_v41  ;;  %v972_v58 = vpack.c.bf16 %v522_v59, %v521_v35  ;;  %v584_v35 = vld [vmem:[#allocation2 + $0xe1] sm:$0xff] }
 0x1e8   :  { %v2608_v46 = vpop.f32.mrf.mxu1 }
 0x1ea   :  { %v1913_v19 = vpop.f32.mrf.mxu2  ;;  %2312 = vmatmul.bf16.gmra.mxu3 %v972_v58 }
 0x1eb   :  { %v8787_v5 = vadd.f32 %v2082_v13, %v1913_v19 }
 0x1ed   :  { %11769 = vst [vmem:[#allocation101_spill] sm:$0xff] %v8787_v5  ;;  %v2273_v13 = vpop.f32.mrf.mxu3 }
 0x1ee   :  { %v1836_v41 = vpop.f32.mrf.mxu0 }
 0x1ef   :  { %v8790_v4 = vadd.f32 %v2005_v30, %v1836_v41  ;;  %2133 = vmatmul.bf16.gmra.mxu2 %v8762_v42  ;;  %v583_v30 = vld [vmem:[#allocation2 + $0xd9] sm:$0xff] }
 0x1f0   :  { %v2611_v5 = vpop.f32.mrf.mxu1  ;;  %v964_v58 = vpack.c.bf16 %v584_v35, %v583_v30  ;;  %v1933_v30 = vadd.f32 %v8442_v25, %v8486_v51 }
 0x1f1   :  { %2471 = vmatmul.bf16.gmra.mxu0 %v955_v29  ;;  %v523_v29 = vld [vmem:[#allocation2 + $0x108] sm:$0xff] }
 0x1f2   :  { %v1916_v53 = vpop.f32.mrf.mxu2 }
 0x1f3   :  { %v8793_v22 = vadd.f32 %v2085_v60, %v1916_v53  ;;  %2650 = vmatmul.bf16.gmra.mxu1 %v8797_v39  ;;  %v524_v60 = vld [vmem:[#allocation2 + $0x110] sm:$0xff] }
 0x1f4   :  { %v981_v41 = vpack.c.bf16 %v524_v60, %v523_v29  ;;  %v585_v60 = vld [vmem:[#allocation2 + $0xf1] sm:$0xff] }
 0x1f5   :  { %11770 = vst [vmem:[#allocation102_spill] sm:$0xff] %v8793_v22  ;;  %v2275_v42 = vpop.f32.mrf.mxu3 }
 0x1f6   :  { %v1838_v10 = vpop.f32.mrf.mxu0 }
 0x1f7   :  { %v8795_v19 = vadd.f32 %v2007_v36, %v1838_v10 }
 0x1f8   :  { %v2613_v36 = vpop.f32.mrf.mxu1 }
 0x1fa   :  { %v1918_v8 = vpop.f32.mrf.mxu2  ;;  %2317 = vmatmul.bf16.gmra.mxu3 %v981_v41 }
 0x1fb   :  { %v8799_v59 = vadd.f32 %v2087_v47, %v1918_v8 }
 0x1fd   :  { %11771 = vst [vmem:[#allocation103_spill] sm:$0xff] %v8799_v59  ;;  %v8804_v10 = vpop.f32.mrf.mxu3 }
 0x1fe   :  { %v2437_v53 = vpop.f32.mrf.mxu0 }
 0x1ff   :  { %2138 = vmatmul.bf16.gmra.mxu2 %v8774_v23  ;;  %v8812_v23 = vpack.c.bf16 %v652_v16, %v651_v40 }
 0x200   :  { %v8806_v22 = vpop.f32.mrf.mxu1 }
 0x201   :  { %2476 = vmatmul.bf16.gmra.mxu0 %v964_v58  ;;  %v586_v58 = vld [vmem:[#allocation2 + $0xf9] sm:$0xff] }
 0x202   :  { %v2099_v43 = vpop.f32.mrf.mxu2 }
 0x203   :  { %v2100_v38 = vadd.f32 %v2099_v43, %v8426_v0  ;;  %2655 = vmatmul.bf16.gmra.mxu1 %v8812_v23 }
 0x205   :  { %v2269_v47 = vadd.f32 %v2268_v37, %v2100_v38  ;;  %v8814_v41 = vpop.f32.mrf.mxu3  ;;  %v525_v37 = vld [vmem:[#allocation2 + $0x120] sm:$0xff]  ;;  %v973_v38 = vpack.c.bf16 %v586_v58, %v585_v60 }
 0x206   :  { %v2439_v8 = vpop.f32.mrf.mxu0  ;;  %v653_v58 = vld [vmem:[#allocation2 + $0x122] sm:$0xff] }
 0x207   :  { %v2438_v59 = vadd.f32 %v2437_v53, %v2269_v47  ;;  %v526_v53 = vld [vmem:[#allocation2 + $0x128] sm:$0xff] }
 0x208   :  { %v990_v47 = vpack.c.bf16 %v526_v53, %v525_v37  ;;  %v8818_v40 = vpop.f32.mrf.mxu1  ;;  %v588_v53 = vld [vmem:[#allocation2 + $0x111] sm:$0xff] }
 0x209   :  { %v8810_v35 = vadd.f32 %v2606_v18, %v2438_v59 }
 0x20a   :  { %v2101_v29 = vpop.f32.mrf.mxu2  ;;  %2322 = vmatmul.bf16.gmra.mxu3 %v990_v47 }
 0x20b   :  { %v2102_v0 = vadd.f32 %v2101_v29, %v1933_v30 }
 0x20d   :  { %v2271_v43 = vadd.f32 %v2270_v57, %v2102_v0  ;;  %v8823_v59 = vpop.f32.mrf.mxu3  ;;  %v654_v0 = vld [vmem:[#allocation2 + $0x12a] sm:$0xff] }
 0x20e   :  { %v2442_v48 = vpop.f32.mrf.mxu0 }
 0x20f   :  { %2143 = vmatmul.bf16.gmra.mxu2 %v8785_v7  ;;  %v2440_v25 = vadd.f32 %v2439_v8, %v2271_v43  ;;  %v8829_v8 = vpack.c.bf16 %v654_v0, %v653_v58 }
 0x210   :  { %v8825_v60 = vpop.f32.mrf.mxu1 }
 0x211   :  { %v8820_v51 = vadd.f32 %v2608_v46, %v2440_v25  ;;  %2481 = vmatmul.bf16.gmra.mxu0 %v973_v38  ;;  %v587_v46 = vld [vmem:[#allocation2 + $0x109] sm:$0xff] }
 0x212   :  { %v2104_v16 = vpop.f32.mrf.mxu2  ;;  %v982_v47 = vpack.c.bf16 %v588_v53, %v587_v46 }
 0x213   :  { %v2105_v18 = vadd.f32 %v2104_v16, %v8510_v63  ;;  %2660 = vmatmul.bf16.gmra.mxu1 %v8829_v8  ;;  %v527_v63 = vld [vmem:[#allocation2 + $0x138] sm:$0xff] }
 0x215   :  { %v2274_v30 = vadd.f32 %v2273_v13, %v2105_v18  ;;  %v8832_v38 = vpop.f32.mrf.mxu3  ;;  %v528_v13 = vld [vmem:[#allocation2 + $0x140] sm:$0xff] }
 0x216   :  { %v2444_v29 = vpop.f32.mrf.mxu0  ;;  %v999_v25 = vpack.c.bf16 %v528_v13, %v527_v63  ;;  %v7914_v18 = vld [vmem:[#allocation6 + $0x1a0] sm:$0xff] }
 0x217   :  { %v2443_v57 = vadd.f32 %v2442_v48, %v2274_v30  ;;  %2769 = vmatpush.bf16.msra.mxu2 %v7914_v18 }
 0x218   :  { %v2623_v30 = vpop.f32.mrf.mxu1 }
 0x219   :  { %v8827_v7 = vadd.f32 %v2611_v5, %v2443_v57 }
 0x21a   :  { %v2106_v37 = vpop.f32.mrf.mxu2  ;;  %2327 = vmatmul.bf16.gmra.mxu3 %v999_v25  ;;  %v590_v25 = vld [vmem:[#allocation2 + $0x129] sm:$0xff] }
 0x21b   :  { %v2107_v43 = vadd.f32 %v2106_v37, %v8531_v62  ;;  %v7922_v62 = vld [vmem:[#allocation6 + $0x1e0] sm:$0xff] }
 0x21c   :  { %2938 = vmatpush.bf16.msra.mxu3 %v7922_v62 }
 0x21d   :  { %v2276_v48 = vadd.f32 %v2275_v42, %v2107_v43  ;;  %v2288_v37 = vpop.f32.mrf.mxu3 }
 0x21e   :  { %v2447_v16 = vpop.f32.mrf.mxu0 }
 0x21f   :  { %2148 = vmatmul.bf16.gmra.mxu2 %v8797_v39  ;;  %v2445_v5 = vadd.f32 %v2444_v29, %v2276_v48  ;;  %v655_v39 = vld [vmem:[#allocation2 + $0x13a] sm:$0xff]  ;;  %v656_v29 = vld [vmem:[#allocation2 + $0x142] sm:$0xff] }
 0x220   :  { %v8840_v43 = vpop.f32.mrf.mxu1  ;;  %v8845_v13 = vpack.c.bf16 %v656_v29, %v655_v39 }
 0x221   :  { %v8836_v57 = vadd.f32 %v2613_v36, %v2445_v5  ;;  %2486 = vmatmul.bf16.gmra.mxu0 %v982_v47  ;;  %v7930_v36 = vld [vmem:[#allocation6 + $0x220] sm:$0xff] }
 0x222   :  { %v2109_v58 = vpop.f32.mrf.mxu2  ;;  %v589_v47 = vld [vmem:[#allocation2 + $0x121] sm:$0xff]  ;;  %3107 = vmatpush.bf16.msra.mxu0 %v7930_v36 }
 0x223   :  { %v2110_v0 = vadd.f32 %v2109_v58, %v8543_v6  ;;  %2665 = vmatmul.bf16.gmra.mxu1 %v8845_v13  ;;  %v991_v62 = vpack.c.bf16 %v590_v25, %v589_v47  ;;  %v657_v25 = vld [vmem:[#allocation2 + $0x152] sm:$0xff] }
 0x225   :  { %v2279_v42 = vadd.f32 %v8804_v10, %v2110_v0  ;;  %v2290_v5 = vpop.f32.mrf.mxu3  ;;  %v529_v10 = vld [vmem:[#allocation2 + $0x150] sm:$0xff] }
 0x226   :  { %v2449_v46 = vpop.f32.mrf.mxu0 }
 0x227   :  { %v2448_v53 = vadd.f32 %v2447_v16, %v2279_v42  ;;  %v530_v16 = vld [vmem:[#allocation2 + $0x158] sm:$0xff] }
 0x228   :  { %v1008_v58 = vpack.c.bf16 %v530_v16, %v529_v10  ;;  %v2628_v42 = vpop.f32.mrf.mxu1  ;;  %v592_v16 = vld [vmem:[#allocation2 + $0x141] sm:$0xff] }
 0x229   :  { %v8843_v63 = vadd.f32 %v8806_v22, %v2448_v53 }
 0x22a   :  { %v2111_v48 = vpop.f32.mrf.mxu2  ;;  %2332 = vmatmul.bf16.gmra.mxu3 %v1008_v58 }
 0x22b   :  { %v2112_v6 = vadd.f32 %v2111_v48, %v8565_v54 }
 0x22d   :  { %v2281_v18 = vadd.f32 %v8814_v41, %v2112_v6  ;;  %v2293_v29 = vpop.f32.mrf.mxu3  ;;  %v658_v6 = vld [vmem:[#allocation2 + $0x15a] sm:$0xff] }
 0x22e   :  { %v2452_v22 = vpop.f32.mrf.mxu0 }
 0x22f   :  { %2153 = vmatmul.bf16.gmra.mxu2 %v8812_v23  ;;  %v2450_v0 = vadd.f32 %v2449_v46, %v2281_v18  ;;  %v8859_v46 = vpack.c.bf16 %v658_v6, %v657_v25  ;;  %v660_v25 = vld [vmem:[#allocation2 + $0x172] sm:$0xff] }
 0x230   :  { %v2631_v47 = vpop.f32.mrf.mxu1 }
 0x231   :  { %v8852_v53 = vadd.f32 %v8818_v40, %v2450_v0  ;;  %2491 = vmatmul.bf16.gmra.mxu0 %v991_v62  ;;  %v591_v40 = vld [vmem:[#allocation2 + $0x139] sm:$0xff] }
 0x232   :  { %v2114_v54 = vpop.f32.mrf.mxu2 }
 0x233   :  { %v2115_v39 = vadd.f32 %v2114_v54, %v8579_v33  ;;  %2670 = vmatmul.bf16.gmra.mxu1 %v8859_v46 }
 0x235   :  { %v2284_v36 = vadd.f32 %v8823_v59, %v2115_v39  ;;  %v2295_v62 = vpop.f32.mrf.mxu3  ;;  %v1000_v59 = vpack.c.bf16 %v592_v16, %v591_v40  ;;  %v593_v40 = vld [vmem:[#allocation2 + $0x151] sm:$0xff]  ;;  %v594_v16 = vld [vmem:[#allocation2 + $0x159] sm:$0xff] }
 0x236   :  { %v2454_v48 = vpop.f32.mrf.mxu0 }
 0x237   :  { %v2453_v41 = vadd.f32 %v2452_v22, %v2284_v36  ;;  %v8873_v36 = vld [vmem:[#allocation3 + $0xf0] sm:$0xff] }
 0x238   :  { %11772 = vst [vmem:[#allocation104_spill] sm:$0xff] %v8873_v36 }
 0x239   :  { %v8857_v23 = vadd.f32 %v8825_v60, %v2453_v41  ;;  %v8866_v60 = vpop.f32.mrf.mxu1  ;;  %277 = vst [vmem:[#allocation2 + $0x181] sm:$0xff] %v8873_v36 }
 0x23a   :  { %v2116_v10 = vpop.f32.mrf.mxu2  ;;  %2337 = vmatmul.bf16.gmra.mxu3 %v8691_v20 }
 0x23b   :  { %v2117_v18 = vadd.f32 %v2116_v10, %v8601_v15 }
 0x23d   :  { %v2286_v33 = vadd.f32 %v8832_v38, %v2117_v18  ;;  %v8871_v39 = vpop.f32.mrf.mxu3  ;;  %v8875_v38 = vld [vmem:[#allocation3 + $0xf8] sm:$0xff] }
 0x23e   :  { %v2457_v58 = vpop.f32.mrf.mxu0  ;;  %11773 = vst [vmem:[#allocation105_spill] sm:$0xff] %v8875_v38 }
 0x23f   :  { %2158 = vmatmul.bf16.gmra.mxu2 %v8829_v8  ;;  %v2455_v22 = vadd.f32 %v2454_v48, %v2286_v33  ;;  %278 = vst [vmem:[#allocation2 + $0x189] sm:$0xff] %v8875_v38 }
 0x240   :  { %v533_v33 = vld [vmem:[#allocation2 + $0x180] sm:$0xff] }
 0x241   :  { %v8868_v0 = vadd.f32 %v2623_v30, %v2455_v22  ;;  %2496 = vmatmul.bf16.gmra.mxu0 %v1000_v59  ;;  %v8879_v48 = vpop.f32.mrf.mxu1  ;;  %v659_v30 = vld [vmem:[#allocation2 + $0x16a] sm:$0xff] }
 0x242   :  { %v2119_v54 = vpop.f32.mrf.mxu2 }
 0x243   :  { %v2120_v15 = vadd.f32 %v2119_v54, %v8615_v3  ;;  %v8884_v3 = vpack.c.bf16 %v660_v25, %v659_v30 }
 0x245   :  { %v2289_v41 = vadd.f32 %v2288_v37, %v2120_v15  ;;  %v8887_v18 = vpop.f32.mrf.mxu3  ;;  %2675 = vmatmul.bf16.gmra.mxu1 %v8884_v3 }
 0x246   :  { %v2459_v8 = vpop.f32.mrf.mxu0  ;;  %v534_v22 = vld [vmem:[#allocation2 + $0x188] sm:$0xff] }
 0x247   :  { %v2458_v20 = vadd.f32 %v2457_v58, %v2289_v41  ;;  %v1009_v58 = vpack.c.bf16 %v594_v16, %v593_v40  ;;  %v1026_v15 = vpack.c.bf16 %v534_v22, %v533_v33  ;;  %v662_v33 = vld [vmem:[#allocation2 + $0x18a] sm:$0xff] }
 0x248   :  { %v595_v22 = vld [vmem:[#allocation2 + $0x169] sm:$0xff] }
 0x249   :  { %v8882_v6 = vadd.f32 %v8840_v43, %v2458_v20  ;;  %v8891_v41 = vpop.f32.mrf.mxu1 }
 0x24a   :  { %v2121_v10 = vpop.f32.mrf.mxu2  ;;  %2342 = vmatmul.bf16.gmra.mxu3 %v1026_v15 }
 0x24b   :  { %v2122_v37 = vadd.f32 %v2121_v10, %v8637_v11 }
 0x24d   :  { %v2291_v59 = vadd.f32 %v2290_v5, %v2122_v37  ;;  %v8896_v25 = vpop.f32.mrf.mxu3  ;;  %v661_v37 = vld [vmem:[#allocation2 + $0x182] sm:$0xff] }
 0x24e   :  { %v2462_v54 = vpop.f32.mrf.mxu0 }
 0x24f   :  { %2163 = vmatmul.bf16.gmra.mxu2 %v8845_v13  ;;  %v2460_v43 = vadd.f32 %v2459_v8, %v2291_v59  ;;  %v1028_v8 = vpack.c.bf16 %v662_v33, %v661_v37 }
 0x251   :  { %v8893_v20 = vadd.f32 %v2628_v42, %v2460_v43  ;;  %2501 = vmatmul.bf16.gmra.mxu0 %v1009_v58  ;;  %v8898_v16 = vpop.f32.mrf.mxu1  ;;  %v596_v42 = vld [vmem:[#allocation2 + $0x171] sm:$0xff] }
 0x252   :  { %v2124_v11 = vpop.f32.mrf.mxu2 }
 0x253   :  { %v2125_v30 = vadd.f32 %v2124_v11, %v8651_v32  ;;  %v535_v32 = vld [vmem:[#allocation2 + $0x1c8] sm:$0xff]  ;;  %v536_v11 = vld [vmem:[#allocation2 + $0x1d0] sm:$0xff] }
 0x255   :  { %v2294_v10 = vadd.f32 %v2293_v29, %v2125_v30  ;;  %v8903_v15 = vpop.f32.mrf.mxu3  ;;  %2680 = vmatmul.bf16.gmra.mxu1 %v1028_v8  ;;  %v1018_v29 = vpack.c.bf16 %v596_v42, %v595_v22  ;;  %v1035_v30 = vpack.c.bf16 %v536_v11, %v535_v32  ;;  %v663_v42 = vld [vmem:[#allocation2 + $0x1ca] sm:$0xff] }
 0x256   :  { %v2464_v5 = vpop.f32.mrf.mxu0 }
 0x257   :  { %v2463_v40 = vadd.f32 %v2462_v54, %v2294_v10 }
 0x259   :  { %v8900_v13 = vadd.f32 %v2631_v47, %v2463_v40  ;;  %v7913_v47 = vld [vmem:[#allocation6 + $0x198] sm:$0xff]  ;;  %v8906_v40 = vpop.f32.mrf.mxu1 }
 0x25a   :  { %v2126_v59 = vpop.f32.mrf.mxu2  ;;  %2347 = vmatmul.bf16.gmra.mxu3 %v1035_v30  ;;  %2770 = vmatpush.bf16.msra.mxu2 %v7913_v47 }
 0x25b   :  { %v2127_v58 = vadd.f32 %v2126_v59, %v8663_v34  ;;  %v7921_v34 = vld [vmem:[#allocation6 + $0x1d8] sm:$0xff] }
 0x25c   :  { %2939 = vmatpush.bf16.msra.mxu3 %v7921_v34 }
 0x25d   :  { %v2296_v43 = vadd.f32 %v2295_v62, %v2127_v58  ;;  %v2308_v8 = vpop.f32.mrf.mxu3  ;;  %v664_v58 = vld [vmem:[#allocation2 + $0x1d2] sm:$0xff] }
 0x25e   :  { %v2467_v54 = vpop.f32.mrf.mxu0 }
 0x25f   :  { %2168 = vmatmul.bf16.gmra.mxu2 %v8859_v46  ;;  %v2465_v10 = vadd.f32 %v2464_v5, %v2296_v43  ;;  %v8918_v43 = vpack.c.bf16 %v664_v58, %v663_v42 }
 0x261   :  { %v8909_v37 = vadd.f32 %v8866_v60, %v2465_v10  ;;  %2506 = vmatmul.bf16.gmra.mxu0 %v1018_v29  ;;  %v8913_v5 = vpop.f32.mrf.mxu1  ;;  %v7929_v60 = vld [vmem:[#allocation6 + $0x218] sm:$0xff]  ;;  %v1027_v10 = vpack.c.bf16 %v8875_v38, %v8873_v36 }
 0x262   :  { %v2129_v33 = vpop.f32.mrf.mxu2  ;;  %3108 = vmatpush.bf16.msra.mxu0 %v7929_v60  ;;  %v471_v60 = vld [vmem:[#allocation2 + $0x1b2] sm:$0xff] }
 0x263   :  { %v2130_v62 = vadd.f32 %v2129_v33, %v8673_v1 }
 0x265   :  { %v2299_v59 = vadd.f32 %v8871_v39, %v2130_v62  ;;  %v8921_v1 = vpop.f32.mrf.mxu3  ;;  %2685 = vmatmul.bf16.gmra.mxu1 %v8918_v43  ;;  %v537_v39 = vld [vmem:[#allocation2 + $0x1e0] sm:$0xff] }
 0x266   :  { %v2469_v22 = vpop.f32.mrf.mxu0 }
 0x267   :  { %v2468_v46 = vadd.f32 %v2467_v54, %v2299_v59  ;;  %v538_v54 = vld [vmem:[#allocation2 + $0x1e8] sm:$0xff] }
 0x269   :  { %v8916_v32 = vadd.f32 %v8879_v48, %v2468_v46  ;;  %v1044_v48 = vpack.c.bf16 %v538_v54, %v537_v39  ;;  %v2648_v33 = vpop.f32.mrf.mxu1  ;;  %v665_v39 = vld [vmem:[#allocation2 + $0x1e2] sm:$0xff] }
 0x26a   :  { %v2131_v29 = vpop.f32.mrf.mxu2 }
 0x26b   :  { %v2132_v11 = vadd.f32 %v2131_v29, %v8683_v2  ;;  %2352 = vmatmul.bf16.gmra.mxu3 %v1044_v48  ;;  %v472_v29 = vld [vmem:[#allocation2 + $0x1ba] sm:$0xff] }
 0x26c   :  { %v1034_v48 = vpack.c.bf16 %v472_v29, %v471_v60 }
 0x26d   :  { %v2301_v30 = vadd.f32 %v8887_v18, %v2132_v11  ;;  %v2313_v46 = vpop.f32.mrf.mxu3 }
 0x26e   :  { %v2472_v47 = vpop.f32.mrf.mxu0 }
 0x26f   :  { %2173 = vmatmul.bf16.gmra.mxu2 %v8884_v3  ;;  %v2470_v34 = vadd.f32 %v2469_v22, %v2301_v30  ;;  %v666_v3 = vld [vmem:[#allocation2 + $0x1ea] sm:$0xff] }
 0x270   :  { %v8936_v54 = vpack.c.bf16 %v666_v3, %v665_v39  ;;  %v599_v30 = vld [vmem:[#allocation2 + $0x1c9] sm:$0xff] }
 0x271   :  { %v8929_v2 = vadd.f32 %v8891_v41, %v2470_v34  ;;  %2511 = vmatmul.bf16.gmra.mxu0 %v1027_v10  ;;  %v2651_v11 = vpop.f32.mrf.mxu1  ;;  %v600_v10 = vld [vmem:[#allocation2 + $0x1d1] sm:$0xff] }
 0x272   :  { %v2134_v62 = vpop.f32.mrf.mxu2 }
 0x273   :  { %v2135_v59 = vadd.f32 %v2134_v62, %v8694_v17 }
 0x275   :  { %v2304_v18 = vadd.f32 %v8896_v25, %v2135_v59  ;;  %v2315_v34 = vpop.f32.mrf.mxu3  ;;  %2690 = vmatmul.bf16.gmra.mxu1 %v8936_v54  ;;  %v539_v25 = vld [vmem:[#allocation2 + $0x1f8] sm:$0xff]  ;;  %v1036_v59 = vpack.c.bf16 %v600_v10, %v599_v30  ;;  %v668_v10 = vld [vmem:[#allocation2 + $0x202] sm:$0xff] }
 0x276   :  { %v2474_v42 = vpop.f32.mrf.mxu0  ;;  %v667_v30 = vld [vmem:[#allocation2 + $0x1fa] sm:$0xff] }
 0x277   :  { %v2473_v58 = vadd.f32 %v2472_v47, %v2304_v18  ;;  %v540_v47 = vld [vmem:[#allocation2 + $0x200] sm:$0xff] }
 0x278   :  { %v1053_v18 = vpack.c.bf16 %v540_v47, %v539_v25  ;;  %v602_v25 = vld [vmem:[#allocation2 + $0x1e9] sm:$0xff] }
 0x279   :  { %v8934_v22 = vadd.f32 %v8898_v16, %v2473_v58  ;;  %v2653_v58 = vpop.f32.mrf.mxu1 }
 0x27a   :  { %v2136_v41 = vpop.f32.mrf.mxu2 }
 0x27b   :  { %v2137_v17 = vadd.f32 %v2136_v41, %v8701_v28  ;;  %2357 = vmatmul.bf16.gmra.mxu3 %v1053_v18 }
 0x27d   :  { %v2306_v62 = vadd.f32 %v8903_v15, %v2137_v17  ;;  %v8945_v29 = vpop.f32.mrf.mxu3  ;;  %v8952_v17 = vpack.c.bf16 %v668_v10, %v667_v30 }
 0x27e   :  { %v2477_v38 = vpop.f32.mrf.mxu0 }
 0x27f   :  { %2178 = vmatmul.bf16.gmra.mxu2 %v1034_v48  ;;  %v2475_v16 = vadd.f32 %v2474_v42, %v2306_v62  ;;  %v601_v48 = vld [vmem:[#allocation2 + $0x1e1] sm:$0xff] }
 0x281   :  { %v8942_v39 = vadd.f32 %v8906_v40, %v2475_v16  ;;  %2516 = vmatmul.bf16.gmra.mxu0 %v1036_v59  ;;  %v8947_v15 = vpop.f32.mrf.mxu1  ;;  %v1045_v59 = vpack.c.bf16 %v602_v25, %v601_v48  ;;  %v669_v48 = vld [vmem:[#allocation2 + $0x212] sm:$0xff]  ;;  %v670_v25 = vld [vmem:[#allocation2 + $0x21a] sm:$0xff] }
 0x282   :  { %v2139_v28 = vpop.f32.mrf.mxu2 }
 0x283   :  { %v2140_v60 = vadd.f32 %v2139_v28, %v8710_v45 }
 0x285   :  { %v2309_v3 = vadd.f32 %v2308_v8, %v2140_v60  ;;  %v8955_v45 = vpop.f32.mrf.mxu3  ;;  %2695 = vmatmul.bf16.gmra.mxu1 %v8952_v17  ;;  %v541_v8 = vld [vmem:[#allocation2 + $0x210] sm:$0xff] }
 0x286   :  { %v2479_v41 = vpop.f32.mrf.mxu0 }
 0x287   :  { %v2478_v36 = vadd.f32 %v2477_v38, %v2309_v3  ;;  %v542_v38 = vld [vmem:[#allocation2 + $0x218] sm:$0xff] }
 0x288   :  { %v1062_v18 = vpack.c.bf16 %v542_v38, %v541_v8  ;;  %v604_v8 = vld [vmem:[#allocation2 + $0x201] sm:$0xff] }
 0x289   :  { %v8950_v42 = vadd.f32 %v8913_v5, %v2478_v36  ;;  %v8960_v5 = vpop.f32.mrf.mxu1 }
 0x28a   :  { %v2141_v40 = vpop.f32.mrf.mxu2 }
 0x28b   :  { %v2142_v47 = vadd.f32 %v2141_v40, %v8715_v50  ;;  %2362 = vmatmul.bf16.gmra.mxu3 %v1062_v18 }
 0x28d   :  { %v2311_v62 = vadd.f32 %v8921_v1, %v2142_v47  ;;  %v8965_v3 = vpop.f32.mrf.mxu3 }
 0x28e   :  { %v2482_v16 = vpop.f32.mrf.mxu0 }
 0x28f   :  { %2183 = vmatmul.bf16.gmra.mxu2 %v8918_v43  ;;  %v2480_v36 = vadd.f32 %v2479_v41, %v2311_v62  ;;  %v8971_v41 = vpack.c.bf16 %v670_v25, %v669_v48 }
 0x291   :  { %v8962_v28 = vadd.f32 %v2648_v33, %v2480_v36  ;;  %2521 = vmatmul.bf16.gmra.mxu0 %v1045_v59  ;;  %v8967_v40 = vpop.f32.mrf.mxu1  ;;  %v603_v33 = vld [vmem:[#allocation2 + $0x1f9] sm:$0xff] }
 0x292   :  { %v2144_v50 = vpop.f32.mrf.mxu2  ;;  %v1054_v18 = vpack.c.bf16 %v604_v8, %v603_v33  ;;  %v672_v8 = vld [vmem:[#allocation2 + $0x232] sm:$0xff] }
 0x293   :  { %v2145_v60 = vadd.f32 %v2144_v50, %v8722_v12  ;;  %v543_v12 = vld [vmem:[#allocation2 + $0x228] sm:$0xff]  ;;  %v7912_v50 = vld [vmem:[#allocation6 + $0x190] sm:$0xff] }
 0x294   :  { %2771 = vmatpush.bf16.msra.mxu2 %v7912_v50 }
 0x295   :  { %v2314_v30 = vadd.f32 %v2313_v46, %v2145_v60  ;;  %v8974_v62 = vpop.f32.mrf.mxu3  ;;  %2700 = vmatmul.bf16.gmra.mxu1 %v8971_v41  ;;  %v544_v46 = vld [vmem:[#allocation2 + $0x230] sm:$0xff] }
 0x296   :  { %v2484_v10 = vpop.f32.mrf.mxu0 }
 0x297   :  { %v2483_v1 = vadd.f32 %v2482_v16, %v2314_v30  ;;  %v1071_v16 = vpack.c.bf16 %v544_v46, %v543_v12 }
 0x299   :  { %v8969_v43 = vadd.f32 %v2651_v11, %v2483_v1  ;;  %v8978_v60 = vpop.f32.mrf.mxu1 }
 0x29a   :  { %v2146_v47 = vpop.f32.mrf.mxu2 }
 0x29b   :  { %v2147_v38 = vadd.f32 %v2146_v47, %v8727_v26  ;;  %2367 = vmatmul.bf16.gmra.mxu3 %v1071_v16  ;;  %v7920_v26 = vld [vmem:[#allocation6 + $0x1d0] sm:$0xff] }
 0x29c   :  { %2940 = vmatpush.bf16.msra.mxu3 %v7920_v26 }
 0x29d   :  { %v2316_v59 = vadd.f32 %v2315_v34, %v2147_v38  ;;  %v2328_v34 = vpop.f32.mrf.mxu3 }
 0x29e   :  { %v2487_v36 = vpop.f32.mrf.mxu0 }
 0x29f   :  { %2188 = vmatmul.bf16.gmra.mxu2 %v8936_v54  ;;  %v2485_v11 = vadd.f32 %v2484_v10, %v2316_v59  ;;  %v671_v10 = vld [vmem:[#allocation2 + $0x22a] sm:$0xff] }
 0x2a0   :  { %v8989_v12 = vpack.c.bf16 %v672_v8, %v671_v10  ;;  %v605_v59 = vld [vmem:[#allocation2 + $0x211] sm:$0xff] }
 0x2a1   :  { %v8980_v30 = vadd.f32 %v2653_v58, %v2485_v11  ;;  %2526 = vmatmul.bf16.gmra.mxu0 %v1054_v18  ;;  %v8984_v54 = vpop.f32.mrf.mxu1  ;;  %v7928_v58 = vld [vmem:[#allocation6 + $0x210] sm:$0xff]  ;;  %v606_v18 = vld [vmem:[#allocation2 + $0x219] sm:$0xff] }
 0x2a2   :  { %v2149_v1 = vpop.f32.mrf.mxu2  ;;  %3109 = vmatpush.bf16.msra.mxu0 %v7928_v58  ;;  %v1063_v50 = vpack.c.bf16 %v606_v18, %v605_v59  ;;  %v673_v59 = vld [vmem:[#allocation2 + $0x242] sm:$0xff]  ;;  %v674_v18 = vld [vmem:[#allocation2 + $0x24a] sm:$0xff] }
 0x2a3   :  { %v2150_v48 = vadd.f32 %v2149_v1, %v8734_v52 }
 0x2a5   :  { %v2319_v25 = vadd.f32 %v8945_v29, %v2150_v48  ;;  %v2330_v16 = vpop.f32.mrf.mxu3  ;;  %2705 = vmatmul.bf16.gmra.mxu1 %v8989_v12  ;;  %v545_v29 = vld [vmem:[#allocation2 + $0x240] sm:$0xff] }
 0x2a6   :  { %v2489_v47 = vpop.f32.mrf.mxu0 }
 0x2a7   :  { %v2488_v33 = vadd.f32 %v2487_v36, %v2319_v25  ;;  %v546_v36 = vld [vmem:[#allocation2 + $0x248] sm:$0xff] }
 0x2a8   :  { %v1080_v26 = vpack.c.bf16 %v546_v36, %v545_v29  ;;  %v608_v29 = vld [vmem:[#allocation2 + $0x231] sm:$0xff] }
 0x2a9   :  { %v8987_v38 = vadd.f32 %v8947_v15, %v2488_v33  ;;  %v2668_v48 = vpop.f32.mrf.mxu1 }
 0x2aa   :  { %v2151_v46 = vpop.f32.mrf.mxu2 }
 0x2ab   :  { %v2152_v52 = vadd.f32 %v2151_v46, %v8739_v21  ;;  %2372 = vmatmul.bf16.gmra.mxu3 %v1080_v26 }
 0x2ad   :  { %v2321_v11 = vadd.f32 %v8955_v45, %v2152_v52  ;;  %v2333_v10 = vpop.f32.mrf.mxu3 }
 0x2ae   :  { %v2492_v15 = vpop.f32.mrf.mxu0 }
 0x2af   :  { %2193 = vmatmul.bf16.gmra.mxu2 %v8952_v17  ;;  %v2490_v1 = vadd.f32 %v2489_v47, %v2321_v11  ;;  %v9003_v47 = vpack.c.bf16 %v674_v18, %v673_v59 }
 0x2b1   :  { %v8996_v25 = vadd.f32 %v8960_v5, %v2490_v1  ;;  %2531 = vmatmul.bf16.gmra.mxu0 %v1063_v50  ;;  %v2671_v46 = vpop.f32.mrf.mxu1  ;;  %v607_v5 = vld [vmem:[#allocation2 + $0x229] sm:$0xff] }
 0x2b2   :  { %v2154_v21 = vpop.f32.mrf.mxu2  ;;  %v1072_v26 = vpack.c.bf16 %v608_v29, %v607_v5  ;;  %v675_v5 = vld [vmem:[#allocation2 + $0x25a] sm:$0xff]  ;;  %v676_v29 = vld [vmem:[#allocation2 + $0x262] sm:$0xff] }
 0x2b3   :  { %v2155_v33 = vadd.f32 %v2154_v21, %v8746_v9  ;;  %v547_v9 = vld [vmem:[#allocation2 + $0x258] sm:$0xff] }
 0x2b5   :  { %v2324_v8 = vadd.f32 %v8965_v3, %v2155_v33  ;;  %v2335_v11 = vpop.f32.mrf.mxu3  ;;  %2710 = vmatmul.bf16.gmra.mxu1 %v9003_v47  ;;  %v548_v3 = vld [vmem:[#allocation2 + $0x260] sm:$0xff] }
 0x2b6   :  { %v2494_v58 = vpop.f32.mrf.mxu0 }
 0x2b7   :  { %v2493_v45 = vadd.f32 %v2492_v15, %v2324_v8  ;;  %v1089_v15 = vpack.c.bf16 %v548_v3, %v547_v9  ;;  %v610_v9 = vld [vmem:[#allocation2 + $0x249] sm:$0xff] }
 0x2b9   :  { %v9001_v17 = vadd.f32 %v8967_v40, %v2493_v45  ;;  %v2673_v21 = vpop.f32.mrf.mxu1 }
 0x2ba   :  { %v2156_v52 = vpop.f32.mrf.mxu2 }
 0x2bb   :  { %v2157_v36 = vadd.f32 %v2156_v52, %v8751_v55  ;;  %2377 = vmatmul.bf16.gmra.mxu3 %v1089_v15 }
 0x2bd   :  { %v2326_v50 = vadd.f32 %v8974_v62, %v2157_v36  ;;  %v9013_v45 = vpop.f32.mrf.mxu3  ;;  %v609_v36 = vld [vmem:[#allocation2 + $0x241] sm:$0xff] }
 0x2be   :  { %v2497_v1 = vpop.f32.mrf.mxu0  ;;  %v1081_v15 = vpack.c.bf16 %v610_v9, %v609_v36  ;;  %v677_v36 = vld [vmem:[#allocation2 + $0x272] sm:$0xff]  ;;  %v678_v9 = vld [vmem:[#allocation2 + $0x27a] sm:$0xff] }
 0x2bf   :  { %2198 = vmatmul.bf16.gmra.mxu2 %v8971_v41  ;;  %v2495_v40 = vadd.f32 %v2494_v58, %v2326_v50  ;;  %v9020_v58 = vpack.c.bf16 %v676_v29, %v675_v5  ;;  %v550_v50 = vld [vmem:[#allocation2 + $0x278] sm:$0xff] }
 0x2c1   :  { %v9010_v33 = vadd.f32 %v8978_v60, %v2495_v40  ;;  %2536 = vmatmul.bf16.gmra.mxu0 %v1072_v26 }
 0x2c2   :  { %v2159_v55 = vpop.f32.mrf.mxu2  ;;  %v9015_v52 = vpop.f32.mrf.mxu1 }
 0x2c3   :  { %v2160_v8 = vadd.f32 %v2159_v55, %v8755_v61 }
 0x2c5   :  { %v2329_v59 = vadd.f32 %v2328_v34, %v2160_v8  ;;  %v9023_v61 = vpop.f32.mrf.mxu3  ;;  %2715 = vmatmul.bf16.gmra.mxu1 %v9020_v58  ;;  %v549_v34 = vld [vmem:[#allocation2 + $0x270] sm:$0xff] }
 0x2c6   :  { %v2499_v18 = vpop.f32.mrf.mxu0 }
 0x2c7   :  { %v2498_v62 = vadd.f32 %v2497_v1, %v2329_v59  ;;  %v1098_v1 = vpack.c.bf16 %v550_v50, %v549_v34  ;;  %v612_v34 = vld [vmem:[#allocation2 + $0x261] sm:$0xff] }
 0x2c9   :  { %v9018_v41 = vadd.f32 %v8984_v54, %v2498_v62 }
 0x2ca   :  { %v2161_v60 = vpop.f32.mrf.mxu2  ;;  %v9027_v55 = vpop.f32.mrf.mxu1 }
 0x2cb   :  { %v2162_v3 = vadd.f32 %v2161_v60, %v8760_v56  ;;  %2382 = vmatmul.bf16.gmra.mxu3 %v1098_v1 }
 0x2cd   :  { %v2331_v26 = vadd.f32 %v2330_v16, %v2162_v3  ;;  %v9032_v62 = vpop.f32.mrf.mxu3 }
 0x2ce   :  { %v2502_v40 = vpop.f32.mrf.mxu0 }
 0x2cf   :  { %2203 = vmatmul.bf16.gmra.mxu2 %v8989_v12  ;;  %v2500_v54 = vadd.f32 %v2499_v18, %v2331_v26  ;;  %v9038_v18 = vpack.c.bf16 %v678_v9, %v677_v36 }
 0x2d1   :  { %v9029_v8 = vadd.f32 %v2668_v48, %v2500_v54  ;;  %2541 = vmatmul.bf16.gmra.mxu0 %v1081_v15  ;;  %v611_v48 = vld [vmem:[#allocation2 + $0x259] sm:$0xff] }
 0x2d2   :  { %v2164_v56 = vpop.f32.mrf.mxu2  ;;  %v9034_v60 = vpop.f32.mrf.mxu1  ;;  %v1090_v1 = vpack.c.bf16 %v612_v34, %v611_v48  ;;  %v680_v34 = vld [vmem:[#allocation2 + $0x292] sm:$0xff] }
 0x2d3   :  { %v2165_v59 = vadd.f32 %v2164_v56, %v8767_v27  ;;  %v551_v27 = vld [vmem:[#allocation2 + $0x288] sm:$0xff] }
 0x2d4   :  { %v7911_v56 = vld [vmem:[#allocation6 + $0x188] sm:$0xff] }
 0x2d5   :  { %v2334_v5 = vadd.f32 %v2333_v10, %v2165_v59  ;;  %v9041_v26 = vpop.f32.mrf.mxu3  ;;  %2720 = vmatmul.bf16.gmra.mxu1 %v9038_v18  ;;  %v552_v10 = vld [vmem:[#allocation2 + $0x290] sm:$0xff]  ;;  %2772 = vmatpush.bf16.msra.mxu2 %v7911_v56 }
 0x2d6   :  { %v2504_v29 = vpop.f32.mrf.mxu0 }
 0x2d7   :  { %v2503_v16 = vadd.f32 %v2502_v40, %v2334_v5  ;;  %v1107_v40 = vpack.c.bf16 %v552_v10, %v551_v27 }
 0x2d9   :  { %v9036_v12 = vadd.f32 %v2671_v46, %v2503_v16 }
 0x2da   :  { %v2166_v3 = vpop.f32.mrf.mxu2  ;;  %v9045_v59 = vpop.f32.mrf.mxu1 }
 0x2db   :  { %v2167_v50 = vadd.f32 %v2166_v3, %v8772_v49  ;;  %2387 = vmatmul.bf16.gmra.mxu3 %v1107_v40  ;;  %v7919_v49 = vld [vmem:[#allocation6 + $0x1c8] sm:$0xff] }
 0x2dc   :  { %2941 = vmatpush.bf16.msra.mxu3 %v7919_v49 }
 0x2dd   :  { %v2336_v15 = vadd.f32 %v2335_v11, %v2167_v50  ;;  %v2348_v11 = vpop.f32.mrf.mxu3 }
 0x2de   :  { %v2507_v54 = vpop.f32.mrf.mxu0 }
 0x2df   :  { %2208 = vmatmul.bf16.gmra.mxu2 %v9003_v47  ;;  %v2505_v46 = vadd.f32 %v2504_v29, %v2336_v15  ;;  %v679_v29 = vld [vmem:[#allocation2 + $0x28a] sm:$0xff] }
 0x2e0   :  { %v9056_v27 = vpack.c.bf16 %v680_v34, %v679_v29  ;;  %v613_v15 = vld [vmem:[#allocation2 + $0x271] sm:$0xff] }
 0x2e1   :  { %v9047_v5 = vadd.f32 %v2673_v21, %v2505_v46  ;;  %2546 = vmatmul.bf16.gmra.mxu0 %v1090_v1  ;;  %v7927_v21 = vld [vmem:[#allocation6 + $0x208] sm:$0xff]  ;;  %v614_v1 = vld [vmem:[#allocation2 + $0x279] sm:$0xff] }
 0x2e2   :  { %v2169_v16 = vpop.f32.mrf.mxu2  ;;  %v9051_v47 = vpop.f32.mrf.mxu1  ;;  %3110 = vmatpush.bf16.msra.mxu0 %v7927_v21  ;;  %v1099_v56 = vpack.c.bf16 %v614_v1, %v613_v15  ;;  %v681_v15 = vld [vmem:[#allocation2 + $0x2a2] sm:$0xff]  ;;  %v682_v1 = vld [vmem:[#allocation2 + $0x2aa] sm:$0xff] }
 0x2e3   :  { %v2170_v36 = vadd.f32 %v2169_v16, %v8779_v31 }
 0x2e5   :  { %v2339_v9 = vadd.f32 %v9013_v45, %v2170_v36  ;;  %v9059_v40 = vpop.f32.mrf.mxu3  ;;  %2725 = vmatmul.bf16.gmra.mxu1 %v9056_v27  ;;  %v553_v45 = vld [vmem:[#allocation2 + $0x2a0] sm:$0xff] }
 0x2e6   :  { %v2509_v3 = vpop.f32.mrf.mxu0 }
 0x2e7   :  { %v2508_v48 = vadd.f32 %v2507_v54, %v2339_v9  ;;  %v554_v54 = vld [vmem:[#allocation2 + $0x2a8] sm:$0xff] }
 0x2e9   :  { %v9054_v50 = vadd.f32 %v9015_v52, %v2508_v48  ;;  %v1116_v52 = vpack.c.bf16 %v554_v54, %v553_v45  ;;  %v616_v45 = vld [vmem:[#allocation2 + $0x291] sm:$0xff] }
 0x2ea   :  { %v2171_v10 = vpop.f32.mrf.mxu2  ;;  %v2688_v36 = vpop.f32.mrf.mxu1 }
 0x2eb   :  { %v2172_v31 = vadd.f32 %v2171_v10, %v8783_v44  ;;  %2392 = vmatmul.bf16.gmra.mxu3 %v1116_v52 }
 0x2ed   :  { %v2341_v46 = vadd.f32 %v9023_v61, %v2172_v31 }
 0x2ee   :  { %v2512_v49 = vpop.f32.mrf.mxu0  ;;  %v2353_v29 = vpop.f32.mrf.mxu3 }
 0x2ef   :  { %2213 = vmatmul.bf16.gmra.mxu2 %v9020_v58  ;;  %v2510_v16 = vadd.f32 %v2509_v3, %v2341_v46  ;;  %v9072_v3 = vpack.c.bf16 %v682_v1, %v681_v15 }
 0x2f1   :  { %v9065_v9 = vadd.f32 %v9027_v55, %v2510_v16  ;;  %2551 = vmatmul.bf16.gmra.mxu0 %v1099_v56  ;;  %v615_v55 = vld [vmem:[#allocation2 + $0x289] sm:$0xff] }
 0x2f2   :  { %v2174_v44 = vpop.f32.mrf.mxu2  ;;  %v2691_v10 = vpop.f32.mrf.mxu1  ;;  %v1108_v52 = vpack.c.bf16 %v616_v45, %v615_v55  ;;  %v683_v55 = vld [vmem:[#allocation2 + $0x2ba] sm:$0xff]  ;;  %v684_v45 = vld [vmem:[#allocation2 + $0x2c2] sm:$0xff] }
 0x2f3   :  { %v2175_v48 = vadd.f32 %v2174_v44, %v8790_v4  ;;  %v555_v4 = vld [vmem:[#allocation2 + $0x2b8] sm:$0xff] }
 0x2f5   :  { %v2344_v34 = vadd.f32 %v9032_v62, %v2175_v48  ;;  %2730 = vmatmul.bf16.gmra.mxu1 %v9072_v3  ;;  %v556_v62 = vld [vmem:[#allocation2 + $0x2c0] sm:$0xff] }
 0x2f6   :  { %v2514_v21 = vpop.f32.mrf.mxu0  ;;  %v9075_v46 = vpop.f32.mrf.mxu3 }
 0x2f7   :  { %v2513_v61 = vadd.f32 %v2512_v49, %v2344_v34  ;;  %v1125_v49 = vpack.c.bf16 %v556_v62, %v555_v4  ;;  %v617_v62 = vld [vmem:[#allocation2 + $0x2a1] sm:$0xff] }
 0x2f9   :  { %v9070_v58 = vadd.f32 %v9034_v60, %v2513_v61 }
 0x2fa   :  { %v2176_v31 = vpop.f32.mrf.mxu2  ;;  %v2693_v44 = vpop.f32.mrf.mxu1 }
 0x2fb   :  { %v2177_v54 = vadd.f32 %v2176_v31, %v8795_v19  ;;  %2397 = vmatmul.bf16.gmra.mxu3 %v1125_v49  ;;  %v558_v49 = vld [vmem:[#allocation2 + $0x2d8] sm:$0xff] }
 0x2fd   :  { %v2346_v56 = vadd.f32 %v9041_v26, %v2177_v54 }
 0x2fe   :  { %v2517_v16 = vpop.f32.mrf.mxu0  ;;  %v9084_v61 = vpop.f32.mrf.mxu3 }
 0x2ff   :  { %2218 = vmatmul.bf16.gmra.mxu2 %v9038_v18  ;;  %v2515_v60 = vadd.f32 %v2514_v21, %v2346_v56  ;;  %v11774_v18 = vld [vmem:[#allocation49_spill] sm:$0xff] }
 0x300   :  { %v2013_v21 = vadd.f32 %v11774_v18, %v8501_v14 }
 0x301   :  { %v9081_v48 = vadd.f32 %v9045_v59, %v2515_v60  ;;  %2556 = vmatmul.bf16.gmra.mxu0 %v1108_v52  ;;  %v9093_v59 = vpack.c.bf16 %v684_v45, %v683_v55  ;;  %v11776_v55 = vld [vmem:[#allocation58_spill] sm:$0xff] }
 0x302   :  { %v2179_v19 = vpop.f32.mrf.mxu2  ;;  %v9086_v31 = vpop.f32.mrf.mxu1 }
 0x303   :  { %v2180_v34 = vadd.f32 %v2179_v19, %v8440_v24  ;;  %v618_v24 = vld [vmem:[#allocation2 + $0x2a9] sm:$0xff] }
 0x304   :  { %v1117_v60 = vpack.c.bf16 %v618_v24, %v617_v62  ;;  %v685_v62 = vld [vmem:[#allocation2 + $0x2d2] sm:$0xff]  ;;  %v686_v24 = vld [vmem:[#allocation2 + $0x2da] sm:$0xff] }
 0x305   :  { %v2349_v15 = vadd.f32 %v2348_v11, %v2180_v34  ;;  %2735 = vmatmul.bf16.gmra.mxu1 %v9093_v59  ;;  %v557_v11 = vld [vmem:[#allocation2 + $0x2d0] sm:$0xff] }
 0x306   :  { %v2519_v1 = vpop.f32.mrf.mxu0  ;;  %v9095_v52 = vpop.f32.mrf.mxu3  ;;  %v1134_v19 = vpack.c.bf16 %v558_v49, %v557_v11  ;;  %v619_v11 = vld [vmem:[#allocation2 + $0x2b9] sm:$0xff]  ;;  %v620_v49 = vld [vmem:[#allocation2 + $0x2c1] sm:$0xff] }
 0x307   :  { %v2518_v26 = vadd.f32 %v2517_v16, %v2349_v15 }
 0x309   :  { %v9091_v54 = vadd.f32 %v9051_v47, %v2518_v26 }
 0x30a   :  { %v2181_v4 = vpop.f32.mrf.mxu2  ;;  %v9100_v34 = vpop.f32.mrf.mxu1 }
 0x30b   :  { %v2182_v56 = vadd.f32 %v2181_v4, %v2013_v21  ;;  %2402 = vmatmul.bf16.gmra.mxu3 %v1134_v19 }
 0x30d   :  { %v2351_v16 = vadd.f32 %v9059_v40, %v2182_v56 }
 0x30e   :  { %v2522_v14 = vpop.f32.mrf.mxu0  ;;  %v9105_v18 = vpop.f32.mrf.mxu3 }
 0x30f   :  { %2223 = vmatmul.bf16.gmra.mxu2 %v9056_v27  ;;  %v2520_v47 = vadd.f32 %v2519_v1, %v2351_v16  ;;  %v9109_v27 = vpack.c.bf16 %v686_v24, %v685_v62  ;;  %v11778_v16 = vld [vmem:[#allocation63_spill] sm:$0xff]  ;;  %v7918_v62 = vld [vmem:[#allocation6 + $0x1c0] sm:$0xff] }
 0x310   :  { %2942 = vmatpush.bf16.msra.mxu3 %v7918_v62 }
 0x311   :  { %v9102_v15 = vadd.f32 %v2688_v36, %v2520_v47  ;;  %2561 = vmatmul.bf16.gmra.mxu0 %v1117_v60  ;;  %v559_v47 = vld [vmem:[#allocation2 + $0x2e8] sm:$0xff] }
 0x312   :  { %v2184_v26 = vpop.f32.mrf.mxu2  ;;  %v2701_v36 = vpop.f32.mrf.mxu1 }
 0x313   :  { %11775 = vst [vmem:[#allocation49_spill] sm:$0xff] %v9102_v15  ;;  %v2185_v45 = vadd.f32 %v2184_v26, %v11776_v55  ;;  %v1126_v26 = vpack.c.bf16 %v620_v49, %v619_v11 }
 0x315   :  { %v2354_v21 = vadd.f32 %v2353_v29, %v2185_v45  ;;  %2740 = vmatmul.bf16.gmra.mxu1 %v9109_v27  ;;  %v560_v29 = vld [vmem:[#allocation2 + $0x2f0] sm:$0xff] }
 0x316   :  { %v2524_v4 = vpop.f32.mrf.mxu0  ;;  %v9112_v19 = vpop.f32.mrf.mxu3  ;;  %v1143_v55 = vpack.c.bf16 %v560_v29, %v559_v47 }
 0x317   :  { %v2523_v40 = vadd.f32 %v2522_v14, %v2354_v21  ;;  %v7910_v21 = vld [vmem:[#allocation6 + $0x180] sm:$0xff] }
 0x318   :  { %2773 = vmatpush.bf16.msra.mxu2 %v7910_v21 }
 0x319   :  { %v9107_v56 = vadd.f32 %v2691_v10, %v2523_v40 }
 0x31a   :  { %v2186_v1 = vpop.f32.mrf.mxu2 }
 0x31b   :  { %11777 = vst [vmem:[#allocation58_spill] sm:$0xff] %v9107_v56  ;;  %v2187_v60 = vadd.f32 %v2186_v1, %v11778_v16  ;;  %2407 = vmatmul.bf16.gmra.mxu3 %v1143_v55  ;;  %v11780_v1 = vld [vmem:[#allocation64_spill] sm:$0xff] }
 0x31c   :  { %v622_v55 = vld [vmem:[#allocation2 + $0x2d9] sm:$0xff] }
 0x31d   :  { %v2356_v14 = vadd.f32 %v9075_v46, %v2187_v60  ;;  %v2703_v46 = vpop.f32.mrf.mxu1 }
 0x31e   :  { %v2527_v10 = vpop.f32.mrf.mxu0  ;;  %v9120_v56 = vpop.f32.mrf.mxu3 }
 0x31f   :  { %2228 = vmatmul.bf16.gmra.mxu2 %v9072_v3  ;;  %v2525_v45 = vadd.f32 %v2524_v4, %v2356_v14  ;;  %v687_v3 = vld [vmem:[#allocation2 + $0x2ea] sm:$0xff]  ;;  %v688_v4 = vld [vmem:[#allocation2 + $0x2f2] sm:$0xff] }
 0x320   :  { %v9126_v29 = vpack.c.bf16 %v688_v4, %v687_v3 }
 0x321   :  { %v9117_v40 = vadd.f32 %v2693_v44, %v2525_v45  ;;  %2566 = vmatmul.bf16.gmra.mxu0 %v1126_v26  ;;  %v7926_v44 = vld [vmem:[#allocation6 + $0x200] sm:$0xff]  ;;  %v621_v26 = vld [vmem:[#allocation2 + $0x2d1] sm:$0xff] }
 0x322   :  { %v2189_v24 = vpop.f32.mrf.mxu2  ;;  %v11782_v45 = vld [vmem:[#allocation69_spill] sm:$0xff]  ;;  %3111 = vmatpush.bf16.msra.mxu0 %v7926_v44  ;;  %v11784_v44 = vld [vmem:[#allocation70_spill] sm:$0xff] }
 0x323   :  { %11779 = vst [vmem:[#allocation63_spill] sm:$0xff] %v9117_v40  ;;  %v2190_v16 = vadd.f32 %v2189_v24, %v11780_v1  ;;  %v1135_v1 = vpack.c.bf16 %v622_v55, %v621_v26  ;;  %v689_v55 = vld [vmem:[#allocation2 + $0x302] sm:$0xff] }
 0x325   :  { %v2359_v11 = vadd.f32 %v9084_v61, %v2190_v16  ;;  %2745 = vmatmul.bf16.gmra.mxu1 %v9126_v29  ;;  %v561_v61 = vld [vmem:[#allocation2 + $0x300] sm:$0xff] }
 0x326   :  { %v2529_v49 = vpop.f32.mrf.mxu0  ;;  %v9129_v62 = vpop.f32.mrf.mxu3 }
 0x327   :  { %v2528_v60 = vadd.f32 %v2527_v10, %v2359_v11  ;;  %v562_v10 = vld [vmem:[#allocation2 + $0x308] sm:$0xff]  ;;  %v2706_v11 = vpop.f32.mrf.mxu1 }
 0x329   :  { %v9124_v47 = vadd.f32 %v9086_v31, %v2528_v60  ;;  %v1152_v31 = vpack.c.bf16 %v562_v10, %v561_v61  ;;  %v624_v10 = vld [vmem:[#allocation2 + $0x2f1] sm:$0xff] }
 0x32a   :  { %v2191_v14 = vpop.f32.mrf.mxu2 }
 0x32b   :  { %11781 = vst [vmem:[#allocation64_spill] sm:$0xff] %v9124_v47  ;;  %v2192_v21 = vadd.f32 %v2191_v14, %v11782_v45  ;;  %2412 = vmatmul.bf16.gmra.mxu3 %v1152_v31 }
 0x32d   :  { %v2361_v24 = vadd.f32 %v9095_v52, %v2192_v21  ;;  %v690_v21 = vld [vmem:[#allocation2 + $0x30a] sm:$0xff] }
 0x32e   :  { %v2532_v16 = vpop.f32.mrf.mxu0  ;;  %v2373_v45 = vpop.f32.mrf.mxu3 }
 0x32f   :  { %2233 = vmatmul.bf16.gmra.mxu2 %v9093_v59  ;;  %v2530_v60 = vadd.f32 %v2529_v49, %v2361_v24  ;;  %v9139_v26 = vpop.f32.mrf.mxu1  ;;  %v9143_v59 = vpack.c.bf16 %v690_v21, %v689_v55  ;;  %v11787_v24 = vld [vmem:[#allocation75_spill] sm:$0xff]  ;;  %v11789_v21 = vld [vmem:[#allocation76_spill] sm:$0xff] }
 0x330   :  { %11785 = vst [vmem:[#allocation70_spill] sm:$0xff] %v9139_v26  ;;  %v9154_v26 = vld [vmem:[#allocation3 + $0x1f0] sm:$0xff] }
 0x331   :  { %v9135_v3 = vadd.f32 %v9100_v34, %v2530_v60  ;;  %2571 = vmatmul.bf16.gmra.mxu0 %v1135_v1  ;;  %v623_v34 = vld [vmem:[#allocation2 + $0x2e9] sm:$0xff]  ;;  %v564_v60 = vld [vmem:[#allocation2 + $0x320] sm:$0xff]  ;;  %11790 = vst [vmem:[#allocation76_spill] sm:$0xff] %v9154_v26 }
 0x332   :  { %v2194_v4 = vpop.f32.mrf.mxu2  ;;  %309 = vst [vmem:[#allocation2 + $0x331] sm:$0xff] %v9154_v26 }
 0x333   :  { %11783 = vst [vmem:[#allocation69_spill] sm:$0xff] %v9135_v3  ;;  %v2195_v14 = vadd.f32 %v2194_v4, %v11784_v44 }
 0x335   :  { %v2364_v47 = vadd.f32 %v9105_v18, %v2195_v14  ;;  %2750 = vmatmul.bf16.gmra.mxu1 %v9143_v59  ;;  %v563_v18 = vld [vmem:[#allocation2 + $0x318] sm:$0xff] }
 0x336   :  { %v2534_v40 = vpop.f32.mrf.mxu0  ;;  %v9146_v31 = vpop.f32.mrf.mxu3  ;;  %v1161_v4 = vpack.c.bf16 %v564_v60, %v563_v18  ;;  %v625_v60 = vld [vmem:[#allocation2 + $0x301] sm:$0xff] }
 0x337   :  { %v2533_v52 = vadd.f32 %v2532_v16, %v2364_v47  ;;  %v1144_v16 = vpack.c.bf16 %v624_v10, %v623_v34  ;;  %v2711_v55 = vpop.f32.mrf.mxu1 }
 0x339   :  { %v9141_v61 = vadd.f32 %v2701_v36, %v2533_v52 }
 0x33a   :  { %v2196_v49 = vpop.f32.mrf.mxu2 }
 0x33b   :  { %11786 = vst [vmem:[#allocation106_spill] sm:$0xff] %v9141_v61  ;;  %v2197_v1 = vadd.f32 %v2196_v49, %v11787_v24  ;;  %2417 = vmatmul.bf16.gmra.mxu3 %v1161_v4  ;;  %v9156_v61 = vld [vmem:[#allocation3 + $0x1f8] sm:$0xff] }
 0x33c   :  { %11791 = vst [vmem:[#allocation107_spill] sm:$0xff] %v9156_v61 }
 0x33d   :  { %v2366_v47 = vadd.f32 %v9112_v19, %v2197_v1  ;;  %310 = vst [vmem:[#allocation2 + $0x339] sm:$0xff] %v9156_v61 }
 0x33e   :  { %v2537_v44 = vpop.f32.mrf.mxu0  ;;  %v2378_v24 = vpop.f32.mrf.mxu3 }
 0x33f   :  { %2238 = vmatmul.bf16.gmra.mxu2 %v9109_v27  ;;  %v2535_v36 = vadd.f32 %v2534_v40, %v2366_v47  ;;  %v691_v40 = vld [vmem:[#allocation2 + $0x31a] sm:$0xff]  ;;  %v626_v47 = vld [vmem:[#allocation2 + $0x309] sm:$0xff] }
 0x341   :  { %v9151_v14 = vadd.f32 %v2703_v46, %v2535_v36  ;;  %2576 = vmatmul.bf16.gmra.mxu0 %v1144_v16  ;;  %v692_v46 = vld [vmem:[#allocation2 + $0x322] sm:$0xff] }
 0x342   :  { %v2199_v52 = vpop.f32.mrf.mxu2  ;;  %v9163_v1 = vpack.c.bf16 %v692_v46, %v691_v40  ;;  %v11793_v16 = vld [vmem:[#allocation81_spill] sm:$0xff]  ;;  %v11796_v46 = vld [vmem:[#allocation82_spill] sm:$0xff] }
 0x343   :  { %11788 = vst [vmem:[#allocation75_spill] sm:$0xff] %v9151_v14  ;;  %v2200_v49 = vadd.f32 %v2199_v52, %v11789_v21  ;;  %v565_v52 = vld [vmem:[#allocation2 + $0x330] sm:$0xff] }
 0x344   :  { %v693_v15 = vld [vmem:[#allocation2 + $0x332] sm:$0xff] }
 0x345   :  { %v2369_v19 = vadd.f32 %v9120_v56, %v2200_v49  ;;  %2755 = vmatmul.bf16.gmra.mxu1 %v9163_v1  ;;  %v9167_v56 = vpop.f32.mrf.mxu1  ;;  %v566_v49 = vld [vmem:[#allocation2 + $0x338] sm:$0xff] }
 0x346   :  { %v2539_v34 = vpop.f32.mrf.mxu0  ;;  %v2380_v36 = vpop.f32.mrf.mxu3  ;;  %11794 = vst [vmem:[#allocation81_spill] sm:$0xff] %v9167_v56 }
 0x347   :  { %v2538_v27 = vadd.f32 %v2537_v44, %v2369_v19  ;;  %v1153_v44 = vpack.c.bf16 %v626_v47, %v625_v60 }
 0x349   :  { %v9161_v10 = vadd.f32 %v2706_v11, %v2538_v27  ;;  %v1170_v11 = vpack.c.bf16 %v566_v49, %v565_v52  ;;  %v627_v52 = vld [vmem:[#allocation2 + $0x319] sm:$0xff] }
 0x34a   :  { %v2201_v18 = vpop.f32.mrf.mxu2 }
 0x34b   :  { %11792 = vst [vmem:[#allocation108_spill] sm:$0xff] %v9161_v10  ;;  %v2202_v4 = vadd.f32 %v2201_v18, %v11793_v16  ;;  %2422 = vmatmul.bf16.gmra.mxu3 %v1170_v11 }
 0x34d   :  { %v2371_v21 = vadd.f32 %v9129_v62, %v2202_v4  ;;  %v2716_v56 = vpop.f32.mrf.mxu1  ;;  %v694_v62 = vld [vmem:[#allocation2 + $0x33a] sm:$0xff] }
 0x34e   :  { %v2542_v19 = vpop.f32.mrf.mxu0  ;;  %v2383_v16 = vpop.f32.mrf.mxu3  ;;  %v1172_v47 = vpack.c.bf16 %v694_v62, %v693_v15 }
 0x34f   :  { %2243 = vmatmul.bf16.gmra.mxu2 %v9126_v29  ;;  %v9171_v27 = vadd.f32 %v2539_v34, %v2371_v21  ;;  %v628_v29 = vld [vmem:[#allocation2 + $0x321] sm:$0xff]  ;;  %v11797_v34 = vld [vmem:[#allocation83_spill] sm:$0xff] }
 0x351   :  { %11795 = vst [vmem:[#allocation109_spill] sm:$0xff] %v9171_v27  ;;  %2581 = vmatmul.bf16.gmra.mxu0 %v1153_v44  ;;  %v760_v44 = vld [vmem:[#allocation2 + $0x31] sm:$0xff] }
 0x352   :  { %v2204_v40 = vpop.f32.mrf.mxu2 }
 0x353   :  { %v2205_v18 = vadd.f32 %v2204_v40, %v11796_v46  ;;  %v1162_v40 = vpack.c.bf16 %v628_v29, %v627_v52 }
 0x355   :  { %v2374_v10 = vadd.f32 %v2373_v45, %v2205_v18  ;;  %2760 = vmatmul.bf16.gmra.mxu1 %v1172_v47  ;;  %v761_v45 = vld [vmem:[#allocation2 + $0x39] sm:$0xff] }
 0x356   :  { %v2544_v14 = vpop.f32.mrf.mxu0  ;;  %v2385_v49 = vpop.f32.mrf.mxu3  ;;  %v895_v18 = vpack.c.bf16 %v761_v45, %v760_v44  ;;  %v1171_v45 = vpack.c.bf16 %v9156_v61, %v9154_v26  ;;  %v764_v26 = vld [vmem:[#allocation2 + $0x61] sm:$0xff] }
 0x357   :  { %v2543_v3 = vadd.f32 %v2542_v19, %v2374_v10 }
 0x359   :  { %v9174_v60 = vadd.f32 %v2711_v55, %v2543_v3  ;;  %v9181_v3 = vpop.f32.mrf.mxu1  ;;  %v11800_v55 = vld [vmem:[#allocation84_spill] sm:$0xff] }
 0x35a   :  { %v2206_v4 = vpop.f32.mrf.mxu2  ;;  %11799 = vst [vmem:[#allocation83_spill] sm:$0xff] %v9181_v3 }
 0x35b   :  { %v2207_v21 = vadd.f32 %v2206_v4, %v11797_v34  ;;  %2943 = vmatmul.bf16.vlgmr.msra.gmra.mxu3 %v895_v18 }
 0x35d   :  { %v2376_v11 = vadd.f32 %v9146_v31, %v2207_v21  ;;  %v11801_v21 = vld [vmem:[#allocation85_spill] sm:$0xff] }
 0x35e   :  { %v2547_v46 = vpop.f32.mrf.mxu0  ;;  %v2388_v62 = vpop.f32.mrf.mxu3 }
 0x35f   :  { %2248 = vmatmul.bf16.gmra.mxu2 %v9143_v59  ;;  %v9179_v10 = vadd.f32 %v2544_v14, %v2376_v11  ;;  %v762_v14 = vld [vmem:[#allocation2 + $0x49] sm:$0xff] }
 0x361   :  { %11798 = vst [vmem:[#allocation82_spill] sm:$0xff] %v9179_v10  ;;  %2586 = vmatmul.bf16.gmra.mxu0 %v1162_v40  ;;  %v2721_v29 = vpop.f32.mrf.mxu1  ;;  %v763_v40 = vld [vmem:[#allocation2 + $0x51] sm:$0xff] }
 0x362   :  { %v2209_v15 = vpop.f32.mrf.mxu2  ;;  %v904_v3 = vpack.c.bf16 %v763_v40, %v762_v14  ;;  %v824_v40 = vld [vmem:[#allocation2 + $0x32] sm:$0xff] }
 0x363   :  { %v2210_v19 = vadd.f32 %v2209_v15, %v11800_v55 }
 0x365   :  { %v2379_v47 = vadd.f32 %v2378_v24, %v2210_v19 }
 0x366   :  { %v2549_v4 = vpop.f32.mrf.mxu0  ;;  %v2390_v59 = vpop.f32.mrf.mxu3 }
 0x367   :  { %v2548_v34 = vadd.f32 %v2547_v46, %v2379_v47  ;;  %v11803_v46 = vld [vmem:[#allocation86_spill] sm:$0xff] }
 0x369   :  { %v9184_v31 = vadd.f32 %v2716_v56, %v2548_v34  ;;  %v9193_v19 = vpop.f32.mrf.mxu1 }
 0x36a   :  { %v2211_v52 = vpop.f32.mrf.mxu2  ;;  %11804 = vst [vmem:[#allocation85_spill] sm:$0xff] %v9193_v19 }
 0x36b   :  { %v2212_v44 = vadd.f32 %v2211_v52, %v11801_v21  ;;  %2948 = vmatmul.bf16.gmra.mxu3 %v904_v3  ;;  %v696_v52 = vld [vmem:[#allocation2 + $0x30] sm:$0xff]  ;;  %v697_v21 = vld [vmem:[#allocation2 + $0x38] sm:$0xff] }
 0x36c   :  { %v894_v3 = vpack.c.bf16 %v697_v21, %v696_v52  ;;  %v698_v21 = vld [vmem:[#allocation2 + $0x48] sm:$0xff] }
 0x36d   :  { %v2381_v11 = vadd.f32 %v2380_v36, %v2212_v44 }
 0x36e   :  { %v2552_v18 = vpop.f32.mrf.mxu0  ;;  %v2393_v55 = vpop.f32.mrf.mxu3 }
 0x36f   :  { %2253 = vmatmul.bf16.gmra.mxu2 %v9163_v1  ;;  %v9190_v24 = vadd.f32 %v2549_v4, %v2381_v11  ;;  %v825_v1 = vld [vmem:[#allocation2 + $0x3a] sm:$0xff]  ;;  %v11805_v4 = vld [vmem:[#allocation87_spill] sm:$0xff] }
 0x371   :  { %11802 = vst [vmem:[#allocation84_spill] sm:$0xff] %v9190_v24  ;;  %2591 = vmatmul.bf16.gmra.mxu0 %v1171_v45  ;;  %v2726_v19 = vpop.f32.mrf.mxu1 }
 0x372   :  { %v2214_v56 = vpop.f32.mrf.mxu2 }
 0x373   :  { %v2215_v15 = vadd.f32 %v2214_v56, %v11803_v46  ;;  %v896_v56 = vpack.c.bf16 %v825_v1, %v824_v40  ;;  %v765_v46 = vld [vmem:[#allocation2 + $0x69] sm:$0xff] }
 0x375   :  { %v2384_v47 = vadd.f32 %v2383_v16, %v2215_v15  ;;  %v913_v16 = vpack.c.bf16 %v765_v46, %v764_v26  ;;  %v11807_v15 = vld [vmem:[#allocation88_spill] sm:$0xff]  ;;  %v826_v26 = vld [vmem:[#allocation2 + $0x4a] sm:$0xff] }
 0x376   :  { %v2554_v36 = vpop.f32.mrf.mxu0  ;;  %v2395_v45 = vpop.f32.mrf.mxu3  ;;  %v766_v46 = vld [vmem:[#allocation2 + $0x79] sm:$0xff] }
 0x377   :  { %v2553_v34 = vadd.f32 %v2552_v18, %v2384_v47 }
 0x379   :  { %v9195_v44 = vadd.f32 %v2721_v29, %v2553_v34 }
 0x37a   :  { %v2216_v14 = vpop.f32.mrf.mxu2 }
 0x37b   :  { %v2217_v11 = vadd.f32 %v2216_v14, %v11805_v4  ;;  %2953 = vmatmul.bf16.gmra.mxu3 %v913_v16  ;;  %v699_v4 = vld [vmem:[#allocation2 + $0x50] sm:$0xff] }
 0x37d   :  { %v2386_v61 = vadd.f32 %v2385_v49, %v2217_v11  ;;  %v9201_v49 = vpop.f32.mrf.mxu1  ;;  %v827_v11 = vld [vmem:[#allocation2 + $0x52] sm:$0xff] }
 0x37e   :  { %v2557_v24 = vpop.f32.mrf.mxu0  ;;  %v2398_v34 = vpop.f32.mrf.mxu3  ;;  %11808 = vst [vmem:[#allocation87_spill] sm:$0xff] %v9201_v49 }
 0x37f   :  { %2774 = vmatmul.bf16.vlgmr.msra.gmra.mxu2 %v894_v3  ;;  %v9198_v18 = vadd.f32 %v2554_v36, %v2386_v61  ;;  %v11809_v61 = vld [vmem:[#allocation89_spill] sm:$0xff]  ;;  %v903_v3 = vpack.c.bf16 %v699_v4, %v698_v21 }
 0x380   :  { %v700_v4 = vld [vmem:[#allocation2 + $0x60] sm:$0xff] }
 0x381   :  { %11806 = vst [vmem:[#allocation86_spill] sm:$0xff] %v9198_v18  ;;  %3112 = vmatmul.bf16.vlgmr.msra.gmra.mxu0 %v896_v56 }
 0x382   :  { %v2219_v29 = vpop.f32.mrf.mxu2 }
 0x383   :  { %v2220_v47 = vadd.f32 %v2219_v29, %v11807_v15  ;;  %v905_v29 = vpack.c.bf16 %v827_v11, %v826_v26  ;;  %v767_v15 = vld [vmem:[#allocation2 + $0x81] sm:$0xff] }
 0x384   :  { %v828_v11 = vld [vmem:[#allocation2 + $0x62] sm:$0xff] }
 0x385   :  { %v2389_v10 = vadd.f32 %v2388_v62, %v2220_v47  ;;  %v922_v47 = vpack.c.bf16 %v767_v15, %v766_v46  ;;  %v768_v15 = vld [vmem:[#allocation2 + $0x91] sm:$0xff] }
 0x386   :  { %v2559_v14 = vpop.f32.mrf.mxu0  ;;  %v2400_v56 = vpop.f32.mrf.mxu3 }
 0x387   :  { %v2558_v52 = vadd.f32 %v2557_v24, %v2389_v10 }
 0x389   :  { %v9203_v40 = vadd.f32 %v2726_v19, %v2558_v52  ;;  %v2731_v19 = vpop.f32.mrf.mxu1  ;;  %v11811_v52 = vld [vmem:[#allocation90_spill] sm:$0xff] }
 0x38a   :  { %v2221_v1 = vpop.f32.mrf.mxu2 }
 0x38b   :  { %v2222_v36 = vadd.f32 %v2221_v1, %v11809_v61  ;;  %2958 = vmatmul.bf16.gmra.mxu3 %v922_v47  ;;  %v701_v61 = vld [vmem:[#allocation2 + $0x68] sm:$0xff] }
 0x38c   :  { %v912_v46 = vpack.c.bf16 %v701_v61, %v700_v4 }
 0x38d   :  { %v2391_v16 = vadd.f32 %v2390_v59, %v2222_v36  ;;  %v829_v36 = vld [vmem:[#allocation2 + $0x6a] sm:$0xff] }
 0x38e   :  { %v2562_v62 = vpop.f32.mrf.mxu0  ;;  %v2403_v18 = vpop.f32.mrf.mxu3 }
 0x38f   :  { %2779 = vmatmul.bf16.gmra.mxu2 %v903_v3  ;;  %v9206_v10 = vadd.f32 %v2559_v14, %v2391_v16  ;;  %v11813_v3 = vld [vmem:[#allocation91_spill] sm:$0xff] }
 0x391   :  { %11810 = vst [vmem:[#allocation88_spill] sm:$0xff] %v9206_v10  ;;  %3117 = vmatmul.bf16.gmra.mxu0 %v905_v29  ;;  %v9212_v29 = vpop.f32.mrf.mxu1 }
 0x392   :  { %v2224_v24 = vpop.f32.mrf.mxu2  ;;  %11814 = vst [vmem:[#allocation90_spill] sm:$0xff] %v9212_v29  ;;  %v702_v29 = vld [vmem:[#allocation2 + $0x78] sm:$0xff] }
 0x393   :  { %v2225_v49 = vadd.f32 %v2224_v24, %v11811_v52  ;;  %v914_v24 = vpack.c.bf16 %v829_v36, %v828_v11  ;;  %v769_v52 = vld [vmem:[#allocation2 + $0x99] sm:$0xff] }
 0x394   :  { %v830_v36 = vld [vmem:[#allocation2 + $0x7a] sm:$0xff] }
 0x395   :  { %v2394_v27 = vadd.f32 %v2393_v55, %v2225_v49  ;;  %v931_v49 = vpack.c.bf16 %v769_v52, %v768_v15 }
 0x396   :  { %v2564_v1 = vpop.f32.mrf.mxu0  ;;  %v2405_v16 = vpop.f32.mrf.mxu3 }
 0x397   :  { %v2563_v21 = vadd.f32 %v2562_v62, %v2394_v27 }
 0x399   :  { %v9209_v59 = vadd.f32 %v2731_v19, %v2563_v21  ;;  %v11816_v19 = vld [vmem:[#allocation92_spill] sm:$0xff]  ;;  %v2736_v61 = vpop.f32.mrf.mxu1 }
 0x39a   :  { %v2226_v26 = vpop.f32.mrf.mxu2 }
 0x39b   :  { %11812 = vst [vmem:[#allocation89_spill] sm:$0xff] %v9209_v59  ;;  %v2227_v14 = vadd.f32 %v2226_v26, %v11813_v3  ;;  %2963 = vmatmul.bf16.gmra.mxu3 %v931_v49  ;;  %v703_v59 = vld [vmem:[#allocation2 + $0x80] sm:$0xff] }
 0x39c   :  { %v921_v15 = vpack.c.bf16 %v703_v59, %v702_v29  ;;  %v704_v59 = vld [vmem:[#allocation2 + $0x90] sm:$0xff]  ;;  %v705_v29 = vld [vmem:[#allocation2 + $0x98] sm:$0xff] }
 0x39d   :  { %v2396_v47 = vadd.f32 %v2395_v45, %v2227_v14  ;;  %v831_v14 = vld [vmem:[#allocation2 + $0x82] sm:$0xff] }
 0x39e   :  { %v2567_v55 = vpop.f32.mrf.mxu0  ;;  %v2408_v10 = vpop.f32.mrf.mxu3  ;;  %v923_v49 = vpack.c.bf16 %v831_v14, %v830_v36  ;;  %v832_v36 = vld [vmem:[#allocation2 + $0x92] sm:$0xff]  ;;  %v833_v14 = vld [vmem:[#allocation2 + $0x9a] sm:$0xff] }
 0x39f   :  { %2784 = vmatmul.bf16.gmra.mxu2 %v912_v46  ;;  %v9214_v27 = vadd.f32 %v2564_v1, %v2396_v47  ;;  %v11818_v46 = vld [vmem:[#allocation93_spill] sm:$0xff] }
 0x3a1   :  { %11815 = vst [vmem:[#allocation91_spill] sm:$0xff] %v9214_v27  ;;  %3122 = vmatmul.bf16.gmra.mxu0 %v914_v24  ;;  %v770_v24 = vld [vmem:[#allocation2 + $0xa9] sm:$0xff] }
 0x3a2   :  { %v2229_v62 = vpop.f32.mrf.mxu2 }
 0x3a3   :  { %v2230_v21 = vadd.f32 %v2229_v62, %v11816_v19  ;;  %v771_v62 = vld [vmem:[#allocation2 + $0xb1] sm:$0xff] }
 0x3a5   :  { %v2399_v26 = vadd.f32 %v2398_v34, %v2230_v21  ;;  %v940_v34 = vpack.c.bf16 %v771_v62, %v770_v24  ;;  %v772_v24 = vld [vmem:[#allocation2 + $0xc1] sm:$0xff]  ;;  %v773_v62 = vld [vmem:[#allocation2 + $0xc9] sm:$0xff] }
 0x3a6   :  { %v2569_v4 = vpop.f32.mrf.mxu0  ;;  %v2410_v47 = vpop.f32.mrf.mxu3 }
 0x3a7   :  { %v2568_v3 = vadd.f32 %v2567_v55, %v2399_v26  ;;  %v11820_v26 = vld [vmem:[#allocation94_spill] sm:$0xff] }
 0x3a9   :  { %v9217_v45 = vadd.f32 %v2736_v61, %v2568_v3 }
 0x3aa   :  { %v2231_v11 = vpop.f32.mrf.mxu2 }
 0x3ab   :  { %11817 = vst [vmem:[#allocation92_spill] sm:$0xff] %v9217_v45  ;;  %v2232_v1 = vadd.f32 %v2231_v11, %v11818_v46  ;;  %2968 = vmatmul.bf16.gmra.mxu3 %v940_v34  ;;  %v11822_v46 = vld [vmem:[#allocation95_spill] sm:$0xff] }
 0x3ad   :  { %v2401_v52 = vadd.f32 %v2400_v56, %v2232_v1 }
 0x3ae   :  { %v2572_v19 = vpop.f32.mrf.mxu0  ;;  %v2413_v3 = vpop.f32.mrf.mxu3 }
 0x3af   :  { %2789 = vmatmul.bf16.gmra.mxu2 %v921_v15  ;;  %v9220_v21 = vadd.f32 %v2569_v4, %v2401_v52  ;;  %v930_v15 = vpack.c.bf16 %v705_v29, %v704_v59  ;;  %v706_v59 = vld [vmem:[#allocation2 + $0xa8] sm:$0xff]  ;;  %v707_v29 = vld [vmem:[#allocation2 + $0xb0] sm:$0xff] }
 0x3b1   :  { %11819 = vst [vmem:[#allocation93_spill] sm:$0xff] %v9220_v21  ;;  %3127 = vmatmul.bf16.gmra.mxu0 %v923_v49  ;;  %v932_v49 = vpack.c.bf16 %v833_v14, %v832_v36  ;;  %v834_v36 = vld [vmem:[#allocation2 + $0xaa] sm:$0xff]  ;;  %v835_v14 = vld [vmem:[#allocation2 + $0xb2] sm:$0xff] }
 0x3b2   :  { %v2234_v55 = vpop.f32.mrf.mxu2 }
 0x3b3   :  { %v2235_v61 = vadd.f32 %v2234_v55, %v11820_v26  ;;  %v949_v55 = vpack.c.bf16 %v773_v62, %v772_v24  ;;  %v774_v24 = vld [vmem:[#allocation2 + $0xd9] sm:$0xff]  ;;  %v775_v62 = vld [vmem:[#allocation2 + $0xe1] sm:$0xff] }
 0x3b5   :  { %v2404_v27 = vadd.f32 %v2403_v18, %v2235_v61 }
 0x3b6   :  { %v2574_v45 = vpop.f32.mrf.mxu0  ;;  %v2415_v4 = vpop.f32.mrf.mxu3 }
 0x3b7   :  { %v9223_v11 = vadd.f32 %v2572_v19, %v2404_v27  ;;  %v11824_v19 = vld [vmem:[#allocation96_spill] sm:$0xff] }
 0x3b9   :  { %11821 = vst [vmem:[#allocation94_spill] sm:$0xff] %v9223_v11 }
 0x3ba   :  { %v2236_v56 = vpop.f32.mrf.mxu2 }
 0x3bb   :  { %v2237_v1 = vadd.f32 %v2236_v56, %v11822_v46  ;;  %2973 = vmatmul.bf16.gmra.mxu3 %v949_v55  ;;  %v11826_v46 = vld [vmem:[#allocation97_spill] sm:$0xff] }
 0x3bd   :  { %v2406_v52 = vadd.f32 %v2405_v16, %v2237_v1 }
 0x3be   :  { %v2577_v34 = vpop.f32.mrf.mxu0  ;;  %v2418_v61 = vpop.f32.mrf.mxu3 }
 0x3bf   :  { %2794 = vmatmul.bf16.gmra.mxu2 %v930_v15  ;;  %v9226_v18 = vadd.f32 %v2574_v45, %v2406_v52  ;;  %v939_v15 = vpack.c.bf16 %v707_v29, %v706_v59  ;;  %v708_v59 = vld [vmem:[#allocation2 + $0xc0] sm:$0xff]  ;;  %v709_v29 = vld [vmem:[#allocation2 + $0xc8] sm:$0xff] }
 0x3c1   :  { %11823 = vst [vmem:[#allocation95_spill] sm:$0xff] %v9226_v18  ;;  %3132 = vmatmul.bf16.gmra.mxu0 %v932_v49  ;;  %v941_v49 = vpack.c.bf16 %v835_v14, %v834_v36  ;;  %v836_v36 = vld [vmem:[#allocation2 + $0xc2] sm:$0xff]  ;;  %v837_v14 = vld [vmem:[#allocation2 + $0xca] sm:$0xff] }
 0x3c2   :  { %v2239_v27 = vpop.f32.mrf.mxu2 }
 0x3c3   :  { %v2240_v26 = vadd.f32 %v2239_v27, %v11824_v19  ;;  %v958_v27 = vpack.c.bf16 %v775_v62, %v774_v24  ;;  %v776_v24 = vld [vmem:[#allocation2 + $0xf1] sm:$0xff]  ;;  %v777_v62 = vld [vmem:[#allocation2 + $0xf9] sm:$0xff] }
 0x3c5   :  { %v2409_v11 = vadd.f32 %v2408_v10, %v2240_v26 }
 0x3c6   :  { %v2579_v21 = vpop.f32.mrf.mxu0  ;;  %v2420_v45 = vpop.f32.mrf.mxu3 }
 0x3c7   :  { %v9229_v56 = vadd.f32 %v2577_v34, %v2409_v11  ;;  %v11828_v34 = vld [vmem:[#allocation98_spill] sm:$0xff] }
 0x3c9   :  { %11825 = vst [vmem:[#allocation96_spill] sm:$0xff] %v9229_v56 }
 0x3ca   :  { %v2241_v16 = vpop.f32.mrf.mxu2 }
 0x3cb   :  { %v2242_v1 = vadd.f32 %v2241_v16, %v11826_v46  ;;  %2978 = vmatmul.bf16.gmra.mxu3 %v958_v27  ;;  %v11830_v46 = vld [vmem:[#allocation99_spill] sm:$0xff] }
 0x3cd   :  { %v2411_v52 = vadd.f32 %v2410_v47, %v2242_v1 }
 0x3ce   :  { %v2582_v55 = vpop.f32.mrf.mxu0  ;;  %v2423_v26 = vpop.f32.mrf.mxu3 }
 0x3cf   :  { %2799 = vmatmul.bf16.gmra.mxu2 %v939_v15  ;;  %v9232_v10 = vadd.f32 %v2579_v21, %v2411_v52  ;;  %v948_v15 = vpack.c.bf16 %v709_v29, %v708_v59  ;;  %v710_v59 = vld [vmem:[#allocation2 + $0xd8] sm:$0xff]  ;;  %v711_v29 = vld [vmem:[#allocation2 + $0xe0] sm:$0xff] }
 0x3d1   :  { %11827 = vst [vmem:[#allocation97_spill] sm:$0xff] %v9232_v10  ;;  %3137 = vmatmul.bf16.gmra.mxu0 %v941_v49  ;;  %v950_v49 = vpack.c.bf16 %v837_v14, %v836_v36  ;;  %v838_v36 = vld [vmem:[#allocation2 + $0xda] sm:$0xff]  ;;  %v839_v14 = vld [vmem:[#allocation2 + $0xe2] sm:$0xff] }
 0x3d2   :  { %v2244_v11 = vpop.f32.mrf.mxu2 }
 0x3d3   :  { %v2245_v19 = vadd.f32 %v2244_v11, %v11828_v34  ;;  %v967_v11 = vpack.c.bf16 %v777_v62, %v776_v24  ;;  %v778_v24 = vld [vmem:[#allocation2 + $0x109] sm:$0xff]  ;;  %v779_v62 = vld [vmem:[#allocation2 + $0x111] sm:$0xff] }
 0x3d5   :  { %v2414_v56 = vadd.f32 %v2413_v3, %v2245_v19 }
 0x3d6   :  { %v2584_v18 = vpop.f32.mrf.mxu0  ;;  %v2425_v21 = vpop.f32.mrf.mxu3 }
 0x3d7   :  { %v9235_v16 = vadd.f32 %v2582_v55, %v2414_v56  ;;  %v11832_v55 = vld [vmem:[#allocation100_spill] sm:$0xff] }
 0x3d9   :  { %11829 = vst [vmem:[#allocation98_spill] sm:$0xff] %v9235_v16 }
 0x3da   :  { %v2246_v47 = vpop.f32.mrf.mxu2 }
 0x3db   :  { %v2247_v1 = vadd.f32 %v2246_v47, %v11830_v46  ;;  %2983 = vmatmul.bf16.gmra.mxu3 %v967_v11  ;;  %v11834_v46 = vld [vmem:[#allocation101_spill] sm:$0xff] }
 0x3dd   :  { %v2416_v52 = vadd.f32 %v2415_v4, %v2247_v1 }
 0x3de   :  { %v2587_v27 = vpop.f32.mrf.mxu0  ;;  %v2944_v19 = vpop.f32.mrf.mxu3 }
 0x3df   :  { %2804 = vmatmul.bf16.gmra.mxu2 %v948_v15  ;;  %v9238_v3 = vadd.f32 %v2584_v18, %v2416_v52  ;;  %v957_v15 = vpack.c.bf16 %v711_v29, %v710_v59  ;;  %v712_v59 = vld [vmem:[#allocation2 + $0xf0] sm:$0xff]  ;;  %v713_v29 = vld [vmem:[#allocation2 + $0xf8] sm:$0xff] }
 0x3e1   :  { %11831 = vst [vmem:[#allocation99_spill] sm:$0xff] %v9238_v3  ;;  %3142 = vmatmul.bf16.gmra.mxu0 %v950_v49  ;;  %v959_v49 = vpack.c.bf16 %v839_v14, %v838_v36  ;;  %v840_v36 = vld [vmem:[#allocation2 + $0xf2] sm:$0xff]  ;;  %v841_v14 = vld [vmem:[#allocation2 + $0xfa] sm:$0xff] }
 0x3e2   :  { %v2249_v56 = vpop.f32.mrf.mxu2 }
 0x3e3   :  { %v2250_v34 = vadd.f32 %v2249_v56, %v11832_v55  ;;  %v976_v56 = vpack.c.bf16 %v779_v62, %v778_v24  ;;  %v780_v24 = vld [vmem:[#allocation2 + $0x121] sm:$0xff]  ;;  %v781_v62 = vld [vmem:[#allocation2 + $0x129] sm:$0xff] }
 0x3e5   :  { %v2419_v16 = vadd.f32 %v2418_v61, %v2250_v34 }
 0x3e6   :  { %v2589_v10 = vpop.f32.mrf.mxu0  ;;  %v2946_v18 = vpop.f32.mrf.mxu3 }
 0x3e7   :  { %v9241_v47 = vadd.f32 %v2587_v27, %v2419_v16  ;;  %v11836_v27 = vld [vmem:[#allocation102_spill] sm:$0xff] }
 0x3e9   :  { %11833 = vst [vmem:[#allocation100_spill] sm:$0xff] %v9241_v47 }
 0x3ea   :  { %v2251_v4 = vpop.f32.mrf.mxu2 }
 0x3eb   :  { %v2252_v1 = vadd.f32 %v2251_v4, %v11834_v46  ;;  %2988 = vmatmul.bf16.gmra.mxu3 %v976_v56  ;;  %v11838_v46 = vld [vmem:[#allocation103_spill] sm:$0xff] }
 0x3ed   :  { %v2421_v52 = vadd.f32 %v2420_v45, %v2252_v1 }
 0x3ee   :  { %v2592_v11 = vpop.f32.mrf.mxu0  ;;  %v2949_v34 = vpop.f32.mrf.mxu3 }
 0x3ef   :  { %2809 = vmatmul.bf16.gmra.mxu2 %v957_v15  ;;  %v9244_v61 = vadd.f32 %v2589_v10, %v2421_v52  ;;  %v966_v15 = vpack.c.bf16 %v713_v29, %v712_v59  ;;  %v714_v59 = vld [vmem:[#allocation2 + $0x108] sm:$0xff]  ;;  %v715_v29 = vld [vmem:[#allocation2 + $0x110] sm:$0xff] }
 0x3f1   :  { %11835 = vst [vmem:[#allocation101_spill] sm:$0xff] %v9244_v61  ;;  %3147 = vmatmul.bf16.gmra.mxu0 %v959_v49  ;;  %v968_v49 = vpack.c.bf16 %v841_v14, %v840_v36  ;;  %v842_v36 = vld [vmem:[#allocation2 + $0x10a] sm:$0xff]  ;;  %v843_v14 = vld [vmem:[#allocation2 + $0x112] sm:$0xff] }
 0x3f2   :  { %v2254_v16 = vpop.f32.mrf.mxu2 }
 0x3f3   :  { %v2255_v55 = vadd.f32 %v2254_v16, %v11836_v27  ;;  %v985_v16 = vpack.c.bf16 %v781_v62, %v780_v24 }
 0x3f5   :  { %v2424_v47 = vadd.f32 %v2423_v26, %v2255_v55 }
 0x3f6   :  { %v2594_v3 = vpop.f32.mrf.mxu0  ;;  %v2951_v10 = vpop.f32.mrf.mxu3 }
 0x3f7   :  { %v9247_v4 = vadd.f32 %v2592_v11, %v2424_v47 }
 0x3f9   :  { %11837 = vst [vmem:[#allocation102_spill] sm:$0xff] %v9247_v4 }
 0x3fa   :  { %v2256_v45 = vpop.f32.mrf.mxu2 }
 0x3fb   :  { %v2257_v1 = vadd.f32 %v2256_v45, %v11838_v46  ;;  %2993 = vmatmul.bf16.gmra.mxu3 %v985_v16 }
 0x3fd   :  { %v2426_v52 = vadd.f32 %v2425_v21, %v2257_v1  ;;  %v975_v1 = vpack.c.bf16 %v715_v29, %v714_v59  ;;  %v717_v29 = vld [vmem:[#allocation2 + $0x128] sm:$0xff] }
 0x3fe   :  { %v3113_v56 = vpop.f32.mrf.mxu0  ;;  %v2954_v27 = vpop.f32.mrf.mxu3 }
 0x3ff   :  { %2814 = vmatmul.bf16.gmra.mxu2 %v966_v15  ;;  %v9250_v26 = vadd.f32 %v2594_v3, %v2426_v52  ;;  %v782_v15 = vld [vmem:[#allocation2 + $0x139] sm:$0xff]  ;;  %v977_v52 = vpack.c.bf16 %v843_v14, %v842_v36  ;;  %v844_v36 = vld [vmem:[#allocation2 + $0x122] sm:$0xff]  ;;  %v845_v14 = vld [vmem:[#allocation2 + $0x12a] sm:$0xff] }
 0x401   :  { %11839 = vst [vmem:[#allocation103_spill] sm:$0xff] %v9250_v26  ;;  %3152 = vmatmul.bf16.gmra.mxu0 %v968_v49  ;;  %v783_v49 = vld [vmem:[#allocation2 + $0x141] sm:$0xff] }
 0x402   :  { %v2775_v47 = vpop.f32.mrf.mxu2 }
 0x403   :  { %v2776_v11 = vadd.f32 %v2775_v47, %v8810_v35  ;;  %v994_v35 = vpack.c.bf16 %v783_v49, %v782_v15  ;;  %v7941_v47 = vld [vmem:[#allocation8 + $0x38] sm:$0xff] }
 0x404   :  { %5197 = vmatpush.bf16.msra.mxu1 %v7941_v47  ;;  %v784_v15 = vld [vmem:[#allocation2 + $0x151] sm:$0xff] }
 0x405   :  { %v2945_v55 = vadd.f32 %v2944_v19, %v2776_v11 }
 0x406   :  { %v3115_v4 = vpop.f32.mrf.mxu0  ;;  %v2956_v3 = vpop.f32.mrf.mxu3 }
 0x407   :  { %v9253_v45 = vadd.f32 %v3113_v56, %v2945_v55 }
 0x40a   :  { %v2777_v21 = vpop.f32.mrf.mxu2 }
 0x40b   :  { %v2778_v46 = vadd.f32 %v2777_v21, %v8820_v51  ;;  %2998 = vmatmul.bf16.gmra.mxu3 %v994_v35 }
 0x40d   :  { %v2947_v24 = vadd.f32 %v2946_v18, %v2778_v46  ;;  %v716_v18 = vld [vmem:[#allocation2 + $0x120] sm:$0xff] }
 0x40e   :  { %v3118_v62 = vpop.f32.mrf.mxu0  ;;  %v2959_v11 = vpop.f32.mrf.mxu3  ;;  %v984_v46 = vpack.c.bf16 %v717_v29, %v716_v18  ;;  %v718_v18 = vld [vmem:[#allocation2 + $0x138] sm:$0xff]  ;;  %v719_v29 = vld [vmem:[#allocation2 + $0x140] sm:$0xff] }
 0x40f   :  { %v9256_v16 = vadd.f32 %v3115_v4, %v2947_v24  ;;  %2819 = vmatmul.bf16.gmra.mxu2 %v975_v1 }
 0x411   :  { %11840 = vst [vmem:[#allocation110_spill] sm:$0xff] %v9256_v16  ;;  %3157 = vmatmul.bf16.gmra.mxu0 %v977_v52  ;;  %v986_v52 = vpack.c.bf16 %v845_v14, %v844_v36  ;;  %v847_v36 = vld [vmem:[#allocation2 + $0x142] sm:$0xff] }
 0x412   :  { %v2780_v19 = vpop.f32.mrf.mxu2 }
 0x413   :  { %v2781_v56 = vadd.f32 %v2780_v19, %v8827_v7  ;;  %v785_v7 = vld [vmem:[#allocation2 + $0x159] sm:$0xff] }
 0x414   :  { %v1003_v35 = vpack.c.bf16 %v785_v7, %v784_v15 }
 0x415   :  { %v2950_v55 = vadd.f32 %v2949_v34, %v2781_v56 }
 0x416   :  { %v3120_v51 = vpop.f32.mrf.mxu0  ;;  %v2961_v1 = vpop.f32.mrf.mxu3 }
 0x417   :  { %v9259_v59 = vadd.f32 %v3118_v62, %v2950_v55 }
 0x41a   :  { %v2782_v21 = vpop.f32.mrf.mxu2 }
 0x41b   :  { %v2783_v4 = vadd.f32 %v2782_v21, %v8836_v57  ;;  %3003 = vmatmul.bf16.gmra.mxu3 %v1003_v35  ;;  %v846_v21 = vld [vmem:[#allocation2 + $0x13a] sm:$0xff] }
 0x41d   :  { %v2952_v24 = vadd.f32 %v2951_v10, %v2783_v4 }
 0x41e   :  { %v3123_v49 = vpop.f32.mrf.mxu0  ;;  %v2964_v56 = vpop.f32.mrf.mxu3 }
 0x41f   :  { %v9262_v34 = vadd.f32 %v3120_v51, %v2952_v24  ;;  %2824 = vmatmul.bf16.gmra.mxu2 %v984_v46  ;;  %v993_v51 = vpack.c.bf16 %v719_v29, %v718_v18  ;;  %v786_v46 = vld [vmem:[#allocation2 + $0x169] sm:$0xff]  ;;  %v995_v24 = vpack.c.bf16 %v847_v36, %v846_v21  ;;  %v721_v29 = vld [vmem:[#allocation2 + $0x158] sm:$0xff] }
 0x420   :  { %v720_v18 = vld [vmem:[#allocation2 + $0x150] sm:$0xff]  ;;  %v849_v21 = vld [vmem:[#allocation2 + $0x15a] sm:$0xff] }
 0x421   :  { %11841 = vst [vmem:[#allocation111_spill] sm:$0xff] %v9262_v34  ;;  %3162 = vmatmul.bf16.gmra.mxu0 %v986_v52  ;;  %v787_v52 = vld [vmem:[#allocation2 + $0x171] sm:$0xff] }
 0x422   :  { %v2785_v62 = vpop.f32.mrf.mxu2 }
 0x423   :  { %v2786_v19 = vadd.f32 %v2785_v62, %v8843_v63  ;;  %v1012_v63 = vpack.c.bf16 %v787_v52, %v786_v46 }
 0x425   :  { %v2955_v47 = vadd.f32 %v2954_v27, %v2786_v19 }
 0x426   :  { %v3125_v55 = vpop.f32.mrf.mxu0  ;;  %v2966_v4 = vpop.f32.mrf.mxu3 }
 0x427   :  { %v9265_v57 = vadd.f32 %v3123_v49, %v2955_v47 }
 0x429   :  { %11842 = vst [vmem:[#allocation112_spill] sm:$0xff] %v9265_v57 }
 0x42a   :  { %v2787_v10 = vpop.f32.mrf.mxu2 }
 0x42b   :  { %v2788_v14 = vadd.f32 %v2787_v10, %v8852_v53  ;;  %3008 = vmatmul.bf16.gmra.mxu3 %v1012_v63  ;;  %v848_v10 = vld [vmem:[#allocation2 + $0x152] sm:$0xff] }
 0x42d   :  { %v2957_v15 = vadd.f32 %v2956_v3, %v2788_v14 }
 0x42e   :  { %v3128_v7 = vpop.f32.mrf.mxu0  ;;  %v2969_v62 = vpop.f32.mrf.mxu3 }
 0x42f   :  { %v9268_v35 = vadd.f32 %v3125_v55, %v2957_v15  ;;  %2829 = vmatmul.bf16.gmra.mxu2 %v993_v51  ;;  %v1002_v55 = vpack.c.bf16 %v721_v29, %v720_v18  ;;  %v788_v51 = vld [vmem:[#allocation2 + $0x181] sm:$0xff]  ;;  %v1004_v15 = vpack.c.bf16 %v849_v21, %v848_v10  ;;  %v723_v29 = vld [vmem:[#allocation2 + $0x170] sm:$0xff] }
 0x430   :  { %v722_v18 = vld [vmem:[#allocation2 + $0x168] sm:$0xff]  ;;  %v851_v10 = vld [vmem:[#allocation2 + $0x172] sm:$0xff] }
 0x431   :  { %11843 = vst [vmem:[#allocation113_spill] sm:$0xff] %v9268_v35  ;;  %3167 = vmatmul.bf16.gmra.mxu0 %v995_v24  ;;  %v789_v24 = vld [vmem:[#allocation2 + $0x189] sm:$0xff] }
 0x432   :  { %v2790_v27 = vpop.f32.mrf.mxu2 }
 0x433   :  { %v2791_v49 = vadd.f32 %v2790_v27, %v8857_v23  ;;  %v1021_v23 = vpack.c.bf16 %v789_v24, %v788_v51  ;;  %v791_v51 = vld [vmem:[#allocation2 + $0x1a1] sm:$0xff] }
 0x435   :  { %v2960_v19 = vadd.f32 %v2959_v11, %v2791_v49 }
 0x436   :  { %v3130_v47 = vpop.f32.mrf.mxu0  ;;  %v2971_v14 = vpop.f32.mrf.mxu3 }
 0x437   :  { %v9271_v53 = vadd.f32 %v3128_v7, %v2960_v19 }
 0x439   :  { %11844 = vst [vmem:[#allocation114_spill] sm:$0xff] %v9271_v53 }
 0x43a   :  { %v2792_v3 = vpop.f32.mrf.mxu2 }
 0x43b   :  { %v2793_v36 = vadd.f32 %v2792_v3, %v8868_v0  ;;  %3013 = vmatmul.bf16.gmra.mxu3 %v1021_v23  ;;  %v850_v3 = vld [vmem:[#allocation2 + $0x16a] sm:$0xff] }
 0x43d   :  { %v2962_v46 = vadd.f32 %v2961_v1, %v2793_v36 }
 0x43e   :  { %v3133_v52 = vpop.f32.mrf.mxu0  ;;  %v2974_v27 = vpop.f32.mrf.mxu3 }
 0x43f   :  { %v9274_v63 = vadd.f32 %v3130_v47, %v2962_v46  ;;  %2834 = vmatmul.bf16.gmra.mxu2 %v1002_v55  ;;  %v1011_v47 = vpack.c.bf16 %v723_v29, %v722_v18  ;;  %v790_v55 = vld [vmem:[#allocation2 + $0x199] sm:$0xff] }
 0x440   :  { %v1030_v24 = vpack.c.bf16 %v791_v51, %v790_v55  ;;  %v724_v29 = vld [vmem:[#allocation2 + $0x180] sm:$0xff] }
 0x441   :  { %11845 = vst [vmem:[#allocation115_spill] sm:$0xff] %v9274_v63  ;;  %3172 = vmatmul.bf16.gmra.mxu0 %v1004_v15  ;;  %v1013_v15 = vpack.c.bf16 %v851_v10, %v850_v3  ;;  %v852_v3 = vld [vmem:[#allocation2 + $0x182] sm:$0xff]  ;;  %v853_v10 = vld [vmem:[#allocation2 + $0x18a] sm:$0xff] }
 0x442   :  { %v2795_v11 = vpop.f32.mrf.mxu2  ;;  %v792_v55 = vld [vmem:[#allocation2 + $0x1e1] sm:$0xff] }
 0x443   :  { %v2796_v7 = vadd.f32 %v2795_v11, %v8882_v6  ;;  %v7940_v11 = vld [vmem:[#allocation8 + $0x30] sm:$0xff] }
 0x444   :  { %5198 = vmatpush.bf16.msra.mxu1 %v7940_v11 }
 0x445   :  { %v2965_v49 = vadd.f32 %v2964_v56, %v2796_v7 }
 0x446   :  { %v3135_v19 = vpop.f32.mrf.mxu0  ;;  %v2976_v36 = vpop.f32.mrf.mxu3 }
 0x447   :  { %v9277_v0 = vadd.f32 %v3133_v52, %v2965_v49 }
 0x44a   :  { %v2797_v1 = vpop.f32.mrf.mxu2 }
 0x44b   :  { %v2798_v21 = vadd.f32 %v2797_v1, %v8893_v20  ;;  %3018 = vmatmul.bf16.gmra.mxu3 %v1030_v24 }
 0x44d   :  { %v2967_v46 = vadd.f32 %v2966_v4, %v2798_v21  ;;  %v725_v4 = vld [vmem:[#allocation2 + $0x188] sm:$0xff] }
 0x44e   :  { %v3138_v6 = vpop.f32.mrf.mxu0  ;;  %v2979_v7 = vpop.f32.mrf.mxu3  ;;  %v1020_v21 = vpack.c.bf16 %v725_v4, %v724_v29  ;;  %v854_v4 = vld [vmem:[#allocation2 + $0x19a] sm:$0xff] }
 0x44f   :  { %v9280_v23 = vadd.f32 %v3135_v19, %v2967_v46  ;;  %2839 = vmatmul.bf16.gmra.mxu2 %v1011_v47  ;;  %v1022_v46 = vpack.c.bf16 %v853_v10, %v852_v3  ;;  %v8035_v3 = vld [vmem:[#allocation2 + $0x1b0] sm:$0xff] }
 0x450   :  { %v9292_v10 = vpack.c.bf16 %v8035_v3, %v8035_v3 }
 0x451   :  { %11846 = vst [vmem:[#allocation116_spill] sm:$0xff] %v9280_v23  ;;  %3177 = vmatmul.bf16.gmra.mxu0 %v1013_v15 }
 0x452   :  { %v2800_v56 = vpop.f32.mrf.mxu2 }
 0x453   :  { %v2801_v52 = vadd.f32 %v2800_v56, %v8900_v13  ;;  %v793_v13 = vld [vmem:[#allocation2 + $0x1e9] sm:$0xff] }
 0x454   :  { %v1039_v24 = vpack.c.bf16 %v793_v13, %v792_v55 }
 0x455   :  { %v2970_v49 = vadd.f32 %v2969_v62, %v2801_v52 }
 0x456   :  { %v3140_v20 = vpop.f32.mrf.mxu0  ;;  %v2981_v47 = vpop.f32.mrf.mxu3 }
 0x457   :  { %v9283_v18 = vadd.f32 %v3138_v6, %v2970_v49 }
 0x459   :  { %11847 = vst [vmem:[#allocation117_spill] sm:$0xff] %v9283_v18 }
 0x45a   :  { %v2802_v1 = vpop.f32.mrf.mxu2 }
 0x45b   :  { %v2803_v19 = vadd.f32 %v2802_v1, %v8909_v37  ;;  %3023 = vmatmul.bf16.gmra.mxu3 %v1039_v24 }
 0x45d   :  { %v2972_v51 = vadd.f32 %v2971_v14, %v2803_v19  ;;  %v855_v14 = vld [vmem:[#allocation2 + $0x1a2] sm:$0xff]  ;;  %v794_v19 = vld [vmem:[#allocation2 + $0x1f9] sm:$0xff] }
 0x45e   :  { %v3143_v15 = vpop.f32.mrf.mxu0  ;;  %v2984_v52 = vpop.f32.mrf.mxu3  ;;  %v1031_v55 = vpack.c.bf16 %v855_v14, %v854_v4  ;;  %v856_v4 = vld [vmem:[#allocation2 + $0x1e2] sm:$0xff]  ;;  %v857_v14 = vld [vmem:[#allocation2 + $0x1ea] sm:$0xff] }
 0x45f   :  { %v9286_v62 = vadd.f32 %v3140_v20, %v2972_v51  ;;  %2844 = vmatmul.bf16.gmra.mxu2 %v1020_v21  ;;  %v795_v51 = vld [vmem:[#allocation2 + $0x201] sm:$0xff] }
 0x461   :  { %11848 = vst [vmem:[#allocation118_spill] sm:$0xff] %v9286_v62  ;;  %3182 = vmatmul.bf16.gmra.mxu0 %v1022_v46 }
 0x462   :  { %v2805_v6 = vpop.f32.mrf.mxu2 }
 0x463   :  { %v2806_v56 = vadd.f32 %v2805_v6, %v8916_v32  ;;  %v1048_v32 = vpack.c.bf16 %v795_v51, %v794_v19  ;;  %v796_v19 = vld [vmem:[#allocation2 + $0x211] sm:$0xff]  ;;  %v797_v51 = vld [vmem:[#allocation2 + $0x219] sm:$0xff] }
 0x465   :  { %v2975_v11 = vadd.f32 %v2974_v27, %v2806_v56 }
 0x466   :  { %v3145_v49 = vpop.f32.mrf.mxu0  ;;  %v2986_v20 = vpop.f32.mrf.mxu3 }
 0x467   :  { %v9289_v37 = vadd.f32 %v3143_v15, %v2975_v11  ;;  %v728_v11 = vld [vmem:[#allocation2 + $0x1e0] sm:$0xff] }
 0x469   :  { %11849 = vst [vmem:[#allocation119_spill] sm:$0xff] %v9289_v37 }
 0x46a   :  { %v2807_v29 = vpop.f32.mrf.mxu2 }
 0x46b   :  { %v2808_v1 = vadd.f32 %v2807_v29, %v8929_v2  ;;  %3028 = vmatmul.bf16.gmra.mxu3 %v1048_v32 }
 0x46d   :  { %v2977_v21 = vadd.f32 %v2976_v36, %v2808_v1  ;;  %v729_v36 = vld [vmem:[#allocation2 + $0x1e8] sm:$0xff] }
 0x46e   :  { %v3148_v46 = vpop.f32.mrf.mxu0  ;;  %v2989_v2 = vpop.f32.mrf.mxu3  ;;  %v1038_v1 = vpack.c.bf16 %v729_v36, %v728_v11  ;;  %v730_v11 = vld [vmem:[#allocation2 + $0x1f8] sm:$0xff]  ;;  %v731_v36 = vld [vmem:[#allocation2 + $0x200] sm:$0xff] }
 0x46f   :  { %v9294_v13 = vadd.f32 %v3145_v49, %v2977_v21  ;;  %2849 = vmatmul.bf16.gmra.mxu2 %v9292_v10 }
 0x471   :  { %11850 = vst [vmem:[#allocation120_spill] sm:$0xff] %v9294_v13  ;;  %3187 = vmatmul.bf16.gmra.mxu0 %v1031_v55  ;;  %v1040_v55 = vpack.c.bf16 %v857_v14, %v856_v4  ;;  %v859_v4 = vld [vmem:[#allocation2 + $0x202] sm:$0xff] }
 0x472   :  { %v2810_v27 = vpop.f32.mrf.mxu2 }
 0x473   :  { %v2811_v15 = vadd.f32 %v2810_v27, %v8934_v22  ;;  %v1057_v22 = vpack.c.bf16 %v797_v51, %v796_v19 }
 0x475   :  { %v2980_v24 = vadd.f32 %v2979_v7, %v2811_v15 }
 0x476   :  { %v3150_v6 = vpop.f32.mrf.mxu0  ;;  %v2991_v3 = vpop.f32.mrf.mxu3 }
 0x477   :  { %v9298_v56 = vadd.f32 %v3148_v46, %v2980_v24 }
 0x479   :  { %11851 = vst [vmem:[#allocation121_spill] sm:$0xff] %v9298_v56 }
 0x47a   :  { %v2812_v29 = vpop.f32.mrf.mxu2 }
 0x47b   :  { %v2813_v49 = vadd.f32 %v2812_v29, %v8942_v39  ;;  %3033 = vmatmul.bf16.gmra.mxu3 %v1057_v22  ;;  %v858_v29 = vld [vmem:[#allocation2 + $0x1fa] sm:$0xff] }
 0x47d   :  { %v2982_v21 = vadd.f32 %v2981_v47, %v2813_v49 }
 0x47e   :  { %v3153_v32 = vpop.f32.mrf.mxu0  ;;  %v2994_v15 = vpop.f32.mrf.mxu3 }
 0x47f   :  { %v9301_v27 = vadd.f32 %v3150_v6, %v2982_v21  ;;  %2854 = vmatmul.bf16.gmra.mxu2 %v1038_v1  ;;  %v1047_v6 = vpack.c.bf16 %v731_v36, %v730_v11  ;;  %v798_v1 = vld [vmem:[#allocation2 + $0x229] sm:$0xff]  ;;  %v1049_v21 = vpack.c.bf16 %v859_v4, %v858_v29  ;;  %v733_v36 = vld [vmem:[#allocation2 + $0x218] sm:$0xff] }
 0x480   :  { %v860_v29 = vld [vmem:[#allocation2 + $0x212] sm:$0xff]  ;;  %v861_v4 = vld [vmem:[#allocation2 + $0x21a] sm:$0xff] }
 0x481   :  { %11852 = vst [vmem:[#allocation122_spill] sm:$0xff] %v9301_v27  ;;  %3192 = vmatmul.bf16.gmra.mxu0 %v1040_v55  ;;  %v799_v55 = vld [vmem:[#allocation2 + $0x231] sm:$0xff] }
 0x482   :  { %v2815_v7 = vpop.f32.mrf.mxu2 }
 0x483   :  { %v2816_v46 = vadd.f32 %v2815_v7, %v8950_v42  ;;  %v1066_v42 = vpack.c.bf16 %v799_v55, %v798_v1  ;;  %v7939_v7 = vld [vmem:[#allocation8 + $0x28] sm:$0xff] }
 0x484   :  { %5199 = vmatpush.bf16.msra.mxu1 %v7939_v7  ;;  %v800_v1 = vld [vmem:[#allocation2 + $0x241] sm:$0xff] }
 0x485   :  { %v2985_v24 = vadd.f32 %v2984_v52, %v2816_v46 }
 0x486   :  { %v3155_v26 = vpop.f32.mrf.mxu0  ;;  %v2996_v49 = vpop.f32.mrf.mxu3 }
 0x487   :  { %v9304_v39 = vadd.f32 %v3153_v32, %v2985_v24 }
 0x489   :  { %11853 = vst [vmem:[#allocation123_spill] sm:$0xff] %v9304_v39 }
 0x48a   :  { %v2817_v47 = vpop.f32.mrf.mxu2 }
 0x48b   :  { %v2818_v14 = vadd.f32 %v2817_v47, %v8962_v28  ;;  %3038 = vmatmul.bf16.gmra.mxu3 %v1066_v42 }
 0x48d   :  { %v2987_v19 = vadd.f32 %v2986_v20, %v2818_v14  ;;  %v732_v20 = vld [vmem:[#allocation2 + $0x210] sm:$0xff] }
 0x48e   :  { %v3158_v51 = vpop.f32.mrf.mxu0  ;;  %v2999_v46 = vpop.f32.mrf.mxu3  ;;  %v1056_v14 = vpack.c.bf16 %v733_v36, %v732_v20  ;;  %v734_v20 = vld [vmem:[#allocation2 + $0x228] sm:$0xff]  ;;  %v735_v36 = vld [vmem:[#allocation2 + $0x230] sm:$0xff] }
 0x48f   :  { %v9307_v22 = vadd.f32 %v3155_v26, %v2987_v19  ;;  %2859 = vmatmul.bf16.gmra.mxu2 %v1047_v6 }
 0x491   :  { %11854 = vst [vmem:[#allocation124_spill] sm:$0xff] %v9307_v22  ;;  %3197 = vmatmul.bf16.gmra.mxu0 %v1049_v21  ;;  %v1058_v21 = vpack.c.bf16 %v861_v4, %v860_v29  ;;  %v863_v29 = vld [vmem:[#allocation2 + $0x232] sm:$0xff] }
 0x492   :  { %v2820_v52 = vpop.f32.mrf.mxu2 }
 0x493   :  { %v2821_v32 = vadd.f32 %v2820_v52, %v8969_v43  ;;  %v801_v43 = vld [vmem:[#allocation2 + $0x249] sm:$0xff] }
 0x494   :  { %v1075_v42 = vpack.c.bf16 %v801_v43, %v800_v1 }
 0x495   :  { %v2990_v24 = vadd.f32 %v2989_v2, %v2821_v32 }
 0x496   :  { %v3160_v28 = vpop.f32.mrf.mxu0  ;;  %v3001_v6 = vpop.f32.mrf.mxu3 }
 0x497   :  { %v9310_v11 = vadd.f32 %v3158_v51, %v2990_v24 }
 0x499   :  { %11855 = vst [vmem:[#allocation125_spill] sm:$0xff] %v9310_v11 }
 0x49a   :  { %v2822_v47 = vpop.f32.mrf.mxu2 }
 0x49b   :  { %v2823_v26 = vadd.f32 %v2822_v47, %v8980_v30  ;;  %3043 = vmatmul.bf16.gmra.mxu3 %v1075_v42  ;;  %v862_v47 = vld [vmem:[#allocation2 + $0x22a] sm:$0xff] }
 0x49d   :  { %v2992_v19 = vadd.f32 %v2991_v3, %v2823_v26 }
 0x49e   :  { %v3163_v55 = vpop.f32.mrf.mxu0  ;;  %v3004_v32 = vpop.f32.mrf.mxu3 }
 0x49f   :  { %v9313_v2 = vadd.f32 %v3160_v28, %v2992_v19  ;;  %2864 = vmatmul.bf16.gmra.mxu2 %v1056_v14  ;;  %v1065_v28 = vpack.c.bf16 %v735_v36, %v734_v20  ;;  %v802_v14 = vld [vmem:[#allocation2 + $0x259] sm:$0xff]  ;;  %v1067_v19 = vpack.c.bf16 %v863_v29, %v862_v47  ;;  %v737_v36 = vld [vmem:[#allocation2 + $0x248] sm:$0xff] }
 0x4a0   :  { %v736_v20 = vld [vmem:[#allocation2 + $0x240] sm:$0xff]  ;;  %v865_v47 = vld [vmem:[#allocation2 + $0x24a] sm:$0xff] }
 0x4a1   :  { %11856 = vst [vmem:[#allocation126_spill] sm:$0xff] %v9313_v2  ;;  %3202 = vmatmul.bf16.gmra.mxu0 %v1058_v21  ;;  %v803_v21 = vld [vmem:[#allocation2 + $0x261] sm:$0xff] }
 0x4a2   :  { %v2825_v51 = vpop.f32.mrf.mxu2 }
 0x4a3   :  { %v2826_v52 = vadd.f32 %v2825_v51, %v8987_v38  ;;  %v1084_v38 = vpack.c.bf16 %v803_v21, %v802_v14 }
 0x4a5   :  { %v2995_v7 = vadd.f32 %v2994_v15, %v2826_v52 }
 0x4a6   :  { %v3165_v24 = vpop.f32.mrf.mxu0  ;;  %v3006_v26 = vpop.f32.mrf.mxu3 }
 0x4a7   :  { %v9316_v30 = vadd.f32 %v3163_v55, %v2995_v7 }
 0x4a9   :  { %11857 = vst [vmem:[#allocation127_spill] sm:$0xff] %v9316_v30 }
 0x4aa   :  { %v2827_v3 = vpop.f32.mrf.mxu2 }
 0x4ab   :  { %v2828_v4 = vadd.f32 %v2827_v3, %v8996_v25  ;;  %3048 = vmatmul.bf16.gmra.mxu3 %v1084_v38  ;;  %v864_v3 = vld [vmem:[#allocation2 + $0x242] sm:$0xff] }
 0x4ad   :  { %v2997_v1 = vadd.f32 %v2996_v49, %v2828_v4 }
 0x4ae   :  { %v3168_v43 = vpop.f32.mrf.mxu0  ;;  %v3009_v51 = vpop.f32.mrf.mxu3 }
 0x4af   :  { %v9319_v42 = vadd.f32 %v3165_v24, %v2997_v1  ;;  %2869 = vmatmul.bf16.gmra.mxu2 %v1065_v28  ;;  %v1074_v24 = vpack.c.bf16 %v737_v36, %v736_v20  ;;  %v804_v28 = vld [vmem:[#allocation2 + $0x271] sm:$0xff]  ;;  %v1076_v1 = vpack.c.bf16 %v865_v47, %v864_v3  ;;  %v739_v36 = vld [vmem:[#allocation2 + $0x260] sm:$0xff] }
 0x4b0   :  { %v738_v20 = vld [vmem:[#allocation2 + $0x258] sm:$0xff]  ;;  %v867_v3 = vld [vmem:[#allocation2 + $0x262] sm:$0xff] }
 0x4b1   :  { %11858 = vst [vmem:[#allocation128_spill] sm:$0xff] %v9319_v42  ;;  %3207 = vmatmul.bf16.gmra.mxu0 %v1067_v19  ;;  %v805_v19 = vld [vmem:[#allocation2 + $0x279] sm:$0xff] }
 0x4b2   :  { %v2830_v15 = vpop.f32.mrf.mxu2 }
 0x4b3   :  { %v2831_v55 = vadd.f32 %v2830_v15, %v9001_v17  ;;  %v1093_v17 = vpack.c.bf16 %v805_v19, %v804_v28 }
 0x4b5   :  { %v3000_v52 = vadd.f32 %v2999_v46, %v2831_v55 }
 0x4b6   :  { %v3170_v7 = vpop.f32.mrf.mxu0  ;;  %v3011_v4 = vpop.f32.mrf.mxu3 }
 0x4b7   :  { %v9322_v25 = vadd.f32 %v3168_v43, %v3000_v52 }
 0x4b9   :  { %11859 = vst [vmem:[#allocation129_spill] sm:$0xff] %v9322_v25 }
 0x4ba   :  { %v2832_v49 = vpop.f32.mrf.mxu2 }
 0x4bb   :  { %v2833_v29 = vadd.f32 %v2832_v49, %v9010_v33  ;;  %3053 = vmatmul.bf16.gmra.mxu3 %v1093_v17  ;;  %v866_v49 = vld [vmem:[#allocation2 + $0x25a] sm:$0xff] }
 0x4bd   :  { %v3002_v14 = vadd.f32 %v3001_v6, %v2833_v29 }
 0x4be   :  { %v3173_v21 = vpop.f32.mrf.mxu0  ;;  %v3014_v15 = vpop.f32.mrf.mxu3 }
 0x4bf   :  { %v9325_v38 = vadd.f32 %v3170_v7, %v3002_v14  ;;  %2874 = vmatmul.bf16.gmra.mxu2 %v1074_v24  ;;  %v1083_v7 = vpack.c.bf16 %v739_v36, %v738_v20  ;;  %v806_v24 = vld [vmem:[#allocation2 + $0x289] sm:$0xff]  ;;  %v1085_v14 = vpack.c.bf16 %v867_v3, %v866_v49  ;;  %v741_v36 = vld [vmem:[#allocation2 + $0x278] sm:$0xff] }
 0x4c0   :  { %v868_v49 = vld [vmem:[#allocation2 + $0x272] sm:$0xff]  ;;  %v869_v3 = vld [vmem:[#allocation2 + $0x27a] sm:$0xff] }
 0x4c1   :  { %11860 = vst [vmem:[#allocation130_spill] sm:$0xff] %v9325_v38  ;;  %3212 = vmatmul.bf16.gmra.mxu0 %v1076_v1  ;;  %v807_v1 = vld [vmem:[#allocation2 + $0x291] sm:$0xff] }
 0x4c2   :  { %v2835_v46 = vpop.f32.mrf.mxu2 }
 0x4c3   :  { %v2836_v43 = vadd.f32 %v2835_v46, %v9018_v41  ;;  %v1102_v41 = vpack.c.bf16 %v807_v1, %v806_v24  ;;  %v7938_v46 = vld [vmem:[#allocation8 + $0x20] sm:$0xff] }
 0x4c4   :  { %5200 = vmatpush.bf16.msra.mxu1 %v7938_v46  ;;  %v808_v24 = vld [vmem:[#allocation2 + $0x2a1] sm:$0xff] }
 0x4c5   :  { %v3005_v55 = vadd.f32 %v3004_v32, %v2836_v43 }
 0x4c6   :  { %v3175_v52 = vpop.f32.mrf.mxu0  ;;  %v3016_v29 = vpop.f32.mrf.mxu3 }
 0x4c7   :  { %v9328_v33 = vadd.f32 %v3173_v21, %v3005_v55 }
 0x4c9   :  { %11861 = vst [vmem:[#allocation131_spill] sm:$0xff] %v9328_v33 }
 0x4ca   :  { %v2837_v6 = vpop.f32.mrf.mxu2 }
 0x4cb   :  { %v2838_v47 = vadd.f32 %v2837_v6, %v9029_v8  ;;  %3058 = vmatmul.bf16.gmra.mxu3 %v1102_v41 }
 0x4cd   :  { %v3007_v28 = vadd.f32 %v3006_v26, %v2838_v47  ;;  %v740_v26 = vld [vmem:[#allocation2 + $0x270] sm:$0xff] }
 0x4ce   :  { %v3178_v19 = vpop.f32.mrf.mxu0  ;;  %v3019_v43 = vpop.f32.mrf.mxu3  ;;  %v1092_v47 = vpack.c.bf16 %v741_v36, %v740_v26  ;;  %v742_v26 = vld [vmem:[#allocation2 + $0x288] sm:$0xff]  ;;  %v743_v36 = vld [vmem:[#allocation2 + $0x290] sm:$0xff] }
 0x4cf   :  { %v9331_v17 = vadd.f32 %v3175_v52, %v3007_v28  ;;  %2879 = vmatmul.bf16.gmra.mxu2 %v1083_v7 }
 0x4d1   :  { %11862 = vst [vmem:[#allocation132_spill] sm:$0xff] %v9331_v17  ;;  %3217 = vmatmul.bf16.gmra.mxu0 %v1085_v14  ;;  %v1094_v14 = vpack.c.bf16 %v869_v3, %v868_v49  ;;  %v871_v49 = vld [vmem:[#allocation2 + $0x292] sm:$0xff] }
 0x4d2   :  { %v2840_v32 = vpop.f32.mrf.mxu2 }
 0x4d3   :  { %v2841_v21 = vadd.f32 %v2840_v32, %v9036_v12  ;;  %v809_v12 = vld [vmem:[#allocation2 + $0x2a9] sm:$0xff] }
 0x4d4   :  { %v1111_v41 = vpack.c.bf16 %v809_v12, %v808_v24 }
 0x4d5   :  { %v3010_v55 = vadd.f32 %v3009_v51, %v2841_v21 }
 0x4d6   :  { %v3180_v8 = vpop.f32.mrf.mxu0  ;;  %v3021_v7 = vpop.f32.mrf.mxu3 }
 0x4d7   :  { %v9334_v20 = vadd.f32 %v3178_v19, %v3010_v55 }
 0x4d9   :  { %11863 = vst [vmem:[#allocation133_spill] sm:$0xff] %v9334_v20 }
 0x4da   :  { %v2842_v6 = vpop.f32.mrf.mxu2 }
 0x4db   :  { %v2843_v52 = vadd.f32 %v2842_v6, %v9047_v5  ;;  %3063 = vmatmul.bf16.gmra.mxu3 %v1111_v41  ;;  %v870_v6 = vld [vmem:[#allocation2 + $0x28a] sm:$0xff] }
 0x4dd   :  { %v3012_v28 = vadd.f32 %v3011_v4, %v2843_v52 }
 0x4de   :  { %v3183_v1 = vpop.f32.mrf.mxu0  ;;  %v3024_v21 = vpop.f32.mrf.mxu3 }
 0x4df   :  { %v9337_v51 = vadd.f32 %v3180_v8, %v3012_v28  ;;  %2884 = vmatmul.bf16.gmra.mxu2 %v1092_v47  ;;  %v1101_v8 = vpack.c.bf16 %v743_v36, %v742_v26  ;;  %v810_v47 = vld [vmem:[#allocation2 + $0x2b9] sm:$0xff]  ;;  %v1103_v28 = vpack.c.bf16 %v871_v49, %v870_v6  ;;  %v745_v36 = vld [vmem:[#allocation2 + $0x2a8] sm:$0xff] }
 0x4e0   :  { %v744_v26 = vld [vmem:[#allocation2 + $0x2a0] sm:$0xff]  ;;  %v873_v6 = vld [vmem:[#allocation2 + $0x2aa] sm:$0xff] }
 0x4e1   :  { %11864 = vst [vmem:[#allocation134_spill] sm:$0xff] %v9337_v51  ;;  %3222 = vmatmul.bf16.gmra.mxu0 %v1094_v14  ;;  %v811_v14 = vld [vmem:[#allocation2 + $0x2c1] sm:$0xff] }
 0x4e2   :  { %v2845_v19 = vpop.f32.mrf.mxu2 }
 0x4e3   :  { %v2846_v32 = vadd.f32 %v2845_v19, %v9054_v50  ;;  %v1120_v50 = vpack.c.bf16 %v811_v14, %v810_v47 }
 0x4e5   :  { %v3015_v46 = vadd.f32 %v3014_v15, %v2846_v32 }
 0x4e6   :  { %v3185_v55 = vpop.f32.mrf.mxu0  ;;  %v3026_v52 = vpop.f32.mrf.mxu3 }
 0x4e7   :  { %v9340_v5 = vadd.f32 %v3183_v1, %v3015_v46 }
 0x4e9   :  { %11865 = vst [vmem:[#allocation135_spill] sm:$0xff] %v9340_v5 }
 0x4ea   :  { %v2847_v4 = vpop.f32.mrf.mxu2 }
 0x4eb   :  { %v2848_v3 = vadd.f32 %v2847_v4, %v9065_v9  ;;  %3068 = vmatmul.bf16.gmra.mxu3 %v1120_v50  ;;  %v872_v4 = vld [vmem:[#allocation2 + $0x2a2] sm:$0xff] }
 0x4ed   :  { %v3017_v24 = vadd.f32 %v3016_v29, %v2848_v3 }
 0x4ee   :  { %v3188_v12 = vpop.f32.mrf.mxu0  ;;  %v3029_v19 = vpop.f32.mrf.mxu3 }
 0x4ef   :  { %v9343_v41 = vadd.f32 %v3185_v55, %v3017_v24  ;;  %2889 = vmatmul.bf16.gmra.mxu2 %v1101_v8  ;;  %v1110_v55 = vpack.c.bf16 %v745_v36, %v744_v26  ;;  %v812_v8 = vld [vmem:[#allocation2 + $0x2d1] sm:$0xff]  ;;  %v1112_v24 = vpack.c.bf16 %v873_v6, %v872_v4  ;;  %v747_v36 = vld [vmem:[#allocation2 + $0x2c0] sm:$0xff] }
 0x4f0   :  { %v746_v26 = vld [vmem:[#allocation2 + $0x2b8] sm:$0xff]  ;;  %v875_v4 = vld [vmem:[#allocation2 + $0x2c2] sm:$0xff] }
 0x4f1   :  { %11866 = vst [vmem:[#allocation136_spill] sm:$0xff] %v9343_v41  ;;  %3227 = vmatmul.bf16.gmra.mxu0 %v1103_v28  ;;  %v813_v28 = vld [vmem:[#allocation2 + $0x2d9] sm:$0xff] }
 0x4f2   :  { %v2850_v15 = vpop.f32.mrf.mxu2  ;;  %v11870_v6 = vld [vmem:[#allocation49_spill] sm:$0xff] }
 0x4f3   :  { %v2851_v1 = vadd.f32 %v2850_v15, %v9070_v58  ;;  %v1129_v58 = vpack.c.bf16 %v813_v28, %v812_v8  ;;  %v815_v28 = vld [vmem:[#allocation2 + $0x2f1] sm:$0xff] }
 0x4f5   :  { %v3020_v32 = vadd.f32 %v3019_v43, %v2851_v1 }
 0x4f6   :  { %v3190_v46 = vpop.f32.mrf.mxu0  ;;  %v3031_v3 = vpop.f32.mrf.mxu3 }
 0x4f7   :  { %v9346_v9 = vadd.f32 %v3188_v12, %v3020_v32 }
 0x4f9   :  { %11867 = vst [vmem:[#allocation137_spill] sm:$0xff] %v9346_v9 }
 0x4fa   :  { %v2852_v29 = vpop.f32.mrf.mxu2 }
 0x4fb   :  { %v2853_v49 = vadd.f32 %v2852_v29, %v9081_v48  ;;  %3073 = vmatmul.bf16.gmra.mxu3 %v1129_v58  ;;  %v874_v29 = vld [vmem:[#allocation2 + $0x2ba] sm:$0xff] }
 0x4fd   :  { %v3022_v47 = vadd.f32 %v3021_v7, %v2853_v49 }
 0x4fe   :  { %v3193_v14 = vpop.f32.mrf.mxu0  ;;  %v3034_v15 = vpop.f32.mrf.mxu3 }
 0x4ff   :  { %v9349_v50 = vadd.f32 %v3190_v46, %v3022_v47  ;;  %2894 = vmatmul.bf16.gmra.mxu2 %v1110_v55  ;;  %v1119_v46 = vpack.c.bf16 %v747_v36, %v746_v26  ;;  %v814_v55 = vld [vmem:[#allocation2 + $0x2e9] sm:$0xff] }
 0x501   :  { %11868 = vst [vmem:[#allocation138_spill] sm:$0xff] %v9349_v50  ;;  %3232 = vmatmul.bf16.gmra.mxu0 %v1112_v24  ;;  %v1121_v24 = vpack.c.bf16 %v875_v4, %v874_v29  ;;  %v876_v4 = vld [vmem:[#allocation2 + $0x2d2] sm:$0xff] }
 0x502   :  { %v2855_v43 = vpop.f32.mrf.mxu2 }
 0x503   :  { %v2856_v12 = vadd.f32 %v2855_v43, %v9091_v54  ;;  %v1138_v54 = vpack.c.bf16 %v815_v28, %v814_v55 }
 0x505   :  { %v3025_v1 = vadd.f32 %v3024_v21, %v2856_v12 }
 0x506   :  { %v3195_v32 = vpop.f32.mrf.mxu0  ;;  %v3036_v8 = vpop.f32.mrf.mxu3 }
 0x507   :  { %v9352_v48 = vadd.f32 %v3193_v14, %v3025_v1  ;;  %v11872_v14 = vld [vmem:[#allocation58_spill] sm:$0xff]  ;;  %v7937_v1 = vld [vmem:[#allocation8 + $0x18] sm:$0xff] }
 0x508   :  { %5201 = vmatpush.bf16.msra.mxu1 %v7937_v1 }
 0x509   :  { %11869 = vst [vmem:[#allocation139_spill] sm:$0xff] %v9352_v48 }
 0x50a   :  { %v2857_v7 = vpop.f32.mrf.mxu2 }
 0x50b   :  { %v2858_v49 = vadd.f32 %v2857_v7, %v11870_v6  ;;  %3078 = vmatmul.bf16.gmra.mxu3 %v1138_v54  ;;  %v749_v7 = vld [vmem:[#allocation2 + $0x2d8] sm:$0xff]  ;;  %v817_v54 = vld [vmem:[#allocation2 + $0x309] sm:$0xff] }
 0x50c   :  { %v877_v6 = vld [vmem:[#allocation2 + $0x2da] sm:$0xff] }
 0x50d   :  { %v3027_v47 = vadd.f32 %v3026_v52, %v2858_v49  ;;  %v748_v52 = vld [vmem:[#allocation2 + $0x2d0] sm:$0xff]  ;;  %v1130_v28 = vpack.c.bf16 %v877_v6, %v876_v4 }
 0x50e   :  { %v3198_v58 = vpop.f32.mrf.mxu0  ;;  %v3039_v61 = vpop.f32.mrf.mxu3  ;;  %v878_v4 = vld [vmem:[#allocation2 + $0x2ea] sm:$0xff]  ;;  %v879_v6 = vld [vmem:[#allocation2 + $0x2f2] sm:$0xff] }
 0x50f   :  { %v9355_v43 = vadd.f32 %v3195_v32, %v3027_v47  ;;  %2899 = vmatmul.bf16.gmra.mxu2 %v1119_v46  ;;  %v11874_v32 = vld [vmem:[#allocation63_spill] sm:$0xff]  ;;  %v1128_v46 = vpack.c.bf16 %v749_v7, %v748_v52  ;;  %v816_v47 = vld [vmem:[#allocation2 + $0x301] sm:$0xff] }
 0x510   :  { %v750_v52 = vld [vmem:[#allocation2 + $0x2e8] sm:$0xff]  ;;  %v751_v7 = vld [vmem:[#allocation2 + $0x2f0] sm:$0xff] }
 0x511   :  { %11871 = vst [vmem:[#allocation49_spill] sm:$0xff] %v9355_v43  ;;  %3237 = vmatmul.bf16.gmra.mxu0 %v1121_v24 }
 0x512   :  { %v2860_v21 = vpop.f32.mrf.mxu2 }
 0x513   :  { %v2861_v12 = vadd.f32 %v2860_v21, %v11872_v14  ;;  %v1147_v14 = vpack.c.bf16 %v817_v54, %v816_v47  ;;  %v819_v54 = vld [vmem:[#allocation2 + $0x321] sm:$0xff] }
 0x515   :  { %v3030_v48 = vadd.f32 %v3029_v19, %v2861_v12 }
 0x516   :  { %v3200_v26 = vpop.f32.mrf.mxu0  ;;  %v3041_v55 = vpop.f32.mrf.mxu3 }
 0x517   :  { %v9358_v36 = vadd.f32 %v3198_v58, %v3030_v48  ;;  %v11876_v58 = vld [vmem:[#allocation64_spill] sm:$0xff] }
 0x519   :  { %11873 = vst [vmem:[#allocation58_spill] sm:$0xff] %v9358_v36 }
 0x51a   :  { %v2862_v29 = vpop.f32.mrf.mxu2 }
 0x51b   :  { %v2863_v49 = vadd.f32 %v2862_v29, %v11874_v32  ;;  %3083 = vmatmul.bf16.gmra.mxu3 %v1147_v14  ;;  %v11878_v32 = vld [vmem:[#allocation69_spill] sm:$0xff] }
 0x51d   :  { %v3032_v24 = vadd.f32 %v3031_v3, %v2863_v49 }
 0x51e   :  { %v3203_v21 = vpop.f32.mrf.mxu0  ;;  %v3044_v1 = vpop.f32.mrf.mxu3 }
 0x51f   :  { %v9361_v19 = vadd.f32 %v3200_v26, %v3032_v24  ;;  %2904 = vmatmul.bf16.gmra.mxu2 %v1128_v46  ;;  %v1137_v26 = vpack.c.bf16 %v751_v7, %v750_v52  ;;  %v818_v46 = vld [vmem:[#allocation2 + $0x319] sm:$0xff] }
 0x520   :  { %v752_v7 = vld [vmem:[#allocation2 + $0x300] sm:$0xff] }
 0x521   :  { %11875 = vst [vmem:[#allocation63_spill] sm:$0xff] %v9361_v19  ;;  %3242 = vmatmul.bf16.gmra.mxu0 %v1130_v28  ;;  %v1139_v28 = vpack.c.bf16 %v879_v6, %v878_v4  ;;  %v880_v4 = vld [vmem:[#allocation2 + $0x302] sm:$0xff]  ;;  %v881_v6 = vld [vmem:[#allocation2 + $0x30a] sm:$0xff] }
 0x522   :  { %v2865_v48 = vpop.f32.mrf.mxu2 }
 0x523   :  { %v2866_v12 = vadd.f32 %v2865_v48, %v11876_v58  ;;  %v1156_v48 = vpack.c.bf16 %v819_v54, %v818_v46  ;;  %v1148_v54 = vpack.c.bf16 %v881_v6, %v880_v4  ;;  %v882_v6 = vld [vmem:[#allocation2 + $0x31a] sm:$0xff] }
 0x525   :  { %v3035_v36 = vadd.f32 %v3034_v15, %v2866_v12 }
 0x526   :  { %v3205_v43 = vpop.f32.mrf.mxu0  ;;  %v9367_v47 = vpop.f32.mrf.mxu3 }
 0x527   :  { %v9364_v29 = vadd.f32 %v3203_v21, %v3035_v36  ;;  %11879 = vst [vmem:[#allocation69_spill] sm:$0xff] %v9367_v47  ;;  %v11880_v21 = vld [vmem:[#allocation106_spill] sm:$0xff] }
 0x529   :  { %11877 = vst [vmem:[#allocation64_spill] sm:$0xff] %v9364_v29 }
 0x52a   :  { %v2867_v3 = vpop.f32.mrf.mxu2 }
 0x52b   :  { %v2868_v49 = vadd.f32 %v2867_v3, %v11878_v32  ;;  %3088 = vmatmul.bf16.gmra.mxu3 %v1156_v48  ;;  %v753_v32 = vld [vmem:[#allocation2 + $0x308] sm:$0xff]  ;;  %v821_v48 = vld [vmem:[#allocation2 + $0x339] sm:$0xff] }
 0x52d   :  { %v3037_v24 = vadd.f32 %v3036_v8, %v2868_v49  ;;  %v11882_v49 = vld [vmem:[#allocation75_spill] sm:$0xff] }
 0x52e   :  { %v3208_v14 = vpop.f32.mrf.mxu0  ;;  %v3049_v12 = vpop.f32.mrf.mxu3 }
 0x52f   :  { %v9369_v15 = vadd.f32 %v3205_v43, %v3037_v24  ;;  %2909 = vmatmul.bf16.gmra.mxu2 %v1137_v26  ;;  %v1146_v43 = vpack.c.bf16 %v753_v32, %v752_v7  ;;  %v820_v26 = vld [vmem:[#allocation2 + $0x331] sm:$0xff] }
 0x530   :  { %v754_v32 = vld [vmem:[#allocation2 + $0x318] sm:$0xff] }
 0x531   :  { %3247 = vmatmul.bf16.gmra.mxu0 %v1139_v28 }
 0x532   :  { %v2870_v36 = vpop.f32.mrf.mxu2 }
 0x533   :  { %v2871_v58 = vadd.f32 %v2870_v36, %v11880_v21  ;;  %v1165_v21 = vpack.c.bf16 %v821_v48, %v820_v26  ;;  %v823_v26 = vld [vmem:[#allocation2 + $0x351] sm:$0xff] }
 0x535   :  { %v3040_v29 = vadd.f32 %v3039_v61, %v2871_v58 }
 0x536   :  { %v3210_v3 = vpop.f32.mrf.mxu0  ;;  %v9375_v24 = vpop.f32.mrf.mxu3 }
 0x537   :  { %v9372_v52 = vadd.f32 %v3208_v14, %v3040_v29  ;;  %v11884_v14 = vld [vmem:[#allocation108_spill] sm:$0xff] }
 0x539   :  { %11881 = vst [vmem:[#allocation106_spill] sm:$0xff] %v9372_v52 }
 0x53a   :  { %v2872_v8 = vpop.f32.mrf.mxu2 }
 0x53b   :  { %v2873_v46 = vadd.f32 %v2872_v8, %v11882_v49  ;;  %3093 = vmatmul.bf16.gmra.mxu3 %v1165_v21  ;;  %v883_v49 = vld [vmem:[#allocation2 + $0x322] sm:$0xff] }
 0x53d   :  { %v3042_v28 = vadd.f32 %v3041_v55, %v2873_v46  ;;  %v755_v55 = vld [vmem:[#allocation2 + $0x320] sm:$0xff] }
 0x53e   :  { %v3213_v36 = vpop.f32.mrf.mxu0  ;;  %v3054_v52 = vpop.f32.mrf.mxu3 }
 0x53f   :  { %v9377_v61 = vadd.f32 %v3210_v3, %v3042_v28  ;;  %2914 = vmatmul.bf16.gmra.mxu2 %v1146_v43  ;;  %v1155_v3 = vpack.c.bf16 %v755_v55, %v754_v32  ;;  %v822_v43 = vld [vmem:[#allocation2 + $0x349] sm:$0xff]  ;;  %v1157_v28 = vpack.c.bf16 %v883_v49, %v882_v6  ;;  %v757_v55 = vld [vmem:[#allocation2 + $0x338] sm:$0xff] }
 0x540   :  { %v756_v32 = vld [vmem:[#allocation2 + $0x330] sm:$0xff]  ;;  %v885_v49 = vld [vmem:[#allocation2 + $0x33a] sm:$0xff] }
 0x541   :  { %11883 = vst [vmem:[#allocation75_spill] sm:$0xff] %v9377_v61  ;;  %3252 = vmatmul.bf16.gmra.mxu0 %v1148_v54  ;;  %v1174_v54 = vpack.c.bf16 %v823_v26, %v822_v43  ;;  %v884_v6 = vld [vmem:[#allocation2 + $0x332] sm:$0xff] }
 0x542   :  { %v2875_v29 = vpop.f32.mrf.mxu2  ;;  %v1166_v26 = vpack.c.bf16 %v885_v49, %v884_v6 }
 0x543   :  { %v2876_v58 = vadd.f32 %v2875_v29, %v11884_v14 }
 0x545   :  { %v3045_v47 = vadd.f32 %v3044_v1, %v2876_v58 }
 0x546   :  { %v9380_v8 = vpop.f32.mrf.mxu0  ;;  %v9386_v46 = vpop.f32.mrf.mxu3 }
 0x547   :  { %v9382_v7 = vadd.f32 %v3213_v36, %v3045_v47  ;;  %11886 = vst [vmem:[#allocation140_spill] sm:$0xff] %v9386_v46  ;;  %v7936_v36 = vld [vmem:[#allocation8 + $0x10] sm:$0xff] }
 0x548   :  { %5202 = vmatpush.bf16.msra.mxu1 %v7936_v36 }
 0x549   :  { %11885 = vst [vmem:[#allocation108_spill] sm:$0xff] %v9382_v7 }
 0x54a   :  { %v9384_v4 = vpop.f32.mrf.mxu2 }
 0x54b   :  { %3098 = vmatmul.bf16.gmra.mxu3 %v1174_v54 }
 0x54e   :  { %v3218_v48 = vpop.f32.mrf.mxu0  ;;  %v3059_v21 = vpop.f32.mrf.mxu3 }
 0x54f   :  { %2919 = vmatmul.bf16.gmra.mxu2 %v1155_v3  ;;  %v1164_v3 = vpack.c.bf16 %v757_v55, %v756_v32 }
 0x551   :  { %3257 = vmatmul.bf16.gmra.mxu0 %v1157_v28 }
 0x552   :  { %v2880_v1 = vpop.f32.mrf.mxu2 }
 0x553   :  { %v2881_v47 = vadd.f32 %v2880_v1, %v9174_v60 }
 0x555   :  { %v3050_v29 = vadd.f32 %v3049_v12, %v2881_v47 }
 0x556   :  { %v9389_v14 = vpop.f32.mrf.mxu0  ;;  %v9395_v43 = vpop.f32.mrf.mxu3 }
 0x557   :  { %v9391_v58 = vadd.f32 %v3218_v48, %v3050_v29  ;;  %v886_v29 = vld [vmem:[#allocation2 + $0x34a] sm:$0xff] }
 0x559   :  { %11887 = vst [vmem:[#allocation141_spill] sm:$0xff] %v9391_v58  ;;  %v887_v58 = vld [vmem:[#allocation2 + $0x352] sm:$0xff] }
 0x55a   :  { %v9393_v46 = vpop.f32.mrf.mxu2  ;;  %v1175_v32 = vpack.c.bf16 %v887_v58, %v886_v29  ;;  %v3343_v58 = vmul.f32 %v9256_v16, %v9256_v16 }
 0x55e   :  { %v3223_v28 = vpop.f32.mrf.mxu0  ;;  %v3064_v48 = vpop.f32.mrf.mxu3 }
 0x55f   :  { %2924 = vmatmul.bf16.gmra.mxu2 %v1164_v3 }
 0x561   :  { %3262 = vmatmul.bf16.gmra.mxu0 %v1166_v26 }
 0x562   :  { %v2885_v60 = vpop.f32.mrf.mxu2 }
 0x563   :  { %v2886_v12 = vadd.f32 %v2885_v60, %v9184_v31 }
 0x565   :  { %v3055_v54 = vadd.f32 %v3054_v52, %v2886_v12 }
 0x566   :  { %v9398_v1 = vpop.f32.mrf.mxu0  ;;  %v9405_v6 = vpop.f32.mrf.mxu3 }
 0x567   :  { %v9400_v47 = vadd.f32 %v3223_v28, %v3055_v54  ;;  %11889 = vst [vmem:[#allocation143_spill] sm:$0xff] %v9405_v6  ;;  %v3344_v54 = vmul.f32 %v9259_v59, %v9259_v59  ;;  %v3346_v6 = vmul.f32 %v9265_v57, %v9265_v57 }
 0x569   :  { %11888 = vst [vmem:[#allocation142_spill] sm:$0xff] %v9400_v47 }
 0x56a   :  { %v9402_v36 = vpop.f32.mrf.mxu2 }
 0x56e   :  { %v3228_v55 = vpop.f32.mrf.mxu0  ;;  %v3069_v60 = vpop.f32.mrf.mxu3 }
 0x56f   :  { %2929 = vmatmul.bf16.gmra.mxu2 %v9292_v10  ;;  %v3342_v10 = vmul.f32 %v9253_v45, %v9253_v45 }
 0x571   :  { %3267 = vmatmul.bf16.gmra.mxu0 %v1175_v32  ;;  %v3406_v32 = vadd.f32 %v3343_v58, %v3342_v10  ;;  %v3347_v58 = vmul.f32 %v9268_v35, %v9268_v35 }
 0x572   :  { %v2890_v49 = vpop.f32.mrf.mxu2 }
 0x573   :  { %v2891_v31 = vadd.f32 %v2890_v49, %v9195_v44 }
 0x575   :  { %v3060_v52 = vadd.f32 %v3059_v21, %v2891_v31  ;;  %v3273_v21 = vadd.f32 %v9256_v16, %v9253_v45 }
 0x576   :  { %v9408_v3 = vpop.f32.mrf.mxu0  ;;  %v9425_v49 = vpop.f32.mrf.mxu3 }
 0x577   :  { %11890 = vst [vmem:[#allocation144_spill] sm:$0xff] %v9408_v3  ;;  %v9410_v26 = vadd.f32 %v3228_v55, %v3060_v52  ;;  %v3345_v55 = vmul.f32 %v9262_v34, %v9262_v34  ;;  %v3274_v52 = vadd.f32 %v3273_v21, %v9259_v59 }
 0x579   :  { %11891 = vst [vmem:[#allocation145_spill] sm:$0xff] %v9410_v26  ;;  %v3407_v26 = vadd.f32 %v3406_v32, %v3344_v54 }
 0x57a   :  { %v9412_v28 = vpop.f32.mrf.mxu2 }
 0x57e   :  { %v3233_v12 = vpop.f32.mrf.mxu0 }
 0x582   :  { %v2895_v29 = vpop.f32.mrf.mxu2 }
 0x583   :  { %v2896_v44 = vadd.f32 %v2895_v29, %v9203_v40  ;;  %v3275_v40 = vadd.f32 %v3274_v52, %v9262_v34  ;;  %v3408_v29 = vadd.f32 %v3407_v26, %v3345_v55  ;;  %v3350_v55 = vmul.f32 %v9277_v0, %v9277_v0  ;;  %v3074_v52 = vpop.f32.mrf.mxu3 }
 0x585   :  { %v3065_v31 = vadd.f32 %v3064_v48, %v2896_v44  ;;  %v3276_v10 = vadd.f32 %v3275_v40, %v9265_v57  ;;  %v3409_v16 = vadd.f32 %v3408_v29, %v3346_v6  ;;  %v3348_v48 = vmul.f32 %v9271_v53, %v9271_v53  ;;  %v9451_v57 = vpop.f32.mrf.mxu1 }
 0x586   :  { %v9430_v3 = vpop.f32.mrf.mxu0  ;;  %v3351_v29 = vmul.f32 %v9280_v23, %v9280_v23 }
 0x587   :  { %v9432_v47 = vadd.f32 %v3233_v12, %v3065_v31  ;;  %v3277_v44 = vadd.f32 %v3276_v10, %v9268_v35  ;;  %v3410_v21 = vadd.f32 %v3409_v16, %v3347_v58  ;;  %v3349_v12 = vmul.f32 %v9274_v63, %v9274_v63 }
 0x588   :  { %v3352_v10 = vmul.f32 %v9283_v18, %v9283_v18 }
 0x589   :  { %v3278_v32 = vadd.f32 %v3277_v44, %v9271_v53  ;;  %v3411_v26 = vadd.f32 %v3410_v21, %v3348_v48  ;;  %v11892_v44 = vld [vmem:[#allocation89_spill] sm:$0xff]  ;;  %v7935_v53 = vld [vmem:[#allocation8 + $0x8] sm:$0xff] }
 0x58a   :  { %v9440_v54 = vpop.f32.mrf.mxu2  ;;  %5203 = vmatpush.bf16.msra.mxu1 %v7935_v53 }
 0x58b   :  { %v3279_v6 = vadd.f32 %v3278_v32, %v9274_v63  ;;  %v3412_v40 = vadd.f32 %v3411_v26, %v3349_v12  ;;  %v3353_v12 = vmul.f32 %v9286_v62, %v9286_v62 }
 0x58d   :  { %v3280_v16 = vadd.f32 %v3279_v6, %v9277_v0  ;;  %v3413_v58 = vadd.f32 %v3412_v40, %v3350_v55  ;;  %v3354_v55 = vmul.f32 %v9289_v37, %v9289_v37 }
 0x58e   :  { %v3238_v31 = vpop.f32.mrf.mxu0 }
 0x58f   :  { %v3281_v35 = vadd.f32 %v3280_v16, %v9280_v23  ;;  %v3414_v34 = vadd.f32 %v3413_v58, %v3351_v29  ;;  %v3355_v29 = vmul.f32 %v9294_v13, %v9294_v13  ;;  %v9470_v16 = vpop.f32.mrf.mxu3  ;;  %v9477_v58 = vpop.f32.mrf.mxu1 }
 0x591   :  { %v3282_v26 = vadd.f32 %v3281_v35, %v9283_v18  ;;  %v3415_v63 = vadd.f32 %v3414_v34, %v3352_v10  ;;  %v3356_v34 = vmul.f32 %v9298_v56, %v9298_v56 }
 0x592   :  { %v2900_v48 = vpop.f32.mrf.mxu2 }
 0x593   :  { %v2901_v21 = vadd.f32 %v2900_v48, %v11892_v44  ;;  %v3283_v48 = vadd.f32 %v3282_v26, %v9286_v62  ;;  %v3416_v44 = vadd.f32 %v3415_v63, %v3353_v12  ;;  %v3357_v63 = vmul.f32 %v9301_v27, %v9301_v27 }
 0x595   :  { %v3070_v32 = vadd.f32 %v3069_v60, %v2901_v21  ;;  %v3284_v53 = vadd.f32 %v3283_v48, %v9289_v37  ;;  %v3417_v60 = vadd.f32 %v3416_v44, %v3354_v55  ;;  %v3359_v44 = vmul.f32 %v9307_v22, %v9307_v22 }
 0x596   :  { %v9463_v6 = vpop.f32.mrf.mxu0 }
 0x597   :  { %v9465_v40 = vadd.f32 %v3238_v31, %v3070_v32  ;;  %v3285_v31 = vadd.f32 %v3284_v53, %v9294_v13  ;;  %v3418_v10 = vadd.f32 %v3417_v60, %v3355_v29  ;;  %v3358_v32 = vmul.f32 %v9304_v39, %v9304_v39  ;;  %v9491_v13 = vpop.f32.mrf.mxu3 }
 0x598   :  { %v3360_v29 = vmul.f32 %v9310_v11, %v9310_v11 }
 0x599   :  { %v3286_v21 = vadd.f32 %v3285_v31, %v9298_v56  ;;  %v3419_v12 = vadd.f32 %v3418_v10, %v3356_v34  ;;  %v11893_v34 = vld [vmem:[#allocation92_spill] sm:$0xff] }
 0x59a   :  { %v9475_v35 = vpop.f32.mrf.mxu2 }
 0x59b   :  { %v3287_v55 = vadd.f32 %v3286_v21, %v9301_v27  ;;  %v3420_v48 = vadd.f32 %v3419_v12, %v3357_v63  ;;  %v3361_v63 = vmul.f32 %v9313_v2, %v9313_v2  ;;  %v9497_v21 = vpop.f32.mrf.mxu1 }
 0x59d   :  { %v3288_v37 = vadd.f32 %v3287_v55, %v9304_v39  ;;  %v3421_v53 = vadd.f32 %v3420_v48, %v3358_v32  ;;  %v3362_v48 = vmul.f32 %v9316_v30, %v9316_v30 }
 0x59e   :  { %v3243_v26 = vpop.f32.mrf.mxu0 }
 0x59f   :  { %v3289_v10 = vadd.f32 %v3288_v37, %v9307_v22  ;;  %v3422_v56 = vadd.f32 %v3421_v53, %v3359_v44  ;;  %v3363_v44 = vmul.f32 %v9319_v42, %v9319_v42  ;;  %v11901_v22 = vld [vmem:[#allocation81_spill] sm:$0xff] }
 0x5a1   :  { %v3290_v55 = vadd.f32 %v3289_v10, %v9310_v11  ;;  %v3423_v32 = vadd.f32 %v3422_v56, %v3360_v29  ;;  %v9517_v10 = vpop.f32.mrf.mxu3 }
 0x5a2   :  { %v2905_v60 = vpop.f32.mrf.mxu2 }
 0x5a3   :  { %v2906_v31 = vadd.f32 %v2905_v60, %v11893_v34  ;;  %v3291_v60 = vadd.f32 %v3290_v55, %v9313_v2  ;;  %v3424_v37 = vadd.f32 %v3423_v32, %v3361_v63  ;;  %v3366_v55 = vmul.f32 %v9328_v33, %v9328_v33 }
 0x5a5   :  { %v3075_v12 = vadd.f32 %v3074_v52, %v2906_v31  ;;  %v3292_v53 = vadd.f32 %v3291_v60, %v9316_v30  ;;  %v3425_v34 = vadd.f32 %v3424_v37, %v3362_v48  ;;  %v3364_v52 = vmul.f32 %v9322_v25, %v9322_v25  ;;  %v9524_v48 = vpop.f32.mrf.mxu1 }
 0x5a6   :  { %v9502_v39 = vpop.f32.mrf.mxu0 }
 0x5a7   :  { %v9504_v27 = vadd.f32 %v3243_v26, %v3075_v12  ;;  %v3293_v29 = vadd.f32 %v3292_v53, %v9319_v42  ;;  %v3426_v31 = vadd.f32 %v3425_v34, %v3363_v44  ;;  %v3365_v26 = vmul.f32 %v9325_v38, %v9325_v38 }
 0x5a8   :  { %v3367_v44 = vmul.f32 %v9331_v17, %v9331_v17  ;;  %v3369_v42 = vmul.f32 %v9337_v51, %v9337_v51 }
 0x5a9   :  { %v3294_v63 = vadd.f32 %v3293_v29, %v9322_v25  ;;  %v3427_v12 = vadd.f32 %v3426_v31, %v3364_v52  ;;  %v3368_v29 = vmul.f32 %v9334_v20, %v9334_v20 }
 0x5aa   :  { %v9512_v56 = vpop.f32.mrf.mxu2 }
 0x5ab   :  { %v3295_v60 = vadd.f32 %v3294_v63, %v9325_v38  ;;  %v3428_v37 = vadd.f32 %v3427_v12, %v3365_v26  ;;  %v3370_v12 = vmul.f32 %v9340_v5, %v9340_v5 }
 0x5ad   :  { %v3296_v53 = vadd.f32 %v3295_v60, %v9328_v33  ;;  %v3429_v34 = vadd.f32 %v3428_v37, %v3366_v55  ;;  %v9542_v55 = vpop.f32.mrf.mxu3 }
 0x5ae   :  { %v9522_v32 = vpop.f32.mrf.mxu0 }
 0x5af   :  { %v3297_v31 = vadd.f32 %v3296_v53, %v9331_v17  ;;  %v3430_v25 = vadd.f32 %v3429_v34, %v3367_v44  ;;  %v3371_v53 = vmul.f32 %v9343_v41, %v9343_v41  ;;  %v9547_v44 = vpop.f32.mrf.mxu1 }
 0x5b1   :  { %v3298_v63 = vadd.f32 %v3297_v31, %v9334_v20  ;;  %v3431_v26 = vadd.f32 %v3430_v25, %v3368_v29  ;;  %v3372_v25 = vmul.f32 %v9346_v9, %v9346_v9 }
 0x5b2   :  { %v9532_v52 = vpop.f32.mrf.mxu2 }
 0x5b3   :  { %v3299_v60 = vadd.f32 %v3298_v63, %v9337_v51  ;;  %v3432_v37 = vadd.f32 %v3431_v26, %v3369_v42  ;;  %v3373_v63 = vmul.f32 %v9349_v50, %v9349_v50  ;;  %v11894_v51 = vld [vmem:[#allocation139_spill] sm:$0xff] }
 0x5b4   :  { %v3374_v33 = vmul.f32 %v11894_v51, %v11894_v51 }
 0x5b5   :  { %v3300_v34 = vadd.f32 %v3299_v60, %v9340_v5  ;;  %v3433_v17 = vadd.f32 %v3432_v37, %v3370_v12  ;;  %v11895_v37 = vld [vmem:[#allocation49_spill] sm:$0xff]  ;;  %v9565_v2 = vpop.f32.mrf.mxu3 }
 0x5b6   :  { %v9540_v38 = vpop.f32.mrf.mxu0  ;;  %v3375_v5 = vmul.f32 %v11895_v37, %v11895_v37 }
 0x5b7   :  { %v3301_v31 = vadd.f32 %v3300_v34, %v9343_v41  ;;  %v3434_v20 = vadd.f32 %v3433_v17, %v3371_v53  ;;  %v11896_v17 = vld [vmem:[#allocation109_spill] sm:$0xff]  ;;  %v11897_v53 = vld [vmem:[#allocation70_spill] sm:$0xff]  ;;  %v9574_v11 = vpop.f32.mrf.mxu1 }
 0x5b8   :  { %v2709_v34 = vadd.f32 %v11897_v53, %v11896_v17 }
 0x5b9   :  { %v3302_v42 = vadd.f32 %v3301_v31, %v9346_v9  ;;  %v3435_v26 = vadd.f32 %v3434_v20, %v3372_v25  ;;  %v11898_v20 = vld [vmem:[#allocation58_spill] sm:$0xff] }
 0x5ba   :  { %v9552_v29 = vpop.f32.mrf.mxu2  ;;  %v3376_v25 = vmul.f32 %v11898_v20, %v11898_v20 }
 0x5bb   :  { %v3303_v12 = vadd.f32 %v3302_v42, %v9349_v50  ;;  %v3436_v60 = vadd.f32 %v3435_v26, %v3373_v63  ;;  %v3377_v26 = vmul.f32 %v9361_v19, %v9361_v19  ;;  %v2878_v50 = vadd.f32 %v9384_v4, %v2709_v34 }
 0x5bd   :  { %v3304_v41 = vadd.f32 %v3303_v12, %v11894_v51  ;;  %v3437_v31 = vadd.f32 %v3436_v60, %v3374_v33  ;;  %v11899_v12 = vld [vmem:[#allocation64_spill] sm:$0xff]  ;;  %v11900_v51 = vld [vmem:[#allocation82_spill] sm:$0xff]  ;;  %v9597_v23 = vpop.f32.mrf.mxu3 }
 0x5be   :  { %v9560_v30 = vpop.f32.mrf.mxu0  ;;  %v3378_v33 = vmul.f32 %v11899_v12, %v11899_v12  ;;  %v2714_v62 = vadd.f32 %v11901_v22, %v11900_v51  ;;  %v11904_v22 = vld [vmem:[#allocation84_spill] sm:$0xff]  ;;  %v11905_v51 = vld [vmem:[#allocation83_spill] sm:$0xff] }
 0x5bf   :  { %v3305_v63 = vadd.f32 %v3304_v41, %v11895_v37  ;;  %v3438_v42 = vadd.f32 %v3437_v31, %v3375_v5  ;;  %v3379_v5 = vmul.f32 %v9369_v15, %v9369_v15  ;;  %v11902_v31 = vld [vmem:[#allocation69_spill] sm:$0xff] }
 0x5c0   :  { %v3047_v37 = vadd.f32 %v11902_v31, %v2878_v50  ;;  %v2883_v4 = vadd.f32 %v9393_v46, %v2714_v62  ;;  %v3381_v50 = vmul.f32 %v9377_v61, %v9377_v61 }
 0x5c1   :  { %v3306_v17 = vadd.f32 %v3305_v63, %v11898_v20  ;;  %v3439_v53 = vadd.f32 %v3438_v42, %v3376_v25  ;;  %v11903_v63 = vld [vmem:[#allocation106_spill] sm:$0xff] }
 0x5c2   :  { %v9572_v9 = vpop.f32.mrf.mxu2  ;;  %v3380_v42 = vmul.f32 %v11903_v63, %v11903_v63  ;;  %v9605_v62 = vadd.f32 %v9380_v8, %v3047_v37  ;;  %v3052_v46 = vadd.f32 %v9375_v24, %v2883_v4 }
 0x5c3   :  { %v3307_v18 = vadd.f32 %v3306_v17, %v9361_v19  ;;  %v3440_v41 = vadd.f32 %v3439_v53, %v3377_v26  ;;  %v2719_v26 = vadd.f32 %v11905_v51, %v11904_v22  ;;  %v3382_v22 = vmul.f32 %v9382_v7, %v9382_v7  ;;  %v11910_v19 = vld [vmem:[#allocation88_spill] sm:$0xff] }
 0x5c4   :  { %11906 = vst [vmem:[#allocation89_spill] sm:$0xff] %v9605_v62  ;;  %v9622_v24 = vadd.f32 %v9389_v14, %v3052_v46 }
 0x5c5   :  { %v3308_v34 = vadd.f32 %v3307_v18, %v11899_v12  ;;  %v3441_v25 = vadd.f32 %v3440_v41, %v3378_v33  ;;  %v9607_v18 = vpop.f32.mrf.mxu1  ;;  %v2888_v33 = vadd.f32 %v9402_v36, %v2719_v26  ;;  %v3383_v12 = vmul.f32 %v9605_v62, %v9605_v62  ;;  %v11909_v36 = vld [vmem:[#allocation140_spill] sm:$0xff]  ;;  %v9634_v46 = vpop.f32.mrf.mxu3 }
 0x5c6   :  { %v9583_v60 = vpop.f32.mrf.mxu0 }
 0x5c7   :  { %v3309_v17 = vadd.f32 %v3308_v34, %v9369_v15  ;;  %v3442_v53 = vadd.f32 %v3441_v25, %v3379_v5  ;;  %v11907_v5 = vld [vmem:[#allocation86_spill] sm:$0xff]  ;;  %v11908_v25 = vld [vmem:[#allocation85_spill] sm:$0xff]  ;;  %v3057_v4 = vadd.f32 %v11909_v36, %v2888_v33 }
 0x5c8   :  { %v2724_v51 = vadd.f32 %v11908_v25, %v11907_v5  ;;  %v11911_v5 = vld [vmem:[#allocation87_spill] sm:$0xff]  ;;  %v11913_v36 = vld [vmem:[#allocation142_spill] sm:$0xff] }
 0x5c9   :  { %v3310_v41 = vadd.f32 %v3309_v17, %v11903_v63  ;;  %v3443_v31 = vadd.f32 %v3442_v53, %v3380_v42  ;;  %v2729_v25 = vadd.f32 %v11911_v5, %v11910_v19  ;;  %v9639_v33 = vadd.f32 %v9398_v1, %v3057_v4  ;;  %v11915_v5 = vld [vmem:[#allocation90_spill] sm:$0xff] }
 0x5ca   :  { %v9595_v20 = vpop.f32.mrf.mxu2  ;;  %v2893_v42 = vadd.f32 %v9412_v28, %v2724_v51  ;;  %v3385_v28 = vmul.f32 %v9622_v24, %v9622_v24 }
 0x5cb   :  { %v3311_v8 = vadd.f32 %v3310_v41, %v9377_v61  ;;  %v3444_v37 = vadd.f32 %v3443_v31, %v3381_v50  ;;  %v11912_v41 = vld [vmem:[#allocation141_spill] sm:$0xff]  ;;  %v2898_v51 = vadd.f32 %v9440_v54, %v2729_v25  ;;  %v11916_v54 = vld [vmem:[#allocation144_spill] sm:$0xff] }
 0x5cc   :  { %v3384_v50 = vmul.f32 %v11912_v41, %v11912_v41  ;;  %v7934_v31 = vld [vmem:[#allocation8] sm:$0xff] }
 0x5cd   :  { %v3312_v26 = vadd.f32 %v3311_v8, %v9382_v7  ;;  %v3445_v17 = vadd.f32 %v3444_v37, %v3382_v22  ;;  %v3062_v22 = vadd.f32 %v9395_v43, %v2893_v42  ;;  %5204 = vmatpush.bf16.msra.mxu1 %v7934_v31  ;;  %v9646_v37 = vpop.f32.mrf.mxu1  ;;  %v3387_v43 = vmul.f32 %v9639_v33, %v9639_v33  ;;  %v11918_v7 = vld [vmem:[#allocation145_spill] sm:$0xff] }
 0x5ce   :  { %v9614_v34 = vpop.f32.mrf.mxu0 }
 0x5cf   :  { %v3313_v61 = vadd.f32 %v3312_v26, %v9605_v62  ;;  %v3446_v14 = vadd.f32 %v3445_v17, %v3383_v12  ;;  %v3386_v26 = vmul.f32 %v11913_v36, %v11913_v36  ;;  %v11914_v17 = vld [vmem:[#allocation91_spill] sm:$0xff]  ;;  %v9656_v42 = vadd.f32 %v11916_v54, %v3062_v22  ;;  %v9676_v54 = vpop.f32.mrf.mxu3 }
 0x5d0   :  { %v2734_v62 = vadd.f32 %v11915_v5, %v11914_v17  ;;  %v3388_v17 = vmul.f32 %v11918_v7, %v11918_v7  ;;  %v11919_v5 = vld [vmem:[#allocation93_spill] sm:$0xff] }
 0x5d1   :  { %v3314_v19 = vadd.f32 %v3313_v61, %v11912_v41  ;;  %v3447_v12 = vadd.f32 %v3446_v14, %v3384_v50  ;;  %v11917_v61 = vld [vmem:[#allocation143_spill] sm:$0xff]  ;;  %v3389_v22 = vmul.f32 %v9656_v42, %v9656_v42 }
 0x5d2   :  { %v9627_v53 = vpop.f32.mrf.mxu2  ;;  %v3067_v25 = vadd.f32 %v11917_v61, %v2898_v51  ;;  %v2903_v50 = vadd.f32 %v9475_v35, %v2734_v62 }
 0x5d3   :  { %v3315_v1 = vadd.f32 %v3314_v19, %v9622_v24  ;;  %v3448_v4 = vadd.f32 %v3447_v12, %v3385_v28  ;;  %v2739_v28 = vadd.f32 %v9451_v57, %v11919_v5 }
 0x5d4   :  { %v9669_v51 = vadd.f32 %v9430_v3, %v3067_v25 }
 0x5d5   :  { %v3316_v31 = vadd.f32 %v3315_v1, %v11913_v36  ;;  %v3449_v41 = vadd.f32 %v3448_v4, %v3386_v26  ;;  %v11920_v1 = vld [vmem:[#allocation94_spill] sm:$0xff]  ;;  %v3072_v26 = vadd.f32 %v9425_v49, %v2903_v50  ;;  %v2908_v4 = vadd.f32 %v9512_v56, %v2739_v28  ;;  %v2758_v50 = vpop.f32.mrf.mxu1 }
 0x5d6   :  { %v9644_v8 = vpop.f32.mrf.mxu0  ;;  %v2742_v35 = vadd.f32 %v9477_v58, %v11920_v1  ;;  %v3392_v1 = vmul.f32 %v9465_v40, %v9465_v40 }
 0x5d7   :  { %v3317_v19 = vadd.f32 %v3316_v31, %v9639_v33  ;;  %v3450_v12 = vadd.f32 %v3449_v41, %v3387_v43  ;;  %v3390_v41 = vmul.f32 %v9432_v47, %v9432_v47  ;;  %v11921_v43 = vld [vmem:[#allocation95_spill] sm:$0xff]  ;;  %v11922_v31 = vld [vmem:[#allocation96_spill] sm:$0xff]  ;;  %v9692_v28 = vadd.f32 %v9463_v6, %v3072_v26 }
 0x5d8   :  { %v2744_v61 = vadd.f32 %v9497_v21, %v11921_v43  ;;  %v2911_v25 = vadd.f32 %v9532_v52, %v2742_v35  ;;  %v2747_v49 = vadd.f32 %v9524_v48, %v11922_v31  ;;  %v3077_v21 = vadd.f32 %v9470_v16, %v2908_v4  ;;  %v11925_v31 = vld [vmem:[#allocation99_spill] sm:$0xff] }
 0x5d9   :  { %v3318_v62 = vadd.f32 %v3317_v19, %v11918_v7  ;;  %v3451_v57 = vadd.f32 %v3450_v12, %v3388_v17  ;;  %v3391_v17 = vmul.f32 %v9669_v51, %v9669_v51  ;;  %v3393_v16 = vmul.f32 %v9692_v28, %v9692_v28 }
 0x5da   :  { %v2922_v14 = vpop.f32.mrf.mxu2  ;;  %v2913_v19 = vadd.f32 %v9552_v29, %v2744_v61  ;;  %v2916_v35 = vadd.f32 %v9572_v9, %v2747_v49  ;;  %v9707_v29 = vadd.f32 %v9502_v39, %v3077_v21  ;;  %v3096_v39 = vpop.f32.mrf.mxu3  ;;  %v11926_v21 = vld [vmem:[#allocation100_spill] sm:$0xff] }
 0x5db   :  { %v3319_v3 = vadd.f32 %v3318_v62, %v9656_v42  ;;  %v3452_v56 = vadd.f32 %v3451_v57, %v3389_v22  ;;  %v3080_v22 = vadd.f32 %v9491_v13, %v2911_v25  ;;  %v11923_v62 = vld [vmem:[#allocation97_spill] sm:$0xff] }
 0x5dc   :  { %v2749_v57 = vadd.f32 %v9547_v44, %v11923_v62  ;;  %v3082_v4 = vadd.f32 %v9517_v10, %v2913_v19  ;;  %v3394_v44 = vmul.f32 %v9504_v27, %v9504_v27  ;;  %v3085_v25 = vadd.f32 %v9542_v55, %v2916_v35 }
 0x5dd   :  { %v3320_v5 = vadd.f32 %v3319_v3, %v9432_v47  ;;  %v3453_v12 = vadd.f32 %v3452_v56, %v3390_v41  ;;  %v11924_v41 = vld [vmem:[#allocation98_spill] sm:$0xff]  ;;  %v9717_v3 = vadd.f32 %v9522_v32, %v3080_v22  ;;  %v2754_v10 = vadd.f32 %v9607_v18, %v11925_v31  ;;  %v2761_v19 = vpop.f32.mrf.mxu1 }
 0x5de   :  { %v9684_v58 = vpop.f32.mrf.mxu0  ;;  %v2752_v43 = vadd.f32 %v9574_v11, %v11924_v41  ;;  %v2918_v9 = vadd.f32 %v9595_v20, %v2749_v57  ;;  %v3395_v20 = vmul.f32 %v9707_v29, %v9707_v29  ;;  %v2757_v55 = vadd.f32 %v9646_v37, %v11926_v21 }
 0x5df   :  { %v3321_v48 = vadd.f32 %v3320_v5, %v9669_v51  ;;  %v3454_v6 = vadd.f32 %v3453_v12, %v3391_v17  ;;  %v9727_v17 = vadd.f32 %v9540_v38, %v3082_v4  ;;  %v2923_v18 = vadd.f32 %v2922_v14, %v2754_v10  ;;  %v11927_v38 = vld [vmem:[#allocation101_spill] sm:$0xff] }
 0x5e0   :  { %v2921_v49 = vadd.f32 %v9627_v53, %v2752_v43  ;;  %v3087_v12 = vadd.f32 %v9565_v2, %v2918_v9  ;;  %v9736_v22 = vadd.f32 %v9560_v30, %v3085_v25  ;;  %v2759_v35 = vadd.f32 %v2758_v50, %v11927_v38 }
 0x5e1   :  { %v3322_v26 = vadd.f32 %v3321_v48, %v9465_v40  ;;  %v3455_v13 = vadd.f32 %v3454_v6, %v3392_v1  ;;  %v3396_v48 = vmul.f32 %v9717_v3, %v9717_v3  ;;  %v3397_v2 = vmul.f32 %v9727_v17, %v9727_v17 }
 0x5e2   :  { %v2925_v52 = vpop.f32.mrf.mxu2  ;;  %v3090_v62 = vadd.f32 %v9597_v23, %v2921_v49  ;;  %v9744_v14 = vadd.f32 %v9583_v60, %v3087_v12  ;;  %v3398_v50 = vmul.f32 %v9736_v22, %v9736_v22  ;;  %v7949_v23 = vld [vmem:[#allocation8 + $0x78] sm:$0xff] }
 0x5e3   :  { %v3323_v61 = vadd.f32 %v3322_v26, %v9692_v28  ;;  %v3456_v11 = vadd.f32 %v3455_v13, %v3393_v16  ;;  %v2926_v57 = vadd.f32 %v2925_v52, %v2757_v55  ;;  %v3092_v26 = vadd.f32 %v9634_v46, %v2923_v18  ;;  %v11928_v52 = vld [vmem:[#allocation102_spill] sm:$0xff]  ;;  %v3099_v46 = vpop.f32.mrf.mxu3  ;;  %5366 = vmatpush.bf16.msrb.mxu2 %v7949_v23 }
 0x5e4   :  { %v2762_v41 = vadd.f32 %v2761_v19, %v11928_v52  ;;  %v9752_v43 = vadd.f32 %v9614_v34, %v3090_v62  ;;  %v11929_v19 = vld [vmem:[#allocation103_spill] sm:$0xff] }
 0x5e5   :  { %v3324_v56 = vadd.f32 %v3323_v61, %v9504_v27  ;;  %v3457_v1 = vadd.f32 %v3456_v11, %v3394_v44  ;;  %v3095_v13 = vadd.f32 %v9676_v54, %v2926_v57  ;;  %v3399_v44 = vmul.f32 %v9744_v14, %v9744_v14  ;;  %v2763_v34 = vpop.f32.mrf.mxu1 }
 0x5e6   :  { %v3265_v5 = vpop.f32.mrf.mxu0  ;;  %v9759_v25 = vadd.f32 %v9644_v8, %v3092_v26  ;;  %v3400_v54 = vmul.f32 %v9752_v43, %v9752_v43  ;;  %v2764_v12 = vadd.f32 %v2763_v34, %v11929_v19 }
 0x5e7   :  { %v3325_v53 = vadd.f32 %v3324_v56, %v9707_v29  ;;  %v3458_v6 = vadd.f32 %v3457_v1, %v3395_v20  ;;  %v9765_v20 = vadd.f32 %v9684_v58, %v3095_v13 }
 0x5e8   :  { %v3401_v8 = vmul.f32 %v9759_v25, %v9759_v25 }
 0x5e9   :  { %v3326_v37 = vadd.f32 %v3325_v53, %v9717_v3  ;;  %v3459_v4 = vadd.f32 %v3458_v6, %v3396_v48  ;;  %v3402_v53 = vmul.f32 %v9765_v20, %v9765_v20 }
 0x5ea   :  { %v2927_v32 = vpop.f32.mrf.mxu2 }
 0x5eb   :  { %v2928_v16 = vadd.f32 %v2927_v32, %v2759_v35  ;;  %v3327_v30 = vadd.f32 %v3326_v37, %v9727_v17  ;;  %v3460_v9 = vadd.f32 %v3459_v4, %v3397_v2  ;;  %v7957_v4 = vld [vmem:[#allocation8 + $0xb8] sm:$0xff] }
 0x5ec   :  { %5535 = vmatpush.bf16.msrb.mxu3 %v7957_v4 }
 0x5ed   :  { %v3328_v60 = vadd.f32 %v3327_v30, %v9736_v22  ;;  %v3097_v31 = vadd.f32 %v3096_v39, %v2928_v16  ;;  %v3461_v49 = vadd.f32 %v3460_v9, %v3398_v50 }
 0x5ee   :  { %v3268_v11 = vpop.f32.mrf.mxu0 }
 0x5ef   :  { %v3329_v56 = vadd.f32 %v3328_v60, %v9744_v14  ;;  %v3462_v21 = vadd.f32 %v3461_v49, %v3399_v44  ;;  %v9770_v39 = vadd.f32 %v3265_v5, %v3097_v31  ;;  %v3101_v5 = vpop.f32.mrf.mxu3 }
 0x5f1   :  { %v3330_v55 = vadd.f32 %v3329_v56, %v9752_v43  ;;  %v3463_v18 = vadd.f32 %v3462_v21, %v3400_v54  ;;  %v3403_v62 = vmul.f32 %v9770_v39, %v9770_v39 }
 0x5f2   :  { %v2930_v61 = vpop.f32.mrf.mxu2 }
 0x5f3   :  { %v2931_v10 = vadd.f32 %v2930_v61, %v2762_v41  ;;  %v3331_v1 = vadd.f32 %v3330_v55, %v9759_v25  ;;  %v3464_v38 = vadd.f32 %v3463_v18, %v3401_v8 }
 0x5f5   :  { %v3100_v32 = vadd.f32 %v3099_v46, %v2931_v10  ;;  %v3332_v35 = vadd.f32 %v3331_v1, %v9765_v20  ;;  %v3465_v6 = vadd.f32 %v3464_v38, %v3402_v53 }
 0x5f6   :  { %v3270_v16 = vpop.f32.mrf.mxu0 }
 0x5f7   :  { %v9776_v48 = vadd.f32 %v3268_v11, %v3100_v32  ;;  %v3333_v37 = vadd.f32 %v3332_v35, %v9770_v39  ;;  %v3466_v30 = vadd.f32 %v3465_v6, %v3403_v62  ;;  %v7948_v32 = vld [vmem:[#allocation8 + $0x70] sm:$0xff]  ;;  %v3479_v62 = vld [vmem:[%s11508_s2] sm:$0x1] }
 0x5f8   :  { %5367 = vmatpush.bf16.msrb.mxu2 %v7948_v32  ;;  %v7956_v32 = vld [vmem:[#allocation8 + $0xb0] sm:$0xff] }
 0x5f9   :  { %v3404_v2 = vmul.f32 %v9776_v48, %v9776_v48  ;;  %v3334_v50 = vadd.f32 %v3333_v37, %v9776_v48  ;;  %v3492_v37 = vld [vmem:[%s11509_s3] sm:$0x1]  ;;  %5536 = vmatpush.bf16.msrb.mxu3 %v7956_v32 }
 0x5fa   :  { %v2932_v58 = vpop.f32.mrf.mxu2 }
 0x5fb   :  { %v2933_v57 = vadd.f32 %v2932_v58, %v2764_v12  ;;  %v3467_v52 = vadd.f32 %v3466_v30, %v3404_v2 }
 0x5fd   :  { %v3102_v26 = vadd.f32 %v3101_v5, %v2933_v57 }
 0x5ff   :  { %v3271_v23 = vadd.f32 %v3270_v16, %v3102_v26 }
 0x601   :  { %v3335_v41 = vadd.f32 %v3334_v50, %v3271_v23  ;;  %v3405_v13 = vmul.f32 %v3271_v23, %v3271_v23 }
 0x603   :  { %v3336_v9 = vrot.slane %v3335_v41, 4  ;;  %v3468_v60 = vadd.f32 %v3467_v52, %v3405_v13  ;;  %v11930_v13 = vld [vmem:[#allocation110_spill] sm:$0xff] }
 0x605   :  { %v3337_v61 = vadd.f32 %v3336_v9, %v3335_v41  ;;  %v3469_v46 = vrot.slane %v3468_v60, 4 }
 0x607   :  { %v3338_v44 = vrot.slane %v3337_v61, 2  ;;  %v3470_v31 = vadd.f32 %v3469_v46, %v3468_v60 }
 0x609   :  { %v3339_v10 = vadd.f32 %v3338_v44, %v3337_v61  ;;  %v3471_v49 = vrot.slane %v3470_v31, 2  ;;  %v11931_v61 = vld [vmem:[#allocation111_spill] sm:$0xff]  ;;  %v11932_v44 = vld [vmem:[#allocation112_spill] sm:$0xff] }
 0x60b   :  { %v3340_v11 = vrot.slane %v3339_v10, 1  ;;  %v3472_v34 = vadd.f32 %v3471_v49, %v3470_v31  ;;  %v11933_v31 = vld [vmem:[#allocation113_spill] sm:$0xff]  ;;  %v11934_v49 = vld [vmem:[#allocation114_spill] sm:$0xff] }
 0x60d   :  { %v3341_v56 = vadd.f32 %v3340_v11, %v3339_v10  ;;  %v3473_v54 = vrot.slane %v3472_v34, 1 }
 0x60f   :  { %v3474_v21 = vadd.f32 %v3473_v54, %v3472_v34  ;;  %v3475_v55 = vmul.f32 0.001953125, %v3341_v56  ;;  %v11935_v34 = vld [vmem:[#allocation115_spill] sm:$0xff] }
 0x611   :  { %v3476_v8 = vmul.f32 0.001953125, %v3474_v21  ;;  %v3477_v19 = vmul.f32 %v3475_v55, %v3475_v55 }
 0x613   :  { %v3478_v12 = vsub.f32 %v3476_v8, %v3477_v19  ;;  %v11937_v8 = vld [vmem:[#allocation75_spill] sm:$0xff] }
 0x615   :  { %v3480_v18 = vadd.f32 1e-05, %v3478_v12  ;;  %v11938_v12 = vld [vmem:[#allocation108_spill] sm:$0xff] }
 0x617   :  { %8031 = vrsqrt.f32 %v3480_v18  ;;  %vm3487_vm1 = vweird.f32 %v3480_v18 }
 0x61d   :  { %v8032_v1 = vpop.eup %8031 }
 0x61e   :  { %v3482_v53 = vmul.f32 %v8032_v1, %v3480_v18  ;;  %vm3488_vm0 = vweird.f32 %v8032_v1 }
 0x61f   :  { %vm3489_vm2 = vmor %vm3487_vm1, %vm3488_vm0 }
 0x620   :  { %v3483_v58 = vmul.f32 %v8032_v1, %v3482_v53  ;;  %v11940_v53 = vld [vmem:[#allocation141_spill] sm:$0xff] }
 0x622   :  { %v3484_v38 = vmul.f32 0.5, %v3483_v58 }
 0x624   :  { %v3485_v35 = vsub.f32 1.5, %v3484_v38 }
 0x626   :  { %v3486_v57 = vmul.f32 %v8032_v1, %v3485_v35 }
 0x628   :  { %v3490_v5 = vsel %vm3489_vm2, %v8032_v1, %v3486_v57  ;;  %v11939_v1 = vld [vmem:[#allocation89_spill] sm:$0xff] }
 0x629   :  { %v3491_v6 = vmul.f32 %v3490_v5, %v3479_v62 }
 0x62b   :  { %v3493_v2 = vmul.f32 %v3491_v6, %v3475_v55  ;;  %v9791_v26 = vperm.slane %v3491_v6, 0 }
 0x62d   :  { %v3494_v16 = vsub.f32 %v3492_v37, %v3493_v2  ;;  %v3561_v4 = vmul.f32 %v9791_v26, %v3271_v23  ;;  %v3498_v41 = vmul.f32 %v9791_v26, %v9253_v45  ;;  %v3499_v9 = vmul.f32 %v9791_v26, %v11930_v13 }
 0x62e   :  { %v3500_v60 = vmul.f32 %v9791_v26, %v9259_v59  ;;  %v3501_v46 = vmul.f32 %v9791_v26, %v11931_v61  ;;  %v3502_v23 = vmul.f32 %v9791_v26, %v11932_v44  ;;  %v3503_v10 = vmul.f32 %v9791_v26, %v11933_v31  ;;  %v11936_v59 = vld [vmem:[#allocation116_spill] sm:$0xff] }
 0x62f   :  { %v9794_v30 = vperm.slane %v3494_v16, 0  ;;  %v3504_v11 = vmul.f32 %v9791_v26, %v11934_v49  ;;  %v9813_v45 = vmul.f32 %v9791_v26, %v11935_v34  ;;  %v9817_v56 = vmul.f32 %v9791_v26, %v9277_v0  ;;  %v7945_v61 = vld [vmem:[#allocation8 + $0x58] sm:$0xff] }
 0x630   :  { %v9821_v54 = vmul.f32 %v9791_v26, %v11936_v59  ;;  %v3535_v21 = vmul.f32 %v9791_v26, %v9369_v15  ;;  %v3536_v55 = vmul.f32 %v9791_v26, %v11903_v63  ;;  %v3537_v19 = vmul.f32 %v9791_v26, %v11937_v8  ;;  %v7947_v63 = vld [vmem:[#allocation8 + $0x68] sm:$0xff]  ;;  %v7953_v59 = vld [vmem:[#allocation8 + $0x98] sm:$0xff] }
 0x631   :  { %v3628_v50 = vadd.f32 %v9794_v30, %v3561_v4  ;;  %v3538_v18 = vmul.f32 %v9791_v26, %v11938_v12  ;;  %v3539_v0 = vmul.f32 %v9791_v26, %v11939_v1  ;;  %v3540_v58 = vmul.f32 %v9791_v26, %v11940_v53  ;;  %5368 = vmatpush.bf16.msrb.mxu2 %v7947_v63 }
 0x632   :  { %v3541_v38 = vmul.f32 %v9791_v26, %v9622_v24  ;;  %v3542_v15 = vmul.f32 %v9791_v26, %v11913_v36  ;;  %v3543_v35 = vmul.f32 %v9791_v26, %v9639_v33  ;;  %v3544_v62 = vmul.f32 %v9791_v26, %v11918_v7  ;;  %v7955_v7 = vld [vmem:[#allocation8 + $0xa8] sm:$0xff] }
 0x633   :  { %v3692_v52 = vmax.f32 %v3628_v50, 0.0  ;;  %v3545_v57 = vmul.f32 %v9791_v26, %v9656_v42  ;;  %v3546_v5 = vmul.f32 %v9791_v26, %v9432_v47  ;;  %v3547_v24 = vmul.f32 %v9791_v26, %v9669_v51  ;;  %5537 = vmatpush.bf16.msrb.mxu3 %v7955_v7 }
 0x634   :  { %v3548_v36 = vmul.f32 %v9791_v26, %v9465_v40  ;;  %v3549_v6 = vmul.f32 %v9791_v26, %v9692_v28  ;;  %v3550_v33 = vmul.f32 %v9791_v26, %v9504_v27  ;;  %v3551_v42 = vmul.f32 %v9791_v26, %v9707_v29 }
 0x635   :  { %3756 = vst [vmem:[#allocation2 + $0x339] sm:$0xff] %v3692_v52  ;;  %v3552_v47 = vmul.f32 %v9791_v26, %v9717_v3  ;;  %v3553_v51 = vmul.f32 %v9791_v26, %v9727_v17  ;;  %v3554_v40 = vmul.f32 %v9791_v26, %v9736_v22  ;;  %v3555_v28 = vmul.f32 %v9791_v26, %v9744_v14  ;;  %v7946_v3 = vld [vmem:[#allocation8 + $0x60] sm:$0xff] }
 0x636   :  { %v3556_v27 = vmul.f32 %v9791_v26, %v9752_v43  ;;  %v3557_v37 = vmul.f32 %v9791_v26, %v9759_v25  ;;  %v3558_v29 = vmul.f32 %v9791_v26, %v9765_v20  ;;  %v3559_v17 = vmul.f32 %v9791_v26, %v9770_v39  ;;  %5369 = vmatpush.bf16.msrb.mxu2 %v7946_v3 }
 0x637   :  { %v3560_v22 = vmul.f32 %v9791_v26, %v9776_v48  ;;  %v9876_v2 = vadd.f32 %v9794_v30, %v3498_v41  ;;  %v9879_v14 = vadd.f32 %v9794_v30, %v3499_v9  ;;  %v9882_v43 = vadd.f32 %v9794_v30, %v3500_v60  ;;  %v7954_v48 = vld [vmem:[#allocation8 + $0xa0] sm:$0xff] }
 0x638   :  { %v9885_v25 = vadd.f32 %v9794_v30, %v3501_v46  ;;  %v9888_v20 = vadd.f32 %v9794_v30, %v3502_v23  ;;  %v9891_v39 = vadd.f32 %v9794_v30, %v3503_v10  ;;  %v9894_v16 = vadd.f32 %v9794_v30, %v3504_v11  ;;  %5538 = vmatpush.bf16.msrb.mxu3 %v7954_v48 }
 0x639   :  { %v9897_v4 = vadd.f32 %v9794_v30, %v3535_v21  ;;  %v9900_v50 = vadd.f32 %v9794_v30, %v3536_v55  ;;  %v9903_v52 = vadd.f32 %v9794_v30, %v3537_v19  ;;  %v9906_v41 = vadd.f32 %v9794_v30, %v3538_v18 }
 0x63a   :  { %11941 = vst [vmem:[#allocation92_spill] sm:$0xff] %v9888_v20  ;;  %v9909_v13 = vadd.f32 %v9794_v30, %v3539_v0  ;;  %v9912_v9 = vadd.f32 %v9794_v30, %v3540_v58  ;;  %v9915_v60 = vadd.f32 %v9794_v30, %v3541_v38  ;;  %v9918_v46 = vadd.f32 %v9794_v30, %v3542_v15  ;;  %v7944_v0 = vld [vmem:[#allocation8 + $0x50] sm:$0xff] }
 0x63b   :  { %11942 = vst [vmem:[#allocation109_spill] sm:$0xff] %v9891_v39  ;;  %v9921_v44 = vadd.f32 %v9794_v30, %v3543_v35  ;;  %v9924_v23 = vadd.f32 %v9794_v30, %v3544_v62  ;;  %v9927_v31 = vadd.f32 %v9794_v30, %v3545_v57  ;;  %v9930_v10 = vadd.f32 %v9794_v30, %v3546_v5  ;;  %v7952_v5 = vld [vmem:[#allocation8 + $0x90] sm:$0xff] }
 0x63c   :  { %v9933_v49 = vadd.f32 %v9794_v30, %v3547_v24  ;;  %v9936_v11 = vadd.f32 %v9794_v30, %v3548_v36  ;;  %v9939_v34 = vadd.f32 %v9794_v30, %v3549_v6  ;;  %5370 = vmatpush.bf16.msrb.mxu2 %v7945_v61  ;;  %v9942_v32 = vadd.f32 %v9794_v30, %v3550_v33  ;;  %v11954_v24 = vld [vmem:[#allocation117_spill] sm:$0xff] }
 0x63d   :  { %v9945_v21 = vadd.f32 %v9794_v30, %v3551_v42  ;;  %v9948_v55 = vadd.f32 %v9794_v30, %v3552_v47  ;;  %v9951_v8 = vadd.f32 %v9794_v30, %v3553_v51  ;;  %v9954_v19 = vadd.f32 %v9794_v30, %v3554_v40  ;;  %5539 = vmatpush.bf16.msrb.mxu3 %v7953_v59  ;;  %v11956_v51 = vld [vmem:[#allocation119_spill] sm:$0xff] }
 0x63e   :  { %11943 = vst [vmem:[#allocation70_spill] sm:$0xff] %v9942_v32  ;;  %v9957_v12 = vadd.f32 %v9794_v30, %v3555_v28  ;;  %v9960_v18 = vadd.f32 %v9794_v30, %v3556_v27  ;;  %v9963_v1 = vadd.f32 %v9794_v30, %v3557_v37  ;;  %v9966_v53 = vadd.f32 %v9794_v30, %v3558_v29 }
 0x63f   :  { %11944 = vst [vmem:[#allocation82_spill] sm:$0xff] %v9945_v21  ;;  %v9969_v58 = vadd.f32 %v9794_v30, %v3559_v17  ;;  %v9972_v38 = vadd.f32 %v9794_v30, %v3560_v22  ;;  %v11633_v15 = vmax.f32 %v9876_v2, 0.0  ;;  %v9977_v63 = vadd.f32 %v9794_v30, %v9813_v45  ;;  %v11955_v45 = vld [vmem:[#allocation118_spill] sm:$0xff]  ;;  %v11958_v22 = vld [vmem:[#allocation121_spill] sm:$0xff] }
 0x640   :  { %11945 = vst [vmem:[#allocation81_spill] sm:$0xff] %v9948_v55  ;;  %v11632_v35 = vmax.f32 %v9879_v14, 0.0  ;;  %v11627_v62 = vmax.f32 %v9882_v43, 0.0  ;;  %v11626_v57 = vmax.f32 %v9885_v25, 0.0  ;;  %5371 = vmatpush.bf16.msrb.mxu2 %v7944_v0  ;;  %v3508_v36 = vmul.f32 %v9791_v26, %v11954_v24  ;;  %v7951_v17 = vld [vmem:[#allocation8 + $0x88] sm:$0xff] }
 0x641   :  { %11946 = vst [vmem:[#allocation69_spill] sm:$0xff] %v9951_v8  ;;  %v9986_v6 = vadd.f32 %v9794_v30, %v9817_v56  ;;  %v11625_v33 = vmax.f32 %v9888_v20, 0.0  ;;  %v3509_v7 = vmul.f32 %v9791_v26, %v11955_v45  ;;  %v9995_v42 = vadd.f32 %v9794_v30, %v9821_v54  ;;  %5540 = vmatpush.bf16.msrb.mxu3 %v7952_v5  ;;  %v7943_v56 = vld [vmem:[#allocation8 + $0x48] sm:$0xff]  ;;  %v11957_v54 = vld [vmem:[#allocation120_spill] sm:$0xff]  ;;  %v7942_v45 = vld [vmem:[#allocation8 + $0x40] sm:$0xff] }
 0x642   :  { %11947 = vst [vmem:[#allocation106_spill] sm:$0xff] %v9954_v19  ;;  %v11624_v47 = vmax.f32 %v9891_v39, 0.0  ;;  %v3510_v40 = vmul.f32 %v9791_v26, %v11956_v51  ;;  %v10003_v28 = vadd.f32 %v9794_v30, %v3508_v36  ;;  %v11630_v27 = vmax.f32 %v9894_v16, 0.0  ;;  %v11959_v0 = vld [vmem:[#allocation122_spill] sm:$0xff]  ;;  %v7964_v39 = vld [vmem:[#allocation8 + $0xf0] sm:$0xff] }
 0x643   :  { %11948 = vst [vmem:[#allocation84_spill] sm:$0xff] %v9957_v12  ;;  %v3511_v37 = vmul.f32 %v9791_v26, %v11957_v54  ;;  %v10011_v29 = vadd.f32 %v9794_v30, %v3509_v7  ;;  %v11628_v3 = vmax.f32 %v9977_v63, 0.0  ;;  %v3512_v48 = vmul.f32 %v9791_v26, %v11958_v22  ;;  %v11960_v7 = vld [vmem:[#allocation123_spill] sm:$0xff]  ;;  %v11961_v54 = vld [vmem:[#allocation124_spill] sm:$0xff] }
 0x644   :  { %11949 = vst [vmem:[#allocation83_spill] sm:$0xff] %v9960_v18  ;;  %5372 = vmatpush.bf16.msrb.mxu2 %v7943_v56  ;;  %v10019_v61 = vadd.f32 %v9794_v30, %v3510_v40  ;;  %v11629_v59 = vmax.f32 %v9986_v6, 0.0  ;;  %v3513_v5 = vmul.f32 %v9791_v26, %v11959_v0  ;;  %v11631_v36 = vmax.f32 %v9995_v42, 0.0  ;;  %v7950_v0 = vld [vmem:[#allocation8 + $0x80] sm:$0xff]  ;;  %v11989_v19 = vld [vmem:[#allocation63_spill] sm:$0xff] }
 0x645   :  { %11950 = vst [vmem:[#allocation86_spill] sm:$0xff] %v9963_v1  ;;  %v10027_v24 = vadd.f32 %v9794_v30, %v3511_v37  ;;  %5541 = vmatpush.bf16.msrb.mxu3 %v7951_v17  ;;  %v3514_v56 = vmul.f32 %v9791_v26, %v11960_v7  ;;  %v10035_v51 = vadd.f32 %v9794_v30, %v3512_v48  ;;  %v11634_v40 = vmax.f32 %v10003_v28, 0.0  ;;  %v11962_v48 = vld [vmem:[#allocation125_spill] sm:$0xff] }
 0x646   :  { %11951 = vst [vmem:[#allocation85_spill] sm:$0xff] %v9966_v53  ;;  %v3515_v37 = vmul.f32 %v9791_v26, %v11961_v54  ;;  %v10043_v22 = vadd.f32 %v9794_v30, %v3513_v5  ;;  %v11635_v17 = vmax.f32 %v10011_v29, 0.0  ;;  %v3516_v7 = vmul.f32 %v9791_v26, %v11962_v48  ;;  %v7965_v5 = vld [vmem:[#allocation8 + $0xf8] sm:$0xff]  ;;  %v11963_v54 = vld [vmem:[#allocation126_spill] sm:$0xff]  ;;  %v11974_v1 = vld [vmem:[#allocation133_spill] sm:$0xff] }
 0x647   :  { %11952 = vst [vmem:[#allocation140_spill] sm:$0xff] %v9969_v58  ;;  %5704 = vmatpush.bf16.msrb.mxu0 %v7965_v5  ;;  %v11970_v20 = vmax.f32 %v10035_v51, 0.0  ;;  %v11986_v18 = vld [vmem:[#allocation49_spill] sm:$0xff]  ;;  %v11995_v32 = vmax.f32 %v9876_v2, 0.0 }
 0x648   :  { %11953 = vst [vmem:[#allocation88_spill] sm:$0xff] %v9972_v38  ;;  %5373 = vmatpush.bf16.msrb.mxu2 %v7942_v45 }
 0x649   :  { %3693 = vst [vmem:[#allocation2 + $0x19] sm:$0xff] %v11633_v15  ;;  %5542 = vmatpush.bf16.msrb.mxu3 %v7950_v0 }
 0x64a   :  { %3694 = vst [vmem:[#allocation2 + $0x21] sm:$0xff] %v11632_v35  ;;  %v11966_v35 = vld [vmem:[#allocation129_spill] sm:$0xff] }
 0x64b   :  { %3695 = vst [vmem:[#allocation2 + $0x31] sm:$0xff] %v11627_v62  ;;  %v10059_v62 = vadd.f32 %v9794_v30, %v3515_v37  ;;  %v11965_v37 = vld [vmem:[#allocation128_spill] sm:$0xff]  ;;  %v3520_v15 = vmul.f32 %v9791_v26, %v11966_v35  ;;  %5705 = vmatpush.bf16.msrb.mxu0 %v7964_v39 }
 0x64c   :  { %3696 = vst [vmem:[#allocation2 + $0x39] sm:$0xff] %v11626_v57  ;;  %v3517_v57 = vmul.f32 %v9791_v26, %v11963_v54  ;;  %v3519_v54 = vmul.f32 %v9791_v26, %v11965_v37  ;;  %v11967_v37 = vld [vmem:[#allocation130_spill] sm:$0xff] }
 0x64d   :  { %3697 = vst [vmem:[#allocation2 + $0x49] sm:$0xff] %v11625_v33  ;;  %v11637_v33 = vmax.f32 %v10019_v61, 0.0  ;;  %v3521_v0 = vmul.f32 %v9791_v26, %v11967_v37  ;;  %v10099_v5 = vadd.f32 %v9794_v30, %v3520_v15  ;;  %v8036_v15 = vld [vmem:[#allocation2 + $0x1b0] sm:$0xff] }
 0x64e   :  { %3698 = vst [vmem:[#allocation2 + $0x51] sm:$0xff] %v11624_v47  ;;  %v10051_v47 = vadd.f32 %v9794_v30, %v3514_v56  ;;  %v11964_v56 = vld [vmem:[#allocation127_spill] sm:$0xff]  ;;  %v10093_v45 = vadd.f32 %v9794_v30, %v3519_v54  ;;  %v10112_v53 = vpack.c.bf16 %v8036_v15, %v8036_v15 }
 0x64f   :  { %3699 = vst [vmem:[#allocation2 + $0x61] sm:$0xff] %v11630_v27  ;;  %v3518_v48 = vmul.f32 %v9791_v26, %v11964_v56  ;;  %v10075_v27 = vadd.f32 %v9794_v30, %v3517_v57  ;;  %v3821_v56 = vld [vmem:[#allocation2 + $0x1] sm:$0xff]  ;;  %v3886_v57 = vld [vmem:[#allocation2 + $0xa] sm:$0xff]  ;;  %v10107_v58 = vadd.f32 %v9794_v30, %v3521_v0 }
 0x650   :  { %3700 = vst [vmem:[#allocation2 + $0x69] sm:$0xff] %v11628_v3  ;;  %v10067_v3 = vadd.f32 %v9794_v30, %v3516_v7  ;;  %v3822_v7 = vld [vmem:[#allocation2 + $0x9] sm:$0xff]  ;;  %v11975_v0 = vmax.f32 %v10051_v47, 0.0  ;;  %5205 = vmatmul.bf16.vlgmr.msra.gmra.mxu1 %v10112_v53 }
 0x651   :  { %3701 = vst [vmem:[#allocation2 + $0x79] sm:$0xff] %v11629_v59  ;;  %v11968_v59 = vld [vmem:[#allocation131_spill] sm:$0xff]  ;;  %v4334_v37 = vpack.c.bf16 %v3822_v7, %v3821_v56  ;;  %v11639_v35 = vmax.f32 %v10075_v27, 0.0  ;;  %v11976_v7 = vld [vmem:[#allocation134_spill] sm:$0xff]  ;;  %v11987_v12 = vmax.f32 %v10107_v58, 0.0 }
 0x652   :  { %3702 = vst [vmem:[#allocation2 + $0x81] sm:$0xff] %v11631_v36  ;;  %v3885_v36 = vld [vmem:[#allocation2 + $0x2] sm:$0xff]  ;;  %v3525_v39 = vmul.f32 %v9791_v26, %v11976_v7 }
 0x653   :  { %3703 = vst [vmem:[#allocation2 + $0x91] sm:$0xff] %v11634_v40  ;;  %v10083_v40 = vadd.f32 %v9794_v30, %v3518_v48  ;;  %v11969_v48 = vmax.f32 %v10027_v24, 0.0  ;;  %v4335_v38 = vpack.c.bf16 %v3886_v57, %v3885_v36  ;;  %5374 = vmatmul.bf16.vlgmr.msrb.gmra.mxu2 %v4334_v37  ;;  %v11979_v37 = vmax.f32 %v10067_v3, 0.0 }
 0x654   :  { %3704 = vst [vmem:[#allocation2 + $0x99] sm:$0xff] %v11635_v17  ;;  %v3522_v17 = vmul.f32 %v9791_v26, %v11968_v59  ;;  %v11971_v59 = vld [vmem:[#allocation132_spill] sm:$0xff]  ;;  %v10142_v7 = vadd.f32 %v9794_v30, %v3525_v39  ;;  %v11982_v39 = vld [vmem:[#allocation138_spill] sm:$0xff] }
 0x655   :  { %3705 = vst [vmem:[#allocation2 + $0xa9] sm:$0xff] %v11637_v33  ;;  %v3523_v54 = vmul.f32 %v9791_v26, %v11971_v59  ;;  %v7963_v33 = vld [vmem:[#allocation8 + $0xe8] sm:$0xff]  ;;  %v11641_v56 = vmax.f32 %v10083_v40, 0.0  ;;  %5543 = vmatmul.bf16.vlgmr.msrb.gmra.mxu3 %v4335_v38 }
 0x656   :  { %3706 = vst [vmem:[#allocation2 + $0xb1] sm:$0xff] %v11969_v48  ;;  %v11972_v48 = vmax.f32 %v10043_v22, 0.0  ;;  %v10117_v36 = vadd.f32 %v9794_v30, %v3522_v17  ;;  %v11978_v17 = vld [vmem:[#allocation135_spill] sm:$0xff]  ;;  %5706 = vmatpush.bf16.msrb.mxu0 %v7963_v33 }
 0x657   :  { %3707 = vst [vmem:[#allocation2 + $0xc1] sm:$0xff] %v11970_v20  ;;  %v3524_v20 = vmul.f32 %v9791_v26, %v11974_v1  ;;  %v10125_v57 = vadd.f32 %v9794_v30, %v3523_v54  ;;  %v11977_v1 = vmax.f32 %v10059_v62, 0.0  ;;  %v11980_v54 = vld [vmem:[#allocation136_spill] sm:$0xff] }
 0x658   :  { %3708 = vst [vmem:[#allocation2 + $0xc9] sm:$0xff] %v11972_v48  ;;  %v3526_v48 = vmul.f32 %v9791_v26, %v11978_v17  ;;  %v7962_v17 = vld [vmem:[#allocation8 + $0xe0] sm:$0xff] }
 0x659   :  { %11973 = vst [vmem:[#allocation87_spill] sm:$0xff] %v10112_v53  ;;  %v10134_v15 = vadd.f32 %v9794_v30, %v3524_v20  ;;  %v11981_v20 = vld [vmem:[#allocation137_spill] sm:$0xff]  ;;  %v11992_v55 = vmax.f32 %v10125_v57, 0.0 }
 0x65a   :  { %3709 = vst [vmem:[#allocation2 + $0xd9] sm:$0xff] %v11975_v0  ;;  %v3527_v0 = vmul.f32 %v9791_v26, %v11980_v54  ;;  %v3528_v59 = vmul.f32 %v9791_v26, %v11981_v20  ;;  %v10150_v38 = vadd.f32 %v9794_v30, %v3526_v48  ;;  %v3529_v54 = vmul.f32 %v9791_v26, %v11982_v39  ;;  %v11984_v20 = vld [vmem:[#allocation139_spill] sm:$0xff] }
 0x65b   :  { %3710 = vst [vmem:[#allocation2 + $0xe1] sm:$0xff] %v11977_v1  ;;  %v3530_v48 = vmul.f32 %v9791_v26, %v11984_v20  ;;  %v3531_v39 = vmul.f32 %v9791_v26, %v11986_v18  ;;  %5707 = vmatpush.bf16.msrb.mxu0 %v7962_v17  ;;  %v11988_v20 = vld [vmem:[#allocation58_spill] sm:$0xff]  ;;  %v11990_v18 = vmax.f32 %v10117_v36, 0.0 }
 0x65c   :  { %3711 = vst [vmem:[#allocation2 + $0xf1] sm:$0xff] %v11979_v37  ;;  %v10158_v1 = vadd.f32 %v9794_v30, %v3527_v0  ;;  %v3595_v53 = vadd.f32 %v9794_v30, %v3528_v59  ;;  %v3596_v0 = vadd.f32 %v9794_v30, %v3529_v54  ;;  %v3532_v59 = vmul.f32 %v9791_v26, %v11988_v20  ;;  %v11991_v54 = vld [vmem:[#allocation64_spill] sm:$0xff] }
 0x65d   :  { %3712 = vst [vmem:[#allocation2 + $0xf9] sm:$0xff] %v11639_v35  ;;  %v11983_v35 = vmax.f32 %v10093_v45, 0.0  ;;  %v3533_v37 = vmul.f32 %v9791_v26, %v11989_v19  ;;  %v3657_v8 = vmax.f32 %v10150_v38, 0.0  ;;  %v3534_v33 = vmul.f32 %v9791_v26, %v11991_v54 }
 0x65e   :  { %3713 = vst [vmem:[#allocation2 + $0x109] sm:$0xff] %v11641_v56  ;;  %v11985_v56 = vmax.f32 %v10099_v5, 0.0  ;;  %v3658_v17 = vmax.f32 %v10158_v1, 0.0  ;;  %v3599_v20 = vadd.f32 %v9794_v30, %v3532_v59  ;;  %v11993_v38 = vmax.f32 %v10134_v15, 0.0 }
 0x65f   :  { %3714 = vst [vmem:[#allocation2 + $0x111] sm:$0xff] %v11983_v35  ;;  %v7961_v35 = vld [vmem:[#allocation8 + $0xd8] sm:$0xff]  ;;  %v3600_v19 = vadd.f32 %v9794_v30, %v3533_v37  ;;  %v3660_v21 = vmax.f32 %v3596_v0, 0.0  ;;  %v11994_v26 = vmax.f32 %v10142_v7, 0.0  ;;  %v11998_v0 = vmax.f32 %v9977_v63, 0.0 }
 0x660   :  { %3715 = vst [vmem:[#allocation2 + $0x121] sm:$0xff] %v11985_v56  ;;  %v3597_v56 = vadd.f32 %v9794_v30, %v3530_v48  ;;  %v3659_v48 = vmax.f32 %v3595_v53, 0.0  ;;  %5708 = vmatpush.bf16.msrb.mxu0 %v7961_v35  ;;  %v7973_v37 = vld [vmem:[#allocation8 + $0x138] sm:$0xff]  ;;  %v7959_v53 = vld [vmem:[#allocation8 + $0xc8] sm:$0xff]  ;;  %v12003_v63 = vmax.f32 %v10019_v61, 0.0 }
 0x661   :  { %3716 = vst [vmem:[#allocation2 + $0x129] sm:$0xff] %v11987_v12  ;;  %v3598_v12 = vadd.f32 %v9794_v30, %v3531_v39  ;;  %v7960_v39 = vld [vmem:[#allocation8 + $0xd0] sm:$0xff]  ;;  %v3664_v59 = vmax.f32 %v3600_v19, 0.0  ;;  %v3887_v19 = vld [vmem:[#allocation2 + $0x1a] sm:$0xff]  ;;  %5873 = vmatpush.bf16.msrb.mxu1 %v7973_v37  ;;  %v12009_v37 = vmax.f32 %v10067_v3, 0.0  ;;  %v12016_v3 = vmax.f32 %v10125_v57, 0.0 }
 0x662   :  { %3717 = vst [vmem:[#allocation2 + $0x139] sm:$0xff] %v11990_v18  ;;  %v3601_v18 = vadd.f32 %v9794_v30, %v3534_v33  ;;  %v3661_v1 = vmax.f32 %v3597_v56, 0.0  ;;  %v11997_v33 = vmax.f32 %v9894_v16, 0.0  ;;  %v12002_v16 = vmax.f32 %v10011_v29, 0.0 }
 0x663   :  { %3718 = vst [vmem:[#allocation2 + $0x141] sm:$0xff] %v11992_v55  ;;  %v3662_v54 = vmax.f32 %v3598_v12, 0.0  ;;  %v3663_v55 = vmax.f32 %v3599_v20, 0.0  ;;  %v3759_v12 = vld [vmem:[#allocation2 + $0x18] sm:$0xff]  ;;  %v3760_v20 = vld [vmem:[#allocation2 + $0x20] sm:$0xff]  ;;  %v12007_v29 = vmax.f32 %v10051_v47, 0.0 }
 0x664   :  { %3719 = vst [vmem:[#allocation2 + $0x151] sm:$0xff] %v11993_v38  ;;  %v11996_v38 = vmax.f32 %v9879_v14, 0.0  ;;  %v10204_v35 = vpack.c.bf16 %v11998_v0, %v11997_v33  ;;  %v3665_v56 = vmax.f32 %v3601_v18, 0.0  ;;  %5709 = vmatpush.bf16.msrb.mxu0 %v7960_v39  ;;  %v12001_v14 = vmax.f32 %v10003_v28, 0.0 }
 0x665   :  { %3720 = vst [vmem:[#allocation2 + $0x159] sm:$0xff] %v11994_v26  ;;  %v12000_v26 = vmax.f32 %v9995_v42, 0.0  ;;  %v4342_v39 = vpack.c.bf16 %v3760_v20, %v3759_v12  ;;  %v12005_v42 = vmax.f32 %v10035_v51, 0.0  ;;  %v12008_v33 = vmax.f32 %v10059_v62, 0.0 }
 0x666   :  { %3721 = vst [vmem:[#allocation2 + $0x169] sm:$0xff] %v3657_v8  ;;  %v4343_v30 = vpack.c.bf16 %v11996_v38, %v11995_v32  ;;  %v10216_v32 = vpack.c.bf16 %v12002_v16, %v12001_v14  ;;  %v12006_v38 = vmax.f32 %v10043_v22, 0.0  ;;  %v12011_v51 = vmax.f32 %v10083_v40, 0.0  ;;  %v12023_v16 = vld [vmem:[#allocation81_spill] sm:$0xff] }
 0x667   :  { %3722 = vst [vmem:[#allocation2 + $0x171] sm:$0xff] %v3658_v17  ;;  %v10234_v61 = vpack.c.bf16 %v12008_v33, %v12007_v29  ;;  %v12012_v22 = vmax.f32 %v10093_v45, 0.0  ;;  %v3667_v62 = vmax.f32 %v9900_v50, 0.0  ;;  %5210 = vmatmul.bf16.gmra.mxu1 %v4342_v39  ;;  %v12014_v47 = vmax.f32 %v10107_v58, 0.0  ;;  %v7958_v45 = vld [vmem:[#allocation8 + $0xc0] sm:$0xff]  ;;  %v12028_v29 = vld [vmem:[#allocation86_spill] sm:$0xff] }
 0x668   :  { %3723 = vst [vmem:[#allocation2 + $0x181] sm:$0xff] %v3659_v48  ;;  %v11999_v48 = vmax.f32 %v9986_v6, 0.0  ;;  %5379 = vmatmul.bf16.gmra.mxu2 %v4343_v30  ;;  %v3888_v6 = vld [vmem:[#allocation2 + $0x22] sm:$0xff]  ;;  %v10228_v28 = vpack.c.bf16 %v12006_v38, %v12005_v42  ;;  %v12010_v30 = vmax.f32 %v10075_v27, 0.0  ;;  %v12015_v27 = vmax.f32 %v10117_v36, 0.0  ;;  %5710 = vmatpush.bf16.msrb.mxu0 %v7959_v53  ;;  %v12027_v42 = vld [vmem:[#allocation83_spill] sm:$0xff] }
 0x669   :  { %3724 = vst [vmem:[#allocation2 + $0x189] sm:$0xff] %v3660_v21  ;;  %v12004_v21 = vmax.f32 %v10027_v24, 0.0  ;;  %v3666_v24 = vmax.f32 %v9897_v4, 0.0  ;;  %v10247_v12 = vpack.c.bf16 %v12012_v22, %v12011_v51  ;;  %v12013_v4 = vmax.f32 %v10099_v5, 0.0  ;;  %v12031_v51 = vld [vmem:[#allocation88_spill] sm:$0xff] }
 0x66a   :  { %v10210_v2 = vpack.c.bf16 %v12000_v26, %v11999_v48  ;;  %3725 = vst [vmem:[#allocation2 + $0x1c9] sm:$0xff] %v3661_v1  ;;  %v4344_v1 = vpack.c.bf16 %v3888_v6, %v3887_v19  ;;  %v10241_v0 = vpack.c.bf16 %v12010_v30, %v12009_v37  ;;  %v10260_v20 = vpack.c.bf16 %v12016_v3, %v12015_v27  ;;  %v3890_v19 = vld [vmem:[#allocation2 + $0x3a] sm:$0xff]  ;;  %v12022_v26 = vld [vmem:[#allocation82_spill] sm:$0xff] }
 0x66b   :  { %v10222_v18 = vpack.c.bf16 %v12004_v21, %v12003_v63  ;;  %3726 = vst [vmem:[#allocation2 + $0x1d1] sm:$0xff] %v3662_v54  ;;  %v10254_v54 = vpack.c.bf16 %v12014_v47, %v12013_v4  ;;  %v3668_v40 = vmax.f32 %v9903_v52, 0.0  ;;  %v12017_v50 = vmax.f32 %v10134_v15, 0.0  ;;  %v12025_v21 = vld [vmem:[#allocation106_spill] sm:$0xff]  ;;  %v12030_v37 = vld [vmem:[#allocation140_spill] sm:$0xff]  ;;  %v3764_v47 = vld [vmem:[#allocation2 + $0x50] sm:$0xff] }
 0x66c   :  { %3727 = vst [vmem:[#allocation2 + $0x1e1] sm:$0xff] %v3663_v55  ;;  %5548 = vmatmul.bf16.gmra.mxu3 %v4344_v1  ;;  %v12018_v5 = vmax.f32 %v10142_v7, 0.0  ;;  %v3669_v58 = vmax.f32 %v9906_v41, 0.0  ;;  %v10270_v36 = vpack.c.bf16 %v3658_v17, %v3657_v8  ;;  %v3670_v57 = vmax.f32 %v9909_v13, 0.0  ;;  %5711 = vmatpush.bf16.msrb.mxu0 %v7958_v45  ;;  %v3761_v8 = vld [vmem:[#allocation2 + $0x30] sm:$0xff]  ;;  %v3762_v17 = vld [vmem:[#allocation2 + $0x38] sm:$0xff] }
 0x66d   :  { %3728 = vst [vmem:[#allocation2 + $0x1e9] sm:$0xff] %v3664_v59  ;;  %v3671_v52 = vmax.f32 %v9912_v9, 0.0  ;;  %v3672_v59 = vmax.f32 %v9915_v60, 0.0  ;;  %v3673_v15 = vmax.f32 %v9918_v46, 0.0  ;;  %v3674_v7 = vmax.f32 %v9921_v44, 0.0  ;;  %v3763_v4 = vld [vmem:[#allocation2 + $0x48] sm:$0xff] }
 0x66e   :  { %v10267_v55 = vpack.c.bf16 %v12018_v5, %v12017_v50  ;;  %3729 = vst [vmem:[#allocation2 + $0x1f9] sm:$0xff] %v3665_v56  ;;  %v3675_v41 = vmax.f32 %v9924_v23, 0.0  ;;  %v3676_v13 = vmax.f32 %v9927_v31, 0.0  ;;  %v3677_v9 = vmax.f32 %v9930_v10, 0.0  ;;  %v3889_v56 = vld [vmem:[#allocation2 + $0x32] sm:$0xff]  ;;  %v12021_v10 = vld [vmem:[#allocation70_spill] sm:$0xff] }
 0x66f   :  { %3730 = vst [vmem:[#allocation2 + $0x201] sm:$0xff] %v3666_v24  ;;  %5712 = vmatmul.bf16.vlgmr.msrb.gmra.mxu0 %v4342_v39  ;;  %v3678_v60 = vmax.f32 %v9933_v49, 0.0  ;;  %v3679_v46 = vmax.f32 %v9936_v11, 0.0  ;;  %v12019_v44 = vmax.f32 %v9882_v43, 0.0  ;;  %v12020_v23 = vmax.f32 %v9885_v25, 0.0  ;;  %v12024_v43 = vld [vmem:[#allocation69_spill] sm:$0xff] }
 0x670   :  { %3731 = vst [vmem:[#allocation2 + $0x211] sm:$0xff] %v3667_v62  ;;  %v3680_v31 = vmax.f32 %v9939_v34, 0.0  ;;  %v3681_v48 = vmax.f32 %v12021_v10, 0.0  ;;  %v4351_v49 = vpack.c.bf16 %v3762_v17, %v3761_v8  ;;  %v3682_v14 = vmax.f32 %v12022_v26, 0.0  ;;  %v12026_v39 = vld [vmem:[#allocation84_spill] sm:$0xff]  ;;  %v12029_v24 = vld [vmem:[#allocation85_spill] sm:$0xff] }
 0x671   :  { %3732 = vst [vmem:[#allocation2 + $0x219] sm:$0xff] %v3668_v40  ;;  %v4352_v53 = vpack.c.bf16 %v12020_v23, %v12019_v44  ;;  %v4353_v11 = vpack.c.bf16 %v3890_v19, %v3889_v56  ;;  %v3683_v63 = vmax.f32 %v12023_v16, 0.0  ;;  %v3684_v25 = vmax.f32 %v12024_v43, 0.0  ;;  %v7972_v62 = vld [vmem:[#allocation8 + $0x130] sm:$0xff]  ;;  %v12032_v27 = vld [vmem:[#allocation92_spill] sm:$0xff]  ;;  %v12034_v40 = vld [vmem:[#allocation109_spill] sm:$0xff] }
 0x672   :  { %3733 = vst [vmem:[#allocation2 + $0x229] sm:$0xff] %v3669_v58  ;;  %v3685_v34 = vmax.f32 %v12025_v21, 0.0  ;;  %v3686_v6 = vmax.f32 %v12026_v39, 0.0  ;;  %v3687_v38 = vmax.f32 %v12027_v42, 0.0  ;;  %v3688_v33 = vmax.f32 %v12028_v29, 0.0  ;;  %5874 = vmatpush.bf16.msrb.mxu1 %v7972_v62  ;;  %v3891_v5 = vld [vmem:[#allocation2 + $0x4a] sm:$0xff] }
 0x673   :  { %3734 = vst [vmem:[#allocation2 + $0x231] sm:$0xff] %v3670_v57  ;;  %v3689_v1 = vmax.f32 %v12029_v24, 0.0  ;;  %v3690_v30 = vmax.f32 %v12030_v37, 0.0  ;;  %v3691_v22 = vmax.f32 %v12031_v51, 0.0  ;;  %v12033_v3 = vmax.f32 %v12032_v27, 0.0  ;;  %v3892_v58 = vld [vmem:[#allocation2 + $0x52] sm:$0xff] }
 0x674   :  { %3735 = vst [vmem:[#allocation2 + $0x241] sm:$0xff] %v3671_v52  ;;  %v12035_v45 = vmax.f32 %v12034_v40, 0.0  ;;  %v4360_v57 = vpack.c.bf16 %v3764_v47, %v3763_v4  ;;  %v4362_v52 = vpack.c.bf16 %v3892_v58, %v3891_v5  ;;  %v3768_v8 = vld [vmem:[#allocation2 + $0x80] sm:$0xff]  ;;  %v3770_v56 = vld [vmem:[#allocation2 + $0x98] sm:$0xff]  ;;  %v3899_v26 = vld [vmem:[#allocation2 + $0xaa] sm:$0xff] }
 0x675   :  { %3736 = vst [vmem:[#allocation2 + $0x249] sm:$0xff] %v3672_v59  ;;  %v3765_v59 = vld [vmem:[#allocation2 + $0x60] sm:$0xff]  ;;  %v3897_v19 = vld [vmem:[#allocation2 + $0x92] sm:$0xff]  ;;  %v3774_v43 = vld [vmem:[#allocation2 + $0xc8] sm:$0xff] }
 0x676   :  { %3737 = vst [vmem:[#allocation2 + $0x259] sm:$0xff] %v3673_v15  ;;  %v4361_v50 = vpack.c.bf16 %v12035_v45, %v12033_v3  ;;  %v3766_v15 = vld [vmem:[#allocation2 + $0x68] sm:$0xff]  ;;  %v3895_v17 = vld [vmem:[#allocation2 + $0x7a] sm:$0xff] }
 0x677   :  { %3738 = vst [vmem:[#allocation2 + $0x261] sm:$0xff] %v3674_v7  ;;  %5215 = vmatmul.bf16.gmra.mxu1 %v4351_v49  ;;  %v3893_v7 = vld [vmem:[#allocation2 + $0x62] sm:$0xff]  ;;  %v3902_v21 = vld [vmem:[#allocation2 + $0xca] sm:$0xff]  ;;  %v3775_v37 = vld [vmem:[#allocation2 + $0xd8] sm:$0xff] }
 0x678   :  { %3739 = vst [vmem:[#allocation2 + $0x271] sm:$0xff] %v3675_v41  ;;  %5384 = vmatmul.bf16.gmra.mxu2 %v4352_v53  ;;  %v3894_v41 = vld [vmem:[#allocation2 + $0x6a] sm:$0xff]  ;;  %v3904_v62 = vld [vmem:[#allocation2 + $0xe2] sm:$0xff] }
 0x679   :  { %3740 = vst [vmem:[#allocation2 + $0x279] sm:$0xff] %v3676_v13  ;;  %v4369_v13 = vpack.c.bf16 %v3766_v15, %v3765_v59  ;;  %v3769_v53 = vld [vmem:[#allocation2 + $0x90] sm:$0xff]  ;;  %v3778_v15 = vld [vmem:[#allocation2 + $0xf8] sm:$0xff] }
 0x67a   :  { %3741 = vst [vmem:[#allocation2 + $0x289] sm:$0xff] %v3677_v9  ;;  %v4371_v9 = vpack.c.bf16 %v3894_v41, %v3893_v7  ;;  %v3777_v59 = vld [vmem:[#allocation2 + $0xf0] sm:$0xff] }
 0x67b   :  { %3742 = vst [vmem:[#allocation2 + $0x291] sm:$0xff] %v3678_v60  ;;  %v3767_v60 = vld [vmem:[#allocation2 + $0x78] sm:$0xff] }
 0x67c   :  { %3743 = vst [vmem:[#allocation2 + $0x2a1] sm:$0xff] %v3679_v46  ;;  %5553 = vmatmul.bf16.gmra.mxu3 %v4353_v11  ;;  %v3896_v46 = vld [vmem:[#allocation2 + $0x82] sm:$0xff]  ;;  %v4378_v44 = vpack.c.bf16 %v3768_v8, %v3767_v60  ;;  %v3905_v41 = vld [vmem:[#allocation2 + $0xf2] sm:$0xff] }
 0x67d   :  { %3744 = vst [vmem:[#allocation2 + $0x2a9] sm:$0xff] %v3680_v31  ;;  %v4380_v23 = vpack.c.bf16 %v3896_v46, %v3895_v17  ;;  %v3898_v31 = vld [vmem:[#allocation2 + $0x9a] sm:$0xff]  ;;  %v4423_v17 = vpack.c.bf16 %v3778_v15, %v3777_v59 }
 0x67e   :  { %3745 = vst [vmem:[#allocation2 + $0x2b9] sm:$0xff] %v3681_v48  ;;  %v4389_v10 = vpack.c.bf16 %v3898_v31, %v3897_v19  ;;  %v3771_v48 = vld [vmem:[#allocation2 + $0xa8] sm:$0xff] }
 0x67f   :  { %3746 = vst [vmem:[#allocation2 + $0x2c1] sm:$0xff] %v3682_v14  ;;  %5717 = vmatmul.bf16.gmra.mxu0 %v4351_v49  ;;  %v3772_v49 = vld [vmem:[#allocation2 + $0xb0] sm:$0xff] }
 0x680   :  { %3747 = vst [vmem:[#allocation2 + $0x2d1] sm:$0xff] %v3683_v63  ;;  %v3900_v14 = vld [vmem:[#allocation2 + $0xb2] sm:$0xff]  ;;  %v4396_v11 = vpack.c.bf16 %v3772_v49, %v3771_v48  ;;  %v3773_v63 = vld [vmem:[#allocation2 + $0xc0] sm:$0xff] }
 0x681   :  { %3748 = vst [vmem:[#allocation2 + $0x2d9] sm:$0xff] %v3684_v25  ;;  %v4398_v16 = vpack.c.bf16 %v3900_v14, %v3899_v26  ;;  %v3901_v25 = vld [vmem:[#allocation2 + $0xc2] sm:$0xff]  ;;  %v3780_v14 = vld [vmem:[#allocation2 + $0x110] sm:$0xff] }
 0x682   :  { %3749 = vst [vmem:[#allocation2 + $0x2e9] sm:$0xff] %v3685_v34  ;;  %v4405_v34 = vpack.c.bf16 %v3774_v43, %v3773_v63  ;;  %v4407_v39 = vpack.c.bf16 %v3902_v21, %v3901_v25  ;;  %v3779_v26 = vld [vmem:[#allocation2 + $0x108] sm:$0xff] }
 0x683   :  { %3750 = vst [vmem:[#allocation2 + $0x2f1] sm:$0xff] %v3686_v6  ;;  %v4432_v25 = vpack.c.bf16 %v3780_v14, %v3779_v26 }
 0x684   :  { %3751 = vst [vmem:[#allocation2 + $0x301] sm:$0xff] %v3687_v38 }
 0x685   :  { %3752 = vst [vmem:[#allocation2 + $0x309] sm:$0xff] %v3688_v33 }
 0x686   :  { %3753 = vst [vmem:[#allocation2 + $0x319] sm:$0xff] %v3689_v1 }
 0x687   :  { %3754 = vst [vmem:[#allocation2 + $0x321] sm:$0xff] %v3690_v30  ;;  %5220 = vmatmul.bf16.gmra.mxu1 %v4360_v57  ;;  %v3776_v30 = vld [vmem:[#allocation2 + $0xe0] sm:$0xff] }
 0x688   :  { %3755 = vst [vmem:[#allocation2 + $0x331] sm:$0xff] %v3691_v22  ;;  %5389 = vmatmul.bf16.gmra.mxu2 %v4361_v50  ;;  %v3903_v22 = vld [vmem:[#allocation2 + $0xda] sm:$0xff]  ;;  %v4414_v47 = vpack.c.bf16 %v3776_v30, %v3775_v37  ;;  %v3782_v37 = vld [vmem:[#allocation2 + $0x128] sm:$0xff] }
 0x68c   :  { %5558 = vmatmul.bf16.gmra.mxu3 %v4362_v52 }
 0x68f   :  { %5722 = vmatmul.bf16.gmra.mxu0 %v4360_v57 }
 0x697   :  { %5225 = vmatmul.bf16.gmra.mxu1 %v4369_v13 }
 0x698   :  { %5394 = vmatmul.bf16.gmra.mxu2 %v10204_v35  ;;  %v4387_v35 = vpack.c.bf16 %v3770_v56, %v3769_v53 }
 0x69c   :  { %5563 = vmatmul.bf16.gmra.mxu3 %v4371_v9 }
 0x69f   :  { %5727 = vmatmul.bf16.gmra.mxu0 %v4369_v13  ;;  %v3906_v13 = vld [vmem:[#allocation2 + $0xfa] sm:$0xff] }
 0x6a0   :  { %v4425_v46 = vpack.c.bf16 %v3906_v13, %v3905_v41  ;;  %v3784_v41 = vld [vmem:[#allocation2 + $0x140] sm:$0xff] }
 0x6a7   :  { %5230 = vmatmul.bf16.gmra.mxu1 %v4378_v44 }
 0x6a8   :  { %5399 = vmatmul.bf16.gmra.mxu2 %v10210_v2  ;;  %v7971_v2 = vld [vmem:[#allocation8 + $0x128] sm:$0xff] }
 0x6a9   :  { %5875 = vmatpush.bf16.msrb.mxu1 %v7971_v2 }
 0x6ac   :  { %5568 = vmatmul.bf16.gmra.mxu3 %v4380_v23 }
 0x6af   :  { %5732 = vmatmul.bf16.gmra.mxu0 %v4378_v44 }
 0x6b7   :  { %5235 = vmatmul.bf16.gmra.mxu1 %v4387_v35 }
 0x6b8   :  { %5404 = vmatmul.bf16.gmra.mxu2 %v10216_v32 }
 0x6bc   :  { %5573 = vmatmul.bf16.gmra.mxu3 %v4389_v10  ;;  %v7970_v10 = vld [vmem:[#allocation8 + $0x120] sm:$0xff] }
 0x6bd   :  { %5876 = vmatpush.bf16.msrb.mxu1 %v7970_v10 }
 0x6bf   :  { %5737 = vmatmul.bf16.gmra.mxu0 %v4387_v35 }
 0x6c7   :  { %5240 = vmatmul.bf16.gmra.mxu1 %v4396_v11 }
 0x6c8   :  { %5409 = vmatmul.bf16.gmra.mxu2 %v10222_v18 }
 0x6cc   :  { %5578 = vmatmul.bf16.gmra.mxu3 %v4398_v16 }
 0x6cd   :  { %v5206_v32 = vpop.f32.mrf.mxu1 }
 0x6cf   :  { %5742 = vmatmul.bf16.gmra.mxu0 %v4396_v11  ;;  %v3908_v11 = vld [vmem:[#allocation2 + $0x112] sm:$0xff] }
 0x6d5   :  { %v5208_v29 = vpop.f32.mrf.mxu1 }
 0x6d6   :  { %v5375_v6 = vpop.f32.mrf.mxu2 }
 0x6d7   :  { %5245 = vmatmul.bf16.gmra.mxu1 %v4405_v34  ;;  %v5376_v38 = vadd.f32 %v5375_v6, %v5206_v32 }
 0x6d8   :  { %5414 = vmatmul.bf16.gmra.mxu2 %v10228_v28  ;;  %v5544_v42 = vpop.f32.mrf.mxu3  ;;  %v4416_v28 = vpack.c.bf16 %v3904_v62, %v3903_v22  ;;  %v3910_v22 = vld [vmem:[#allocation2 + $0x12a] sm:$0xff] }
 0x6d9   :  { %v5545_v18 = vadd.f32 %v5544_v42, %v5376_v38 }
 0x6dc   :  { %5583 = vmatmul.bf16.gmra.mxu3 %v4407_v39 }
 0x6de   :  { %v5377_v33 = vpop.f32.mrf.mxu2 }
 0x6df   :  { %5747 = vmatmul.bf16.gmra.mxu0 %v4405_v34  ;;  %v5378_v1 = vadd.f32 %v5377_v33, %v5208_v29 }
 0x6e0   :  { %v5546_v24 = vpop.f32.mrf.mxu3 }
 0x6e1   :  { %v5547_v51 = vadd.f32 %v5546_v24, %v5378_v1  ;;  %v3781_v1 = vld [vmem:[#allocation2 + $0x120] sm:$0xff] }
 0x6e4   :  { %v5211_v4 = vpop.f32.mrf.mxu1 }
 0x6e7   :  { %5250 = vmatmul.bf16.gmra.mxu1 %v4414_v47 }
 0x6e8   :  { %5419 = vmatmul.bf16.gmra.mxu2 %v10234_v61 }
 0x6eb   :  { %v5380_v27 = vpop.f32.mrf.mxu2 }
 0x6ec   :  { %5588 = vmatmul.bf16.gmra.mxu3 %v4416_v28  ;;  %v5381_v3 = vadd.f32 %v5380_v27, %v5211_v4  ;;  %v5713_v45 = vpop.f32.mrf.mxu0  ;;  %v5213_v5 = vpop.f32.mrf.mxu1  ;;  %v4441_v28 = vpack.c.bf16 %v3782_v37, %v3781_v1  ;;  %v7969_v37 = vld [vmem:[#allocation8 + $0x118] sm:$0xff] }
 0x6ed   :  { %v10308_v58 = vadd.f32 %v5713_v45, %v5545_v18  ;;  %5877 = vmatpush.bf16.msrb.mxu1 %v7969_v37  ;;  %v3919_v37 = vld [vmem:[#allocation2 + $0x1ca] sm:$0xff] }
 0x6ef   :  { %v5549_v40 = vpop.f32.mrf.mxu3  ;;  %5752 = vmatmul.bf16.gmra.mxu0 %v4414_v47 }
 0x6f0   :  { %v5550_v50 = vadd.f32 %v5549_v40, %v5381_v3 }
 0x6f3   :  { %v5382_v57 = vpop.f32.mrf.mxu2 }
 0x6f4   :  { %v5383_v52 = vadd.f32 %v5382_v57, %v5213_v5  ;;  %v5715_v61 = vpop.f32.mrf.mxu0  ;;  %v5216_v60 = vpop.f32.mrf.mxu1 }
 0x6f5   :  { %v10310_v8 = vadd.f32 %v5715_v61, %v5547_v51  ;;  %v3909_v51 = vld [vmem:[#allocation2 + $0x122] sm:$0xff]  ;;  %v3911_v61 = vld [vmem:[#allocation2 + $0x13a] sm:$0xff] }
 0x6f6   :  { %v4443_v27 = vpack.c.bf16 %v3910_v22, %v3909_v51  ;;  %v3787_v22 = vld [vmem:[#allocation2 + $0x168] sm:$0xff] }
 0x6f7   :  { %v5551_v7 = vpop.f32.mrf.mxu3  ;;  %5255 = vmatmul.bf16.gmra.mxu1 %v4423_v17 }
 0x6f8   :  { %v5552_v9 = vadd.f32 %v5551_v7, %v5383_v52  ;;  %5424 = vmatmul.bf16.gmra.mxu2 %v10241_v0  ;;  %v3907_v0 = vld [vmem:[#allocation2 + $0x10a] sm:$0xff]  ;;  %v3783_v7 = vld [vmem:[#allocation2 + $0x138] sm:$0xff] }
 0x6f9   :  { %v4434_v21 = vpack.c.bf16 %v3908_v11, %v3907_v0  ;;  %v3786_v0 = vld [vmem:[#allocation2 + $0x158] sm:$0xff] }
 0x6fb   :  { %v5385_v44 = vpop.f32.mrf.mxu2 }
 0x6fc   :  { %5593 = vmatmul.bf16.gmra.mxu3 %v4425_v46  ;;  %v5386_v23 = vadd.f32 %v5385_v44, %v5216_v60  ;;  %v5718_v56 = vpop.f32.mrf.mxu0  ;;  %v5218_v31 = vpop.f32.mrf.mxu1  ;;  %v4450_v44 = vpack.c.bf16 %v3784_v41, %v3783_v7 }
 0x6fd   :  { %v10313_v35 = vadd.f32 %v5718_v56, %v5550_v50 }
 0x6ff   :  { %v5554_v53 = vpop.f32.mrf.mxu3  ;;  %5757 = vmatmul.bf16.gmra.mxu0 %v4423_v17 }
 0x700   :  { %v5555_v19 = vadd.f32 %v5554_v53, %v5386_v23 }
 0x703   :  { %v5387_v48 = vpop.f32.mrf.mxu2 }
 0x704   :  { %v5388_v49 = vadd.f32 %v5387_v48, %v5218_v31  ;;  %v5720_v16 = vpop.f32.mrf.mxu0  ;;  %v5221_v43 = vpop.f32.mrf.mxu1 }
 0x705   :  { %v10315_v32 = vadd.f32 %v5720_v16, %v5552_v9  ;;  %v3912_v9 = vld [vmem:[#allocation2 + $0x142] sm:$0xff]  ;;  %v3913_v16 = vld [vmem:[#allocation2 + $0x152] sm:$0xff] }
 0x706   :  { %v4452_v23 = vpack.c.bf16 %v3912_v9, %v3911_v61  ;;  %v3853_v61 = vld [vmem:[#allocation2 + $0x1b1] sm:$0xff]  ;;  %v3854_v9 = vld [vmem:[#allocation2 + $0x1b9] sm:$0xff] }
 0x707   :  { %v5556_v2 = vpop.f32.mrf.mxu3  ;;  %5260 = vmatmul.bf16.gmra.mxu1 %v4432_v25 }
 0x708   :  { %v5557_v63 = vadd.f32 %v5556_v2, %v5388_v49  ;;  %5429 = vmatmul.bf16.gmra.mxu2 %v10247_v12  ;;  %v3785_v2 = vld [vmem:[#allocation2 + $0x150] sm:$0xff] }
 0x70b   :  { %v5390_v34 = vpop.f32.mrf.mxu2 }
 0x70c   :  { %5598 = vmatmul.bf16.gmra.mxu3 %v4434_v21  ;;  %v5391_v39 = vadd.f32 %v5390_v34, %v5221_v43  ;;  %v5723_v42 = vpop.f32.mrf.mxu0  ;;  %v5223_v18 = vpop.f32.mrf.mxu1  ;;  %v4459_v34 = vpack.c.bf16 %v3786_v0, %v3785_v2  ;;  %v3979_v2 = vld [vmem:[#allocation2 + $0x180] sm:$0xff]  ;;  %v3980_v0 = vld [vmem:[#allocation2 + $0x188] sm:$0xff] }
 0x70d   :  { %v10318_v29 = vadd.f32 %v5723_v42, %v5555_v19 }
 0x70f   :  { %v5559_v6 = vpop.f32.mrf.mxu3  ;;  %5762 = vmatmul.bf16.gmra.mxu0 %v4432_v25 }
 0x710   :  { %v5560_v38 = vadd.f32 %v5559_v6, %v5391_v39 }
 0x713   :  { %v5392_v33 = vpop.f32.mrf.mxu2 }
 0x714   :  { %v5393_v24 = vadd.f32 %v5392_v33, %v5223_v18  ;;  %v5725_v12 = vpop.f32.mrf.mxu0  ;;  %v5226_v4 = vpop.f32.mrf.mxu1 }
 0x715   :  { %v10320_v47 = vadd.f32 %v5725_v12, %v5557_v63  ;;  %v3914_v63 = vld [vmem:[#allocation2 + $0x15a] sm:$0xff]  ;;  %v3788_v12 = vld [vmem:[#allocation2 + $0x170] sm:$0xff] }
 0x716   :  { %v4461_v39 = vpack.c.bf16 %v3914_v63, %v3913_v16 }
 0x717   :  { %v5561_v30 = vpop.f32.mrf.mxu3  ;;  %5265 = vmatmul.bf16.gmra.mxu1 %v4441_v28 }
 0x718   :  { %v5562_v62 = vadd.f32 %v5561_v30, %v5393_v24  ;;  %5434 = vmatmul.bf16.gmra.mxu2 %v10254_v54 }
 0x71b   :  { %v5395_v3 = vpop.f32.mrf.mxu2 }
 0x71c   :  { %5603 = vmatmul.bf16.gmra.mxu3 %v4443_v27  ;;  %v5396_v40 = vadd.f32 %v5395_v3, %v5226_v4  ;;  %v5728_v50 = vpop.f32.mrf.mxu0  ;;  %v5228_v57 = vpop.f32.mrf.mxu1  ;;  %v3916_v4 = vld [vmem:[#allocation2 + $0x172] sm:$0xff] }
 0x71d   :  { %v10323_v52 = vadd.f32 %v5728_v50, %v5560_v38 }
 0x71f   :  { %v5564_v45 = vpop.f32.mrf.mxu3  ;;  %5767 = vmatmul.bf16.gmra.mxu0 %v4441_v28 }
 0x720   :  { %v5565_v5 = vadd.f32 %v5564_v45, %v5396_v40  ;;  %v4468_v45 = vpack.c.bf16 %v3788_v12, %v3787_v22 }
 0x723   :  { %v5397_v59 = vpop.f32.mrf.mxu2 }
 0x724   :  { %v5398_v15 = vadd.f32 %v5397_v59, %v5228_v57  ;;  %v5730_v54 = vpop.f32.mrf.mxu0  ;;  %v5231_v17 = vpop.f32.mrf.mxu1 }
 0x725   :  { %v10325_v46 = vadd.f32 %v5730_v54, %v5562_v62 }
 0x727   :  { %v5566_v13 = vpop.f32.mrf.mxu3  ;;  %5270 = vmatmul.bf16.gmra.mxu1 %v4450_v44 }
 0x728   :  { %v5567_v60 = vadd.f32 %v5566_v13, %v5398_v15  ;;  %5439 = vmatmul.bf16.gmra.mxu2 %v10260_v20 }
 0x72b   :  { %v5400_v53 = vpop.f32.mrf.mxu2 }
 0x72c   :  { %5608 = vmatmul.bf16.gmra.mxu3 %v4452_v23  ;;  %v5401_v56 = vadd.f32 %v5400_v53, %v5231_v17  ;;  %v5733_v31 = vpop.f32.mrf.mxu0  ;;  %v5233_v48 = vpop.f32.mrf.mxu1  ;;  %v4478_v17 = vpack.c.bf16 %v3854_v9, %v3853_v61  ;;  %v3918_v23 = vld [vmem:[#allocation2 + $0x1ba] sm:$0xff]  ;;  %v3794_v9 = vld [vmem:[#allocation2 + $0x1e8] sm:$0xff] }
 0x72d   :  { %v10328_v49 = vadd.f32 %v5733_v31, %v5565_v5  ;;  %v3793_v61 = vld [vmem:[#allocation2 + $0x1e0] sm:$0xff] }
 0x72f   :  { %v5569_v19 = vpop.f32.mrf.mxu3  ;;  %5772 = vmatmul.bf16.gmra.mxu0 %v4450_v44  ;;  %v3917_v44 = vld [vmem:[#allocation2 + $0x1b2] sm:$0xff] }
 0x730   :  { %v5570_v10 = vadd.f32 %v5569_v19, %v5401_v56  ;;  %v4479_v31 = vpack.c.bf16 %v3918_v23, %v3917_v44  ;;  %v3922_v44 = vld [vmem:[#allocation2 + $0x1ea] sm:$0xff] }
 0x733   :  { %v5402_v26 = vpop.f32.mrf.mxu2 }
 0x734   :  { %v5403_v14 = vadd.f32 %v5402_v26, %v5233_v48  ;;  %v5735_v20 = vpop.f32.mrf.mxu0  ;;  %v5236_v25 = vpop.f32.mrf.mxu1  ;;  %v12036_v48 = vld [vmem:[#allocation87_spill] sm:$0xff] }
 0x735   :  { %v10330_v21 = vadd.f32 %v5735_v20, %v5567_v60 }
 0x737   :  { %v5571_v11 = vpop.f32.mrf.mxu3  ;;  %5275 = vmatmul.bf16.gmra.mxu1 %v4459_v34 }
 0x738   :  { %v5572_v43 = vadd.f32 %v5571_v11, %v5403_v14  ;;  %5444 = vmatmul.bf16.gmra.mxu2 %v10267_v55  ;;  %v3915_v55 = vld [vmem:[#allocation2 + $0x16a] sm:$0xff] }
 0x739   :  { %v4470_v50 = vpack.c.bf16 %v3916_v4, %v3915_v55 }
 0x73b   :  { %v5405_v6 = vpop.f32.mrf.mxu2 }
 0x73c   :  { %5613 = vmatmul.bf16.gmra.mxu3 %v4461_v39  ;;  %v5406_v42 = vadd.f32 %v5405_v6, %v5236_v25  ;;  %v5738_v18 = vpop.f32.mrf.mxu0  ;;  %v5238_v24 = vpop.f32.mrf.mxu1  ;;  %v4471_v25 = vpack.c.bf16 %v3980_v0, %v3979_v2  ;;  %v3855_v39 = vld [vmem:[#allocation2 + $0x1c9] sm:$0xff]  ;;  %v3856_v6 = vld [vmem:[#allocation2 + $0x1d1] sm:$0xff] }
 0x73d   :  { %v10333_v1 = vadd.f32 %v5738_v18, %v5570_v10  ;;  %v3792_v18 = vld [vmem:[#allocation2 + $0x1d0] sm:$0xff] }
 0x73f   :  { %v5574_v38 = vpop.f32.mrf.mxu3  ;;  %5777 = vmatmul.bf16.gmra.mxu0 %v4459_v34 }
 0x740   :  { %v5575_v33 = vadd.f32 %v5574_v38, %v5406_v42  ;;  %v3791_v38 = vld [vmem:[#allocation2 + $0x1c8] sm:$0xff] }
 0x741   :  { %v4486_v55 = vpack.c.bf16 %v3792_v18, %v3791_v38 }
 0x743   :  { %v5407_v30 = vpop.f32.mrf.mxu2 }
 0x744   :  { %v5408_v51 = vadd.f32 %v5407_v30, %v5238_v24  ;;  %v5740_v28 = vpop.f32.mrf.mxu0  ;;  %v5241_v3 = vpop.f32.mrf.mxu1  ;;  %v4487_v24 = vpack.c.bf16 %v3856_v6, %v3855_v39  ;;  %v3920_v30 = vld [vmem:[#allocation2 + $0x1d2] sm:$0xff] }
 0x745   :  { %v10335_v40 = vadd.f32 %v5740_v28, %v5572_v43  ;;  %v4488_v4 = vpack.c.bf16 %v3920_v30, %v3919_v37  ;;  %v3795_v6 = vld [vmem:[#allocation2 + $0x1f8] sm:$0xff] }
 0x747   :  { %v5576_v62 = vpop.f32.mrf.mxu3  ;;  %5280 = vmatmul.bf16.gmra.mxu1 %v4468_v45 }
 0x748   :  { %v5577_v27 = vadd.f32 %v5576_v62, %v5408_v51  ;;  %5449 = vmatmul.bf16.gmra.mxu2 %v10270_v36 }
 0x74b   :  { %v5410_v5 = vpop.f32.mrf.mxu2 }
 0x74c   :  { %5618 = vmatmul.bf16.gmra.mxu3 %v4470_v50  ;;  %v5411_v57 = vadd.f32 %v5410_v5, %v5241_v3  ;;  %v5743_v15 = vpop.f32.mrf.mxu0  ;;  %v5243_v41 = vpop.f32.mrf.mxu1 }
 0x74d   :  { %v10338_v13 = vadd.f32 %v5743_v15, %v5575_v33  ;;  %v3857_v15 = vld [vmem:[#allocation2 + $0x1e1] sm:$0xff] }
 0x74f   :  { %v5579_v59 = vpop.f32.mrf.mxu3  ;;  %5782 = vmatmul.bf16.gmra.mxu0 %v4468_v45 }
 0x750   :  { %v5580_v7 = vadd.f32 %v5579_v59, %v5411_v57 }
 0x753   :  { %v5412_v54 = vpop.f32.mrf.mxu2 }
 0x754   :  { %v5413_v60 = vadd.f32 %v5412_v54, %v5243_v41  ;;  %v5745_v53 = vpop.f32.mrf.mxu0  ;;  %v5246_v19 = vpop.f32.mrf.mxu1 }
 0x755   :  { %v10340_v10 = vadd.f32 %v5745_v53, %v5577_v27 }
 0x757   :  { %v5581_v36 = vpop.f32.mrf.mxu3  ;;  %5285 = vmatmul.bf16.gmra.mxu1 %v12036_v48 }
 0x758   :  { %v5582_v56 = vadd.f32 %v5581_v36, %v5413_v60  ;;  %5454 = vmatmul.bf16.gmra.mxu2 %v4478_v17  ;;  %v3921_v17 = vld [vmem:[#allocation2 + $0x1e2] sm:$0xff] }
 0x75b   :  { %v5415_v26 = vpop.f32.mrf.mxu2 }
 0x75c   :  { %5623 = vmatmul.bf16.gmra.mxu3 %v4479_v31  ;;  %v5416_v14 = vadd.f32 %v5415_v26, %v5246_v19  ;;  %v5748_v16 = vpop.f32.mrf.mxu0  ;;  %v5248_v20 = vpop.f32.mrf.mxu1  ;;  %v4495_v19 = vpack.c.bf16 %v3794_v9, %v3793_v61  ;;  %v4497_v31 = vpack.c.bf16 %v3922_v44, %v3921_v17  ;;  %v3797_v61 = vld [vmem:[#allocation2 + $0x210] sm:$0xff]  ;;  %v3798_v9 = vld [vmem:[#allocation2 + $0x218] sm:$0xff] }
 0x75d   :  { %v10343_v43 = vadd.f32 %v5748_v16, %v5580_v7  ;;  %v3858_v7 = vld [vmem:[#allocation2 + $0x1e9] sm:$0xff]  ;;  %v3925_v17 = vld [vmem:[#allocation2 + $0x212] sm:$0xff]  ;;  %v3926_v44 = vld [vmem:[#allocation2 + $0x21a] sm:$0xff] }
 0x75e   :  { %v4496_v60 = vpack.c.bf16 %v3858_v7, %v3857_v15  ;;  %v3861_v15 = vld [vmem:[#allocation2 + $0x211] sm:$0xff]  ;;  %v3862_v7 = vld [vmem:[#allocation2 + $0x219] sm:$0xff] }
 0x75f   :  { %v5584_v11 = vpop.f32.mrf.mxu3  ;;  %5787 = vmatmul.bf16.gmra.mxu0 %v4471_v25  ;;  %v3859_v25 = vld [vmem:[#allocation2 + $0x1f9] sm:$0xff] }
 0x760   :  { %v5585_v63 = vadd.f32 %v5584_v11, %v5416_v14 }
 0x763   :  { %v5417_v34 = vpop.f32.mrf.mxu2 }
 0x764   :  { %v5418_v42 = vadd.f32 %v5417_v34, %v5248_v20  ;;  %v5750_v51 = vpop.f32.mrf.mxu0  ;;  %v5251_v12 = vpop.f32.mrf.mxu1  ;;  %v3860_v34 = vld [vmem:[#allocation2 + $0x201] sm:$0xff] }
 0x765   :  { %v10345_v62 = vadd.f32 %v5750_v51, %v5582_v56  ;;  %v4505_v18 = vpack.c.bf16 %v3860_v34, %v3859_v25  ;;  %v3863_v34 = vld [vmem:[#allocation2 + $0x229] sm:$0xff] }
 0x767   :  { %v5586_v33 = vpop.f32.mrf.mxu3  ;;  %5290 = vmatmul.bf16.gmra.mxu1 %v4486_v55 }
 0x768   :  { %v5587_v22 = vadd.f32 %v5586_v33, %v5418_v42  ;;  %5459 = vmatmul.bf16.gmra.mxu2 %v4487_v24  ;;  %v3796_v42 = vld [vmem:[#allocation2 + $0x200] sm:$0xff] }
 0x769   :  { %v3923_v33 = vld [vmem:[#allocation2 + $0x1fa] sm:$0xff]  ;;  %v3924_v24 = vld [vmem:[#allocation2 + $0x202] sm:$0xff] }
 0x76b   :  { %v5420_v28 = vpop.f32.mrf.mxu2 }
 0x76c   :  { %5628 = vmatmul.bf16.gmra.mxu3 %v4488_v4  ;;  %v5421_v27 = vadd.f32 %v5420_v28, %v5251_v12  ;;  %v5753_v45 = vpop.f32.mrf.mxu0  ;;  %v5253_v5 = vpop.f32.mrf.mxu1  ;;  %v4504_v12 = vpack.c.bf16 %v3796_v42, %v3795_v6  ;;  %v3799_v42 = vld [vmem:[#allocation2 + $0x228] sm:$0xff] }
 0x76d   :  { %v10347_v57 = vadd.f32 %v5753_v45, %v5585_v63  ;;  %v7968_v63 = vld [vmem:[#allocation8 + $0x110] sm:$0xff] }
 0x76e   :  { %5878 = vmatpush.bf16.msrb.mxu1 %v7968_v63 }
 0x76f   :  { %v5589_v3 = vpop.f32.mrf.mxu3  ;;  %5792 = vmatmul.bf16.gmra.mxu0 %v4486_v55  ;;  %v4506_v55 = vpack.c.bf16 %v3924_v24, %v3923_v33  ;;  %v3927_v24 = vld [vmem:[#allocation2 + $0x22a] sm:$0xff] }
 0x770   :  { %v5590_v50 = vadd.f32 %v5589_v3, %v5421_v27 }
 0x773   :  { %v5422_v59 = vpop.f32.mrf.mxu2 }
 0x774   :  { %v5423_v41 = vadd.f32 %v5422_v59, %v5253_v5  ;;  %v5755_v23 = vpop.f32.mrf.mxu0  ;;  %v5256_v53 = vpop.f32.mrf.mxu1 }
 0x775   :  { %v10349_v56 = vadd.f32 %v5755_v23, %v5587_v22 }
 0x777   :  { %v5591_v54 = vpop.f32.mrf.mxu3  ;;  %5295 = vmatmul.bf16.gmra.mxu1 %v4495_v19 }
 0x778   :  { %v5592_v36 = vadd.f32 %v5591_v54, %v5423_v41  ;;  %5464 = vmatmul.bf16.gmra.mxu2 %v4496_v60  ;;  %v4514_v60 = vpack.c.bf16 %v3862_v7, %v3861_v15 }
 0x77b   :  { %v5425_v48 = vpop.f32.mrf.mxu2 }
 0x77c   :  { %5633 = vmatmul.bf16.gmra.mxu3 %v4497_v31  ;;  %v5426_v26 = vadd.f32 %v5425_v48, %v5256_v53  ;;  %v5758_v2 = vpop.f32.mrf.mxu0  ;;  %v5258_v11 = vpop.f32.mrf.mxu1  ;;  %v4513_v31 = vpack.c.bf16 %v3798_v9, %v3797_v61  ;;  %v4515_v48 = vpack.c.bf16 %v3926_v44, %v3925_v17  ;;  %v3865_v61 = vld [vmem:[#allocation2 + $0x241] sm:$0xff]  ;;  %v3866_v9 = vld [vmem:[#allocation2 + $0x249] sm:$0xff] }
 0x77d   :  { %v10351_v16 = vadd.f32 %v5758_v2, %v5590_v50  ;;  %v3802_v17 = vld [vmem:[#allocation2 + $0x248] sm:$0xff] }
 0x77f   :  { %v5594_v14 = vpop.f32.mrf.mxu3  ;;  %5797 = vmatmul.bf16.gmra.mxu0 %v4495_v19 }
 0x780   :  { %v5595_v0 = vadd.f32 %v5594_v14, %v5426_v26 }
 0x783   :  { %v5427_v20 = vpop.f32.mrf.mxu2 }
 0x784   :  { %v5428_v39 = vadd.f32 %v5427_v20, %v5258_v11  ;;  %v5760_v37 = vpop.f32.mrf.mxu0  ;;  %v5261_v51 = vpop.f32.mrf.mxu1 }
 0x785   :  { %v10353_v22 = vadd.f32 %v5760_v37, %v5592_v36  ;;  %v3928_v37 = vld [vmem:[#allocation2 + $0x232] sm:$0xff] }
 0x787   :  { %v5596_v38 = vpop.f32.mrf.mxu3  ;;  %5300 = vmatmul.bf16.gmra.mxu1 %v4504_v12 }
 0x788   :  { %v5597_v30 = vadd.f32 %v5596_v38, %v5428_v39  ;;  %5469 = vmatmul.bf16.gmra.mxu2 %v4505_v18  ;;  %v3864_v39 = vld [vmem:[#allocation2 + $0x231] sm:$0xff] }
 0x789   :  { %v3800_v38 = vld [vmem:[#allocation2 + $0x230] sm:$0xff]  ;;  %v4523_v33 = vpack.c.bf16 %v3864_v39, %v3863_v34 }
 0x78b   :  { %v5430_v4 = vpop.f32.mrf.mxu2 }
 0x78c   :  { %5638 = vmatmul.bf16.gmra.mxu3 %v4506_v55  ;;  %v5431_v28 = vadd.f32 %v5430_v4, %v5261_v51  ;;  %v5763_v3 = vpop.f32.mrf.mxu0  ;;  %v5263_v50 = vpop.f32.mrf.mxu1  ;;  %v4522_v4 = vpack.c.bf16 %v3800_v38, %v3799_v42  ;;  %v7967_v38 = vld [vmem:[#allocation8 + $0x108] sm:$0xff] }
 0x78d   :  { %v10355_v5 = vadd.f32 %v5763_v3, %v5595_v0  ;;  %5879 = vmatpush.bf16.msrb.mxu1 %v7967_v38 }
 0x78f   :  { %v5599_v27 = vpop.f32.mrf.mxu3  ;;  %5802 = vmatmul.bf16.gmra.mxu0 %v4504_v12 }
 0x790   :  { %v5600_v45 = vadd.f32 %v5599_v27, %v5431_v28  ;;  %v4524_v28 = vpack.c.bf16 %v3928_v37, %v3927_v24  ;;  %v3868_v24 = vld [vmem:[#allocation2 + $0x261] sm:$0xff] }
 0x793   :  { %v5432_v59 = vpop.f32.mrf.mxu2 }
 0x794   :  { %v5433_v41 = vadd.f32 %v5432_v59, %v5263_v50  ;;  %v5765_v23 = vpop.f32.mrf.mxu0  ;;  %v5266_v53 = vpop.f32.mrf.mxu1 }
 0x795   :  { %v10357_v19 = vadd.f32 %v5765_v23, %v5597_v30  ;;  %v4532_v23 = vpack.c.bf16 %v3866_v9, %v3865_v61 }
 0x797   :  { %v5601_v54 = vpop.f32.mrf.mxu3  ;;  %5305 = vmatmul.bf16.gmra.mxu1 %v4513_v31 }
 0x798   :  { %v5602_v36 = vadd.f32 %v5601_v54, %v5433_v41  ;;  %5474 = vmatmul.bf16.gmra.mxu2 %v4514_v60  ;;  %v3801_v60 = vld [vmem:[#allocation2 + $0x240] sm:$0xff] }
 0x79b   :  { %v5435_v26 = vpop.f32.mrf.mxu2 }
 0x79c   :  { %5643 = vmatmul.bf16.gmra.mxu3 %v4515_v48  ;;  %v5436_v14 = vadd.f32 %v5435_v26, %v5266_v53  ;;  %v5768_v0 = vpop.f32.mrf.mxu0  ;;  %v5268_v63 = vpop.f32.mrf.mxu1  ;;  %v3930_v53 = vld [vmem:[#allocation2 + $0x24a] sm:$0xff] }
 0x79d   :  { %v10359_v20 = vadd.f32 %v5768_v0, %v5600_v45 }
 0x79f   :  { %v5604_v2 = vpop.f32.mrf.mxu3  ;;  %5807 = vmatmul.bf16.gmra.mxu0 %v4513_v31 }
 0x7a0   :  { %v5605_v11 = vadd.f32 %v5604_v2, %v5436_v14  ;;  %v4531_v2 = vpack.c.bf16 %v3802_v17, %v3801_v60 }
 0x7a3   :  { %v5437_v25 = vpop.f32.mrf.mxu2 }
 0x7a4   :  { %v5438_v6 = vadd.f32 %v5437_v25, %v5268_v63  ;;  %v5770_v30 = vpop.f32.mrf.mxu0  ;;  %v5271_v12 = vpop.f32.mrf.mxu1 }
 0x7a5   :  { %v10361_v55 = vadd.f32 %v5770_v30, %v5602_v36  ;;  %v3929_v36 = vld [vmem:[#allocation2 + $0x242] sm:$0xff]  ;;  %v3803_v30 = vld [vmem:[#allocation2 + $0x258] sm:$0xff] }
 0x7a6   :  { %v4533_v0 = vpack.c.bf16 %v3930_v53, %v3929_v36  ;;  %v3869_v53 = vld [vmem:[#allocation2 + $0x271] sm:$0xff] }
 0x7a7   :  { %v5606_v18 = vpop.f32.mrf.mxu3  ;;  %5310 = vmatmul.bf16.gmra.mxu1 %v4522_v4 }
 0x7a8   :  { %v5607_v51 = vadd.f32 %v5606_v18, %v5438_v6  ;;  %5479 = vmatmul.bf16.gmra.mxu2 %v4523_v33  ;;  %v3867_v33 = vld [vmem:[#allocation2 + $0x259] sm:$0xff] }
 0x7ab   :  { %v5440_v27 = vpop.f32.mrf.mxu2 }
 0x7ac   :  { %5648 = vmatmul.bf16.gmra.mxu3 %v4524_v28  ;;  %v5441_v3 = vadd.f32 %v5440_v27, %v5271_v12  ;;  %v5773_v50 = vpop.f32.mrf.mxu0  ;;  %v5273_v15 = vpop.f32.mrf.mxu1  ;;  %v3931_v28 = vld [vmem:[#allocation2 + $0x25a] sm:$0xff]  ;;  %v3932_v27 = vld [vmem:[#allocation2 + $0x262] sm:$0xff] }
 0x7ad   :  { %v10363_v7 = vadd.f32 %v5773_v50, %v5605_v11 }
 0x7af   :  { %v5609_v45 = vpop.f32.mrf.mxu3  ;;  %5812 = vmatmul.bf16.gmra.mxu0 %v4522_v4  ;;  %v4541_v4 = vpack.c.bf16 %v3868_v24, %v3867_v33 }
 0x7b0   :  { %v5610_v59 = vadd.f32 %v5609_v45, %v5441_v3 }
 0x7b3   :  { %v5442_v41 = vpop.f32.mrf.mxu2 }
 0x7b4   :  { %v5443_v54 = vadd.f32 %v5442_v41, %v5273_v15  ;;  %v5775_v31 = vpop.f32.mrf.mxu0  ;;  %v5276_v26 = vpop.f32.mrf.mxu1  ;;  %v4542_v41 = vpack.c.bf16 %v3932_v27, %v3931_v28 }
 0x7b5   :  { %v10365_v14 = vadd.f32 %v5775_v31, %v5607_v51  ;;  %v3804_v51 = vld [vmem:[#allocation2 + $0x260] sm:$0xff] }
 0x7b6   :  { %v3870_v31 = vld [vmem:[#allocation2 + $0x279] sm:$0xff] }
 0x7b7   :  { %v5611_v44 = vpop.f32.mrf.mxu3  ;;  %5315 = vmatmul.bf16.gmra.mxu1 %v4531_v2 }
 0x7b8   :  { %v5612_v48 = vadd.f32 %v5611_v44, %v5443_v54  ;;  %5484 = vmatmul.bf16.gmra.mxu2 %v4532_v23 }
 0x7bb   :  { %v5445_v11 = vpop.f32.mrf.mxu2 }
 0x7bc   :  { %5653 = vmatmul.bf16.gmra.mxu3 %v4533_v0  ;;  %v5446_v63 = vadd.f32 %v5445_v11, %v5276_v26  ;;  %v5778_v34 = vpop.f32.mrf.mxu0  ;;  %v5278_v6 = vpop.f32.mrf.mxu1  ;;  %v4550_v11 = vpack.c.bf16 %v3870_v31, %v3869_v53 }
 0x7bd   :  { %v10367_v42 = vadd.f32 %v5778_v34, %v5610_v59  ;;  %v4540_v59 = vpack.c.bf16 %v3804_v51, %v3803_v30 }
 0x7bf   :  { %v5614_v25 = vpop.f32.mrf.mxu3  ;;  %5817 = vmatmul.bf16.gmra.mxu0 %v4531_v2  ;;  %v3806_v2 = vld [vmem:[#allocation2 + $0x278] sm:$0xff] }
 0x7c0   :  { %v5615_v39 = vadd.f32 %v5614_v25, %v5446_v63  ;;  %v3933_v63 = vld [vmem:[#allocation2 + $0x272] sm:$0xff]  ;;  %v3934_v25 = vld [vmem:[#allocation2 + $0x27a] sm:$0xff] }
 0x7c3   :  { %v5447_v18 = vpop.f32.mrf.mxu2 }
 0x7c4   :  { %v5448_v37 = vadd.f32 %v5447_v18, %v5278_v6  ;;  %v5780_v3 = vpop.f32.mrf.mxu0  ;;  %v5281_v50 = vpop.f32.mrf.mxu1 }
 0x7c5   :  { %v10369_v15 = vadd.f32 %v5780_v3, %v5612_v48  ;;  %v3805_v48 = vld [vmem:[#allocation2 + $0x270] sm:$0xff] }
 0x7c6   :  { %v4549_v33 = vpack.c.bf16 %v3806_v2, %v3805_v48  ;;  %v3871_v3 = vld [vmem:[#allocation2 + $0x289] sm:$0xff] }
 0x7c7   :  { %v5616_v12 = vpop.f32.mrf.mxu3  ;;  %5320 = vmatmul.bf16.gmra.mxu1 %v4540_v59 }
 0x7c8   :  { %v5617_v45 = vadd.f32 %v5616_v12, %v5448_v37  ;;  %5489 = vmatmul.bf16.gmra.mxu2 %v4541_v4 }
 0x7cb   :  { %v5450_v61 = vpop.f32.mrf.mxu2 }
 0x7cc   :  { %5658 = vmatmul.bf16.gmra.mxu3 %v4542_v41  ;;  %v5451_v9 = vadd.f32 %v5450_v61, %v5281_v50  ;;  %v5783_v60 = vpop.f32.mrf.mxu0  ;;  %v5283_v44 = vpop.f32.mrf.mxu1  ;;  %v3872_v50 = vld [vmem:[#allocation2 + $0x291] sm:$0xff] }
 0x7cd   :  { %v10371_v23 = vadd.f32 %v5783_v60, %v5615_v39  ;;  %v4551_v39 = vpack.c.bf16 %v3934_v25, %v3933_v63  ;;  %v3808_v41 = vld [vmem:[#allocation2 + $0x290] sm:$0xff] }
 0x7ce   :  { %v3936_v60 = vld [vmem:[#allocation2 + $0x292] sm:$0xff] }
 0x7cf   :  { %v5619_v54 = vpop.f32.mrf.mxu3  ;;  %5822 = vmatmul.bf16.gmra.mxu0 %v4540_v59 }
 0x7d0   :  { %v5620_v17 = vadd.f32 %v5619_v54, %v5451_v9  ;;  %v4559_v9 = vpack.c.bf16 %v3872_v50, %v3871_v3  ;;  %v3935_v54 = vld [vmem:[#allocation2 + $0x28a] sm:$0xff] }
 0x7d3   :  { %v5452_v36 = vpop.f32.mrf.mxu2 }
 0x7d4   :  { %v5453_v26 = vadd.f32 %v5452_v36, %v5283_v44  ;;  %v5785_v34 = vpop.f32.mrf.mxu0  ;;  %v5286_v38 = vpop.f32.mrf.mxu1 }
 0x7d5   :  { %v10373_v18 = vadd.f32 %v5785_v34, %v5617_v45  ;;  %v3807_v45 = vld [vmem:[#allocation2 + $0x288] sm:$0xff] }
 0x7d7   :  { %v5621_v0 = vpop.f32.mrf.mxu3  ;;  %5325 = vmatmul.bf16.gmra.mxu1 %v4549_v33 }
 0x7d8   :  { %v5622_v6 = vadd.f32 %v5621_v0, %v5453_v26  ;;  %5494 = vmatmul.bf16.gmra.mxu2 %v4550_v11  ;;  %v4558_v26 = vpack.c.bf16 %v3808_v41, %v3807_v45 }
 0x7db   :  { %v5455_v24 = vpop.f32.mrf.mxu2 }
 0x7dc   :  { %5663 = vmatmul.bf16.gmra.mxu3 %v4551_v39  ;;  %v5456_v37 = vadd.f32 %v5455_v24, %v5286_v38  ;;  %v5788_v51 = vpop.f32.mrf.mxu0  ;;  %v5288_v4 = vpop.f32.mrf.mxu1  ;;  %v3874_v39 = vld [vmem:[#allocation2 + $0x2a9] sm:$0xff] }
 0x7dd   :  { %v10375_v28 = vadd.f32 %v5788_v51, %v5620_v17  ;;  %v4560_v17 = vpack.c.bf16 %v3936_v60, %v3935_v54 }
 0x7df   :  { %v5624_v30 = vpop.f32.mrf.mxu3  ;;  %5827 = vmatmul.bf16.gmra.mxu0 %v4549_v33  ;;  %v3873_v33 = vld [vmem:[#allocation2 + $0x2a1] sm:$0xff] }
 0x7e0   :  { %v5625_v12 = vadd.f32 %v5624_v30, %v5456_v37  ;;  %v3810_v37 = vld [vmem:[#allocation2 + $0x2a8] sm:$0xff]  ;;  %v4568_v51 = vpack.c.bf16 %v3874_v39, %v3873_v33  ;;  %v3939_v39 = vld [vmem:[#allocation2 + $0x2ba] sm:$0xff] }
 0x7e3   :  { %v5457_v27 = vpop.f32.mrf.mxu2 }
 0x7e4   :  { %v5458_v59 = vadd.f32 %v5457_v27, %v5288_v4  ;;  %v5790_v44 = vpop.f32.mrf.mxu0  ;;  %v5291_v53 = vpop.f32.mrf.mxu1  ;;  %v3937_v4 = vld [vmem:[#allocation2 + $0x2a2] sm:$0xff]  ;;  %v3938_v27 = vld [vmem:[#allocation2 + $0x2aa] sm:$0xff] }
 0x7e5   :  { %v10377_v31 = vadd.f32 %v5790_v44, %v5622_v6  ;;  %v3809_v6 = vld [vmem:[#allocation2 + $0x2a0] sm:$0xff] }
 0x7e6   :  { %v4567_v41 = vpack.c.bf16 %v3810_v37, %v3809_v6 }
 0x7e7   :  { %v5626_v61 = vpop.f32.mrf.mxu3  ;;  %5330 = vmatmul.bf16.gmra.mxu1 %v4558_v26 }
 0x7e8   :  { %v5627_v36 = vadd.f32 %v5626_v61, %v5458_v59  ;;  %5499 = vmatmul.bf16.gmra.mxu2 %v4559_v9 }
 0x7eb   :  { %v5460_v48 = vpop.f32.mrf.mxu2 }
 0x7ec   :  { %5668 = vmatmul.bf16.gmra.mxu3 %v4560_v17  ;;  %v5461_v2 = vadd.f32 %v5460_v48, %v5291_v53  ;;  %v5793_v11 = vpop.f32.mrf.mxu0  ;;  %v5293_v25 = vpop.f32.mrf.mxu1  ;;  %v7966_v17 = vld [vmem:[#allocation8 + $0x100] sm:$0xff] }
 0x7ed   :  { %v10379_v34 = vadd.f32 %v5793_v11, %v5625_v12  ;;  %v4569_v12 = vpack.c.bf16 %v3938_v27, %v3937_v4  ;;  %5880 = vmatpush.bf16.msrb.mxu1 %v7966_v17  ;;  %v3811_v11 = vld [vmem:[#allocation2 + $0x2b8] sm:$0xff] }
 0x7ef   :  { %v5629_v0 = vpop.f32.mrf.mxu3  ;;  %5832 = vmatmul.bf16.gmra.mxu0 %v4558_v26 }
 0x7f0   :  { %v5630_v63 = vadd.f32 %v5629_v0, %v5461_v2  ;;  %v3875_v2 = vld [vmem:[#allocation2 + $0x2b9] sm:$0xff]  ;;  %v3876_v0 = vld [vmem:[#allocation2 + $0x2c1] sm:$0xff] }
 0x7f1   :  { %v4577_v33 = vpack.c.bf16 %v3876_v0, %v3875_v2 }
 0x7f3   :  { %v5462_v38 = vpop.f32.mrf.mxu2 }
 0x7f4   :  { %v5463_v24 = vadd.f32 %v5462_v38, %v5293_v25  ;;  %v5795_v3 = vpop.f32.mrf.mxu0  ;;  %v5296_v59 = vpop.f32.mrf.mxu1  ;;  %v3812_v25 = vld [vmem:[#allocation2 + $0x2c0] sm:$0xff] }
 0x7f5   :  { %v10381_v45 = vadd.f32 %v5795_v3, %v5627_v36 }
 0x7f7   :  { %v5631_v30 = vpop.f32.mrf.mxu3  ;;  %5335 = vmatmul.bf16.gmra.mxu1 %v4567_v41 }
 0x7f8   :  { %v5632_v50 = vadd.f32 %v5631_v30, %v5463_v24  ;;  %5504 = vmatmul.bf16.gmra.mxu2 %v4568_v51  ;;  %v3940_v24 = vld [vmem:[#allocation2 + $0x2c2] sm:$0xff] }
 0x7f9   :  { %v4578_v4 = vpack.c.bf16 %v3940_v24, %v3939_v39 }
 0x7fb   :  { %v5465_v61 = vpop.f32.mrf.mxu2 }
 0x7fc   :  { %5673 = vmatmul.bf16.gmra.mxu3 %v4569_v12  ;;  %v5466_v9 = vadd.f32 %v5465_v61, %v5296_v59  ;;  %v5798_v60 = vpop.f32.mrf.mxu0  ;;  %v5298_v53 = vpop.f32.mrf.mxu1 }
 0x7fd   :  { %v10383_v26 = vadd.f32 %v5798_v60, %v5630_v63  ;;  %v4576_v63 = vpack.c.bf16 %v3812_v25, %v3811_v11  ;;  %v3877_v60 = vld [vmem:[#allocation2 + $0x2d1] sm:$0xff]  ;;  %v3942_v11 = vld [vmem:[#allocation2 + $0x2da] sm:$0xff] }
 0x7ff   :  { %v5634_v54 = vpop.f32.mrf.mxu3  ;;  %5837 = vmatmul.bf16.gmra.mxu0 %v4567_v41 }
 0x800   :  { %v5635_v44 = vadd.f32 %v5634_v54, %v5466_v9 }
 0x803   :  { %v5467_v48 = vpop.f32.mrf.mxu2 }
 0x804   :  { %v5468_v36 = vadd.f32 %v5467_v48, %v5298_v53  ;;  %v5800_v6 = vpop.f32.mrf.mxu0  ;;  %v5301_v30 = vpop.f32.mrf.mxu1  ;;  %v3878_v53 = vld [vmem:[#allocation2 + $0x2d9] sm:$0xff] }
 0x805   :  { %v10385_v51 = vadd.f32 %v5800_v6, %v5632_v50  ;;  %v3813_v50 = vld [vmem:[#allocation2 + $0x2d0] sm:$0xff]  ;;  %v3814_v48 = vld [vmem:[#allocation2 + $0x2d8] sm:$0xff]  ;;  %v4586_v0 = vpack.c.bf16 %v3878_v53, %v3877_v60 }
 0x806   :  { %v4585_v24 = vpack.c.bf16 %v3814_v48, %v3813_v50  ;;  %v3879_v60 = vld [vmem:[#allocation2 + $0x2e9] sm:$0xff] }
 0x807   :  { %v5636_v38 = vpop.f32.mrf.mxu3  ;;  %5340 = vmatmul.bf16.gmra.mxu1 %v4576_v63  ;;  %v3816_v50 = vld [vmem:[#allocation2 + $0x2f0] sm:$0xff] }
 0x808   :  { %v5637_v37 = vadd.f32 %v5636_v38, %v5468_v36  ;;  %5509 = vmatmul.bf16.gmra.mxu2 %v4577_v33  ;;  %v3941_v36 = vld [vmem:[#allocation2 + $0x2d2] sm:$0xff] }
 0x80b   :  { %v5470_v27 = vpop.f32.mrf.mxu2 }
 0x80c   :  { %5678 = vmatmul.bf16.gmra.mxu3 %v4578_v4  ;;  %v5471_v3 = vadd.f32 %v5470_v27, %v5301_v30  ;;  %v5803_v41 = vpop.f32.mrf.mxu0  ;;  %v5303_v61 = vpop.f32.mrf.mxu1 }
 0x80d   :  { %v10387_v9 = vadd.f32 %v5803_v41, %v5635_v44  ;;  %v4587_v44 = vpack.c.bf16 %v3942_v11, %v3941_v36  ;;  %v7981_v41 = vld [vmem:[#allocation8 + $0x178] sm:$0xff] }
 0x80e   :  { %6042 = vmatpush.bf16.msra.mxu2 %v7981_v41  ;;  %v3944_v36 = vld [vmem:[#allocation2 + $0x2f2] sm:$0xff]  ;;  %v7987_v41 = vld [vmem:[#allocation8 + $0x1a8] sm:$0xff] }
 0x80f   :  { %v5639_v59 = vpop.f32.mrf.mxu3  ;;  %5842 = vmatmul.bf16.gmra.mxu0 %v4576_v63 }
 0x810   :  { %v5640_v12 = vadd.f32 %v5639_v59, %v5471_v3 }
 0x813   :  { %v5472_v54 = vpop.f32.mrf.mxu2 }
 0x814   :  { %v5473_v17 = vadd.f32 %v5472_v54, %v5303_v61  ;;  %v5805_v25 = vpop.f32.mrf.mxu0  ;;  %v5306_v33 = vpop.f32.mrf.mxu1  ;;  %v7989_v61 = vld [vmem:[#allocation8 + $0x1b8] sm:$0xff] }
 0x815   :  { %v10389_v39 = vadd.f32 %v5805_v25, %v5637_v37  ;;  %v3880_v37 = vld [vmem:[#allocation2 + $0x2f1] sm:$0xff]  ;;  %6211 = vmatpush.bf16.msra.mxu3 %v7989_v61 }
 0x817   :  { %v5641_v2 = vpop.f32.mrf.mxu3  ;;  %5345 = vmatmul.bf16.gmra.mxu1 %v4585_v24 }
 0x818   :  { %v5642_v38 = vadd.f32 %v5641_v2, %v5473_v17  ;;  %5514 = vmatmul.bf16.gmra.mxu2 %v4586_v0  ;;  %v3815_v17 = vld [vmem:[#allocation2 + $0x2e8] sm:$0xff]  ;;  %v4595_v2 = vpack.c.bf16 %v3880_v37, %v3879_v60 }
 0x819   :  { %v3943_v0 = vld [vmem:[#allocation2 + $0x2ea] sm:$0xff] }
 0x81b   :  { %v5475_v6 = vpop.f32.mrf.mxu2 }
 0x81c   :  { %5683 = vmatmul.bf16.gmra.mxu3 %v4587_v44  ;;  %v5476_v30 = vadd.f32 %v5475_v6, %v5306_v33  ;;  %v5808_v4 = vpop.f32.mrf.mxu0  ;;  %v5308_v3 = vpop.f32.mrf.mxu1  ;;  %v7980_v44 = vld [vmem:[#allocation8 + $0x170] sm:$0xff] }
 0x81d   :  { %v10391_v59 = vadd.f32 %v5808_v4, %v5640_v12  ;;  %v7988_v6 = vld [vmem:[#allocation8 + $0x1b0] sm:$0xff]  ;;  %6043 = vmatpush.bf16.msra.mxu2 %v7980_v44  ;;  %v3817_v44 = vld [vmem:[#allocation2 + $0x300] sm:$0xff] }
 0x81e   :  { %6212 = vmatpush.bf16.msra.mxu3 %v7988_v6  ;;  %v3818_v6 = vld [vmem:[#allocation2 + $0x308] sm:$0xff] }
 0x81f   :  { %v5644_v63 = vpop.f32.mrf.mxu3  ;;  %5847 = vmatmul.bf16.gmra.mxu0 %v4585_v24  ;;  %v4594_v24 = vpack.c.bf16 %v3816_v50, %v3815_v17  ;;  %v7986_v17 = vld [vmem:[#allocation8 + $0x1a0] sm:$0xff]  ;;  %v7977_v50 = vld [vmem:[#allocation8 + $0x158] sm:$0xff] }
 0x820   :  { %v5645_v27 = vadd.f32 %v5644_v63, %v5476_v30  ;;  %v4596_v30 = vpack.c.bf16 %v3944_v36, %v3943_v0  ;;  %v7979_v63 = vld [vmem:[#allocation8 + $0x168] sm:$0xff] }
 0x821   :  { %6044 = vmatpush.bf16.msra.mxu2 %v7979_v63  ;;  %v3881_v0 = vld [vmem:[#allocation2 + $0x301] sm:$0xff]  ;;  %v3882_v36 = vld [vmem:[#allocation2 + $0x309] sm:$0xff] }
 0x822   :  { %6213 = vmatpush.bf16.msra.mxu3 %v7987_v41  ;;  %v4604_v63 = vpack.c.bf16 %v3882_v36, %v3881_v0  ;;  %v7995_v36 = vld [vmem:[#allocation8 + $0x1e8] sm:$0xff] }
 0x823   :  { %v5477_v54 = vpop.f32.mrf.mxu2 }
 0x824   :  { %v5478_v53 = vadd.f32 %v5477_v54, %v5308_v3  ;;  %v5810_v11 = vpop.f32.mrf.mxu0  ;;  %v5311_v33 = vpop.f32.mrf.mxu1 }
 0x825   :  { %v10393_v12 = vadd.f32 %v5810_v11, %v5642_v38 }
 0x826   :  { %6214 = vmatpush.bf16.msra.mxu3 %v7986_v17  ;;  %v7996_v17 = vld [vmem:[#allocation8 + $0x1f0] sm:$0xff] }
 0x827   :  { %v5646_v48 = vpop.f32.mrf.mxu3  ;;  %12037 = vst [vmem:[#allocation142_spill] sm:$0xff] %v10393_v12  ;;  %5350 = vmatmul.bf16.gmra.mxu1 %v4594_v24 }
 0x828   :  { %v5647_v25 = vadd.f32 %v5646_v48, %v5478_v53  ;;  %5519 = vmatmul.bf16.gmra.mxu2 %v4595_v2  ;;  %v7978_v53 = vld [vmem:[#allocation8 + $0x160] sm:$0xff]  ;;  %v7997_v48 = vld [vmem:[#allocation8 + $0x1f8] sm:$0xff] }
 0x829   :  { %6045 = vmatpush.bf16.msra.mxu2 %v7978_v53  ;;  %6380 = vmatpush.bf16.msra.mxu0 %v7997_v48  ;;  %v7976_v53 = vld [vmem:[#allocation8 + $0x150] sm:$0xff]  ;;  %v7975_v48 = vld [vmem:[#allocation8 + $0x148] sm:$0xff] }
 0x82b   :  { %v5480_v4 = vpop.f32.mrf.mxu2 }
 0x82c   :  { %5688 = vmatmul.bf16.gmra.mxu3 %v4596_v30  ;;  %v5481_v3 = vadd.f32 %v5480_v4, %v5311_v33  ;;  %v5813_v54 = vpop.f32.mrf.mxu0  ;;  %v5313_v37 = vpop.f32.mrf.mxu1  ;;  %v7985_v33 = vld [vmem:[#allocation8 + $0x198] sm:$0xff]  ;;  %v3946_v4 = vld [vmem:[#allocation2 + $0x30a] sm:$0xff] }
 0x82d   :  { %v10395_v38 = vadd.f32 %v5813_v54, %v5645_v27  ;;  %v3945_v27 = vld [vmem:[#allocation2 + $0x302] sm:$0xff]  ;;  %6046 = vmatpush.bf16.msra.mxu2 %v7977_v50  ;;  %v4603_v54 = vpack.c.bf16 %v3818_v6, %v3817_v44  ;;  %6215 = vmatpush.bf16.msra.mxu3 %v7985_v33 }
 0x82e   :  { %6381 = vmatpush.bf16.msra.mxu0 %v7996_v17  ;;  %v3883_v17 = vld [vmem:[#allocation2 + $0x319] sm:$0xff] }
 0x82f   :  { %v5649_v61 = vpop.f32.mrf.mxu3  ;;  %12038 = vst [vmem:[#allocation91_spill] sm:$0xff] %v10395_v38  ;;  %5852 = vmatmul.bf16.gmra.mxu0 %v4594_v24 }
 0x830   :  { %v5650_v60 = vadd.f32 %v5649_v61, %v5481_v3 }
 0x831   :  { %6047 = vmatpush.bf16.msra.mxu2 %v7976_v53 }
 0x832   :  { %6382 = vmatpush.bf16.msra.mxu0 %v7995_v36 }
 0x833   :  { %v5482_v2 = vpop.f32.mrf.mxu2 }
 0x834   :  { %v5483_v11 = vadd.f32 %v5482_v2, %v5313_v37  ;;  %v5815_v3 = vpop.f32.mrf.mxu0  ;;  %v5316_v24 = vpop.f32.mrf.mxu1  ;;  %v7984_v37 = vld [vmem:[#allocation8 + $0x190] sm:$0xff]  ;;  %v4605_v2 = vpack.c.bf16 %v3946_v4, %v3945_v27  ;;  %v7982_v27 = vld [vmem:[#allocation8 + $0x180] sm:$0xff] }
 0x835   :  { %v10397_v61 = vadd.f32 %v5815_v3, %v5647_v25  ;;  %6216 = vmatpush.bf16.msra.mxu3 %v7984_v37  ;;  %6048 = vmatpush.bf16.msra.mxu2 %v7975_v48  ;;  %v7994_v4 = vld [vmem:[#allocation8 + $0x1e0] sm:$0xff]  ;;  %v8005_v3 = vld [vmem:[#allocation8 + $0x238] sm:$0xff] }
 0x836   :  { %6383 = vmatpush.bf16.msra.mxu0 %v7994_v4  ;;  %v7993_v37 = vld [vmem:[#allocation8 + $0x1d8] sm:$0xff]  ;;  %6549 = vmatpush.bf16.msra.mxu1 %v8005_v3 }
 0x837   :  { %v5651_v30 = vpop.f32.mrf.mxu3  ;;  %12039 = vst [vmem:[#allocation90_spill] sm:$0xff] %v10397_v61  ;;  %5355 = vmatmul.bf16.gmra.mxu1 %v4603_v54  ;;  %v3819_v48 = vld [vmem:[#allocation2 + $0x318] sm:$0xff]  ;;  %v7992_v61 = vld [vmem:[#allocation8 + $0x1d0] sm:$0xff] }
 0x838   :  { %v5652_v41 = vadd.f32 %v5651_v30, %v5483_v11  ;;  %5524 = vmatmul.bf16.gmra.mxu2 %v4604_v63  ;;  %v7983_v11 = vld [vmem:[#allocation8 + $0x188] sm:$0xff]  ;;  %v7974_v63 = vld [vmem:[#allocation8 + $0x140] sm:$0xff] }
 0x839   :  { %6217 = vmatpush.bf16.msra.mxu3 %v7983_v11  ;;  %6049 = vmatpush.bf16.msra.mxu2 %v7974_v63  ;;  %v3948_v11 = vld [vmem:[#allocation2 + $0x322] sm:$0xff] }
 0x83a   :  { %6384 = vmatpush.bf16.msra.mxu0 %v7993_v37  ;;  %v7990_v37 = vld [vmem:[#allocation8 + $0x1c0] sm:$0xff] }
 0x83b   :  { %v5485_v0 = vpop.f32.mrf.mxu2 }
 0x83c   :  { %5693 = vmatmul.bf16.gmra.mxu3 %v4605_v2  ;;  %v5486_v50 = vadd.f32 %v5485_v0, %v5316_v24  ;;  %v5818_v25 = vpop.f32.mrf.mxu0  ;;  %v5318_v6 = vpop.f32.mrf.mxu1  ;;  %v3884_v24 = vld [vmem:[#allocation2 + $0x321] sm:$0xff] }
 0x83d   :  { %v10399_v33 = vadd.f32 %v5818_v25, %v5650_v60  ;;  %6218 = vmatpush.bf16.msra.mxu3 %v7982_v27  ;;  %v3820_v0 = vld [vmem:[#allocation2 + $0x320] sm:$0xff]  ;;  %v4613_v60 = vpack.c.bf16 %v3884_v24, %v3883_v17  ;;  %v7991_v27 = vld [vmem:[#allocation8 + $0x1c8] sm:$0xff] }
 0x83e   :  { %v4612_v63 = vpack.c.bf16 %v3820_v0, %v3819_v48  ;;  %6385 = vmatpush.bf16.msra.mxu0 %v7992_v61  ;;  %v4077_v48 = vld [vmem:[#allocation2 + $0x1a] sm:$0xff]  ;;  %v4078_v0 = vld [vmem:[#allocation2 + $0x22] sm:$0xff] }
 0x83f   :  { %v5654_v30 = vpop.f32.mrf.mxu3  ;;  %12040 = vst [vmem:[#allocation144_spill] sm:$0xff] %v10399_v33  ;;  %5857 = vmatmul.bf16.gmra.mxu0 %v4603_v54  ;;  %v4338_v61 = vpack.c.bf16 %v4078_v0, %v4077_v48 }
 0x840   :  { %v5655_v44 = vadd.f32 %v5654_v30, %v5486_v50  ;;  %v3947_v50 = vld [vmem:[#allocation2 + $0x31a] sm:$0xff] }
 0x841   :  { %v4614_v4 = vpack.c.bf16 %v3948_v11, %v3947_v50  ;;  %v4014_v50 = vld [vmem:[#allocation2 + $0x21] sm:$0xff] }
 0x842   :  { %6386 = vmatpush.bf16.msra.mxu0 %v7991_v27 }
 0x843   :  { %v5487_v53 = vpop.f32.mrf.mxu2 }
 0x844   :  { %v5488_v2 = vadd.f32 %v5487_v53, %v5318_v6  ;;  %v5820_v30 = vpop.f32.mrf.mxu0  ;;  %v5321_v33 = vpop.f32.mrf.mxu1 }
 0x845   :  { %v10401_v54 = vadd.f32 %v5820_v30, %v5652_v41  ;;  %v4141_v30 = vld [vmem:[#allocation2 + $0x30] sm:$0xff] }
 0x846   :  { %6387 = vmatpush.bf16.msra.mxu0 %v7990_v37  ;;  %v4011_v37 = vld [vmem:[#allocation2 + $0x330] sm:$0xff] }
 0x847   :  { %v5656_v36 = vpop.f32.mrf.mxu3  ;;  %12041 = vst [vmem:[#allocation143_spill] sm:$0xff] %v10401_v54  ;;  %5360 = vmatmul.bf16.gmra.mxu1 %v4612_v63 }
 0x848   :  { %v5657_v25 = vadd.f32 %v5656_v36, %v5488_v2  ;;  %5529 = vmatmul.bf16.gmra.mxu2 %v4613_v60  ;;  %v4013_v60 = vld [vmem:[#allocation2 + $0x19] sm:$0xff] }
 0x84b   :  { %v5490_v6 = vpop.f32.mrf.mxu2 }
 0x84c   :  { %5698 = vmatmul.bf16.gmra.mxu3 %v4614_v4  ;;  %v5491_v3 = vadd.f32 %v5490_v6, %v5321_v33  ;;  %v5823_v17 = vpop.f32.mrf.mxu0  ;;  %v5323_v38 = vpop.f32.mrf.mxu1  ;;  %v4142_v33 = vld [vmem:[#allocation2 + $0x38] sm:$0xff] }
 0x84d   :  { %v10403_v2 = vadd.f32 %v5823_v17, %v5655_v44  ;;  %v4337_v44 = vpack.c.bf16 %v4014_v50, %v4013_v60  ;;  %v4339_v27 = vpack.c.bf16 %v4142_v33, %v4141_v30  ;;  %v4015_v50 = vld [vmem:[#allocation2 + $0x31] sm:$0xff] }
 0x84f   :  { %v5659_v53 = vpop.f32.mrf.mxu3  ;;  %12042 = vst [vmem:[#allocation145_spill] sm:$0xff] %v10403_v2  ;;  %5862 = vmatmul.bf16.gmra.mxu0 %v4612_v63 }
 0x850   :  { %v5660_v24 = vadd.f32 %v5659_v53, %v5491_v3 }
 0x853   :  { %v5492_v41 = vpop.f32.mrf.mxu2 }
 0x854   :  { %v5493_v36 = vadd.f32 %v5492_v41, %v5323_v38  ;;  %v5825_v4 = vpop.f32.mrf.mxu0  ;;  %v5326_v3 = vpop.f32.mrf.mxu1  ;;  %v4012_v38 = vld [vmem:[#allocation2 + $0x338] sm:$0xff] }
 0x855   :  { %v10405_v53 = vadd.f32 %v5825_v4, %v5657_v25  ;;  %v4615_v12 = vpack.c.bf16 %v4012_v38, %v4011_v37  ;;  %v4079_v25 = vld [vmem:[#allocation2 + $0x32] sm:$0xff]  ;;  %v4143_v4 = vld [vmem:[#allocation2 + $0x48] sm:$0xff] }
 0x857   :  { %v5661_v11 = vpop.f32.mrf.mxu3  ;;  %12043 = vst [vmem:[#allocation93_spill] sm:$0xff] %v10405_v53  ;;  %5881 = vmatmul.bf16.vlgmr.msrb.gmra.mxu1 %v4337_v44 }
 0x858   :  { %v5662_v6 = vadd.f32 %v5661_v11, %v5493_v36  ;;  %6050 = vmatmul.bf16.vlgmr.msra.gmra.mxu2 %v4338_v61  ;;  %v4080_v11 = vld [vmem:[#allocation2 + $0x3a] sm:$0xff] }
 0x859   :  { %v4016_v61 = vld [vmem:[#allocation2 + $0x39] sm:$0xff]  ;;  %v4347_v33 = vpack.c.bf16 %v4080_v11, %v4079_v25  ;;  %v4081_v11 = vld [vmem:[#allocation2 + $0x4a] sm:$0xff] }
 0x85b   :  { %v5495_v63 = vpop.f32.mrf.mxu2 }
 0x85c   :  { %6219 = vmatmul.bf16.vlgmr.msra.gmra.mxu3 %v4339_v27  ;;  %v5496_v17 = vadd.f32 %v5495_v63, %v5326_v3  ;;  %v5828_v2 = vpop.f32.mrf.mxu0  ;;  %v5328_v48 = vpop.f32.mrf.mxu1  ;;  %v4144_v3 = vld [vmem:[#allocation2 + $0x50] sm:$0xff] }
 0x85d   :  { %v10407_v0 = vadd.f32 %v5828_v2, %v5660_v24  ;;  %v4348_v24 = vpack.c.bf16 %v4144_v3, %v4143_v4  ;;  %v4146_v4 = vld [vmem:[#allocation2 + $0x68] sm:$0xff] }
 0x85f   :  { %v5664_v41 = vpop.f32.mrf.mxu3  ;;  %5867 = vmatmul.bf16.gmra.mxu0 %v4615_v12 }
 0x860   :  { %v5665_v54 = vadd.f32 %v5664_v41, %v5496_v17  ;;  %v4346_v17 = vpack.c.bf16 %v4016_v61, %v4015_v50 }
 0x863   :  { %v5497_v36 = vpop.f32.mrf.mxu2 }
 0x864   :  { %v5498_v60 = vadd.f32 %v5497_v36, %v5328_v48  ;;  %v5830_v44 = vpop.f32.mrf.mxu0  ;;  %v5331_v63 = vpop.f32.mrf.mxu1 }
 0x865   :  { %v10409_v53 = vadd.f32 %v5830_v44, %v5662_v6  ;;  %v4017_v6 = vld [vmem:[#allocation2 + $0x49] sm:$0xff]  ;;  %v4018_v44 = vld [vmem:[#allocation2 + $0x51] sm:$0xff] }
 0x867   :  { %v5666_v30 = vpop.f32.mrf.mxu3  ;;  %12044 = vst [vmem:[#allocation94_spill] sm:$0xff] %v10409_v53  ;;  %5886 = vmatmul.bf16.gmra.mxu1 %v4346_v17 }
 0x868   :  { %v5667_v27 = vadd.f32 %v5666_v30, %v5498_v60  ;;  %6055 = vmatmul.bf16.gmra.mxu2 %v4347_v33  ;;  %v4082_v60 = vld [vmem:[#allocation2 + $0x52] sm:$0xff]  ;;  %v4145_v33 = vld [vmem:[#allocation2 + $0x60] sm:$0xff] }
 0x869   :  { %v4356_v61 = vpack.c.bf16 %v4082_v60, %v4081_v11  ;;  %v8004_v11 = vld [vmem:[#allocation8 + $0x230] sm:$0xff] }
 0x86a   :  { %6550 = vmatpush.bf16.msra.mxu1 %v8004_v11 }
 0x86b   :  { %v5500_v12 = vpop.f32.mrf.mxu2 }
 0x86c   :  { %6224 = vmatmul.bf16.gmra.mxu3 %v4348_v24  ;;  %v5501_v2 = vadd.f32 %v5500_v12, %v5331_v63  ;;  %v5833_v38 = vpop.f32.mrf.mxu0  ;;  %v5333_v48 = vpop.f32.mrf.mxu1 }
 0x86d   :  { %v10411_v36 = vadd.f32 %v5833_v38, %v5665_v54  ;;  %v4357_v54 = vpack.c.bf16 %v4146_v4, %v4145_v33  ;;  %v4147_v4 = vld [vmem:[#allocation2 + $0x78] sm:$0xff] }
 0x86f   :  { %v5669_v37 = vpop.f32.mrf.mxu3  ;;  %12045 = vst [vmem:[#allocation95_spill] sm:$0xff] %v10411_v36  ;;  %6388 = vmatmul.bf16.vlgmr.msra.gmra.mxu0 %v4346_v17 }
 0x870   :  { %v5670_v41 = vadd.f32 %v5669_v37, %v5501_v2  ;;  %v4355_v2 = vpack.c.bf16 %v4018_v44, %v4017_v6  ;;  %v4019_v6 = vld [vmem:[#allocation2 + $0x61] sm:$0xff]  ;;  %v4020_v44 = vld [vmem:[#allocation2 + $0x69] sm:$0xff] }
 0x873   :  { %v5502_v25 = vpop.f32.mrf.mxu2 }
 0x874   :  { %v5503_v30 = vadd.f32 %v5502_v25, %v5333_v48  ;;  %v5835_v3 = vpop.f32.mrf.mxu0  ;;  %v5336_v63 = vpop.f32.mrf.mxu1 }
 0x875   :  { %v10413_v12 = vadd.f32 %v5835_v3, %v5667_v27  ;;  %v4148_v3 = vld [vmem:[#allocation2 + $0x80] sm:$0xff] }
 0x877   :  { %v5671_v50 = vpop.f32.mrf.mxu3  ;;  %12046 = vst [vmem:[#allocation96_spill] sm:$0xff] %v10413_v12  ;;  %5891 = vmatmul.bf16.gmra.mxu1 %v4355_v2 }
 0x878   :  { %v5672_v24 = vadd.f32 %v5671_v50, %v5503_v30  ;;  %6060 = vmatmul.bf16.gmra.mxu2 %v4356_v61  ;;  %v4083_v30 = vld [vmem:[#allocation2 + $0x62] sm:$0xff]  ;;  %v4084_v50 = vld [vmem:[#allocation2 + $0x6a] sm:$0xff] }
 0x879   :  { %v4365_v33 = vpack.c.bf16 %v4084_v50, %v4083_v30  ;;  %v4085_v50 = vld [vmem:[#allocation2 + $0x7a] sm:$0xff] }
 0x87b   :  { %v5505_v17 = vpop.f32.mrf.mxu2 }
 0x87c   :  { %6229 = vmatmul.bf16.gmra.mxu3 %v4357_v54  ;;  %v5506_v37 = vadd.f32 %v5505_v17, %v5336_v63  ;;  %v5838_v48 = vpop.f32.mrf.mxu0  ;;  %v5338_v36 = vpop.f32.mrf.mxu1 }
 0x87d   :  { %v10415_v53 = vadd.f32 %v5838_v48, %v5670_v41  ;;  %v4364_v41 = vpack.c.bf16 %v4020_v44, %v4019_v6 }
 0x87f   :  { %v5674_v38 = vpop.f32.mrf.mxu3  ;;  %12047 = vst [vmem:[#allocation97_spill] sm:$0xff] %v10415_v53  ;;  %6393 = vmatmul.bf16.gmra.mxu0 %v4355_v2  ;;  %v4366_v2 = vpack.c.bf16 %v4148_v3, %v4147_v4  ;;  %v4150_v4 = vld [vmem:[#allocation2 + $0x98] sm:$0xff] }
 0x880   :  { %v5675_v25 = vadd.f32 %v5674_v38, %v5506_v37 }
 0x883   :  { %v5507_v60 = vpop.f32.mrf.mxu2 }
 0x884   :  { %v5508_v27 = vadd.f32 %v5507_v60, %v5338_v36  ;;  %v5840_v63 = vpop.f32.mrf.mxu0  ;;  %v5341_v17 = vpop.f32.mrf.mxu1 }
 0x885   :  { %v10417_v37 = vadd.f32 %v5840_v63, %v5672_v24  ;;  %v4021_v24 = vld [vmem:[#allocation2 + $0x79] sm:$0xff]  ;;  %v4022_v63 = vld [vmem:[#allocation2 + $0x81] sm:$0xff] }
 0x887   :  { %v5676_v61 = vpop.f32.mrf.mxu3  ;;  %12048 = vst [vmem:[#allocation98_spill] sm:$0xff] %v10417_v37  ;;  %5896 = vmatmul.bf16.gmra.mxu1 %v4364_v41 }
 0x888   :  { %v5677_v54 = vadd.f32 %v5676_v61, %v5508_v27  ;;  %6065 = vmatmul.bf16.gmra.mxu2 %v4365_v33  ;;  %v4086_v27 = vld [vmem:[#allocation2 + $0x82] sm:$0xff]  ;;  %v4149_v33 = vld [vmem:[#allocation2 + $0x90] sm:$0xff] }
 0x889   :  { %v4374_v44 = vpack.c.bf16 %v4086_v27, %v4085_v50  ;;  %v4087_v27 = vld [vmem:[#allocation2 + $0x92] sm:$0xff] }
 0x88b   :  { %v5510_v38 = vpop.f32.mrf.mxu2 }
 0x88c   :  { %6234 = vmatmul.bf16.gmra.mxu3 %v4366_v2  ;;  %v5511_v48 = vadd.f32 %v5510_v38, %v5341_v17  ;;  %v5843_v11 = vpop.f32.mrf.mxu0  ;;  %v5343_v53 = vpop.f32.mrf.mxu1 }
 0x88d   :  { %v10419_v12 = vadd.f32 %v5843_v11, %v5675_v25  ;;  %v4375_v25 = vpack.c.bf16 %v4150_v4, %v4149_v33  ;;  %v4152_v33 = vld [vmem:[#allocation2 + $0xb0] sm:$0xff] }
 0x88f   :  { %v5679_v36 = vpop.f32.mrf.mxu3  ;;  %12049 = vst [vmem:[#allocation99_spill] sm:$0xff] %v10419_v12  ;;  %6398 = vmatmul.bf16.gmra.mxu0 %v4364_v41 }
 0x890   :  { %v5680_v60 = vadd.f32 %v5679_v36, %v5511_v48  ;;  %v4373_v48 = vpack.c.bf16 %v4022_v63, %v4021_v24 }
 0x893   :  { %v5512_v30 = vpop.f32.mrf.mxu2 }
 0x894   :  { %v5513_v61 = vadd.f32 %v5512_v30, %v5343_v53  ;;  %v5845_v3 = vpop.f32.mrf.mxu0  ;;  %v5346_v17 = vpop.f32.mrf.mxu1 }
 0x895   :  { %v10421_v38 = vadd.f32 %v5845_v3, %v5677_v54  ;;  %v4023_v54 = vld [vmem:[#allocation2 + $0x91] sm:$0xff]  ;;  %v4024_v3 = vld [vmem:[#allocation2 + $0x99] sm:$0xff] }
 0x897   :  { %v5681_v6 = vpop.f32.mrf.mxu3  ;;  %12050 = vst [vmem:[#allocation100_spill] sm:$0xff] %v10421_v38  ;;  %5901 = vmatmul.bf16.gmra.mxu1 %v4373_v48 }
 0x898   :  { %v5682_v2 = vadd.f32 %v5681_v6, %v5513_v61  ;;  %6070 = vmatmul.bf16.gmra.mxu2 %v4374_v44  ;;  %v4088_v61 = vld [vmem:[#allocation2 + $0x9a] sm:$0xff]  ;;  %v4151_v44 = vld [vmem:[#allocation2 + $0xa8] sm:$0xff] }
 0x899   :  { %v4383_v63 = vpack.c.bf16 %v4088_v61, %v4087_v27  ;;  %v4089_v61 = vld [vmem:[#allocation2 + $0xaa] sm:$0xff] }
 0x89b   :  { %v5515_v41 = vpop.f32.mrf.mxu2 }
 0x89c   :  { %6239 = vmatmul.bf16.gmra.mxu3 %v4375_v25  ;;  %v5516_v36 = vadd.f32 %v5515_v41, %v5346_v17  ;;  %v5848_v53 = vpop.f32.mrf.mxu0  ;;  %v5348_v12 = vpop.f32.mrf.mxu1 }
 0x89d   :  { %v10423_v37 = vadd.f32 %v5848_v53, %v5680_v60  ;;  %v4384_v60 = vpack.c.bf16 %v4152_v33, %v4151_v44  ;;  %v4154_v44 = vld [vmem:[#allocation2 + $0xc8] sm:$0xff] }
 0x89f   :  { %v5684_v11 = vpop.f32.mrf.mxu3  ;;  %12051 = vst [vmem:[#allocation101_spill] sm:$0xff] %v10423_v37  ;;  %6403 = vmatmul.bf16.gmra.mxu0 %v4373_v48 }
 0x8a0   :  { %v5685_v30 = vadd.f32 %v5684_v11, %v5516_v36  ;;  %v4382_v36 = vpack.c.bf16 %v4024_v3, %v4023_v54 }
 0x8a3   :  { %v5517_v50 = vpop.f32.mrf.mxu2 }
 0x8a4   :  { %v5518_v6 = vadd.f32 %v5517_v50, %v5348_v12  ;;  %v5850_v4 = vpop.f32.mrf.mxu0  ;;  %v5351_v17 = vpop.f32.mrf.mxu1 }
 0x8a5   :  { %v10425_v41 = vadd.f32 %v5850_v4, %v5682_v2  ;;  %v4025_v2 = vld [vmem:[#allocation2 + $0xa9] sm:$0xff]  ;;  %v4026_v4 = vld [vmem:[#allocation2 + $0xb1] sm:$0xff] }
 0x8a7   :  { %v5686_v24 = vpop.f32.mrf.mxu3  ;;  %12052 = vst [vmem:[#allocation102_spill] sm:$0xff] %v10425_v41  ;;  %5906 = vmatmul.bf16.gmra.mxu1 %v4382_v36 }
 0x8a8   :  { %v5687_v25 = vadd.f32 %v5686_v24, %v5518_v6  ;;  %6075 = vmatmul.bf16.gmra.mxu2 %v4383_v63  ;;  %v4090_v6 = vld [vmem:[#allocation2 + $0xb2] sm:$0xff]  ;;  %v4153_v63 = vld [vmem:[#allocation2 + $0xc0] sm:$0xff] }
 0x8a9   :  { %v4392_v3 = vpack.c.bf16 %v4090_v6, %v4089_v61  ;;  %v8003_v61 = vld [vmem:[#allocation8 + $0x228] sm:$0xff] }
 0x8aa   :  { %6551 = vmatpush.bf16.msra.mxu1 %v8003_v61 }
 0x8ab   :  { %v5520_v48 = vpop.f32.mrf.mxu2 }
 0x8ac   :  { %6244 = vmatmul.bf16.gmra.mxu3 %v4384_v60  ;;  %v5521_v11 = vadd.f32 %v5520_v48, %v5351_v17  ;;  %v5853_v12 = vpop.f32.mrf.mxu0  ;;  %v5353_v37 = vpop.f32.mrf.mxu1 }
 0x8ad   :  { %v10427_v38 = vadd.f32 %v5853_v12, %v5685_v30  ;;  %v4393_v30 = vpack.c.bf16 %v4154_v44, %v4153_v63  ;;  %v4155_v44 = vld [vmem:[#allocation2 + $0xd8] sm:$0xff] }
 0x8af   :  { %v5689_v53 = vpop.f32.mrf.mxu3  ;;  %12053 = vst [vmem:[#allocation103_spill] sm:$0xff] %v10427_v38  ;;  %6408 = vmatmul.bf16.gmra.mxu0 %v4382_v36 }
 0x8b0   :  { %v5690_v50 = vadd.f32 %v5689_v53, %v5521_v11  ;;  %v4391_v11 = vpack.c.bf16 %v4026_v4, %v4025_v2  ;;  %v4027_v2 = vld [vmem:[#allocation2 + $0xc1] sm:$0xff]  ;;  %v4028_v4 = vld [vmem:[#allocation2 + $0xc9] sm:$0xff] }
 0x8b3   :  { %v5522_v27 = vpop.f32.mrf.mxu2 }
 0x8b4   :  { %v5523_v24 = vadd.f32 %v5522_v27, %v5353_v37  ;;  %v5855_v33 = vpop.f32.mrf.mxu0  ;;  %v5356_v17 = vpop.f32.mrf.mxu1 }
 0x8b5   :  { %v10429_v48 = vadd.f32 %v5855_v33, %v5687_v25  ;;  %v4156_v33 = vld [vmem:[#allocation2 + $0xe0] sm:$0xff] }
 0x8b7   :  { %v5691_v54 = vpop.f32.mrf.mxu3  ;;  %12054 = vst [vmem:[#allocation110_spill] sm:$0xff] %v10429_v48  ;;  %5911 = vmatmul.bf16.gmra.mxu1 %v4391_v11 }
 0x8b8   :  { %v5692_v60 = vadd.f32 %v5691_v54, %v5523_v24  ;;  %6080 = vmatmul.bf16.gmra.mxu2 %v4392_v3  ;;  %v4091_v24 = vld [vmem:[#allocation2 + $0xc2] sm:$0xff]  ;;  %v4092_v54 = vld [vmem:[#allocation2 + $0xca] sm:$0xff] }
 0x8b9   :  { %v4401_v63 = vpack.c.bf16 %v4092_v54, %v4091_v24  ;;  %v4093_v54 = vld [vmem:[#allocation2 + $0xda] sm:$0xff] }
 0x8bb   :  { %v5525_v36 = vpop.f32.mrf.mxu2 }
 0x8bc   :  { %6249 = vmatmul.bf16.gmra.mxu3 %v4393_v30  ;;  %v5526_v53 = vadd.f32 %v5525_v36, %v5356_v17  ;;  %v5858_v37 = vpop.f32.mrf.mxu0  ;;  %v5358_v38 = vpop.f32.mrf.mxu1 }
 0x8bd   :  { %v10431_v41 = vadd.f32 %v5858_v37, %v5690_v50  ;;  %v4400_v50 = vpack.c.bf16 %v4028_v4, %v4027_v2 }
 0x8bf   :  { %v5694_v12 = vpop.f32.mrf.mxu3  ;;  %12055 = vst [vmem:[#allocation111_spill] sm:$0xff] %v10431_v41  ;;  %6413 = vmatmul.bf16.gmra.mxu0 %v4391_v11  ;;  %v4402_v11 = vpack.c.bf16 %v4156_v33, %v4155_v44  ;;  %v4158_v44 = vld [vmem:[#allocation2 + $0xf8] sm:$0xff] }
 0x8c0   :  { %v5695_v27 = vadd.f32 %v5694_v12, %v5526_v53 }
 0x8c3   :  { %v5527_v6 = vpop.f32.mrf.mxu2 }
 0x8c4   :  { %v5528_v25 = vadd.f32 %v5527_v6, %v5358_v38  ;;  %v5860_v17 = vpop.f32.mrf.mxu0  ;;  %v5361_v36 = vpop.f32.mrf.mxu1 }
 0x8c5   :  { %v10433_v53 = vadd.f32 %v5860_v17, %v5692_v60  ;;  %v4029_v60 = vld [vmem:[#allocation2 + $0xd9] sm:$0xff]  ;;  %v4030_v17 = vld [vmem:[#allocation2 + $0xe1] sm:$0xff] }
 0x8c7   :  { %v5696_v3 = vpop.f32.mrf.mxu3  ;;  %5916 = vmatmul.bf16.gmra.mxu1 %v4400_v50 }
 0x8c8   :  { %v5697_v30 = vadd.f32 %v5696_v3, %v5528_v25  ;;  %6085 = vmatmul.bf16.gmra.mxu2 %v4401_v63  ;;  %v4094_v25 = vld [vmem:[#allocation2 + $0xe2] sm:$0xff]  ;;  %v4157_v63 = vld [vmem:[#allocation2 + $0xf0] sm:$0xff] }
 0x8c9   :  { %v4410_v4 = vpack.c.bf16 %v4094_v25, %v4093_v54 }
 0x8cb   :  { %v5530_v12 = vpop.f32.mrf.mxu2 }
 0x8cc   :  { %6254 = vmatmul.bf16.gmra.mxu3 %v4402_v11  ;;  %v5531_v37 = vadd.f32 %v5530_v12, %v5361_v36  ;;  %v5863_v61 = vpop.f32.mrf.mxu0  ;;  %v5363_v41 = vpop.f32.mrf.mxu1 }
 0x8cd   :  { %v10435_v48 = vadd.f32 %v5863_v61, %v5695_v27  ;;  %v4409_v27 = vpack.c.bf16 %v4030_v17, %v4029_v60  ;;  %v4031_v60 = vld [vmem:[#allocation2 + $0xf1] sm:$0xff]  ;;  %v4032_v17 = vld [vmem:[#allocation2 + $0xf9] sm:$0xff] }
 0x8cf   :  { %v5699_v38 = vpop.f32.mrf.mxu3  ;;  %12056 = vst [vmem:[#allocation112_spill] sm:$0xff] %v10435_v48  ;;  %6418 = vmatmul.bf16.gmra.mxu0 %v4400_v50  ;;  %v4411_v50 = vpack.c.bf16 %v4158_v44, %v4157_v63  ;;  %v4159_v44 = vld [vmem:[#allocation2 + $0x108] sm:$0xff] }
 0x8d0   :  { %v5700_v6 = vadd.f32 %v5699_v38, %v5531_v37 }
 0x8d3   :  { %v5532_v24 = vpop.f32.mrf.mxu2 }
 0x8d4   :  { %v5533_v3 = vadd.f32 %v5532_v24, %v5363_v41  ;;  %v5865_v33 = vpop.f32.mrf.mxu0  ;;  %v5882_v36 = vpop.f32.mrf.mxu1 }
 0x8d5   :  { %v10437_v12 = vadd.f32 %v5865_v33, %v5697_v30  ;;  %v5883_v37 = vadd.f32 %v5882_v36, %v10308_v58  ;;  %v4096_v33 = vld [vmem:[#allocation2 + $0xfa] sm:$0xff]  ;;  %v4160_v36 = vld [vmem:[#allocation2 + $0x110] sm:$0xff] }
 0x8d7   :  { %v5701_v2 = vpop.f32.mrf.mxu3  ;;  %5921 = vmatmul.bf16.gmra.mxu1 %v4409_v27 }
 0x8d8   :  { %v5702_v11 = vadd.f32 %v5701_v2, %v5533_v3  ;;  %6090 = vmatmul.bf16.gmra.mxu2 %v4410_v4  ;;  %v4095_v2 = vld [vmem:[#allocation2 + $0xf2] sm:$0xff] }
 0x8d9   :  { %v4419_v63 = vpack.c.bf16 %v4096_v33, %v4095_v2 }
 0x8db   :  { %v6051_v38 = vpop.f32.mrf.mxu2 }
 0x8dc   :  { %6259 = vmatmul.bf16.gmra.mxu3 %v4411_v50  ;;  %v6052_v41 = vadd.f32 %v6051_v38, %v5883_v37  ;;  %v5868_v24 = vpop.f32.mrf.mxu0  ;;  %v5884_v54 = vpop.f32.mrf.mxu1 }
 0x8dd   :  { %v10440_v25 = vadd.f32 %v5868_v24, %v5700_v6  ;;  %v5885_v3 = vadd.f32 %v5884_v54, %v10310_v8  ;;  %v4420_v8 = vpack.c.bf16 %v4160_v36, %v4159_v44  ;;  %v4161_v36 = vld [vmem:[#allocation2 + $0x120] sm:$0xff] }
 0x8df   :  { %v6220_v61 = vpop.f32.mrf.mxu3  ;;  %6423 = vmatmul.bf16.gmra.mxu0 %v4409_v27 }
 0x8e0   :  { %v6221_v48 = vadd.f32 %v6220_v61, %v6052_v41  ;;  %v4418_v61 = vpack.c.bf16 %v4032_v17, %v4031_v60  ;;  %v4033_v60 = vld [vmem:[#allocation2 + $0x109] sm:$0xff]  ;;  %v4034_v17 = vld [vmem:[#allocation2 + $0x111] sm:$0xff] }
 0x8e3   :  { %v6053_v30 = vpop.f32.mrf.mxu2 }
 0x8e4   :  { %v6054_v58 = vadd.f32 %v6053_v30, %v5885_v3  ;;  %v5870_v37 = vpop.f32.mrf.mxu0  ;;  %v5887_v38 = vpop.f32.mrf.mxu1 }
 0x8e5   :  { %v10443_v41 = vadd.f32 %v5870_v37, %v5702_v11  ;;  %v5888_v6 = vadd.f32 %v5887_v38, %v10313_v35  ;;  %v4098_v37 = vld [vmem:[#allocation2 + $0x112] sm:$0xff]  ;;  %v4162_v38 = vld [vmem:[#allocation2 + $0x128] sm:$0xff] }
 0x8e7   :  { %v6222_v4 = vpop.f32.mrf.mxu3  ;;  %5926 = vmatmul.bf16.gmra.mxu1 %v4418_v61 }
 0x8e8   :  { %v6223_v50 = vadd.f32 %v6222_v4, %v6054_v58  ;;  %6095 = vmatmul.bf16.gmra.mxu2 %v4419_v63  ;;  %v4097_v4 = vld [vmem:[#allocation2 + $0x10a] sm:$0xff] }
 0x8e9   :  { %v4428_v44 = vpack.c.bf16 %v4098_v37, %v4097_v4 }
 0x8eb   :  { %v6056_v27 = vpop.f32.mrf.mxu2 }
 0x8ec   :  { %6264 = vmatmul.bf16.gmra.mxu3 %v4420_v8  ;;  %v6057_v24 = vadd.f32 %v6056_v27, %v5888_v6  ;;  %v6389_v3 = vpop.f32.mrf.mxu0  ;;  %v5889_v2 = vpop.f32.mrf.mxu1 }
 0x8ed   :  { %v10446_v33 = vadd.f32 %v6389_v3, %v6221_v48  ;;  %v5890_v58 = vadd.f32 %v5889_v2, %v10315_v32  ;;  %v4429_v32 = vpack.c.bf16 %v4162_v38, %v4161_v36 }
 0x8ef   :  { %v6225_v54 = vpop.f32.mrf.mxu3  ;;  %6428 = vmatmul.bf16.gmra.mxu0 %v4418_v61 }
 0x8f0   :  { %v6226_v30 = vadd.f32 %v6225_v54, %v6057_v24  ;;  %v4427_v54 = vpack.c.bf16 %v4034_v17, %v4033_v60  ;;  %v4035_v17 = vld [vmem:[#allocation2 + $0x121] sm:$0xff] }
 0x8f3   :  { %v6058_v11 = vpop.f32.mrf.mxu2 }
 0x8f4   :  { %v6059_v35 = vadd.f32 %v6058_v11, %v5890_v58  ;;  %v6391_v6 = vpop.f32.mrf.mxu0  ;;  %v5892_v27 = vpop.f32.mrf.mxu1 }
 0x8f5   :  { %v10449_v24 = vadd.f32 %v6391_v6, %v6223_v50  ;;  %v5893_v48 = vadd.f32 %v5892_v27, %v10318_v29  ;;  %v8002_v50 = vld [vmem:[#allocation8 + $0x220] sm:$0xff]  ;;  %v4100_v29 = vld [vmem:[#allocation2 + $0x12a] sm:$0xff]  ;;  %v4163_v27 = vld [vmem:[#allocation2 + $0x138] sm:$0xff] }
 0x8f6   :  { %v4099_v6 = vld [vmem:[#allocation2 + $0x122] sm:$0xff]  ;;  %6552 = vmatpush.bf16.msra.mxu1 %v8002_v50 }
 0x8f7   :  { %v6227_v63 = vpop.f32.mrf.mxu3  ;;  %5931 = vmatmul.bf16.gmra.mxu1 %v4427_v54  ;;  %v4437_v38 = vpack.c.bf16 %v4100_v29, %v4099_v6 }
 0x8f8   :  { %v6228_v8 = vadd.f32 %v6227_v63, %v6059_v35  ;;  %6100 = vmatmul.bf16.gmra.mxu2 %v4428_v44  ;;  %v4036_v44 = vld [vmem:[#allocation2 + $0x129] sm:$0xff] }
 0x8fb   :  { %v6061_v61 = vpop.f32.mrf.mxu2 }
 0x8fc   :  { %6269 = vmatmul.bf16.gmra.mxu3 %v4429_v32  ;;  %v6062_v3 = vadd.f32 %v6061_v61, %v5893_v48  ;;  %v6394_v58 = vpop.f32.mrf.mxu0  ;;  %v5894_v4 = vpop.f32.mrf.mxu1  ;;  %v4164_v48 = vld [vmem:[#allocation2 + $0x140] sm:$0xff] }
 0x8fd   :  { %v10452_v37 = vadd.f32 %v6394_v58, %v6226_v30  ;;  %v5895_v35 = vadd.f32 %v5894_v4, %v10320_v47 }
 0x8ff   :  { %v6230_v2 = vpop.f32.mrf.mxu3  ;;  %6433 = vmatmul.bf16.gmra.mxu0 %v4427_v54  ;;  %v4436_v54 = vpack.c.bf16 %v4036_v44, %v4035_v17  ;;  %v4037_v17 = vld [vmem:[#allocation2 + $0x139] sm:$0xff]  ;;  %v4038_v44 = vld [vmem:[#allocation2 + $0x141] sm:$0xff] }
 0x900   :  { %v6231_v11 = vadd.f32 %v6230_v2, %v6062_v3  ;;  %v4438_v2 = vpack.c.bf16 %v4164_v48, %v4163_v27  ;;  %v4165_v48 = vld [vmem:[#allocation2 + $0x150] sm:$0xff] }
 0x903   :  { %v6063_v63 = vpop.f32.mrf.mxu2 }
 0x904   :  { %v6064_v60 = vadd.f32 %v6063_v63, %v5895_v35  ;;  %v6396_v32 = vpop.f32.mrf.mxu0  ;;  %v5897_v3 = vpop.f32.mrf.mxu1 }
 0x905   :  { %v10455_v30 = vadd.f32 %v6396_v32, %v6228_v8  ;;  %v5898_v47 = vadd.f32 %v5897_v3, %v10323_v52  ;;  %v4102_v32 = vld [vmem:[#allocation2 + $0x142] sm:$0xff]  ;;  %v4166_v3 = vld [vmem:[#allocation2 + $0x158] sm:$0xff] }
 0x907   :  { %v6232_v36 = vpop.f32.mrf.mxu3  ;;  %5936 = vmatmul.bf16.gmra.mxu1 %v4436_v54 }
 0x908   :  { %v6233_v61 = vadd.f32 %v6232_v36, %v6064_v60  ;;  %6105 = vmatmul.bf16.gmra.mxu2 %v4437_v38  ;;  %v4101_v36 = vld [vmem:[#allocation2 + $0x13a] sm:$0xff] }
 0x909   :  { %v4446_v27 = vpack.c.bf16 %v4102_v32, %v4101_v36 }
 0x90b   :  { %v6066_v58 = vpop.f32.mrf.mxu2 }
 0x90c   :  { %6274 = vmatmul.bf16.gmra.mxu3 %v4438_v2  ;;  %v6067_v4 = vadd.f32 %v6066_v58, %v5898_v47  ;;  %v6399_v50 = vpop.f32.mrf.mxu0  ;;  %v5899_v6 = vpop.f32.mrf.mxu1 }
 0x90d   :  { %v10458_v29 = vadd.f32 %v6399_v50, %v6231_v11  ;;  %v5900_v60 = vadd.f32 %v5899_v6, %v10325_v46  ;;  %v4447_v46 = vpack.c.bf16 %v4166_v3, %v4165_v48  ;;  %v4167_v3 = vld [vmem:[#allocation2 + $0x168] sm:$0xff] }
 0x90f   :  { %v6235_v35 = vpop.f32.mrf.mxu3  ;;  %6438 = vmatmul.bf16.gmra.mxu0 %v4436_v54 }
 0x910   :  { %v6236_v63 = vadd.f32 %v6235_v35, %v6067_v4  ;;  %v4445_v35 = vpack.c.bf16 %v4038_v44, %v4037_v17  ;;  %v4039_v17 = vld [vmem:[#allocation2 + $0x151] sm:$0xff]  ;;  %v4040_v44 = vld [vmem:[#allocation2 + $0x159] sm:$0xff] }
 0x913   :  { %v6068_v8 = vpop.f32.mrf.mxu2 }
 0x914   :  { %v6069_v52 = vadd.f32 %v6068_v8, %v5900_v60  ;;  %v6401_v47 = vpop.f32.mrf.mxu0  ;;  %v5902_v58 = vpop.f32.mrf.mxu1 }
 0x915   :  { %v10461_v4 = vadd.f32 %v6401_v47, %v6233_v61  ;;  %v5903_v11 = vadd.f32 %v5902_v58, %v10328_v49  ;;  %v4104_v47 = vld [vmem:[#allocation2 + $0x15a] sm:$0xff]  ;;  %v4168_v58 = vld [vmem:[#allocation2 + $0x170] sm:$0xff] }
 0x917   :  { %v6237_v38 = vpop.f32.mrf.mxu3  ;;  %5941 = vmatmul.bf16.gmra.mxu1 %v4445_v35 }
 0x918   :  { %v6238_v2 = vadd.f32 %v6237_v38, %v6069_v52  ;;  %6110 = vmatmul.bf16.gmra.mxu2 %v4446_v27  ;;  %v4103_v38 = vld [vmem:[#allocation2 + $0x152] sm:$0xff] }
 0x919   :  { %v4455_v48 = vpack.c.bf16 %v4104_v47, %v4103_v38 }
 0x91b   :  { %v6071_v54 = vpop.f32.mrf.mxu2 }
 0x91c   :  { %6279 = vmatmul.bf16.gmra.mxu3 %v4447_v46  ;;  %v6072_v50 = vadd.f32 %v6071_v54, %v5903_v11  ;;  %v6404_v60 = vpop.f32.mrf.mxu0  ;;  %v5904_v36 = vpop.f32.mrf.mxu1 }
 0x91d   :  { %v10464_v32 = vadd.f32 %v6404_v60, %v6236_v63  ;;  %v5905_v52 = vadd.f32 %v5904_v36, %v10330_v21  ;;  %v4456_v21 = vpack.c.bf16 %v4168_v58, %v4167_v3  ;;  %v4169_v58 = vld [vmem:[#allocation2 + $0x180] sm:$0xff] }
 0x91f   :  { %v6240_v6 = vpop.f32.mrf.mxu3  ;;  %6443 = vmatmul.bf16.gmra.mxu0 %v4445_v35 }
 0x920   :  { %v6241_v8 = vadd.f32 %v6240_v6, %v6072_v50  ;;  %v4454_v6 = vpack.c.bf16 %v4040_v44, %v4039_v17  ;;  %v4041_v17 = vld [vmem:[#allocation2 + $0x169] sm:$0xff]  ;;  %v4042_v44 = vld [vmem:[#allocation2 + $0x171] sm:$0xff] }
 0x923   :  { %v6073_v61 = vpop.f32.mrf.mxu2 }
 0x924   :  { %v6074_v49 = vadd.f32 %v6073_v61, %v5905_v52  ;;  %v6406_v11 = vpop.f32.mrf.mxu0  ;;  %v5907_v54 = vpop.f32.mrf.mxu1 }
 0x925   :  { %v10467_v50 = vadd.f32 %v6406_v11, %v6238_v2  ;;  %v5908_v63 = vadd.f32 %v5907_v54, %v10333_v1  ;;  %v4106_v11 = vld [vmem:[#allocation2 + $0x172] sm:$0xff]  ;;  %v4170_v54 = vld [vmem:[#allocation2 + $0x188] sm:$0xff] }
 0x927   :  { %v6242_v27 = vpop.f32.mrf.mxu3  ;;  %5946 = vmatmul.bf16.gmra.mxu1 %v4454_v6 }
 0x928   :  { %v6243_v46 = vadd.f32 %v6242_v27, %v6074_v49  ;;  %6115 = vmatmul.bf16.gmra.mxu2 %v4455_v48  ;;  %v4105_v27 = vld [vmem:[#allocation2 + $0x16a] sm:$0xff] }
 0x929   :  { %v4464_v3 = vpack.c.bf16 %v4106_v11, %v4105_v27 }
 0x92b   :  { %v6076_v35 = vpop.f32.mrf.mxu2 }
 0x92c   :  { %6284 = vmatmul.bf16.gmra.mxu3 %v4456_v21  ;;  %v6077_v60 = vadd.f32 %v6076_v35, %v5908_v63  ;;  %v6409_v52 = vpop.f32.mrf.mxu0  ;;  %v5909_v38 = vpop.f32.mrf.mxu1 }
 0x92d   :  { %v10470_v47 = vadd.f32 %v6409_v52, %v6241_v8  ;;  %v5910_v49 = vadd.f32 %v5909_v38, %v10335_v40  ;;  %v4465_v40 = vpack.c.bf16 %v4170_v54, %v4169_v58 }
 0x92f   :  { %v6245_v36 = vpop.f32.mrf.mxu3  ;;  %6448 = vmatmul.bf16.gmra.mxu0 %v4454_v6 }
 0x930   :  { %v6246_v61 = vadd.f32 %v6245_v36, %v6077_v60  ;;  %v4463_v36 = vpack.c.bf16 %v4042_v44, %v4041_v17  ;;  %v4043_v44 = vld [vmem:[#allocation2 + $0x181] sm:$0xff] }
 0x933   :  { %v6078_v2 = vpop.f32.mrf.mxu2 }
 0x934   :  { %v6079_v1 = vadd.f32 %v6078_v2, %v5910_v49  ;;  %v6411_v63 = vpop.f32.mrf.mxu0  ;;  %v5912_v35 = vpop.f32.mrf.mxu1 }
 0x935   :  { %v10473_v60 = vadd.f32 %v6411_v63, %v6243_v46  ;;  %v5913_v8 = vadd.f32 %v5912_v35, %v10338_v13  ;;  %v8001_v46 = vld [vmem:[#allocation8 + $0x218] sm:$0xff]  ;;  %v4107_v63 = vld [vmem:[#allocation2 + $0x182] sm:$0xff]  ;;  %v4108_v13 = vld [vmem:[#allocation2 + $0x18a] sm:$0xff] }
 0x936   :  { %6553 = vmatpush.bf16.msra.mxu1 %v8001_v46  ;;  %v4473_v54 = vpack.c.bf16 %v4108_v13, %v4107_v63 }
 0x937   :  { %v6247_v48 = vpop.f32.mrf.mxu3  ;;  %5951 = vmatmul.bf16.gmra.mxu1 %v4463_v36 }
 0x938   :  { %v6248_v21 = vadd.f32 %v6247_v48, %v6079_v1  ;;  %6120 = vmatmul.bf16.gmra.mxu2 %v4464_v3  ;;  %v4044_v3 = vld [vmem:[#allocation2 + $0x189] sm:$0xff] }
 0x93b   :  { %v6081_v6 = vpop.f32.mrf.mxu2 }
 0x93c   :  { %6289 = vmatmul.bf16.gmra.mxu3 %v4465_v40  ;;  %v6082_v52 = vadd.f32 %v6081_v6, %v5913_v8  ;;  %v6414_v49 = vpop.f32.mrf.mxu0  ;;  %v5914_v27 = vpop.f32.mrf.mxu1  ;;  %v8037_v6 = vld [vmem:[#allocation2 + $0x1b0] sm:$0xff] }
 0x93d   :  { %v10476_v11 = vadd.f32 %v6414_v49, %v6246_v61  ;;  %v5915_v1 = vadd.f32 %v5914_v27, %v10340_v10 }
 0x93f   :  { %v6250_v38 = vpop.f32.mrf.mxu3  ;;  %12057 = vst [vmem:[#allocation113_spill] sm:$0xff] %v10476_v11  ;;  %6453 = vmatmul.bf16.gmra.mxu0 %v4463_v36  ;;  %v4472_v36 = vpack.c.bf16 %v4044_v3, %v4043_v44  ;;  %v4045_v44 = vld [vmem:[#allocation2 + $0x1c9] sm:$0xff]  ;;  %v4046_v3 = vld [vmem:[#allocation2 + $0x1d1] sm:$0xff] }
 0x940   :  { %v6251_v2 = vadd.f32 %v6250_v38, %v6082_v52  ;;  %v10479_v52 = vpack.c.bf16 %v8037_v6, %v8037_v6  ;;  %v4174_v6 = vld [vmem:[#allocation2 + $0x1e8] sm:$0xff] }
 0x943   :  { %v6083_v48 = vpop.f32.mrf.mxu2 }
 0x944   :  { %v6084_v17 = vadd.f32 %v6083_v48, %v5915_v1  ;;  %v6416_v35 = vpop.f32.mrf.mxu0  ;;  %v5917_v40 = vpop.f32.mrf.mxu1 }
 0x945   :  { %v10481_v61 = vadd.f32 %v6416_v35, %v6248_v21  ;;  %v5918_v10 = vadd.f32 %v5917_v40, %v10343_v43  ;;  %v4173_v40 = vld [vmem:[#allocation2 + $0x1e0] sm:$0xff] }
 0x947   :  { %v6252_v58 = vpop.f32.mrf.mxu3  ;;  %12058 = vst [vmem:[#allocation114_spill] sm:$0xff] %v10481_v61  ;;  %5956 = vmatmul.bf16.gmra.mxu1 %v4472_v36 }
 0x948   :  { %v6253_v8 = vadd.f32 %v6252_v58, %v6084_v17  ;;  %6125 = vmatmul.bf16.gmra.mxu2 %v4473_v54  ;;  %v4109_v17 = vld [vmem:[#allocation2 + $0x1ca] sm:$0xff]  ;;  %v4110_v58 = vld [vmem:[#allocation2 + $0x1d2] sm:$0xff] }
 0x949   :  { %v4482_v35 = vpack.c.bf16 %v4110_v58, %v4109_v17 }
 0x94b   :  { %v6086_v38 = vpop.f32.mrf.mxu2 }
 0x94c   :  { %6294 = vmatmul.bf16.gmra.mxu3 %v10479_v52  ;;  %v6087_v49 = vadd.f32 %v6086_v38, %v5918_v10  ;;  %v6419_v1 = vpop.f32.mrf.mxu0  ;;  %v5919_v48 = vpop.f32.mrf.mxu1 }
 0x94d   :  { %v10485_v63 = vadd.f32 %v6419_v1, %v6251_v2  ;;  %v5920_v13 = vadd.f32 %v5919_v48, %v10345_v62  ;;  %v4483_v62 = vpack.c.bf16 %v4174_v6, %v4173_v40  ;;  %v4236_v1 = vld [vmem:[#allocation2 + $0x1a1] sm:$0xff] }
 0x94f   :  { %v6255_v27 = vpop.f32.mrf.mxu3  ;;  %12059 = vst [vmem:[#allocation115_spill] sm:$0xff] %v10485_v63  ;;  %6458 = vmatmul.bf16.gmra.mxu0 %v4472_v36  ;;  %v4235_v36 = vld [vmem:[#allocation2 + $0x199] sm:$0xff] }
 0x950   :  { %v6256_v46 = vadd.f32 %v6255_v27, %v6087_v49  ;;  %v4481_v27 = vpack.c.bf16 %v4046_v3, %v4045_v44  ;;  %v4112_v44 = vld [vmem:[#allocation2 + $0x1ea] sm:$0xff] }
 0x953   :  { %v6088_v21 = vpop.f32.mrf.mxu2 }
 0x954   :  { %v6089_v43 = vadd.f32 %v6088_v21, %v5920_v13  ;;  %v6421_v10 = vpop.f32.mrf.mxu0  ;;  %v5922_v61 = vpop.f32.mrf.mxu1  ;;  %v4475_v21 = vpack.c.bf16 %v4236_v1, %v4235_v36 }
 0x955   :  { %v10488_v49 = vadd.f32 %v6421_v10, %v6253_v8  ;;  %v5923_v2 = vadd.f32 %v5922_v61, %v10347_v57  ;;  %v4111_v61 = vld [vmem:[#allocation2 + $0x1e2] sm:$0xff]  ;;  %v4175_v10 = vld [vmem:[#allocation2 + $0x1f8] sm:$0xff] }
 0x956   :  { %v4491_v6 = vpack.c.bf16 %v4112_v44, %v4111_v61  ;;  %v4113_v44 = vld [vmem:[#allocation2 + $0x1fa] sm:$0xff] }
 0x957   :  { %v6257_v54 = vpop.f32.mrf.mxu3  ;;  %5961 = vmatmul.bf16.gmra.mxu1 %v4481_v27 }
 0x958   :  { %v6258_v38 = vadd.f32 %v6257_v54, %v6089_v43  ;;  %6130 = vmatmul.bf16.gmra.mxu2 %v4482_v35  ;;  %v4047_v54 = vld [vmem:[#allocation2 + $0x1e1] sm:$0xff]  ;;  %v4048_v35 = vld [vmem:[#allocation2 + $0x1e9] sm:$0xff] }
 0x95b   :  { %v6091_v48 = vpop.f32.mrf.mxu2 }
 0x95c   :  { %6299 = vmatmul.bf16.gmra.mxu3 %v4483_v62  ;;  %v6092_v13 = vadd.f32 %v6091_v48, %v5923_v2  ;;  %v6424_v58 = vpop.f32.mrf.mxu0  ;;  %v5924_v11 = vpop.f32.mrf.mxu1  ;;  %v4176_v2 = vld [vmem:[#allocation2 + $0x200] sm:$0xff]  ;;  %v4490_v48 = vpack.c.bf16 %v4048_v35, %v4047_v54 }
 0x95d   :  { %v10491_v43 = vadd.f32 %v6424_v58, %v6256_v46  ;;  %v5925_v8 = vadd.f32 %v5924_v11, %v10349_v56  ;;  %v4492_v56 = vpack.c.bf16 %v4176_v2, %v4175_v10  ;;  %v4049_v54 = vld [vmem:[#allocation2 + $0x1f9] sm:$0xff]  ;;  %v4050_v35 = vld [vmem:[#allocation2 + $0x201] sm:$0xff]  ;;  %v4177_v10 = vld [vmem:[#allocation2 + $0x210] sm:$0xff] }
 0x95e   :  { %v4178_v2 = vld [vmem:[#allocation2 + $0x218] sm:$0xff] }
 0x95f   :  { %v6260_v17 = vpop.f32.mrf.mxu3  ;;  %6463 = vmatmul.bf16.gmra.mxu0 %v4475_v21 }
 0x960   :  { %v6261_v63 = vadd.f32 %v6260_v17, %v6092_v13 }
 0x963   :  { %v6093_v57 = vpop.f32.mrf.mxu2 }
 0x964   :  { %v6094_v3 = vadd.f32 %v6093_v57, %v5925_v8  ;;  %v6426_v27 = vpop.f32.mrf.mxu0  ;;  %v5927_v36 = vpop.f32.mrf.mxu1 }
 0x965   :  { %v10494_v1 = vadd.f32 %v6426_v27, %v6258_v38  ;;  %v5928_v46 = vadd.f32 %v5927_v36, %v10351_v16 }
 0x967   :  { %v6262_v40 = vpop.f32.mrf.mxu3  ;;  %5966 = vmatmul.bf16.gmra.mxu1 %v4490_v48 }
 0x968   :  { %v6263_v62 = vadd.f32 %v6262_v40, %v6094_v3  ;;  %6135 = vmatmul.bf16.gmra.mxu2 %v4491_v6  ;;  %v4114_v3 = vld [vmem:[#allocation2 + $0x202] sm:$0xff] }
 0x969   :  { %v4500_v6 = vpack.c.bf16 %v4114_v3, %v4113_v44 }
 0x96b   :  { %v6096_v11 = vpop.f32.mrf.mxu2 }
 0x96c   :  { %6304 = vmatmul.bf16.gmra.mxu3 %v4492_v56  ;;  %v6097_v13 = vadd.f32 %v6096_v11, %v5928_v46  ;;  %v6429_v17 = vpop.f32.mrf.mxu0  ;;  %v5929_v8 = vpop.f32.mrf.mxu1  ;;  %v4499_v11 = vpack.c.bf16 %v4050_v35, %v4049_v54  ;;  %v4051_v35 = vld [vmem:[#allocation2 + $0x211] sm:$0xff] }
 0x96d   :  { %v10497_v57 = vadd.f32 %v6429_v17, %v6261_v63  ;;  %v5930_v61 = vadd.f32 %v5929_v8, %v10353_v22  ;;  %v4501_v22 = vpack.c.bf16 %v4178_v2, %v4177_v10  ;;  %v4179_v2 = vld [vmem:[#allocation2 + $0x228] sm:$0xff] }
 0x96f   :  { %v6265_v21 = vpop.f32.mrf.mxu3  ;;  %6468 = vmatmul.bf16.gmra.mxu0 %v4490_v48 }
 0x970   :  { %v6266_v58 = vadd.f32 %v6265_v21, %v6097_v13 }
 0x973   :  { %v6098_v38 = vpop.f32.mrf.mxu2 }
 0x974   :  { %v6099_v16 = vadd.f32 %v6098_v38, %v5930_v61  ;;  %v6431_v27 = vpop.f32.mrf.mxu0  ;;  %v5932_v46 = vpop.f32.mrf.mxu1 }
 0x975   :  { %v10500_v56 = vadd.f32 %v6431_v27, %v6263_v62  ;;  %v5933_v63 = vadd.f32 %v5932_v46, %v10355_v5  ;;  %v8000_v62 = vld [vmem:[#allocation8 + $0x210] sm:$0xff]  ;;  %v4116_v5 = vld [vmem:[#allocation2 + $0x21a] sm:$0xff] }
 0x976   :  { %6554 = vmatpush.bf16.msra.mxu1 %v8000_v62  ;;  %v4180_v27 = vld [vmem:[#allocation2 + $0x230] sm:$0xff] }
 0x977   :  { %v6267_v40 = vpop.f32.mrf.mxu3  ;;  %5971 = vmatmul.bf16.gmra.mxu1 %v4499_v11 }
 0x978   :  { %v6268_v36 = vadd.f32 %v6267_v40, %v6099_v16  ;;  %6140 = vmatmul.bf16.gmra.mxu2 %v4500_v6  ;;  %v4115_v16 = vld [vmem:[#allocation2 + $0x212] sm:$0xff] }
 0x979   :  { %v4052_v40 = vld [vmem:[#allocation2 + $0x219] sm:$0xff]  ;;  %v4509_v10 = vpack.c.bf16 %v4116_v5, %v4115_v16  ;;  %v4117_v5 = vld [vmem:[#allocation2 + $0x22a] sm:$0xff] }
 0x97b   :  { %v6101_v48 = vpop.f32.mrf.mxu2 }
 0x97c   :  { %6309 = vmatmul.bf16.gmra.mxu3 %v4501_v22  ;;  %v6102_v13 = vadd.f32 %v6101_v48, %v5933_v63  ;;  %v6434_v17 = vpop.f32.mrf.mxu0  ;;  %v5934_v61 = vpop.f32.mrf.mxu1  ;;  %v4510_v48 = vpack.c.bf16 %v4180_v27, %v4179_v2  ;;  %v4181_v2 = vld [vmem:[#allocation2 + $0x240] sm:$0xff]  ;;  %v4182_v27 = vld [vmem:[#allocation2 + $0x248] sm:$0xff] }
 0x97d   :  { %v10503_v38 = vadd.f32 %v6434_v17, %v6266_v58  ;;  %v5935_v44 = vadd.f32 %v5934_v61, %v10357_v19 }
 0x97f   :  { %v6270_v21 = vpop.f32.mrf.mxu3  ;;  %6473 = vmatmul.bf16.gmra.mxu0 %v4499_v11  ;;  %v4508_v11 = vpack.c.bf16 %v4052_v40, %v4051_v35  ;;  %v4053_v35 = vld [vmem:[#allocation2 + $0x229] sm:$0xff]  ;;  %v4054_v40 = vld [vmem:[#allocation2 + $0x231] sm:$0xff] }
 0x980   :  { %v6271_v8 = vadd.f32 %v6270_v21, %v6102_v13 }
 0x983   :  { %v6103_v3 = vpop.f32.mrf.mxu2 }
 0x984   :  { %v6104_v54 = vadd.f32 %v6103_v3, %v5935_v44  ;;  %v6436_v46 = vpop.f32.mrf.mxu0  ;;  %v5937_v22 = vpop.f32.mrf.mxu1 }
 0x985   :  { %v10506_v58 = vadd.f32 %v6436_v46, %v6268_v36  ;;  %v5938_v19 = vadd.f32 %v5937_v22, %v10359_v20 }
 0x987   :  { %v6272_v6 = vpop.f32.mrf.mxu3  ;;  %5976 = vmatmul.bf16.gmra.mxu1 %v4508_v11 }
 0x988   :  { %v6273_v63 = vadd.f32 %v6272_v6, %v6104_v54  ;;  %6145 = vmatmul.bf16.gmra.mxu2 %v4509_v10  ;;  %v4118_v54 = vld [vmem:[#allocation2 + $0x232] sm:$0xff] }
 0x989   :  { %v4518_v10 = vpack.c.bf16 %v4118_v54, %v4117_v5  ;;  %v4119_v54 = vld [vmem:[#allocation2 + $0x242] sm:$0xff] }
 0x98b   :  { %v6106_v13 = vpop.f32.mrf.mxu2 }
 0x98c   :  { %6314 = vmatmul.bf16.gmra.mxu3 %v4510_v48  ;;  %v6107_v21 = vadd.f32 %v6106_v13, %v5938_v19  ;;  %v6439_v61 = vpop.f32.mrf.mxu0  ;;  %v5939_v62 = vpop.f32.mrf.mxu1  ;;  %v4517_v13 = vpack.c.bf16 %v4054_v40, %v4053_v35  ;;  %v4055_v35 = vld [vmem:[#allocation2 + $0x241] sm:$0xff]  ;;  %v4056_v40 = vld [vmem:[#allocation2 + $0x249] sm:$0xff] }
 0x98d   :  { %v10509_v3 = vadd.f32 %v6439_v61, %v6271_v8  ;;  %v5940_v16 = vadd.f32 %v5939_v62, %v10361_v55  ;;  %v4519_v55 = vpack.c.bf16 %v4182_v27, %v4181_v2  ;;  %v4183_v2 = vld [vmem:[#allocation2 + $0x258] sm:$0xff]  ;;  %v4184_v27 = vld [vmem:[#allocation2 + $0x260] sm:$0xff] }
 0x98f   :  { %v6275_v17 = vpop.f32.mrf.mxu3  ;;  %6478 = vmatmul.bf16.gmra.mxu0 %v4508_v11 }
 0x990   :  { %v6276_v44 = vadd.f32 %v6275_v17, %v6107_v21 }
 0x993   :  { %v6108_v36 = vpop.f32.mrf.mxu2 }
 0x994   :  { %v6109_v20 = vadd.f32 %v6108_v36, %v5940_v16  ;;  %v6441_v46 = vpop.f32.mrf.mxu0  ;;  %v5942_v19 = vpop.f32.mrf.mxu1 }
 0x995   :  { %v10512_v48 = vadd.f32 %v6441_v46, %v6273_v63  ;;  %v5943_v8 = vadd.f32 %v5942_v19, %v10363_v7 }
 0x997   :  { %v6277_v6 = vpop.f32.mrf.mxu3  ;;  %5981 = vmatmul.bf16.gmra.mxu1 %v4517_v13 }
 0x998   :  { %v6278_v22 = vadd.f32 %v6277_v6, %v6109_v20  ;;  %6150 = vmatmul.bf16.gmra.mxu2 %v4518_v10  ;;  %v4120_v20 = vld [vmem:[#allocation2 + $0x24a] sm:$0xff] }
 0x999   :  { %v4527_v10 = vpack.c.bf16 %v4120_v20, %v4119_v54  ;;  %v4121_v20 = vld [vmem:[#allocation2 + $0x25a] sm:$0xff] }
 0x99b   :  { %v6111_v11 = vpop.f32.mrf.mxu2 }
 0x99c   :  { %6319 = vmatmul.bf16.gmra.mxu3 %v4519_v55  ;;  %v6112_v21 = vadd.f32 %v6111_v11, %v5943_v8  ;;  %v6444_v61 = vpop.f32.mrf.mxu0  ;;  %v5944_v16 = vpop.f32.mrf.mxu1  ;;  %v4526_v11 = vpack.c.bf16 %v4056_v40, %v4055_v35  ;;  %v4057_v35 = vld [vmem:[#allocation2 + $0x259] sm:$0xff]  ;;  %v4058_v40 = vld [vmem:[#allocation2 + $0x261] sm:$0xff] }
 0x99d   :  { %v10515_v36 = vadd.f32 %v6444_v61, %v6276_v44  ;;  %v5945_v5 = vadd.f32 %v5944_v16, %v10365_v14  ;;  %v4528_v14 = vpack.c.bf16 %v4184_v27, %v4183_v2  ;;  %v4185_v2 = vld [vmem:[#allocation2 + $0x270] sm:$0xff]  ;;  %v4186_v27 = vld [vmem:[#allocation2 + $0x278] sm:$0xff] }
 0x99f   :  { %v6280_v17 = vpop.f32.mrf.mxu3  ;;  %6483 = vmatmul.bf16.gmra.mxu0 %v4517_v13 }
 0x9a0   :  { %v6281_v62 = vadd.f32 %v6280_v17, %v6112_v21 }
 0x9a3   :  { %v6113_v63 = vpop.f32.mrf.mxu2 }
 0x9a4   :  { %v6114_v7 = vadd.f32 %v6113_v63, %v5945_v5  ;;  %v6446_v46 = vpop.f32.mrf.mxu0  ;;  %v5947_v8 = vpop.f32.mrf.mxu1 }
 0x9a5   :  { %v10518_v55 = vadd.f32 %v6446_v46, %v6278_v22  ;;  %v5948_v44 = vadd.f32 %v5947_v8, %v10367_v42 }
 0x9a7   :  { %v6282_v6 = vpop.f32.mrf.mxu3  ;;  %5986 = vmatmul.bf16.gmra.mxu1 %v4526_v11 }
 0x9a8   :  { %v6283_v19 = vadd.f32 %v6282_v6, %v6114_v7  ;;  %6155 = vmatmul.bf16.gmra.mxu2 %v4527_v10  ;;  %v4122_v7 = vld [vmem:[#allocation2 + $0x262] sm:$0xff] }
 0x9a9   :  { %v4536_v10 = vpack.c.bf16 %v4122_v7, %v4121_v20 }
 0x9ab   :  { %v6116_v13 = vpop.f32.mrf.mxu2 }
 0x9ac   :  { %6324 = vmatmul.bf16.gmra.mxu3 %v4528_v14  ;;  %v6117_v21 = vadd.f32 %v6116_v13, %v5948_v44  ;;  %v6449_v61 = vpop.f32.mrf.mxu0  ;;  %v5949_v5 = vpop.f32.mrf.mxu1  ;;  %v4535_v13 = vpack.c.bf16 %v4058_v40, %v4057_v35  ;;  %v4059_v40 = vld [vmem:[#allocation2 + $0x271] sm:$0xff] }
 0x9ad   :  { %v10521_v63 = vadd.f32 %v6449_v61, %v6281_v62  ;;  %v5950_v54 = vadd.f32 %v5949_v5, %v10369_v15  ;;  %v4537_v15 = vpack.c.bf16 %v4186_v27, %v4185_v2  ;;  %v4187_v27 = vld [vmem:[#allocation2 + $0x288] sm:$0xff] }
 0x9af   :  { %v6285_v17 = vpop.f32.mrf.mxu3  ;;  %6488 = vmatmul.bf16.gmra.mxu0 %v4526_v11 }
 0x9b0   :  { %v6286_v16 = vadd.f32 %v6285_v17, %v6117_v21 }
 0x9b3   :  { %v6118_v22 = vpop.f32.mrf.mxu2 }
 0x9b4   :  { %v6119_v42 = vadd.f32 %v6118_v22, %v5950_v54  ;;  %v6451_v46 = vpop.f32.mrf.mxu0  ;;  %v5952_v44 = vpop.f32.mrf.mxu1 }
 0x9b5   :  { %v10524_v14 = vadd.f32 %v6451_v46, %v6283_v19  ;;  %v5953_v62 = vadd.f32 %v5952_v44, %v10371_v23  ;;  %v7999_v19 = vld [vmem:[#allocation8 + $0x208] sm:$0xff]  ;;  %v4124_v23 = vld [vmem:[#allocation2 + $0x27a] sm:$0xff]  ;;  %v4188_v46 = vld [vmem:[#allocation2 + $0x290] sm:$0xff] }
 0x9b6   :  { %6555 = vmatpush.bf16.msra.mxu1 %v7999_v19 }
 0x9b7   :  { %v6287_v6 = vpop.f32.mrf.mxu3  ;;  %5991 = vmatmul.bf16.gmra.mxu1 %v4535_v13 }
 0x9b8   :  { %v6288_v8 = vadd.f32 %v6287_v6, %v6119_v42  ;;  %6160 = vmatmul.bf16.gmra.mxu2 %v4536_v10  ;;  %v4123_v42 = vld [vmem:[#allocation2 + $0x272] sm:$0xff] }
 0x9b9   :  { %v4060_v6 = vld [vmem:[#allocation2 + $0x279] sm:$0xff]  ;;  %v4545_v2 = vpack.c.bf16 %v4124_v23, %v4123_v42  ;;  %v4125_v23 = vld [vmem:[#allocation2 + $0x28a] sm:$0xff] }
 0x9bb   :  { %v6121_v11 = vpop.f32.mrf.mxu2 }
 0x9bc   :  { %6329 = vmatmul.bf16.gmra.mxu3 %v4537_v15  ;;  %v6122_v21 = vadd.f32 %v6121_v11, %v5953_v62  ;;  %v6454_v61 = vpop.f32.mrf.mxu0  ;;  %v5954_v54 = vpop.f32.mrf.mxu1  ;;  %v4546_v11 = vpack.c.bf16 %v4188_v46, %v4187_v27  ;;  %v4189_v27 = vld [vmem:[#allocation2 + $0x2a0] sm:$0xff]  ;;  %v4190_v46 = vld [vmem:[#allocation2 + $0x2a8] sm:$0xff] }
 0x9bd   :  { %v10527_v22 = vadd.f32 %v6454_v61, %v6286_v16  ;;  %v5955_v20 = vadd.f32 %v5954_v54, %v10373_v18 }
 0x9bf   :  { %v6290_v17 = vpop.f32.mrf.mxu3  ;;  %6493 = vmatmul.bf16.gmra.mxu0 %v4535_v13  ;;  %v4544_v13 = vpack.c.bf16 %v4060_v6, %v4059_v40  ;;  %v4061_v40 = vld [vmem:[#allocation2 + $0x289] sm:$0xff]  ;;  %v4062_v6 = vld [vmem:[#allocation2 + $0x291] sm:$0xff] }
 0x9c0   :  { %v6291_v5 = vadd.f32 %v6290_v17, %v6122_v21 }
 0x9c3   :  { %v6123_v7 = vpop.f32.mrf.mxu2 }
 0x9c4   :  { %v6124_v35 = vadd.f32 %v6123_v7, %v5955_v20  ;;  %v6456_v44 = vpop.f32.mrf.mxu0  ;;  %v5957_v15 = vpop.f32.mrf.mxu1 }
 0x9c5   :  { %v10530_v16 = vadd.f32 %v6456_v44, %v6288_v8  ;;  %v5958_v18 = vadd.f32 %v5957_v15, %v10375_v28 }
 0x9c7   :  { %v6292_v10 = vpop.f32.mrf.mxu3  ;;  %5996 = vmatmul.bf16.gmra.mxu1 %v4544_v13 }
 0x9c8   :  { %v6293_v62 = vadd.f32 %v6292_v10, %v6124_v35  ;;  %6165 = vmatmul.bf16.gmra.mxu2 %v4545_v2  ;;  %v4126_v35 = vld [vmem:[#allocation2 + $0x292] sm:$0xff] }
 0x9c9   :  { %v4554_v2 = vpack.c.bf16 %v4126_v35, %v4125_v23  ;;  %v4127_v35 = vld [vmem:[#allocation2 + $0x2a2] sm:$0xff] }
 0x9cb   :  { %v6126_v21 = vpop.f32.mrf.mxu2 }
 0x9cc   :  { %6334 = vmatmul.bf16.gmra.mxu3 %v4546_v11  ;;  %v6127_v17 = vadd.f32 %v6126_v21, %v5958_v18  ;;  %v6459_v54 = vpop.f32.mrf.mxu0  ;;  %v5959_v19 = vpop.f32.mrf.mxu1  ;;  %v4553_v21 = vpack.c.bf16 %v4062_v6, %v4061_v40  ;;  %v4063_v40 = vld [vmem:[#allocation2 + $0x2a1] sm:$0xff]  ;;  %v4064_v6 = vld [vmem:[#allocation2 + $0x2a9] sm:$0xff] }
 0x9cd   :  { %v10533_v7 = vadd.f32 %v6459_v54, %v6291_v5  ;;  %v5960_v42 = vadd.f32 %v5959_v19, %v10377_v31  ;;  %v4555_v31 = vpack.c.bf16 %v4190_v46, %v4189_v27  ;;  %v4191_v27 = vld [vmem:[#allocation2 + $0x2b8] sm:$0xff]  ;;  %v4192_v46 = vld [vmem:[#allocation2 + $0x2c0] sm:$0xff] }
 0x9cf   :  { %v6295_v61 = vpop.f32.mrf.mxu3  ;;  %6498 = vmatmul.bf16.gmra.mxu0 %v4544_v13 }
 0x9d0   :  { %v6296_v20 = vadd.f32 %v6295_v61, %v6127_v17 }
 0x9d3   :  { %v6128_v8 = vpop.f32.mrf.mxu2 }
 0x9d4   :  { %v6129_v28 = vadd.f32 %v6128_v8, %v5960_v42  ;;  %v6461_v44 = vpop.f32.mrf.mxu0  ;;  %v5962_v18 = vpop.f32.mrf.mxu1 }
 0x9d5   :  { %v10536_v11 = vadd.f32 %v6461_v44, %v6293_v62  ;;  %v5963_v5 = vadd.f32 %v5962_v18, %v10379_v34 }
 0x9d7   :  { %v6297_v10 = vpop.f32.mrf.mxu3  ;;  %6001 = vmatmul.bf16.gmra.mxu1 %v4553_v21 }
 0x9d8   :  { %v6298_v15 = vadd.f32 %v6297_v10, %v6129_v28  ;;  %6170 = vmatmul.bf16.gmra.mxu2 %v4554_v2  ;;  %v4128_v28 = vld [vmem:[#allocation2 + $0x2aa] sm:$0xff] }
 0x9d9   :  { %v4563_v2 = vpack.c.bf16 %v4128_v28, %v4127_v35  ;;  %v4129_v28 = vld [vmem:[#allocation2 + $0x2ba] sm:$0xff] }
 0x9db   :  { %v6131_v13 = vpop.f32.mrf.mxu2 }
 0x9dc   :  { %6339 = vmatmul.bf16.gmra.mxu3 %v4555_v31  ;;  %v6132_v17 = vadd.f32 %v6131_v13, %v5963_v5  ;;  %v6464_v54 = vpop.f32.mrf.mxu0  ;;  %v5964_v42 = vpop.f32.mrf.mxu1  ;;  %v4562_v13 = vpack.c.bf16 %v4064_v6, %v4063_v40  ;;  %v4065_v40 = vld [vmem:[#allocation2 + $0x2b9] sm:$0xff]  ;;  %v4066_v6 = vld [vmem:[#allocation2 + $0x2c1] sm:$0xff] }
 0x9dd   :  { %v10539_v8 = vadd.f32 %v6464_v54, %v6296_v20  ;;  %v5965_v23 = vadd.f32 %v5964_v42, %v10381_v45  ;;  %v4564_v45 = vpack.c.bf16 %v4192_v46, %v4191_v27  ;;  %v4193_v27 = vld [vmem:[#allocation2 + $0x2d0] sm:$0xff]  ;;  %v4194_v46 = vld [vmem:[#allocation2 + $0x2d8] sm:$0xff] }
 0x9df   :  { %v6300_v61 = vpop.f32.mrf.mxu3  ;;  %6503 = vmatmul.bf16.gmra.mxu0 %v4553_v21 }
 0x9e0   :  { %v6301_v19 = vadd.f32 %v6300_v61, %v6132_v17 }
 0x9e3   :  { %v6133_v62 = vpop.f32.mrf.mxu2 }
 0x9e4   :  { %v6134_v34 = vadd.f32 %v6133_v62, %v5965_v23  ;;  %v6466_v44 = vpop.f32.mrf.mxu0  ;;  %v5967_v5 = vpop.f32.mrf.mxu1 }
 0x9e5   :  { %v10542_v31 = vadd.f32 %v6466_v44, %v6298_v15  ;;  %v5968_v20 = vadd.f32 %v5967_v5, %v10383_v26 }
 0x9e7   :  { %v6302_v10 = vpop.f32.mrf.mxu3  ;;  %6006 = vmatmul.bf16.gmra.mxu1 %v4562_v13 }
 0x9e8   :  { %v6303_v18 = vadd.f32 %v6302_v10, %v6134_v34  ;;  %6175 = vmatmul.bf16.gmra.mxu2 %v4563_v2  ;;  %v4130_v34 = vld [vmem:[#allocation2 + $0x2c2] sm:$0xff] }
 0x9e9   :  { %v4572_v2 = vpack.c.bf16 %v4130_v34, %v4129_v28 }
 0x9eb   :  { %v6136_v21 = vpop.f32.mrf.mxu2 }
 0x9ec   :  { %6344 = vmatmul.bf16.gmra.mxu3 %v4564_v45  ;;  %v6137_v17 = vadd.f32 %v6136_v21, %v5968_v20  ;;  %v6469_v54 = vpop.f32.mrf.mxu0  ;;  %v5969_v23 = vpop.f32.mrf.mxu1  ;;  %v4571_v21 = vpack.c.bf16 %v4066_v6, %v4065_v40  ;;  %v4067_v6 = vld [vmem:[#allocation2 + $0x2d1] sm:$0xff] }
 0x9ed   :  { %v10545_v62 = vadd.f32 %v6469_v54, %v6301_v19  ;;  %v5970_v35 = vadd.f32 %v5969_v23, %v10385_v51  ;;  %v4573_v51 = vpack.c.bf16 %v4194_v46, %v4193_v27  ;;  %v4195_v46 = vld [vmem:[#allocation2 + $0x2e8] sm:$0xff] }
 0x9ef   :  { %v6305_v61 = vpop.f32.mrf.mxu3  ;;  %6508 = vmatmul.bf16.gmra.mxu0 %v4562_v13 }
 0x9f0   :  { %v6306_v42 = vadd.f32 %v6305_v61, %v6137_v17 }
 0x9f3   :  { %v6138_v15 = vpop.f32.mrf.mxu2 }
 0x9f4   :  { %v6139_v26 = vadd.f32 %v6138_v15, %v5970_v35  ;;  %v6471_v44 = vpop.f32.mrf.mxu0  ;;  %v5972_v20 = vpop.f32.mrf.mxu1 }
 0x9f5   :  { %v10548_v45 = vadd.f32 %v6471_v44, %v6303_v18  ;;  %v5973_v19 = vadd.f32 %v5972_v20, %v10387_v9  ;;  %v7998_v18 = vld [vmem:[#allocation8 + $0x200] sm:$0xff]  ;;  %v4196_v44 = vld [vmem:[#allocation2 + $0x2f0] sm:$0xff] }
 0x9f6   :  { %v4132_v9 = vld [vmem:[#allocation2 + $0x2da] sm:$0xff]  ;;  %6556 = vmatpush.bf16.msra.mxu1 %v7998_v18 }
 0x9f7   :  { %v6307_v10 = vpop.f32.mrf.mxu3  ;;  %6011 = vmatmul.bf16.gmra.mxu1 %v4571_v21 }
 0x9f8   :  { %v6308_v5 = vadd.f32 %v6307_v10, %v6139_v26  ;;  %6180 = vmatmul.bf16.gmra.mxu2 %v4572_v2  ;;  %v4131_v26 = vld [vmem:[#allocation2 + $0x2d2] sm:$0xff] }
 0x9f9   :  { %v4068_v10 = vld [vmem:[#allocation2 + $0x2d9] sm:$0xff]  ;;  %v4581_v27 = vpack.c.bf16 %v4132_v9, %v4131_v26  ;;  %v12061_v26 = vld [vmem:[#allocation142_spill] sm:$0xff] }
 0x9fb   :  { %v6141_v13 = vpop.f32.mrf.mxu2 }
 0x9fc   :  { %6349 = vmatmul.bf16.gmra.mxu3 %v4573_v51  ;;  %v6142_v17 = vadd.f32 %v6141_v13, %v5973_v19  ;;  %v6474_v54 = vpop.f32.mrf.mxu0  ;;  %v5974_v35 = vpop.f32.mrf.mxu1  ;;  %v4582_v13 = vpack.c.bf16 %v4196_v44, %v4195_v46  ;;  %v4197_v44 = vld [vmem:[#allocation2 + $0x300] sm:$0xff] }
 0x9fd   :  { %v10551_v15 = vadd.f32 %v6474_v54, %v6306_v42  ;;  %v5975_v28 = vadd.f32 %v5974_v35, %v10389_v39 }
 0x9ff   :  { %v6310_v61 = vpop.f32.mrf.mxu3  ;;  %6513 = vmatmul.bf16.gmra.mxu0 %v4571_v21  ;;  %v4580_v21 = vpack.c.bf16 %v4068_v10, %v4067_v6  ;;  %v4069_v6 = vld [vmem:[#allocation2 + $0x2e9] sm:$0xff]  ;;  %v4070_v10 = vld [vmem:[#allocation2 + $0x2f1] sm:$0xff] }
 0xa00   :  { %v6311_v23 = vadd.f32 %v6310_v61, %v6142_v17 }
 0xa03   :  { %v6143_v34 = vpop.f32.mrf.mxu2 }
 0xa04   :  { %v6144_v40 = vadd.f32 %v6143_v34, %v5975_v28  ;;  %v6476_v20 = vpop.f32.mrf.mxu0  ;;  %v5977_v51 = vpop.f32.mrf.mxu1 }
 0xa05   :  { %v10554_v42 = vadd.f32 %v6476_v20, %v6308_v5  ;;  %v5978_v39 = vadd.f32 %v5977_v51, %v10391_v59  ;;  %v4198_v20 = vld [vmem:[#allocation2 + $0x308] sm:$0xff] }
 0xa07   :  { %v6312_v2 = vpop.f32.mrf.mxu3  ;;  %6016 = vmatmul.bf16.gmra.mxu1 %v4580_v21 }
 0xa08   :  { %v6313_v19 = vadd.f32 %v6312_v2, %v6144_v40  ;;  %6185 = vmatmul.bf16.gmra.mxu2 %v4581_v27  ;;  %v4133_v40 = vld [vmem:[#allocation2 + $0x2ea] sm:$0xff]  ;;  %v4134_v2 = vld [vmem:[#allocation2 + $0x2f2] sm:$0xff] }
 0xa09   :  { %v4590_v46 = vpack.c.bf16 %v4134_v2, %v4133_v40 }
 0xa0b   :  { %v6146_v17 = vpop.f32.mrf.mxu2 }
 0xa0c   :  { %6354 = vmatmul.bf16.gmra.mxu3 %v4582_v13  ;;  %v6147_v61 = vadd.f32 %v6146_v17, %v5978_v39  ;;  %v6479_v35 = vpop.f32.mrf.mxu0  ;;  %v5979_v18 = vpop.f32.mrf.mxu1 }
 0xa0d   :  { %v10557_v34 = vadd.f32 %v6479_v35, %v6311_v23  ;;  %v5980_v9 = vadd.f32 %v5979_v18, %v12061_v26  ;;  %v12063_v23 = vld [vmem:[#allocation91_spill] sm:$0xff] }
 0xa0f   :  { %v6315_v54 = vpop.f32.mrf.mxu3  ;;  %12060 = vst [vmem:[#allocation116_spill] sm:$0xff] %v10557_v34  ;;  %6518 = vmatmul.bf16.gmra.mxu0 %v4580_v21  ;;  %v4591_v21 = vpack.c.bf16 %v4198_v20, %v4197_v44  ;;  %v12065_v34 = vld [vmem:[#allocation90_spill] sm:$0xff]  ;;  %v4199_v20 = vld [vmem:[#allocation2 + $0x318] sm:$0xff] }
 0xa10   :  { %v6316_v28 = vadd.f32 %v6315_v54, %v6147_v61  ;;  %v4589_v54 = vpack.c.bf16 %v4070_v10, %v4069_v6  ;;  %v4071_v6 = vld [vmem:[#allocation2 + $0x301] sm:$0xff]  ;;  %v4072_v10 = vld [vmem:[#allocation2 + $0x309] sm:$0xff] }
 0xa13   :  { %v6148_v5 = vpop.f32.mrf.mxu2 }
 0xa14   :  { %v6149_v59 = vadd.f32 %v6148_v5, %v5980_v9  ;;  %v6481_v51 = vpop.f32.mrf.mxu0  ;;  %v5982_v13 = vpop.f32.mrf.mxu1 }
 0xa15   :  { %v10560_v17 = vadd.f32 %v6481_v51, %v6313_v19  ;;  %v5983_v61 = vadd.f32 %v5982_v13, %v12063_v23  ;;  %v4136_v51 = vld [vmem:[#allocation2 + $0x30a] sm:$0xff]  ;;  %v4200_v23 = vld [vmem:[#allocation2 + $0x320] sm:$0xff] }
 0xa17   :  { %v6317_v27 = vpop.f32.mrf.mxu3  ;;  %12062 = vst [vmem:[#allocation75_spill] sm:$0xff] %v10560_v17  ;;  %6021 = vmatmul.bf16.gmra.mxu1 %v4589_v54  ;;  %v12069_v17 = vld [vmem:[#allocation143_spill] sm:$0xff] }
 0xa18   :  { %v6318_v39 = vadd.f32 %v6317_v27, %v6149_v59  ;;  %6190 = vmatmul.bf16.gmra.mxu2 %v4590_v46  ;;  %v4135_v27 = vld [vmem:[#allocation2 + $0x302] sm:$0xff] }
 0xa19   :  { %v4599_v44 = vpack.c.bf16 %v4136_v51, %v4135_v27 }
 0xa1b   :  { %v6151_v35 = vpop.f32.mrf.mxu2 }
 0xa1c   :  { %6359 = vmatmul.bf16.gmra.mxu3 %v4591_v21  ;;  %v6152_v18 = vadd.f32 %v6151_v35, %v5983_v61  ;;  %v6484_v9 = vpop.f32.mrf.mxu0  ;;  %v5984_v40 = vpop.f32.mrf.mxu1 }
 0xa1d   :  { %v10563_v2 = vadd.f32 %v6484_v9, %v6316_v28  ;;  %v5985_v59 = vadd.f32 %v5984_v40, %v12065_v34  ;;  %v12067_v28 = vld [vmem:[#allocation144_spill] sm:$0xff]  ;;  %v4598_v9 = vpack.c.bf16 %v4072_v10, %v4071_v6  ;;  %v4600_v34 = vpack.c.bf16 %v4200_v23, %v4199_v20  ;;  %v4074_v10 = vld [vmem:[#allocation2 + $0x321] sm:$0xff]  ;;  %v4201_v23 = vld [vmem:[#allocation2 + $0x330] sm:$0xff] }
 0xa1e   :  { %v4073_v6 = vld [vmem:[#allocation2 + $0x319] sm:$0xff] }
 0xa1f   :  { %v6320_v26 = vpop.f32.mrf.mxu3  ;;  %12064 = vst [vmem:[#allocation108_spill] sm:$0xff] %v10563_v2  ;;  %6523 = vmatmul.bf16.gmra.mxu0 %v4589_v54 }
 0xa20   :  { %v6321_v5 = vadd.f32 %v6320_v26, %v6152_v18 }
 0xa23   :  { %v6153_v19 = vpop.f32.mrf.mxu2 }
 0xa24   :  { %v6154_v13 = vadd.f32 %v6153_v19, %v5985_v59  ;;  %v6486_v61 = vpop.f32.mrf.mxu0  ;;  %v5987_v35 = vpop.f32.mrf.mxu1 }
 0xa25   :  { %v10566_v18 = vadd.f32 %v6486_v61, %v6318_v39  ;;  %v5988_v26 = vadd.f32 %v5987_v35, %v12067_v28  ;;  %v4138_v61 = vld [vmem:[#allocation2 + $0x322] sm:$0xff]  ;;  %v4202_v28 = vld [vmem:[#allocation2 + $0x338] sm:$0xff] }
 0xa27   :  { %v6322_v46 = vpop.f32.mrf.mxu3  ;;  %12066 = vst [vmem:[#allocation89_spill] sm:$0xff] %v10566_v18  ;;  %6026 = vmatmul.bf16.gmra.mxu1 %v4598_v9  ;;  %v12071_v18 = vld [vmem:[#allocation93_spill] sm:$0xff] }
 0xa28   :  { %v6323_v21 = vadd.f32 %v6322_v46, %v6154_v13  ;;  %6195 = vmatmul.bf16.gmra.mxu2 %v4599_v44  ;;  %v4137_v46 = vld [vmem:[#allocation2 + $0x31a] sm:$0xff] }
 0xa29   :  { %v4608_v20 = vpack.c.bf16 %v4138_v61, %v4137_v46 }
 0xa2b   :  { %v6156_v54 = vpop.f32.mrf.mxu2 }
 0xa2c   :  { %6364 = vmatmul.bf16.gmra.mxu3 %v4600_v34  ;;  %v6157_v40 = vadd.f32 %v6156_v54, %v5988_v26  ;;  %v6489_v19 = vpop.f32.mrf.mxu0  ;;  %v5989_v27 = vpop.f32.mrf.mxu1 }
 0xa2d   :  { %v10569_v51 = vadd.f32 %v6489_v19, %v6321_v5  ;;  %v5990_v13 = vadd.f32 %v5989_v27, %v12069_v17  ;;  %v12070_v5 = vld [vmem:[#allocation145_spill] sm:$0xff]  ;;  %v4607_v19 = vpack.c.bf16 %v4074_v10, %v4073_v6  ;;  %v4609_v17 = vpack.c.bf16 %v4202_v28, %v4201_v23  ;;  %v4075_v6 = vld [vmem:[#allocation2 + $0x331] sm:$0xff] }
 0xa2e   :  { %v4076_v10 = vld [vmem:[#allocation2 + $0x339] sm:$0xff] }
 0xa2f   :  { %v6325_v59 = vpop.f32.mrf.mxu3  ;;  %12068 = vst [vmem:[#allocation141_spill] sm:$0xff] %v10569_v51  ;;  %6528 = vmatmul.bf16.gmra.mxu0 %v4598_v9 }
 0xa30   :  { %v6326_v2 = vadd.f32 %v6325_v59, %v6157_v40 }
 0xa33   :  { %v6158_v39 = vpop.f32.mrf.mxu2 }
 0xa34   :  { %v6159_v35 = vadd.f32 %v6158_v39, %v5990_v13  ;;  %v6491_v26 = vpop.f32.mrf.mxu0  ;;  %v5992_v54 = vpop.f32.mrf.mxu1 }
 0xa35   :  { %v10572_v40 = vadd.f32 %v6491_v26, %v6323_v21  ;;  %v5993_v59 = vadd.f32 %v5992_v54, %v12070_v5  ;;  %v4140_v26 = vld [vmem:[#allocation2 + $0x33a] sm:$0xff] }
 0xa37   :  { %v6327_v44 = vpop.f32.mrf.mxu3  ;;  %6031 = vmatmul.bf16.gmra.mxu1 %v4607_v19 }
 0xa38   :  { %v6328_v34 = vadd.f32 %v6327_v44, %v6159_v35  ;;  %6200 = vmatmul.bf16.gmra.mxu2 %v4608_v20  ;;  %v4139_v44 = vld [vmem:[#allocation2 + $0x332] sm:$0xff] }
 0xa39   :  { %v10578_v23 = vpack.c.bf16 %v4140_v26, %v4139_v44 }
 0xa3b   :  { %v6161_v9 = vpop.f32.mrf.mxu2  ;;  %12072 = vst [vmem:[#allocation117_spill] sm:$0xff] %v10578_v23 }
 0xa3c   :  { %6369 = vmatmul.bf16.gmra.mxu3 %v4609_v17  ;;  %v6162_v27 = vadd.f32 %v6161_v9, %v5993_v59  ;;  %v6494_v39 = vpop.f32.mrf.mxu0  ;;  %v5994_v46 = vpop.f32.mrf.mxu1  ;;  %v4616_v9 = vpack.c.bf16 %v4076_v10, %v4075_v6 }
 0xa3d   :  { %v10575_v61 = vadd.f32 %v6494_v39, %v6326_v2  ;;  %v5995_v35 = vadd.f32 %v5994_v46, %v12071_v18 }
 0xa3f   :  { %v6330_v13 = vpop.f32.mrf.mxu3  ;;  %6533 = vmatmul.bf16.gmra.mxu0 %v4607_v19 }
 0xa40   :  { %v6331_v51 = vadd.f32 %v6330_v13, %v6162_v27 }
 0xa43   :  { %v6163_v21 = vpop.f32.mrf.mxu2 }
 0xa44   :  { %v6164_v54 = vadd.f32 %v6163_v21, %v5995_v35  ;;  %v6496_v28 = vpop.f32.mrf.mxu0  ;;  %v5997_v59 = vpop.f32.mrf.mxu1  ;;  %v12074_v21 = vld [vmem:[#allocation94_spill] sm:$0xff] }
 0xa45   :  { %v10580_v17 = vadd.f32 %v6496_v28, %v6328_v34  ;;  %v5998_v2 = vadd.f32 %v5997_v59, %v10407_v0  ;;  %v4269_v0 = vld [vmem:[#allocation2 + $0x32] sm:$0xff] }
 0xa46   :  { %v12076_v59 = vld [vmem:[#allocation95_spill] sm:$0xff] }
 0xa47   :  { %v6332_v20 = vpop.f32.mrf.mxu3  ;;  %6036 = vmatmul.bf16.gmra.mxu1 %v4616_v9 }
 0xa48   :  { %v6333_v5 = vadd.f32 %v6332_v20, %v6164_v54  ;;  %6205 = vmatmul.bf16.gmra.mxu2 %v10578_v23  ;;  %v4270_v54 = vld [vmem:[#allocation2 + $0x3a] sm:$0xff] }
 0xa4b   :  { %v6166_v18 = vpop.f32.mrf.mxu2 }
 0xa4c   :  { %6374 = vmatmul.bf16.gmra.mxu3 %v10479_v52  ;;  %v6167_v19 = vadd.f32 %v6166_v18, %v5998_v2  ;;  %v6499_v13 = vpop.f32.mrf.mxu0  ;;  %v5999_v46 = vpop.f32.mrf.mxu1  ;;  %v4341_v18 = vpack.c.bf16 %v4270_v54, %v4269_v0 }
 0xa4d   :  { %v10585_v35 = vadd.f32 %v6499_v13, %v6331_v51  ;;  %v6000_v44 = vadd.f32 %v5999_v46, %v12074_v21  ;;  %v4268_v51 = vld [vmem:[#allocation2 + $0x351] sm:$0xff] }
 0xa4f   :  { %v6335_v27 = vpop.f32.mrf.mxu3  ;;  %12073 = vst [vmem:[#allocation118_spill] sm:$0xff] %v10585_v35  ;;  %6538 = vmatmul.bf16.gmra.mxu0 %v4616_v9  ;;  %v12078_v35 = vld [vmem:[#allocation96_spill] sm:$0xff] }
 0xa50   :  { %v6336_v39 = vadd.f32 %v6335_v27, %v6167_v19  ;;  %v4267_v19 = vld [vmem:[#allocation2 + $0x349] sm:$0xff] }
 0xa51   :  { %v4619_v46 = vpack.c.bf16 %v4268_v51, %v4267_v19 }
 0xa53   :  { %v6168_v34 = vpop.f32.mrf.mxu2 }
 0xa54   :  { %v6169_v26 = vadd.f32 %v6168_v34, %v6000_v44  ;;  %v6501_v10 = vpop.f32.mrf.mxu0  ;;  %v6002_v28 = vpop.f32.mrf.mxu1 }
 0xa55   :  { %v10588_v52 = vadd.f32 %v6501_v10, %v6333_v5  ;;  %v6003_v2 = vadd.f32 %v6002_v28, %v12076_v59  ;;  %v4271_v10 = vld [vmem:[#allocation2 + $0x4a] sm:$0xff]  ;;  %v4272_v28 = vld [vmem:[#allocation2 + $0x52] sm:$0xff] }
 0xa56   :  { %v4350_v51 = vpack.c.bf16 %v4272_v28, %v4271_v10  ;;  %v12082_v28 = vld [vmem:[#allocation99_spill] sm:$0xff] }
 0xa57   :  { %v6337_v6 = vpop.f32.mrf.mxu3  ;;  %12075 = vst [vmem:[#allocation119_spill] sm:$0xff] %v10588_v52  ;;  %6557 = vmatmul.bf16.vlgmr.msra.gmra.mxu1 %v4341_v18 }
 0xa58   :  { %v6338_v20 = vadd.f32 %v6337_v6, %v6169_v26 }
 0xa5b   :  { %v6171_v27 = vpop.f32.mrf.mxu2 }
 0xa5c   :  { %v6172_v13 = vadd.f32 %v6171_v27, %v6003_v2  ;;  %v6504_v21 = vpop.f32.mrf.mxu0  ;;  %v6004_v34 = vpop.f32.mrf.mxu1  ;;  %v12080_v2 = vld [vmem:[#allocation97_spill] sm:$0xff] }
 0xa5d   :  { %v10591_v23 = vadd.f32 %v6504_v21, %v6336_v39  ;;  %v6005_v26 = vadd.f32 %v6004_v34, %v12078_v35  ;;  %v12081_v34 = vld [vmem:[#allocation98_spill] sm:$0xff] }
 0xa5f   :  { %v6340_v9 = vpop.f32.mrf.mxu3  ;;  %12077 = vst [vmem:[#allocation120_spill] sm:$0xff] %v10591_v23  ;;  %6543 = vmatmul.bf16.gmra.mxu0 %v4619_v46 }
 0xa60   :  { %v6341_v44 = vadd.f32 %v6340_v9, %v6172_v13 }
 0xa63   :  { %v6173_v5 = vpop.f32.mrf.mxu2 }
 0xa64   :  { %v6174_v6 = vadd.f32 %v6173_v5, %v6005_v26  ;;  %v6506_v54 = vpop.f32.mrf.mxu0  ;;  %v6007_v18 = vpop.f32.mrf.mxu1 }
 0xa65   :  { %v10594_v52 = vadd.f32 %v6506_v54, %v6338_v20  ;;  %v6008_v19 = vadd.f32 %v6007_v18, %v12080_v2 }
 0xa67   :  { %v6342_v0 = vpop.f32.mrf.mxu3  ;;  %12079 = vst [vmem:[#allocation121_spill] sm:$0xff] %v10594_v52  ;;  %6562 = vmatmul.bf16.gmra.mxu1 %v4350_v51 }
 0xa68   :  { %v6343_v59 = vadd.f32 %v6342_v0, %v6174_v6  ;;  %v4273_v6 = vld [vmem:[#allocation2 + $0x62] sm:$0xff]  ;;  %v4274_v0 = vld [vmem:[#allocation2 + $0x6a] sm:$0xff] }
 0xa6b   :  { %v6176_v27 = vpop.f32.mrf.mxu2 }
 0xa6c   :  { %v6177_v39 = vadd.f32 %v6176_v27, %v6008_v19  ;;  %v6509_v9 = vpop.f32.mrf.mxu0  ;;  %v6009_v46 = vpop.f32.mrf.mxu1  ;;  %v4359_v19 = vpack.c.bf16 %v4274_v0, %v4273_v6 }
 0xa6d   :  { %v10597_v21 = vadd.f32 %v6509_v9, %v6341_v44  ;;  %v6010_v26 = vadd.f32 %v6009_v46, %v12081_v34  ;;  %v12083_v34 = vld [vmem:[#allocation100_spill] sm:$0xff] }
 0xa6f   :  { %v6345_v13 = vpop.f32.mrf.mxu3 }
 0xa70   :  { %v6346_v35 = vadd.f32 %v6345_v13, %v6177_v39 }
 0xa73   :  { %v6178_v5 = vpop.f32.mrf.mxu2 }
 0xa74   :  { %v6179_v23 = vadd.f32 %v6178_v5, %v6010_v26  ;;  %v6511_v54 = vpop.f32.mrf.mxu0  ;;  %v6012_v18 = vpop.f32.mrf.mxu1  ;;  %v4275_v5 = vld [vmem:[#allocation2 + $0x7a] sm:$0xff] }
 0xa75   :  { %v10600_v10 = vadd.f32 %v6511_v54, %v6343_v59  ;;  %v6013_v2 = vadd.f32 %v6012_v18, %v12082_v28  ;;  %v12085_v18 = vld [vmem:[#allocation101_spill] sm:$0xff] }
 0xa77   :  { %v6347_v20 = vpop.f32.mrf.mxu3  ;;  %6567 = vmatmul.bf16.gmra.mxu1 %v4359_v19 }
 0xa78   :  { %v6348_v52 = vadd.f32 %v6347_v20, %v6179_v23  ;;  %v4276_v23 = vld [vmem:[#allocation2 + $0x82] sm:$0xff] }
 0xa79   :  { %v4368_v0 = vpack.c.bf16 %v4276_v23, %v4275_v5  ;;  %v4279_v5 = vld [vmem:[#allocation2 + $0xaa] sm:$0xff]  ;;  %v4280_v23 = vld [vmem:[#allocation2 + $0xb2] sm:$0xff] }
 0xa7b   :  { %v6181_v51 = vpop.f32.mrf.mxu2 }
 0xa7c   :  { %v6182_v27 = vadd.f32 %v6181_v51, %v6013_v2  ;;  %v6514_v39 = vpop.f32.mrf.mxu0  ;;  %v6014_v9 = vpop.f32.mrf.mxu1 }
 0xa7d   :  { %v10603_v46 = vadd.f32 %v6514_v39, %v6346_v35  ;;  %v10606_v26 = vadd.f32 %v6014_v9, %v12083_v34  ;;  %v12087_v35 = vld [vmem:[#allocation102_spill] sm:$0xff]  ;;  %v12089_v9 = vld [vmem:[#allocation103_spill] sm:$0xff] }
 0xa7f   :  { %v6350_v44 = vpop.f32.mrf.mxu3  ;;  %12084 = vst [vmem:[#allocation122_spill] sm:$0xff] %v10606_v26  ;;  %v4331_v26 = vld [vmem:[#allocation2 + $0x34a] sm:$0xff] }
 0xa80   :  { %v6351_v13 = vadd.f32 %v6350_v44, %v6182_v27  ;;  %v4277_v27 = vld [vmem:[#allocation2 + $0x92] sm:$0xff]  ;;  %v4278_v44 = vld [vmem:[#allocation2 + $0x9a] sm:$0xff] }
 0xa84   :  { %v6516_v20 = vpop.f32.mrf.mxu0  ;;  %v6017_v59 = vpop.f32.mrf.mxu1 }
 0xa85   :  { %v10608_v54 = vadd.f32 %v6516_v20, %v6348_v52  ;;  %v10611_v6 = vadd.f32 %v6017_v59, %v12085_v18  ;;  %v4377_v52 = vpack.c.bf16 %v4278_v44, %v4277_v27  ;;  %v12091_v59 = vld [vmem:[#allocation110_spill] sm:$0xff]  ;;  %v12096_v44 = vld [vmem:[#allocation112_spill] sm:$0xff] }
 0xa87   :  { %12086 = vst [vmem:[#allocation123_spill] sm:$0xff] %v10611_v6  ;;  %6572 = vmatmul.bf16.gmra.mxu1 %v4368_v0 }
 0xa8c   :  { %v6519_v28 = vpop.f32.mrf.mxu0  ;;  %v6019_v2 = vpop.f32.mrf.mxu1 }
 0xa8d   :  { %v10613_v19 = vadd.f32 %v6519_v28, %v6351_v13  ;;  %v10616_v51 = vadd.f32 %v6019_v2, %v12087_v35  ;;  %v12093_v13 = vld [vmem:[#allocation111_spill] sm:$0xff]  ;;  %v4386_v2 = vpack.c.bf16 %v4280_v23, %v4279_v5 }
 0xa8f   :  { %12088 = vst [vmem:[#allocation124_spill] sm:$0xff] %v10616_v51 }
 0xa94   :  { %v6022_v39 = vpop.f32.mrf.mxu1 }
 0xa95   :  { %v10619_v34 = vadd.f32 %v6022_v39, %v12089_v9  ;;  %v4281_v39 = vld [vmem:[#allocation2 + $0xc2] sm:$0xff]  ;;  %v4282_v9 = vld [vmem:[#allocation2 + $0xca] sm:$0xff] }
 0xa97   :  { %12090 = vst [vmem:[#allocation125_spill] sm:$0xff] %v10619_v34  ;;  %6577 = vmatmul.bf16.gmra.mxu1 %v4377_v52 }
 0xa9c   :  { %v6024_v20 = vpop.f32.mrf.mxu1 }
 0xa9d   :  { %v10622_v18 = vadd.f32 %v6024_v20, %v12091_v59  ;;  %v4395_v20 = vpack.c.bf16 %v4282_v9, %v4281_v39 }
 0xa9f   :  { %12092 = vst [vmem:[#allocation126_spill] sm:$0xff] %v10622_v18 }
 0xaa4   :  { %v6027_v0 = vpop.f32.mrf.mxu1 }
 0xaa5   :  { %v10625_v28 = vadd.f32 %v6027_v0, %v12093_v13  ;;  %v4283_v0 = vld [vmem:[#allocation2 + $0xda] sm:$0xff]  ;;  %v4284_v13 = vld [vmem:[#allocation2 + $0xe2] sm:$0xff] }
 0xaa7   :  { %12094 = vst [vmem:[#allocation127_spill] sm:$0xff] %v10625_v28  ;;  %6582 = vmatmul.bf16.gmra.mxu1 %v4386_v2  ;;  %v12135_v28 = vld [vmem:[#allocation89_spill] sm:$0xff] }
 0xaac   :  { %v6029_v35 = vpop.f32.mrf.mxu1 }
 0xaad   :  { %v10628_v51 = vadd.f32 %v6029_v35, %v10433_v53  ;;  %v4404_v53 = vpack.c.bf16 %v4284_v13, %v4283_v0 }
 0xaaf   :  { %12095 = vst [vmem:[#allocation128_spill] sm:$0xff] %v10628_v51 }
 0xab4   :  { %v6032_v27 = vpop.f32.mrf.mxu1 }
 0xab5   :  { %v10631_v52 = vadd.f32 %v6032_v27, %v12096_v44  ;;  %v4285_v27 = vld [vmem:[#allocation2 + $0xf2] sm:$0xff]  ;;  %v4286_v44 = vld [vmem:[#allocation2 + $0xfa] sm:$0xff] }
 0xab7   :  { %12097 = vst [vmem:[#allocation129_spill] sm:$0xff] %v10631_v52  ;;  %6587 = vmatmul.bf16.gmra.mxu1 %v4395_v20  ;;  %v12131_v52 = vld [vmem:[#allocation75_spill] sm:$0xff] }
 0xabc   :  { %v6034_v59 = vpop.f32.mrf.mxu1 }
 0xabd   :  { %v10634_v18 = vadd.f32 %v6034_v59, %v10437_v12  ;;  %v4413_v12 = vpack.c.bf16 %v4286_v44, %v4285_v27 }
 0xabf   :  { %12098 = vst [vmem:[#allocation130_spill] sm:$0xff] %v10634_v18 }
 0xac4   :  { %v6037_v5 = vpop.f32.mrf.mxu1 }
 0xac5   :  { %v10637_v23 = vadd.f32 %v6037_v5, %v10440_v25  ;;  %v4287_v25 = vld [vmem:[#allocation2 + $0x10a] sm:$0xff]  ;;  %v4288_v5 = vld [vmem:[#allocation2 + $0x112] sm:$0xff] }
 0xac7   :  { %12099 = vst [vmem:[#allocation131_spill] sm:$0xff] %v10637_v23  ;;  %6592 = vmatmul.bf16.gmra.mxu1 %v4404_v53 }
 0xacc   :  { %v6039_v2 = vpop.f32.mrf.mxu1 }
 0xacd   :  { %v10640_v35 = vadd.f32 %v6039_v2, %v10443_v41  ;;  %v4422_v41 = vpack.c.bf16 %v4288_v5, %v4287_v25 }
 0xacf   :  { %12100 = vst [vmem:[#allocation132_spill] sm:$0xff] %v10640_v35  ;;  %v12113_v35 = vld [vmem:[#allocation114_spill] sm:$0xff] }
 0xad4   :  { %v6558_v39 = vpop.f32.mrf.mxu1 }
 0xad5   :  { %v10643_v9 = vadd.f32 %v6558_v39, %v10446_v33  ;;  %v4289_v33 = vld [vmem:[#allocation2 + $0x122] sm:$0xff]  ;;  %v4290_v39 = vld [vmem:[#allocation2 + $0x12a] sm:$0xff] }
 0xad7   :  { %12101 = vst [vmem:[#allocation133_spill] sm:$0xff] %v10643_v9  ;;  %6597 = vmatmul.bf16.gmra.mxu1 %v4413_v12 }
 0xadc   :  { %v6560_v20 = vpop.f32.mrf.mxu1 }
 0xadd   :  { %v10646_v59 = vadd.f32 %v6560_v20, %v10449_v24  ;;  %v4431_v24 = vpack.c.bf16 %v4290_v39, %v4289_v33 }
 0xadf   :  { %12102 = vst [vmem:[#allocation134_spill] sm:$0xff] %v10646_v59 }
 0xae4   :  { %v6563_v0 = vpop.f32.mrf.mxu1 }
 0xae5   :  { %v10649_v13 = vadd.f32 %v6563_v0, %v10452_v37  ;;  %v4291_v37 = vld [vmem:[#allocation2 + $0x13a] sm:$0xff]  ;;  %v4292_v0 = vld [vmem:[#allocation2 + $0x142] sm:$0xff] }
 0xae7   :  { %12103 = vst [vmem:[#allocation135_spill] sm:$0xff] %v10649_v13  ;;  %6602 = vmatmul.bf16.gmra.mxu1 %v4422_v41 }
 0xaec   :  { %v6565_v53 = vpop.f32.mrf.mxu1 }
 0xaed   :  { %v10652_v2 = vadd.f32 %v6565_v53, %v10455_v30  ;;  %v4440_v30 = vpack.c.bf16 %v4292_v0, %v4291_v37  ;;  %v12111_v0 = vld [vmem:[#allocation113_spill] sm:$0xff] }
 0xaef   :  { %12104 = vst [vmem:[#allocation136_spill] sm:$0xff] %v10652_v2 }
 0xaf4   :  { %v6568_v27 = vpop.f32.mrf.mxu1 }
 0xaf5   :  { %v10655_v44 = vadd.f32 %v6568_v27, %v10458_v29  ;;  %v4293_v29 = vld [vmem:[#allocation2 + $0x152] sm:$0xff]  ;;  %v4294_v27 = vld [vmem:[#allocation2 + $0x15a] sm:$0xff] }
 0xaf7   :  { %12105 = vst [vmem:[#allocation137_spill] sm:$0xff] %v10655_v44  ;;  %6607 = vmatmul.bf16.gmra.mxu1 %v4431_v24 }
 0xafc   :  { %v6570_v12 = vpop.f32.mrf.mxu1 }
 0xafd   :  { %v10658_v20 = vadd.f32 %v6570_v12, %v10461_v4  ;;  %v4449_v4 = vpack.c.bf16 %v4294_v27, %v4293_v29  ;;  %v12115_v27 = vld [vmem:[#allocation115_spill] sm:$0xff] }
 0xaff   :  { %12106 = vst [vmem:[#allocation138_spill] sm:$0xff] %v10658_v20 }
 0xb04   :  { %v6573_v25 = vpop.f32.mrf.mxu1 }
 0xb05   :  { %v10661_v5 = vadd.f32 %v6573_v25, %v10464_v32  ;;  %v4295_v32 = vld [vmem:[#allocation2 + $0x16a] sm:$0xff]  ;;  %v4296_v25 = vld [vmem:[#allocation2 + $0x172] sm:$0xff] }
 0xb07   :  { %12107 = vst [vmem:[#allocation139_spill] sm:$0xff] %v10661_v5  ;;  %6612 = vmatmul.bf16.gmra.mxu1 %v4440_v30 }
 0xb0c   :  { %v6575_v41 = vpop.f32.mrf.mxu1 }
 0xb0d   :  { %v10664_v53 = vadd.f32 %v6575_v41, %v10467_v50  ;;  %v4458_v50 = vpack.c.bf16 %v4296_v25, %v4295_v32 }
 0xb0f   :  { %12108 = vst [vmem:[#allocation49_spill] sm:$0xff] %v10664_v53 }
 0xb14   :  { %v6578_v33 = vpop.f32.mrf.mxu1 }
 0xb15   :  { %v10667_v39 = vadd.f32 %v6578_v33, %v10470_v47  ;;  %v4297_v47 = vld [vmem:[#allocation2 + $0x182] sm:$0xff]  ;;  %v4298_v33 = vld [vmem:[#allocation2 + $0x18a] sm:$0xff] }
 0xb17   :  { %12109 = vst [vmem:[#allocation58_spill] sm:$0xff] %v10667_v39  ;;  %6617 = vmatmul.bf16.gmra.mxu1 %v4449_v4 }
 0xb1c   :  { %v6580_v24 = vpop.f32.mrf.mxu1 }
 0xb1d   :  { %v10670_v12 = vadd.f32 %v6580_v24, %v10473_v60  ;;  %v4467_v60 = vpack.c.bf16 %v4298_v33, %v4297_v47 }
 0xb1f   :  { %12110 = vst [vmem:[#allocation63_spill] sm:$0xff] %v10670_v12 }
 0xb24   :  { %v6583_v37 = vpop.f32.mrf.mxu1 }
 0xb25   :  { %v10673_v30 = vadd.f32 %v6583_v37, %v12111_v0  ;;  %v4299_v37 = vld [vmem:[#allocation2 + $0x19a] sm:$0xff]  ;;  %v4300_v0 = vld [vmem:[#allocation2 + $0x1a2] sm:$0xff] }
 0xb26   :  { %v4476_v32 = vpack.c.bf16 %v4300_v0, %v4299_v37  ;;  %v4303_v37 = vld [vmem:[#allocation2 + $0x1fa] sm:$0xff] }
 0xb27   :  { %12112 = vst [vmem:[#allocation64_spill] sm:$0xff] %v10673_v30  ;;  %6622 = vmatmul.bf16.gmra.mxu1 %v4458_v50 }
 0xb2c   :  { %v6585_v41 = vpop.f32.mrf.mxu1 }
 0xb2d   :  { %v10676_v23 = vadd.f32 %v6585_v41, %v12113_v35 }
 0xb2f   :  { %12114 = vst [vmem:[#allocation70_spill] sm:$0xff] %v10676_v23 }
 0xb34   :  { %v6588_v29 = vpop.f32.mrf.mxu1 }
 0xb35   :  { %v10679_v4 = vadd.f32 %v6588_v29, %v12115_v27  ;;  %v4301_v29 = vld [vmem:[#allocation2 + $0x1e2] sm:$0xff]  ;;  %v4302_v27 = vld [vmem:[#allocation2 + $0x1ea] sm:$0xff] }
 0xb37   :  { %12116 = vst [vmem:[#allocation82_spill] sm:$0xff] %v10679_v4  ;;  %6627 = vmatmul.bf16.gmra.mxu1 %v4467_v60 }
 0xb3c   :  { %v6590_v24 = vpop.f32.mrf.mxu1 }
 0xb3d   :  { %v10682_v18 = vadd.f32 %v6590_v24, %v10488_v49  ;;  %v4485_v49 = vpack.c.bf16 %v4302_v27, %v4301_v29 }
 0xb3f   :  { %12117 = vst [vmem:[#allocation81_spill] sm:$0xff] %v10682_v18 }
 0xb44   :  { %v6593_v25 = vpop.f32.mrf.mxu1 }
 0xb45   :  { %v10685_v50 = vadd.f32 %v6593_v25, %v10491_v43  ;;  %v4304_v43 = vld [vmem:[#allocation2 + $0x202] sm:$0xff] }
 0xb47   :  { %12118 = vst [vmem:[#allocation69_spill] sm:$0xff] %v10685_v50  ;;  %6632 = vmatmul.bf16.gmra.mxu1 %v4476_v32 }
 0xb4c   :  { %v6595_v35 = vpop.f32.mrf.mxu1 }
 0xb4d   :  { %v10688_v41 = vadd.f32 %v6595_v35, %v10494_v1  ;;  %v4494_v1 = vpack.c.bf16 %v4304_v43, %v4303_v37 }
 0xb4f   :  { %12119 = vst [vmem:[#allocation106_spill] sm:$0xff] %v10688_v41 }
 0xb54   :  { %v6598_v47 = vpop.f32.mrf.mxu1 }
 0xb55   :  { %v10691_v33 = vadd.f32 %v6598_v47, %v10497_v57  ;;  %v4305_v57 = vld [vmem:[#allocation2 + $0x212] sm:$0xff]  ;;  %v4306_v47 = vld [vmem:[#allocation2 + $0x21a] sm:$0xff] }
 0xb57   :  { %12120 = vst [vmem:[#allocation84_spill] sm:$0xff] %v10691_v33  ;;  %6637 = vmatmul.bf16.gmra.mxu1 %v4485_v49 }
 0xb5c   :  { %v6600_v60 = vpop.f32.mrf.mxu1 }
 0xb5d   :  { %v10694_v24 = vadd.f32 %v6600_v60, %v10500_v56  ;;  %v4503_v56 = vpack.c.bf16 %v4306_v47, %v4305_v57 }
 0xb5f   :  { %12121 = vst [vmem:[#allocation83_spill] sm:$0xff] %v10694_v24 }
 0xb64   :  { %v6603_v0 = vpop.f32.mrf.mxu1 }
 0xb65   :  { %v10697_v32 = vadd.f32 %v6603_v0, %v10503_v38  ;;  %v4307_v38 = vld [vmem:[#allocation2 + $0x22a] sm:$0xff]  ;;  %v4308_v0 = vld [vmem:[#allocation2 + $0x232] sm:$0xff] }
 0xb67   :  { %12122 = vst [vmem:[#allocation86_spill] sm:$0xff] %v10697_v32  ;;  %6642 = vmatmul.bf16.gmra.mxu1 %v4494_v1 }
 0xb6c   :  { %v6605_v25 = vpop.f32.mrf.mxu1 }
 0xb6d   :  { %v10700_v35 = vadd.f32 %v6605_v25, %v10506_v58  ;;  %v4512_v58 = vpack.c.bf16 %v4308_v0, %v4307_v38 }
 0xb6f   :  { %12123 = vst [vmem:[#allocation85_spill] sm:$0xff] %v10700_v35 }
 0xb74   :  { %v6608_v29 = vpop.f32.mrf.mxu1 }
 0xb75   :  { %v10703_v27 = vadd.f32 %v6608_v29, %v10509_v3  ;;  %v4309_v3 = vld [vmem:[#allocation2 + $0x242] sm:$0xff]  ;;  %v4310_v29 = vld [vmem:[#allocation2 + $0x24a] sm:$0xff] }
 0xb77   :  { %12124 = vst [vmem:[#allocation140_spill] sm:$0xff] %v10703_v27  ;;  %6647 = vmatmul.bf16.gmra.mxu1 %v4503_v56 }
 0xb7c   :  { %v6610_v49 = vpop.f32.mrf.mxu1 }
 0xb7d   :  { %v10706_v60 = vadd.f32 %v6610_v49, %v10512_v48  ;;  %v4521_v48 = vpack.c.bf16 %v4310_v29, %v4309_v3 }
 0xb7f   :  { %12125 = vst [vmem:[#allocation88_spill] sm:$0xff] %v10706_v60 }
 0xb84   :  { %v6613_v37 = vpop.f32.mrf.mxu1 }
 0xb85   :  { %v10709_v43 = vadd.f32 %v6613_v37, %v10515_v36  ;;  %v4311_v36 = vld [vmem:[#allocation2 + $0x25a] sm:$0xff]  ;;  %v4312_v37 = vld [vmem:[#allocation2 + $0x262] sm:$0xff] }
 0xb87   :  { %12126 = vst [vmem:[#allocation92_spill] sm:$0xff] %v10709_v43  ;;  %6652 = vmatmul.bf16.gmra.mxu1 %v4512_v58 }
 0xb8c   :  { %v6615_v1 = vpop.f32.mrf.mxu1 }
 0xb8d   :  { %v10712_v25 = vadd.f32 %v6615_v1, %v10518_v55  ;;  %v4530_v55 = vpack.c.bf16 %v4312_v37, %v4311_v36 }
 0xb94   :  { %v6618_v57 = vpop.f32.mrf.mxu1 }
 0xb95   :  { %v10715_v47 = vadd.f32 %v6618_v57, %v10521_v63  ;;  %v4313_v63 = vld [vmem:[#allocation2 + $0x272] sm:$0xff]  ;;  %v4314_v57 = vld [vmem:[#allocation2 + $0x27a] sm:$0xff] }
 0xb97   :  { %6657 = vmatmul.bf16.gmra.mxu1 %v4521_v48 }
 0xb9c   :  { %v6620_v56 = vpop.f32.mrf.mxu1 }
 0xb9d   :  { %v10718_v49 = vadd.f32 %v6620_v56, %v10524_v14  ;;  %v4539_v14 = vpack.c.bf16 %v4314_v57, %v4313_v63 }
 0xba4   :  { %v6623_v38 = vpop.f32.mrf.mxu1 }
 0xba5   :  { %v10721_v0 = vadd.f32 %v6623_v38, %v10527_v22  ;;  %v4315_v22 = vld [vmem:[#allocation2 + $0x28a] sm:$0xff]  ;;  %v4316_v38 = vld [vmem:[#allocation2 + $0x292] sm:$0xff] }
 0xba7   :  { %6662 = vmatmul.bf16.gmra.mxu1 %v4530_v55 }
 0xbac   :  { %v6625_v58 = vpop.f32.mrf.mxu1 }
 0xbad   :  { %v10724_v1 = vadd.f32 %v6625_v58, %v10530_v16  ;;  %v4548_v16 = vpack.c.bf16 %v4316_v38, %v4315_v22 }
 0xbb4   :  { %v6628_v3 = vpop.f32.mrf.mxu1 }
 0xbb5   :  { %v10727_v29 = vadd.f32 %v6628_v3, %v10533_v7  ;;  %v4317_v7 = vld [vmem:[#allocation2 + $0x2a2] sm:$0xff]  ;;  %v4318_v3 = vld [vmem:[#allocation2 + $0x2aa] sm:$0xff] }
 0xbb7   :  { %6667 = vmatmul.bf16.gmra.mxu1 %v4539_v14 }
 0xbbc   :  { %v6630_v48 = vpop.f32.mrf.mxu1 }
 0xbbd   :  { %v10730_v56 = vadd.f32 %v6630_v48, %v10536_v11  ;;  %v4557_v11 = vpack.c.bf16 %v4318_v3, %v4317_v7  ;;  %v12129_v3 = vld [vmem:[#allocation116_spill] sm:$0xff] }
 0xbc4   :  { %v6633_v36 = vpop.f32.mrf.mxu1 }
 0xbc5   :  { %v10733_v37 = vadd.f32 %v6633_v36, %v10539_v8  ;;  %v4319_v8 = vld [vmem:[#allocation2 + $0x2ba] sm:$0xff]  ;;  %v4320_v36 = vld [vmem:[#allocation2 + $0x2c2] sm:$0xff] }
 0xbc7   :  { %6672 = vmatmul.bf16.gmra.mxu1 %v4548_v16 }
 0xbcc   :  { %v6635_v55 = vpop.f32.mrf.mxu1 }
 0xbcd   :  { %v10736_v58 = vadd.f32 %v6635_v55, %v10542_v31  ;;  %v4566_v31 = vpack.c.bf16 %v4320_v36, %v4319_v8  ;;  %v12133_v36 = vld [vmem:[#allocation108_spill] sm:$0xff] }
 0xbd4   :  { %v6638_v63 = vpop.f32.mrf.mxu1 }
 0xbd5   :  { %v10739_v57 = vadd.f32 %v6638_v63, %v10545_v62  ;;  %v4321_v62 = vld [vmem:[#allocation2 + $0x2d2] sm:$0xff]  ;;  %v4322_v63 = vld [vmem:[#allocation2 + $0x2da] sm:$0xff] }
 0xbd7   :  { %6677 = vmatmul.bf16.gmra.mxu1 %v4557_v11 }
 0xbdc   :  { %v6640_v14 = vpop.f32.mrf.mxu1 }
 0xbdd   :  { %v10742_v48 = vadd.f32 %v6640_v14, %v10548_v45  ;;  %v4575_v45 = vpack.c.bf16 %v4322_v63, %v4321_v62  ;;  %v12137_v63 = vld [vmem:[#allocation141_spill] sm:$0xff] }
 0xbe4   :  { %v6643_v22 = vpop.f32.mrf.mxu1 }
 0xbe5   :  { %v10745_v38 = vadd.f32 %v6643_v22, %v10551_v15  ;;  %v4323_v15 = vld [vmem:[#allocation2 + $0x2ea] sm:$0xff]  ;;  %v4324_v22 = vld [vmem:[#allocation2 + $0x2f2] sm:$0xff] }
 0xbe7   :  { %12127 = vst [vmem:[#allocation109_spill] sm:$0xff] %v10745_v38  ;;  %6682 = vmatmul.bf16.gmra.mxu1 %v4566_v31 }
 0xbec   :  { %v6645_v16 = vpop.f32.mrf.mxu1 }
 0xbed   :  { %v10748_v55 = vadd.f32 %v6645_v16, %v10554_v42  ;;  %v4584_v42 = vpack.c.bf16 %v4324_v22, %v4323_v15 }
 0xbef   :  { %12128 = vst [vmem:[#allocation87_spill] sm:$0xff] %v10748_v55 }
 0xbf4   :  { %v6648_v7 = vpop.f32.mrf.mxu1 }
 0xbf5   :  { %v10751_v11 = vadd.f32 %v6648_v7, %v12129_v3  ;;  %v4325_v7 = vld [vmem:[#allocation2 + $0x302] sm:$0xff]  ;;  %v4326_v3 = vld [vmem:[#allocation2 + $0x30a] sm:$0xff] }
 0xbf7   :  { %12130 = vst [vmem:[#allocation142_spill] sm:$0xff] %v10751_v11  ;;  %6687 = vmatmul.bf16.gmra.mxu1 %v4575_v45 }
 0xbfc   :  { %v6650_v14 = vpop.f32.mrf.mxu1 }
 0xbfd   :  { %v10754_v51 = vadd.f32 %v6650_v14, %v12131_v52  ;;  %v4593_v52 = vpack.c.bf16 %v4326_v3, %v4325_v7  ;;  %v12144_v3 = vld [vmem:[#allocation117_spill] sm:$0xff] }
 0xbff   :  { %12132 = vst [vmem:[#allocation91_spill] sm:$0xff] %v10754_v51 }
 0xc04   :  { %v6653_v8 = vpop.f32.mrf.mxu1 }
 0xc05   :  { %v10757_v31 = vadd.f32 %v6653_v8, %v12133_v36  ;;  %v4327_v8 = vld [vmem:[#allocation2 + $0x31a] sm:$0xff]  ;;  %v4328_v36 = vld [vmem:[#allocation2 + $0x322] sm:$0xff] }
 0xc07   :  { %12134 = vst [vmem:[#allocation90_spill] sm:$0xff] %v10757_v31  ;;  %6692 = vmatmul.bf16.gmra.mxu1 %v4584_v42 }
 0xc0c   :  { %v6655_v16 = vpop.f32.mrf.mxu1 }
 0xc0d   :  { %v10760_v34 = vadd.f32 %v6655_v16, %v12135_v28  ;;  %v4602_v28 = vpack.c.bf16 %v4328_v36, %v4327_v8  ;;  %v12147_v8 = vld [vmem:[#allocation120_spill] sm:$0xff] }
 0xc0f   :  { %12136 = vst [vmem:[#allocation144_spill] sm:$0xff] %v10760_v34 }
 0xc14   :  { %v6658_v62 = vpop.f32.mrf.mxu1 }
 0xc15   :  { %v10763_v45 = vadd.f32 %v6658_v62, %v12137_v63  ;;  %v12142_v63 = vld [vmem:[#allocation118_spill] sm:$0xff] }
 0xc17   :  { %12138 = vst [vmem:[#allocation143_spill] sm:$0xff] %v10763_v45  ;;  %6697 = vmatmul.bf16.gmra.mxu1 %v4593_v52  ;;  %v12145_v52 = vld [vmem:[#allocation119_spill] sm:$0xff] }
 0xc1c   :  { %v6660_v14 = vpop.f32.mrf.mxu1 }
 0xc1d   :  { %v10766_v6 = vadd.f32 %v6660_v14, %v10572_v40 }
 0xc1f   :  { %12139 = vst [vmem:[#allocation145_spill] sm:$0xff] %v10766_v6  ;;  %v4332_v6 = vld [vmem:[#allocation2 + $0x352] sm:$0xff] }
 0xc24   :  { %v6663_v15 = vpop.f32.mrf.mxu1 }
 0xc25   :  { %v10769_v22 = vadd.f32 %v6663_v15, %v10575_v61  ;;  %v4620_v61 = vpack.c.bf16 %v4332_v6, %v4331_v26  ;;  %v6789_v26 = vmul.f32 %v10649_v13, %v10649_v13 }
 0xc27   :  { %12140 = vst [vmem:[#allocation93_spill] sm:$0xff] %v10769_v22  ;;  %6702 = vmatmul.bf16.gmra.mxu1 %v4602_v28  ;;  %v12149_v28 = vld [vmem:[#allocation121_spill] sm:$0xff] }
 0xc2c   :  { %v6665_v42 = vpop.f32.mrf.mxu1 }
 0xc2d   :  { %v10772_v16 = vadd.f32 %v6665_v42, %v10580_v17 }
 0xc2f   :  { %12141 = vst [vmem:[#allocation94_spill] sm:$0xff] %v10772_v16 }
 0xc34   :  { %v6668_v62 = vpop.f32.mrf.mxu1 }
 0xc35   :  { %v10775_v7 = vadd.f32 %v6668_v62, %v12142_v63  ;;  %v6788_v62 = vmul.f32 %v10646_v59, %v10646_v59  ;;  %v6787_v63 = vmul.f32 %v10643_v9, %v10643_v9 }
 0xc37   :  { %12143 = vst [vmem:[#allocation95_spill] sm:$0xff] %v10775_v7  ;;  %6707 = vmatmul.bf16.gmra.mxu1 %v12144_v3  ;;  %v6718_v3 = vadd.f32 %v10646_v59, %v10643_v9 }
 0xc3c   :  { %v6670_v40 = vpop.f32.mrf.mxu1 }
 0xc3d   :  { %v10779_v14 = vadd.f32 %v6670_v40, %v12145_v52  ;;  %v6851_v40 = vadd.f32 %v6788_v62, %v6787_v63  ;;  %v6719_v52 = vadd.f32 %v6718_v3, %v10649_v13  ;;  %v6792_v62 = vmul.f32 %v10658_v20, %v10658_v20 }
 0xc3e   :  { %v6793_v13 = vmul.f32 %v10661_v5, %v10661_v5 }
 0xc3f   :  { %12146 = vst [vmem:[#allocation96_spill] sm:$0xff] %v10779_v14 }
 0xc44   :  { %v6673_v15 = vpop.f32.mrf.mxu1 }
 0xc45   :  { %v10782_v36 = vadd.f32 %v6673_v15, %v12147_v8  ;;  %v6852_v8 = vadd.f32 %v6851_v40, %v6789_v26  ;;  %v6794_v40 = vmul.f32 %v10664_v53, %v10664_v53 }
 0xc47   :  { %12148 = vst [vmem:[#allocation97_spill] sm:$0xff] %v10782_v36  ;;  %6712 = vmatmul.bf16.gmra.mxu1 %v4620_v61  ;;  %v6790_v61 = vmul.f32 %v10652_v2, %v10652_v2 }
 0xc49   :  { %v6853_v59 = vadd.f32 %v6852_v8, %v6790_v61 }
 0xc4c   :  { %v6675_v17 = vpop.f32.mrf.mxu1 }
 0xc4d   :  { %v10785_v42 = vadd.f32 %v6675_v17, %v12149_v28  ;;  %v6720_v17 = vadd.f32 %v6719_v52, %v10652_v2  ;;  %v6791_v28 = vmul.f32 %v10655_v44, %v10655_v44  ;;  %v6824_v2 = vmul.f32 %v10754_v51, %v10754_v51 }
 0xc4f   :  { %12150 = vst [vmem:[#allocation98_spill] sm:$0xff] %v10785_v42  ;;  %v6721_v9 = vadd.f32 %v6720_v17, %v10655_v44  ;;  %v6854_v63 = vadd.f32 %v6853_v59, %v6791_v28  ;;  %v6795_v59 = vmul.f32 %v10667_v39, %v10667_v39 }
 0xc51   :  { %v6722_v3 = vadd.f32 %v6721_v9, %v10658_v20  ;;  %v10819_v9 = vpop.f32.mrf.mxu2 }
 0xc53   :  { %v6723_v26 = vadd.f32 %v6722_v3, %v10661_v5 }
 0xc54   :  { %v6678_v6 = vpop.f32.mrf.mxu1 }
 0xc55   :  { %v10799_v15 = vadd.f32 %v6678_v6, %v10597_v21  ;;  %v6855_v6 = vadd.f32 %v6854_v63, %v6792_v62  ;;  %v6724_v8 = vadd.f32 %v6723_v26, %v10664_v53  ;;  %v6796_v62 = vmul.f32 %v10670_v12, %v10670_v12  ;;  %v10824_v63 = vpop.f32.mrf.mxu3 }
 0xc57   :  { %v6856_v61 = vadd.f32 %v6855_v6, %v6793_v13  ;;  %v6725_v28 = vadd.f32 %v6724_v8, %v10667_v39  ;;  %v6797_v13 = vmul.f32 %v10673_v30, %v10673_v30  ;;  %v6820_v39 = vmul.f32 %v10742_v48, %v10742_v48 }
 0xc59   :  { %v6857_v17 = vadd.f32 %v6856_v61, %v6794_v40  ;;  %v6798_v40 = vmul.f32 %v10676_v23, %v10676_v23 }
 0xc5b   :  { %v6858_v3 = vadd.f32 %v6857_v17, %v6795_v59  ;;  %v6799_v17 = vmul.f32 %v10679_v4, %v10679_v4 }
 0xc5c   :  { %v6680_v21 = vpop.f32.mrf.mxu1 }
 0xc5d   :  { %v10814_v52 = vadd.f32 %v6680_v21, %v10600_v10  ;;  %v6726_v10 = vadd.f32 %v6725_v28, %v10670_v12  ;;  %v10829_v21 = vpop.f32.mrf.mxu0  ;;  %v6859_v26 = vadd.f32 %v6858_v3, %v6796_v62  ;;  %v6800_v62 = vmul.f32 %v10682_v18, %v10682_v18  ;;  %v10843_v3 = vpop.f32.mrf.mxu2 }
 0xc5f   :  { %v6727_v53 = vadd.f32 %v6726_v10, %v10673_v30  ;;  %v6860_v8 = vadd.f32 %v6859_v26, %v6797_v13  ;;  %v10848_v13 = vpop.f32.mrf.mxu3 }
 0xc61   :  { %v6728_v59 = vadd.f32 %v6727_v53, %v10676_v23  ;;  %v6861_v28 = vadd.f32 %v6860_v8, %v6798_v40  ;;  %v6802_v40 = vmul.f32 %v10688_v41, %v10688_v41 }
 0xc63   :  { %v6729_v12 = vadd.f32 %v6728_v59, %v10679_v4  ;;  %v6862_v10 = vadd.f32 %v6861_v28, %v6799_v17  ;;  %v6803_v28 = vmul.f32 %v10691_v33, %v10691_v33 }
 0xc64   :  { %v6683_v6 = vpop.f32.mrf.mxu1 }
 0xc65   :  { %v10835_v61 = vadd.f32 %v6683_v6, %v10603_v46  ;;  %v6730_v30 = vadd.f32 %v6729_v12, %v10682_v18  ;;  %v6801_v46 = vmul.f32 %v10685_v50, %v10685_v50  ;;  %v6863_v6 = vadd.f32 %v6862_v10, %v6800_v62  ;;  %v10856_v59 = vpop.f32.mrf.mxu0 }
 0xc67   :  { %v6731_v26 = vadd.f32 %v6730_v30, %v10685_v50  ;;  %v6864_v17 = vadd.f32 %v6863_v6, %v6801_v46  ;;  %v6804_v30 = vmul.f32 %v10694_v24, %v10694_v24  ;;  %v10867_v50 = vpop.f32.mrf.mxu2 }
 0xc69   :  { %v6732_v12 = vadd.f32 %v6731_v26, %v10688_v41  ;;  %v6865_v18 = vadd.f32 %v6864_v17, %v6802_v40  ;;  %v6806_v26 = vmul.f32 %v10700_v35, %v10700_v35  ;;  %v10875_v17 = vpop.f32.mrf.mxu3 }
 0xc6b   :  { %v6733_v4 = vadd.f32 %v6732_v12, %v10691_v33  ;;  %v6866_v62 = vadd.f32 %v6865_v18, %v6803_v28  ;;  %v6807_v12 = vmul.f32 %v10703_v27, %v10703_v27  ;;  %v6816_v33 = vmul.f32 %v10730_v56, %v10730_v56 }
 0xc6c   :  { %v6685_v53 = vpop.f32.mrf.mxu1 }
 0xc6d   :  { %v10854_v8 = vadd.f32 %v6685_v53, %v10608_v54  ;;  %v6734_v10 = vadd.f32 %v6733_v4, %v10694_v24  ;;  %v6805_v54 = vmul.f32 %v10697_v32, %v10697_v32  ;;  %v6867_v46 = vadd.f32 %v6866_v62, %v6804_v30  ;;  %v10880_v28 = vpop.f32.mrf.mxu0 }
 0xc6e   :  { %v6808_v62 = vmul.f32 %v10706_v60, %v10706_v60 }
 0xc6f   :  { %v6735_v6 = vadd.f32 %v6734_v10, %v10697_v32  ;;  %v6868_v18 = vadd.f32 %v6867_v46, %v6805_v54  ;;  %v6815_v32 = vmul.f32 %v10727_v29, %v10727_v29 }
 0xc71   :  { %v6736_v4 = vadd.f32 %v6735_v6, %v10700_v35  ;;  %v6869_v24 = vadd.f32 %v6868_v18, %v6806_v26  ;;  %v6810_v35 = vmul.f32 %v10712_v25, %v10712_v25  ;;  %v10893_v26 = vpop.f32.mrf.mxu2 }
 0xc73   :  { %v6737_v30 = vadd.f32 %v6736_v4, %v10703_v27  ;;  %v6870_v10 = vadd.f32 %v6869_v24, %v6807_v12  ;;  %v6811_v24 = vmul.f32 %v10715_v47, %v10715_v47  ;;  %v10898_v12 = vpop.f32.mrf.mxu3 }
 0xc74   :  { %v6688_v53 = vpop.f32.mrf.mxu1 }
 0xc75   :  { %v10873_v40 = vadd.f32 %v6688_v53, %v10613_v19  ;;  %v6738_v19 = vadd.f32 %v6737_v30, %v10706_v60  ;;  %v6809_v53 = vmul.f32 %v10709_v43, %v10709_v43  ;;  %v6871_v46 = vadd.f32 %v6870_v10, %v6808_v62  ;;  %v10903_v10 = vpop.f32.mrf.mxu0 }
 0xc76   :  { %v6812_v62 = vmul.f32 %v10718_v49, %v10718_v49 }
 0xc77   :  { %v6739_v6 = vadd.f32 %v6738_v19, %v10709_v43  ;;  %v6872_v18 = vadd.f32 %v6871_v46, %v6809_v53  ;;  %v6813_v53 = vmul.f32 %v10721_v0, %v10721_v0 }
 0xc79   :  { %v6740_v4 = vadd.f32 %v6739_v6, %v10712_v25  ;;  %v6873_v30 = vadd.f32 %v6872_v18, %v6810_v35  ;;  %v6814_v35 = vmul.f32 %v10724_v1, %v10724_v1 }
 0xc7b   :  { %v6741_v60 = vadd.f32 %v6740_v4, %v10715_v47  ;;  %v6874_v19 = vadd.f32 %v6873_v30, %v6811_v24  ;;  %v10916_v24 = vpop.f32.mrf.mxu2 }
 0xc7c   :  { %v10888_v54 = vpop.f32.mrf.mxu1 }
 0xc7d   :  { %v6742_v43 = vadd.f32 %v6741_v60, %v10718_v49  ;;  %v6875_v6 = vadd.f32 %v6874_v19, %v6812_v62  ;;  %v10921_v62 = vpop.f32.mrf.mxu3 }
 0xc7f   :  { %v6743_v27 = vadd.f32 %v6742_v43, %v10721_v0  ;;  %v6876_v18 = vadd.f32 %v6875_v6, %v6813_v53  ;;  %v6817_v53 = vmul.f32 %v10733_v37, %v10733_v37 }
 0xc81   :  { %v6744_v4 = vadd.f32 %v6743_v27, %v10724_v1  ;;  %v6877_v60 = vadd.f32 %v6876_v18, %v6814_v35  ;;  %v10926_v27 = vpop.f32.mrf.mxu0  ;;  %v6818_v18 = vmul.f32 %v10736_v58, %v10736_v58 }
 0xc83   :  { %v6745_v30 = vadd.f32 %v6744_v4, %v10727_v29  ;;  %v6878_v43 = vadd.f32 %v6877_v60, %v6815_v32  ;;  %v6819_v32 = vmul.f32 %v10739_v57, %v10739_v57  ;;  %v10939_v5 = vpop.f32.mrf.mxu2 }
 0xc84   :  { %v10908_v46 = vpop.f32.mrf.mxu1 }
 0xc85   :  { %v6746_v19 = vadd.f32 %v6745_v30, %v10730_v56  ;;  %v6879_v41 = vadd.f32 %v6878_v43, %v6816_v33 }
 0xc87   :  { %v6747_v35 = vadd.f32 %v6746_v19, %v10733_v37  ;;  %v6880_v4 = vadd.f32 %v6879_v41, %v6817_v53  ;;  %v6821_v19 = vmul.f32 %v10745_v38, %v10745_v38  ;;  %v10944_v41 = vpop.f32.mrf.mxu3 }
 0xc89   :  { %v6748_v23 = vadd.f32 %v6747_v35, %v10736_v58  ;;  %v6881_v60 = vadd.f32 %v6880_v4, %v6818_v18  ;;  %v10951_v4 = vpop.f32.mrf.mxu0 }
 0xc8b   :  { %v6749_v30 = vadd.f32 %v6748_v23, %v10739_v57  ;;  %v6882_v33 = vadd.f32 %v6881_v60, %v6819_v32  ;;  %v6822_v23 = vmul.f32 %v10748_v55, %v10748_v55  ;;  %v6823_v60 = vmul.f32 %v10751_v11, %v10751_v11 }
 0xc8c   :  { %v10928_v6 = vpop.f32.mrf.mxu1 }
 0xc8d   :  { %v6750_v43 = vadd.f32 %v6749_v30, %v10742_v48  ;;  %v6883_v35 = vadd.f32 %v6882_v33, %v6820_v39 }
 0xc8f   :  { %v6751_v18 = vadd.f32 %v6750_v43, %v10745_v38  ;;  %v6884_v20 = vadd.f32 %v6883_v35, %v6821_v19  ;;  %v6825_v43 = vmul.f32 %v10757_v31, %v10757_v31  ;;  %v10964_v19 = vpop.f32.mrf.mxu2 }
 0xc91   :  { %v6752_v32 = vadd.f32 %v6751_v18, %v10748_v55  ;;  %v6885_v30 = vadd.f32 %v6884_v20, %v6822_v23  ;;  %v6826_v20 = vmul.f32 %v10760_v34, %v10760_v34  ;;  %v10969_v23 = vpop.f32.mrf.mxu3  ;;  %v12151_v55 = vld [vmem:[#allocation145_spill] sm:$0xff] }
 0xc93   :  { %v6753_v44 = vadd.f32 %v6752_v32, %v10751_v11  ;;  %v6886_v39 = vadd.f32 %v6885_v30, %v6823_v60  ;;  %v10974_v30 = vpop.f32.mrf.mxu0 }
 0xc94   :  { %v10946_v53 = vpop.f32.mrf.mxu1 }
 0xc95   :  { %v6754_v33 = vadd.f32 %v6753_v44, %v10754_v51  ;;  %v6887_v35 = vadd.f32 %v6886_v39, %v6824_v2  ;;  %v6827_v44 = vmul.f32 %v10763_v45, %v10763_v45  ;;  %v6828_v2 = vmul.f32 %v12151_v55, %v12151_v55 }
 0xc97   :  { %v6755_v18 = vadd.f32 %v6754_v33, %v10757_v31  ;;  %v6888_v32 = vadd.f32 %v6887_v35, %v6825_v43  ;;  %v6829_v31 = vmul.f32 %v10769_v22, %v10769_v22 }
 0xc99   :  { %v6756_v60 = vadd.f32 %v6755_v18, %v10760_v34  ;;  %v6889_v51 = vadd.f32 %v6888_v32, %v6826_v20  ;;  %v6830_v34 = vmul.f32 %v10772_v16, %v10772_v16  ;;  %v10987_v20 = vpop.f32.mrf.mxu2 }
 0xc9b   :  { %v6757_v11 = vadd.f32 %v6756_v60, %v10763_v45  ;;  %v6890_v39 = vadd.f32 %v6889_v51, %v6827_v44  ;;  %v6831_v51 = vmul.f32 %v10775_v7, %v10775_v7 }
 0xc9c   :  { %v10962_v38 = vpop.f32.mrf.mxu1 }
 0xc9d   :  { %v6758_v33 = vadd.f32 %v6757_v11, %v12151_v55  ;;  %v6891_v35 = vadd.f32 %v6890_v39, %v6828_v2  ;;  %v10992_v11 = vpop.f32.mrf.mxu3  ;;  %v6832_v2 = vmul.f32 %v10779_v14, %v10779_v14  ;;  %v10997_v39 = vpop.f32.mrf.mxu0 }
 0xc9f   :  { %v6759_v18 = vadd.f32 %v6758_v33, %v10769_v22  ;;  %v6892_v32 = vadd.f32 %v6891_v35, %v6829_v31  ;;  %v6833_v31 = vmul.f32 %v10782_v36, %v10782_v36 }
 0xca1   :  { %v6760_v60 = vadd.f32 %v6759_v18, %v10772_v16  ;;  %v6893_v44 = vadd.f32 %v6892_v32, %v6830_v34  ;;  %v6834_v34 = vmul.f32 %v10785_v42, %v10785_v42  ;;  %v12152_v32 = vld [vmem:[#allocation122_spill] sm:$0xff] }
 0xca3   :  { %v6761_v55 = vadd.f32 %v6760_v60, %v10775_v7  ;;  %v6894_v33 = vadd.f32 %v6893_v44, %v6831_v51  ;;  %v6184_v60 = vadd.f32 %v10819_v9, %v12152_v32  ;;  %v12153_v51 = vld [vmem:[#allocation123_spill] sm:$0xff] }
 0xca4   :  { %v10982_v43 = vpop.f32.mrf.mxu1  ;;  %v6187_v44 = vadd.f32 %v10843_v3, %v12153_v51 }
 0xca5   :  { %v6762_v22 = vadd.f32 %v6761_v55, %v10779_v14  ;;  %v6895_v18 = vadd.f32 %v6894_v33, %v6832_v2  ;;  %v6835_v55 = vmul.f32 %v10799_v15, %v10799_v15  ;;  %v6353_v14 = vadd.f32 %v10824_v63, %v6184_v60  ;;  %v6203_v2 = vpop.f32.mrf.mxu2 }
 0xca6   :  { %v6356_v9 = vadd.f32 %v10848_v13, %v6187_v44  ;;  %v6837_v63 = vmul.f32 %v10835_v61, %v10835_v61  ;;  %v6541_v13 = vpop.f32.mrf.mxu0 }
 0xca7   :  { %v6763_v16 = vadd.f32 %v6762_v22, %v10782_v36  ;;  %v6896_v7 = vadd.f32 %v6895_v18, %v6833_v31  ;;  %v6836_v36 = vmul.f32 %v10814_v52, %v10814_v52  ;;  %v12154_v31 = vld [vmem:[#allocation124_spill] sm:$0xff]  ;;  %v6372_v18 = vpop.f32.mrf.mxu3  ;;  %v6522_v32 = vadd.f32 %v10829_v21, %v6353_v14 }
 0xca8   :  { %v6838_v14 = vmul.f32 %v10854_v8, %v10854_v8 }
 0xca9   :  { %v6764_v45 = vadd.f32 %v6763_v16, %v10785_v42  ;;  %v6897_v33 = vadd.f32 %v6896_v7, %v6834_v34  ;;  %v6189_v16 = vadd.f32 %v10867_v50, %v12154_v31  ;;  %v12155_v34 = vld [vmem:[#allocation125_spill] sm:$0xff]  ;;  %v11033_v21 = vadd.f32 %v10888_v54, %v6522_v32  ;;  %v12157_v31 = vld [vmem:[#allocation127_spill] sm:$0xff] }
 0xcaa   :  { %v6192_v60 = vadd.f32 %v10893_v26, %v12155_v34 }
 0xcab   :  { %v6765_v22 = vadd.f32 %v6764_v45, %v10799_v15  ;;  %v6898_v42 = vadd.f32 %v6897_v33, %v6835_v55  ;;  %v6358_v7 = vadd.f32 %v10875_v17, %v6189_v16  ;;  %v6525_v45 = vadd.f32 %v10856_v59, %v6356_v9  ;;  %v12156_v33 = vld [vmem:[#allocation126_spill] sm:$0xff] }
 0xcac   :  { %v11002_v35 = vpop.f32.mrf.mxu1  ;;  %v6361_v55 = vadd.f32 %v10898_v12, %v6192_v60  ;;  %v6194_v59 = vadd.f32 %v10916_v24, %v12156_v33  ;;  %v6197_v12 = vadd.f32 %v10939_v5, %v12157_v31  ;;  %v6840_v24 = vmul.f32 %v11033_v21, %v11033_v21  ;;  %v12160_v33 = vld [vmem:[#allocation130_spill] sm:$0xff] }
 0xcad   :  { %v6766_v3 = vadd.f32 %v6765_v22, %v10814_v52  ;;  %v6899_v44 = vadd.f32 %v6898_v42, %v6836_v36  ;;  %v6527_v17 = vadd.f32 %v10880_v28, %v6358_v7  ;;  %v6839_v36 = vmul.f32 %v10873_v40, %v10873_v40 }
 0xcae   :  { %v11043_v42 = vadd.f32 %v10908_v46, %v6525_v45  ;;  %v6363_v9 = vadd.f32 %v10921_v62, %v6194_v59  ;;  %v6530_v54 = vadd.f32 %v10903_v10, %v6361_v55  ;;  %v6206_v10 = vpop.f32.mrf.mxu2  ;;  %v6544_v59 = vpop.f32.mrf.mxu0 }
 0xcaf   :  { %v6767_v50 = vadd.f32 %v6766_v3, %v10835_v61  ;;  %v6900_v22 = vadd.f32 %v6899_v44, %v6837_v63  ;;  %v11053_v32 = vadd.f32 %v10928_v6, %v6527_v17  ;;  %v6366_v3 = vadd.f32 %v10944_v41, %v6197_v12  ;;  %v12158_v63 = vld [vmem:[#allocation128_spill] sm:$0xff]  ;;  %v12159_v41 = vld [vmem:[#allocation129_spill] sm:$0xff]  ;;  %v6375_v44 = vpop.f32.mrf.mxu3 }
 0xcb0   :  { %v6532_v46 = vadd.f32 %v10926_v27, %v6363_v9  ;;  %v6199_v62 = vadd.f32 %v10964_v19, %v12158_v63  ;;  %v6841_v45 = vmul.f32 %v11043_v42, %v11043_v42  ;;  %v11063_v34 = vadd.f32 %v10946_v53, %v6530_v54  ;;  %v12161_v54 = vld [vmem:[#allocation131_spill] sm:$0xff] }
 0xcb1   :  { %v6768_v26 = vadd.f32 %v6767_v50, %v10854_v8  ;;  %v6901_v28 = vadd.f32 %v6900_v22, %v6838_v14  ;;  %v6535_v60 = vadd.f32 %v10951_v4, %v6366_v3  ;;  %v6202_v27 = vadd.f32 %v10987_v20, %v12159_v41 }
 0xcb2   :  { %v6368_v6 = vadd.f32 %v10969_v23, %v6199_v62  ;;  %v6842_v55 = vmul.f32 %v11053_v32, %v11053_v32  ;;  %v11073_v17 = vadd.f32 %v10962_v38, %v6532_v46  ;;  %v6204_v4 = vadd.f32 %v6203_v2, %v12160_v33 }
 0xcb3   :  { %v6769_v16 = vadd.f32 %v6768_v26, %v10873_v40  ;;  %v6902_v7 = vadd.f32 %v6901_v28, %v6839_v36  ;;  %v6371_v53 = vadd.f32 %v10992_v11, %v6202_v27  ;;  %v6843_v26 = vmul.f32 %v11063_v34, %v11063_v34 }
 0xcb4   :  { %v6708_v51 = vpop.f32.mrf.mxu1  ;;  %v6537_v23 = vadd.f32 %v10974_v30, %v6368_v6  ;;  %v11082_v36 = vadd.f32 %v10982_v43, %v6535_v60  ;;  %v6373_v9 = vadd.f32 %v6372_v18, %v6204_v4  ;;  %v6207_v31 = vadd.f32 %v6206_v10, %v12161_v54 }
 0xcb5   :  { %v6770_v5 = vadd.f32 %v6769_v16, %v11033_v21  ;;  %v6903_v19 = vadd.f32 %v6902_v7, %v6840_v24  ;;  %v6540_v38 = vadd.f32 %v10997_v39, %v6371_v53  ;;  %v6844_v2 = vmul.f32 %v11073_v17, %v11073_v17 }
 0xcb6   :  { %v11090_v12 = vadd.f32 %v11002_v35, %v6537_v23  ;;  %v6376_v28 = vadd.f32 %v6375_v44, %v6207_v31  ;;  %v6542_v16 = vadd.f32 %v6541_v13, %v6373_v9  ;;  %v6845_v18 = vmul.f32 %v11082_v36, %v11082_v36  ;;  %v6208_v63 = vpop.f32.mrf.mxu2  ;;  %v12162_v13 = vld [vmem:[#allocation132_spill] sm:$0xff]  ;;  %v6546_v27 = vpop.f32.mrf.mxu0 }
 0xcb7   :  { %v6771_v14 = vadd.f32 %v6770_v5, %v11043_v42  ;;  %v6904_v22 = vadd.f32 %v6903_v19, %v6841_v45  ;;  %v11095_v39 = vadd.f32 %v6708_v51, %v6540_v38  ;;  %v6209_v5 = vadd.f32 %v6208_v63, %v12162_v13  ;;  %v6377_v45 = vpop.f32.mrf.mxu3 }
 0xcb8   :  { %v6545_v3 = vadd.f32 %v6544_v59, %v6376_v28  ;;  %v6846_v35 = vmul.f32 %v11090_v12, %v11090_v12 }
 0xcb9   :  { %v6772_v20 = vadd.f32 %v6771_v14, %v11053_v32  ;;  %v6905_v11 = vadd.f32 %v6904_v22, %v6842_v55  ;;  %v6847_v51 = vmul.f32 %v11095_v39, %v11095_v39  ;;  %v6378_v44 = vadd.f32 %v6377_v45, %v6209_v5 }
 0xcbb   :  { %v6773_v30 = vadd.f32 %v6772_v20, %v11063_v34  ;;  %v6906_v24 = vadd.f32 %v6905_v11, %v6843_v26  ;;  %v6547_v55 = vadd.f32 %v6546_v27, %v6378_v44  ;;  %v6924_v44 = vld [vmem:[%s11511_s5] sm:$0x1]  ;;  %s8149_s5 = smov [#allocation9]  }
 0xcbc   :  { %v6710_v50 = vpop.f32.mrf.mxu1 }
 0xcbd   :  { %v6774_v43 = vadd.f32 %v6773_v30, %v11073_v17  ;;  %v6907_v62 = vadd.f32 %v6906_v24, %v6844_v2  ;;  %v11100_v7 = vadd.f32 %v6710_v50, %v6542_v16 }
 0xcbf   :  { %v6775_v10 = vadd.f32 %v6774_v43, %v11082_v36  ;;  %v6908_v6 = vadd.f32 %v6907_v62, %v6845_v18  ;;  %v6848_v50 = vmul.f32 %v11100_v7, %v11100_v7 }
 0xcc1   :  { %v6776_v60 = vadd.f32 %v6775_v10, %v11090_v12  ;;  %v6909_v19 = vadd.f32 %v6908_v6, %v6846_v35 }
 0xcc3   :  { %v6777_v14 = vadd.f32 %v6776_v60, %v11095_v39  ;;  %v6910_v53 = vadd.f32 %v6909_v19, %v6847_v51 }
 0xcc4   :  { %v6713_v46 = vpop.f32.mrf.mxu1 }
 0xcc5   :  { %v11106_v41 = vadd.f32 %v6713_v46, %v6545_v3  ;;  %v6778_v23 = vadd.f32 %v6777_v14, %v11100_v7  ;;  %v6911_v59 = vadd.f32 %v6910_v53, %v6848_v50 }
 0xcc7   :  { %v6849_v33 = vmul.f32 %v11106_v41, %v11106_v41  ;;  %v6779_v22 = vadd.f32 %v6778_v23, %v11106_v41 }
 0xcc9   :  { %v6912_v26 = vadd.f32 %v6911_v59, %v6849_v33 }
 0xccc   :  { %v6715_v4 = vpop.f32.mrf.mxu1 }
 0xccd   :  { %v6716_v20 = vadd.f32 %v6715_v4, %v6547_v55  ;;  %v6937_v55 = vld [vmem:[%s11512_s6] sm:$0x1]  ;;  %s7270_s6 = sshll.u32 %s8149_s5, 4  ;;  %s7271_s6 = int_to_ptr.vmem [resolvable:$true] %s7270_s6 }
 0xccf   :  { %v6780_v9 = vadd.f32 %v6779_v22, %v6716_v20  ;;  %v6850_v38 = vmul.f32 %v6716_v20, %v6716_v20 }
 0xcd1   :  { %v6781_v54 = vrot.slane %v6780_v9, 4  ;;  %v6913_v31 = vadd.f32 %v6912_v26, %v6850_v38  ;;  %v12163_v26 = vld [vmem:[#allocation107_spill] sm:$0xff] }
 0xcd3   :  { %v6782_v11 = vadd.f32 %v6781_v54, %v6780_v9  ;;  %v6914_v30 = vrot.slane %v6913_v31, 4 }
 0xcd5   :  { %v6783_v2 = vrot.slane %v6782_v11, 2  ;;  %v6915_v28 = vadd.f32 %v6914_v30, %v6913_v31 }
 0xcd7   :  { %v6784_v16 = vadd.f32 %v6783_v2, %v6782_v11  ;;  %v6916_v24 = vrot.slane %v6915_v28, 2 }
 0xcd9   :  { %v6785_v43 = vrot.slane %v6784_v16, 1  ;;  %v6917_v18 = vadd.f32 %v6916_v24, %v6915_v28  ;;  %v12165_v24 = vld [vmem:[#allocation87_spill] sm:$0xff] }
 0xcdb   :  { %v6786_v3 = vadd.f32 %v6785_v43, %v6784_v16  ;;  %v6918_v46 = vrot.slane %v6917_v18, 1  ;;  %v12164_v16 = vld [vmem:[#allocation109_spill] sm:$0xff]  ;;  %v12166_v43 = vld [vmem:[#allocation142_spill] sm:$0xff] }
 0xcdd   :  { %v6919_v63 = vadd.f32 %v6918_v46, %v6917_v18  ;;  %v6920_v62 = vmul.f32 0.001953125, %v6786_v3  ;;  %v12167_v18 = vld [vmem:[#allocation91_spill] sm:$0xff]  ;;  %v12168_v3 = vld [vmem:[#allocation90_spill] sm:$0xff]  ;;  %v12169_v46 = vld [vmem:[#allocation144_spill] sm:$0xff] }
 0xcdf   :  { %v6921_v10 = vmul.f32 0.001953125, %v6919_v63  ;;  %v6922_v35 = vmul.f32 %v6920_v62, %v6920_v62  ;;  %v12170_v63 = vld [vmem:[#allocation143_spill] sm:$0xff] }
 0xce1   :  { %v6923_v13 = vsub.f32 %v6921_v10, %v6922_v35  ;;  %v12172_v35 = vld [vmem:[#allocation93_spill] sm:$0xff] }
 0xce3   :  { %v6925_v5 = vadd.f32 1e-05, %v6923_v13 }
 0xce5   :  { %8033 = vrsqrt.f32 %v6925_v5  ;;  %vm6932_vm4 = vweird.f32 %v6925_v5 }
 0xceb   :  { %v8034_v45 = vpop.eup %8033 }
 0xcec   :  { %v6927_v6 = vmul.f32 %v8034_v45, %v6925_v5  ;;  %vm6933_vm3 = vweird.f32 %v8034_v45  ;;  %v12173_v5 = vld [vmem:[#allocation94_spill] sm:$0xff] }
 0xced   :  { %vm6934_vm5 = vmor %vm6932_vm4, %vm6933_vm3 }
 0xcee   :  { %v6928_v60 = vmul.f32 %v8034_v45, %v6927_v6  ;;  %v12174_v6 = vld [vmem:[#allocation95_spill] sm:$0xff] }
 0xcf0   :  { %v6929_v51 = vmul.f32 0.5, %v6928_v60 }
 0xcf2   :  { %v6930_v27 = vsub.f32 1.5, %v6929_v51  ;;  %v12175_v51 = vld [vmem:[#allocation96_spill] sm:$0xff] }
 0xcf4   :  { %v6931_v19 = vmul.f32 %v8034_v45, %v6930_v27 }
 0xcf6   :  { %v6935_v14 = vsel %vm6934_vm5, %v8034_v45, %v6931_v19 }
 0xcf7   :  { %v6936_v50 = vmul.f32 %v6935_v14, %v6924_v44  ;;  %v12176_v44 = vld [vmem:[#allocation97_spill] sm:$0xff]  ;;  %v12177_v14 = vld [vmem:[#allocation98_spill] sm:$0xff] }
 0xcf9   :  { %v6938_v53 = vmul.f32 %v6936_v50, %v6920_v62  ;;  %v11121_v23 = vperm.slane %v6936_v50, 0  ;;  %v12171_v62 = vld [vmem:[#allocation145_spill] sm:$0xff] }
 0xcfb   :  { %v6939_v33 = vsub.f32 %v6937_v55, %v6938_v53  ;;  %v7006_v4 = vmul.f32 %v11121_v23, %v6716_v20  ;;  %v6966_v54 = vmul.f32 %v11121_v23, %v10712_v25  ;;  %v6967_v31 = vmul.f32 %v11121_v23, %v10715_v47 }
 0xcfc   :  { %v6968_v11 = vmul.f32 %v11121_v23, %v10718_v49  ;;  %v6969_v20 = vmul.f32 %v11121_v23, %v10721_v0  ;;  %v6970_v30 = vmul.f32 %v11121_v23, %v10724_v1  ;;  %v6971_v2 = vmul.f32 %v11121_v23, %v10727_v29 }
 0xcfd   :  { %v11124_v59 = vperm.slane %v6939_v33, 0  ;;  %v6972_v28 = vmul.f32 %v11121_v23, %v10730_v56  ;;  %v6973_v25 = vmul.f32 %v11121_v23, %v10733_v37  ;;  %v6974_v47 = vmul.f32 %v11121_v23, %v10736_v58 }
 0xcfe   :  { %v6975_v49 = vmul.f32 %v11121_v23, %v10739_v57  ;;  %v6976_v0 = vmul.f32 %v11121_v23, %v10742_v48  ;;  %v6977_v1 = vmul.f32 %v11121_v23, %v12164_v16  ;;  %v6978_v29 = vmul.f32 %v11121_v23, %v12165_v24 }
 0xcff   :  { %v7073_v22 = vadd.f32 %v11124_v59, %v7006_v4  ;;  %v6979_v56 = vmul.f32 %v11121_v23, %v12166_v43  ;;  %v6980_v37 = vmul.f32 %v11121_v23, %v12167_v18  ;;  %v6981_v58 = vmul.f32 %v11121_v23, %v12168_v3 }
 0xd00   :  { %v6982_v57 = vmul.f32 %v11121_v23, %v12169_v46  ;;  %v6983_v48 = vmul.f32 %v11121_v23, %v12170_v63  ;;  %v6984_v10 = vmul.f32 %v11121_v23, %v12171_v62  ;;  %v6985_v13 = vmul.f32 %v11121_v23, %v12172_v35 }
 0xd01   :  { %v7137_v9 = vadd.f32 %v7073_v22, %v12163_v26  ;;  %v6986_v45 = vmul.f32 %v11121_v23, %v12173_v5  ;;  %v6987_v60 = vmul.f32 %v11121_v23, %v12174_v6  ;;  %v6988_v27 = vmul.f32 %v11121_v23, %v12175_v51 }
 0xd02   :  { %v6989_v19 = vmul.f32 %v11121_v23, %v12176_v44  ;;  %v6990_v50 = vmul.f32 %v11121_v23, %v12177_v14  ;;  %v6991_v55 = vmul.f32 %v11121_v23, %v10799_v15  ;;  %v6992_v53 = vmul.f32 %v11121_v23, %v10814_v52 }
 0xd03   :  { %v7201_v38 = vmax.f32 %v7137_v9, 0.0  ;;  %v6993_v33 = vmul.f32 %v11121_v23, %v10835_v61  ;;  %v6994_v4 = vmul.f32 %v11121_v23, %v10854_v8  ;;  %v6995_v22 = vmul.f32 %v11121_v23, %v10873_v40 }
 0xd04   :  { %v6996_v26 = vmul.f32 %v11121_v23, %v11033_v21  ;;  %v6997_v9 = vmul.f32 %v11121_v23, %v11043_v42  ;;  %v6998_v15 = vmul.f32 %v11121_v23, %v11053_v32  ;;  %v6999_v52 = vmul.f32 %v11121_v23, %v11063_v34 }
 0xd05   :  { %7265 = vst [vmem:[#allocation9 + $0x1f8] sm:$0xff] %v7201_v38  ;;  %v7000_v61 = vmul.f32 %v11121_v23, %v11073_v17  ;;  %v7001_v8 = vmul.f32 %v11121_v23, %v11082_v36  ;;  %v7002_v40 = vmul.f32 %v11121_v23, %v11090_v12  ;;  %v7003_v21 = vmul.f32 %v11121_v23, %v11095_v39 }
 0xd06   :  { %v7004_v42 = vmul.f32 %v11121_v23, %v11100_v7  ;;  %v7005_v32 = vmul.f32 %v11121_v23, %v11106_v41  ;;  %v11209_v34 = vadd.f32 %v11124_v59, %v6966_v54  ;;  %v11212_v17 = vadd.f32 %v11124_v59, %v6967_v31 }
 0xd07   :  { %v11215_v36 = vadd.f32 %v11124_v59, %v6968_v11  ;;  %v11218_v12 = vadd.f32 %v11124_v59, %v6969_v20  ;;  %v11221_v39 = vadd.f32 %v11124_v59, %v6970_v30  ;;  %v11224_v7 = vadd.f32 %v11124_v59, %v6971_v2 }
 0xd08   :  { %v11227_v41 = vadd.f32 %v11124_v59, %v6972_v28  ;;  %v11230_v38 = vadd.f32 %v11124_v59, %v6973_v25  ;;  %v11233_v54 = vadd.f32 %v11124_v59, %v6974_v47  ;;  %v11236_v31 = vadd.f32 %v11124_v59, %v6975_v49 }
 0xd09   :  { %v11239_v11 = vadd.f32 %v11124_v59, %v6976_v0  ;;  %v11242_v20 = vadd.f32 %v11124_v59, %v6977_v1  ;;  %v11245_v30 = vadd.f32 %v11124_v59, %v6978_v29  ;;  %v11248_v2 = vadd.f32 %v11124_v59, %v6979_v56 }
 0xd0a   :  { %v11251_v28 = vadd.f32 %v11124_v59, %v6980_v37  ;;  %v11254_v25 = vadd.f32 %v11124_v59, %v6981_v58  ;;  %v11257_v47 = vadd.f32 %v11124_v59, %v6982_v57  ;;  %v11260_v49 = vadd.f32 %v11124_v59, %v6983_v48 }
 0xd0b   :  { %v11263_v0 = vadd.f32 %v11124_v59, %v6984_v10  ;;  %v11266_v16 = vadd.f32 %v11124_v59, %v6985_v13  ;;  %v11269_v1 = vadd.f32 %v11124_v59, %v6986_v45  ;;  %v11272_v24 = vadd.f32 %v11124_v59, %v6987_v60  ;;  %v12187_v60 = vld [vmem:[#allocation133_spill] sm:$0xff] }
 0xd0c   :  { %v11275_v29 = vadd.f32 %v11124_v59, %v6988_v27  ;;  %v11278_v43 = vadd.f32 %v11124_v59, %v6989_v19  ;;  %v11281_v56 = vadd.f32 %v11124_v59, %v6990_v50  ;;  %v11284_v18 = vadd.f32 %v11124_v59, %v6991_v55  ;;  %v12188_v27 = vld [vmem:[#allocation134_spill] sm:$0xff]  ;;  %v12189_v19 = vld [vmem:[#allocation135_spill] sm:$0xff]  ;;  %v12190_v50 = vld [vmem:[#allocation136_spill] sm:$0xff] }
 0xd0d   :  { %v11287_v37 = vadd.f32 %v11124_v59, %v6992_v53  ;;  %v11290_v3 = vadd.f32 %v11124_v59, %v6993_v33  ;;  %v11293_v58 = vadd.f32 %v11124_v59, %v6994_v4  ;;  %v11296_v46 = vadd.f32 %v11124_v59, %v6995_v22  ;;  %v12191_v53 = vld [vmem:[#allocation137_spill] sm:$0xff]  ;;  %v12192_v22 = vld [vmem:[#allocation138_spill] sm:$0xff] }
 0xd0e   :  { %v11299_v57 = vadd.f32 %v11124_v59, %v6996_v26  ;;  %v11302_v63 = vadd.f32 %v11124_v59, %v6997_v9  ;;  %v11305_v48 = vadd.f32 %v11124_v59, %v6998_v15  ;;  %v11308_v62 = vadd.f32 %v11124_v59, %v6999_v52 }
 0xd0f   :  { %v11311_v10 = vadd.f32 %v11124_v59, %v7000_v61  ;;  %v11314_v35 = vadd.f32 %v11124_v59, %v7001_v8  ;;  %v11317_v13 = vadd.f32 %v11124_v59, %v7002_v40  ;;  %v11320_v5 = vadd.f32 %v11124_v59, %v7003_v21  ;;  %v12193_v61 = vld [vmem:[#allocation139_spill] sm:$0xff]  ;;  %v12194_v21 = vld [vmem:[#allocation49_spill] sm:$0xff] }
 0xd10   :  { %12178 = vst [vmem:[#allocation99_spill] sm:$0xff] %v11302_v63  ;;  %v11323_v45 = vadd.f32 %v11124_v59, %v7004_v42  ;;  %v11326_v6 = vadd.f32 %v11124_v59, %v7005_v32  ;;  %v6943_v51 = vmul.f32 %v11121_v23, %v12187_v60  ;;  %v6944_v44 = vmul.f32 %v11121_v23, %v12188_v27  ;;  %v12195_v60 = vld [vmem:[#allocation58_spill] sm:$0xff]  ;;  %v12196_v27 = vld [vmem:[#allocation63_spill] sm:$0xff] }
 0xd11   :  { %12179 = vst [vmem:[#allocation100_spill] sm:$0xff] %v11305_v48  ;;  %v6945_v14 = vmul.f32 %v11121_v23, %v12189_v19  ;;  %v6946_v55 = vmul.f32 %v11121_v23, %v12190_v50  ;;  %v6947_v33 = vmul.f32 %v11121_v23, %v12191_v53  ;;  %v6948_v26 = vmul.f32 %v11121_v23, %v12192_v22  ;;  %v12198_v53 = vld [vmem:[#allocation16_spill] sm:$0xff] }
 0xd12   :  { %12180 = vst [vmem:[#allocation101_spill] sm:$0xff] %v11308_v62  ;;  %v7010_v4 = vadd.f32 %v11124_v59, %v6943_v51  ;;  %v7011_v9 = vadd.f32 %v11124_v59, %v6944_v44  ;;  %v6949_v8 = vmul.f32 %v11121_v23, %v12193_v61  ;;  %v6950_v42 = vmul.f32 %v11121_v23, %v12194_v21 }
 0xd13   :  { %12181 = vst [vmem:[#allocation102_spill] sm:$0xff] %v11311_v10  ;;  %v7012_v15 = vadd.f32 %v11124_v59, %v6945_v14  ;;  %v7013_v52 = vadd.f32 %v11124_v59, %v6946_v55  ;;  %v7014_v40 = vadd.f32 %v11124_v59, %v6947_v33  ;;  %v7015_v32 = vadd.f32 %v11124_v59, %v6948_v26  ;;  %v12197_v14 = vld [vmem:[#allocation15_spill] sm:$0xff] }
 0xd14   :  { %12182 = vst [vmem:[#allocation103_spill] sm:$0xff] %v11314_v35  ;;  %v6951_v51 = vmul.f32 %v11121_v23, %v12195_v60  ;;  %v6952_v44 = vmul.f32 %v11121_v23, %v12196_v27  ;;  %v7016_v19 = vadd.f32 %v11124_v59, %v6949_v8  ;;  %v7074_v50 = vadd.f32 %v7010_v4, %v12197_v14  ;;  %v12199_v33 = vld [vmem:[#allocation19_spill] sm:$0xff]  ;;  %v12204_v35 = vld [vmem:[#allocation82_spill] sm:$0xff]  ;;  %v12206_v14 = vld [vmem:[#allocation24_spill] sm:$0xff] }
 0xd15   :  { %12183 = vst [vmem:[#allocation110_spill] sm:$0xff] %v11317_v13  ;;  %v7017_v55 = vadd.f32 %v11124_v59, %v6950_v42  ;;  %v7075_v22 = vadd.f32 %v7011_v9, %v12198_v53  ;;  %v7076_v61 = vadd.f32 %v7012_v15, %v12199_v33  ;;  %v12203_v13 = vld [vmem:[#allocation23_spill] sm:$0xff]  ;;  %v6955_v4 = vmul.f32 %v11121_v23, %v12204_v35  ;;  %v12205_v42 = vld [vmem:[#allocation81_spill] sm:$0xff] }
 0xd16   :  { %12184 = vst [vmem:[#allocation111_spill] sm:$0xff] %v11320_v5  ;;  %v12202_v5 = vld [vmem:[#allocation70_spill] sm:$0xff]  ;;  %v7018_v27 = vadd.f32 %v11124_v59, %v6951_v51  ;;  %v7078_v8 = vadd.f32 %v7014_v40, %v12203_v13  ;;  %v6956_v9 = vmul.f32 %v11121_v23, %v12205_v42  ;;  %v7019_v15 = vadd.f32 %v11124_v59, %v6952_v44  ;;  %v12207_v53 = vld [vmem:[#allocation27_spill] sm:$0xff]  ;;  %v12208_v51 = vld [vmem:[#allocation28_spill] sm:$0xff] }
 0xd17   :  { %12185 = vst [vmem:[#allocation112_spill] sm:$0xff] %v11323_v45  ;;  %v12201_v45 = vld [vmem:[#allocation64_spill] sm:$0xff]  ;;  %v6954_v60 = vmul.f32 %v11121_v23, %v12202_v5  ;;  %v7080_v5 = vadd.f32 %v7016_v19, %v12207_v53  ;;  %v7138_v33 = vmax.f32 %v7074_v50, 0.0  ;;  %v7081_v10 = vadd.f32 %v7017_v55, %v12208_v51  ;;  %v12209_v35 = vld [vmem:[#allocation69_spill] sm:$0xff]  ;;  %v12210_v44 = vld [vmem:[#allocation31_spill] sm:$0xff] }
 0xd18   :  { %12186 = vst [vmem:[#allocation113_spill] sm:$0xff] %v11326_v6  ;;  %v12200_v6 = vld [vmem:[#allocation20_spill] sm:$0xff]  ;;  %v6953_v26 = vmul.f32 %v11121_v23, %v12201_v45  ;;  %v7139_v13 = vmax.f32 %v7075_v22, 0.0  ;;  %v7140_v40 = vmax.f32 %v7076_v61, 0.0  ;;  %v6957_v48 = vmul.f32 %v11121_v23, %v12209_v35  ;;  %v12214_v53 = vld [vmem:[#allocation35_spill] sm:$0xff] }
 0xd19   :  { %v7077_v21 = vadd.f32 %v7013_v52, %v12200_v6  ;;  %v7079_v6 = vadd.f32 %v7015_v32, %v12206_v14  ;;  %v7021_v45 = vadd.f32 %v11124_v59, %v6954_v60  ;;  %v7022_v42 = vadd.f32 %v11124_v59, %v6955_v4  ;;  %7202 = vst [vmem:[#allocation9] sm:$0xff] %v7138_v33  ;;  %v12212_v50 = vld [vmem:[#allocation32_spill] sm:$0xff] }
 0xd1a   :  { %v7020_v52 = vadd.f32 %v11124_v59, %v6953_v26  ;;  %v7082_v63 = vadd.f32 %v7018_v27, %v12210_v44  ;;  %v7142_v32 = vmax.f32 %v7078_v8, 0.0  ;;  %v12211_v26 = vld [vmem:[#allocation106_spill] sm:$0xff]  ;;  %v7023_v19 = vadd.f32 %v11124_v59, %v6956_v9  ;;  %7203 = vst [vmem:[#allocation9 + $0x8] sm:$0xff] %v7139_v13  ;;  %v12213_v22 = vld [vmem:[#allocation84_spill] sm:$0xff]  ;;  %v12215_v27 = vld [vmem:[#allocation83_spill] sm:$0xff] }
 0xd1b   :  { %v7141_v62 = vmax.f32 %v7077_v21, 0.0  ;;  %v6958_v60 = vmul.f32 %v11121_v23, %v12211_v26  ;;  %v7083_v14 = vadd.f32 %v7019_v15, %v12212_v50  ;;  %v7143_v55 = vmax.f32 %v7079_v6, 0.0  ;;  %7204 = vst [vmem:[#allocation9 + $0x10] sm:$0xff] %v7140_v40  ;;  %v12216_v35 = vld [vmem:[#allocation36_spill] sm:$0xff]  ;;  %v12217_v15 = vld [vmem:[#allocation86_spill] sm:$0xff]  ;;  %v12218_v26 = vld [vmem:[#allocation39_spill] sm:$0xff] }
 0xd1c   :  { %v6959_v61 = vmul.f32 %v11121_v23, %v12213_v22  ;;  %v7024_v21 = vadd.f32 %v11124_v59, %v6957_v48  ;;  %v7084_v4 = vadd.f32 %v7020_v52, %v12214_v53  ;;  %v7144_v51 = vmax.f32 %v7080_v5, 0.0  ;;  %7206 = vst [vmem:[#allocation9 + $0x20] sm:$0xff] %v7142_v32  ;;  %v12219_v52 = vld [vmem:[#allocation85_spill] sm:$0xff]  ;;  %v12220_v22 = vld [vmem:[#allocation40_spill] sm:$0xff] }
 0xd1d   :  { %v6960_v8 = vmul.f32 %v11121_v23, %v12215_v27  ;;  %v7025_v33 = vadd.f32 %v11124_v59, %v6958_v60  ;;  %v7085_v9 = vadd.f32 %v7021_v45, %v12216_v35  ;;  %v7145_v44 = vmax.f32 %v7081_v10, 0.0  ;;  %7205 = vst [vmem:[#allocation9 + $0x18] sm:$0xff] %v7141_v62  ;;  %v12221_v10 = vld [vmem:[#allocation140_spill] sm:$0xff]  ;;  %v12222_v27 = vld [vmem:[#allocation43_spill] sm:$0xff] }
 0xd1e   :  { %v6961_v6 = vmul.f32 %v11121_v23, %v12217_v15  ;;  %v7026_v13 = vadd.f32 %v11124_v59, %v6959_v61  ;;  %v7086_v48 = vadd.f32 %v7022_v42, %v12218_v26  ;;  %v7146_v50 = vmax.f32 %v7082_v63, 0.0  ;;  %7207 = vst [vmem:[#allocation9 + $0x28] sm:$0xff] %v7143_v55  ;;  %v12223_v63 = vld [vmem:[#allocation88_spill] sm:$0xff] }
 0xd1f   :  { %v6962_v5 = vmul.f32 %v11121_v23, %v12219_v52  ;;  %v7027_v40 = vadd.f32 %v11124_v59, %v6960_v8  ;;  %v7087_v60 = vadd.f32 %v7023_v19, %v12220_v22  ;;  %v7147_v53 = vmax.f32 %v7083_v14, 0.0  ;;  %7208 = vst [vmem:[#allocation9 + $0x30] sm:$0xff] %v7144_v51  ;;  %v12224_v15 = vld [vmem:[#allocation44_spill] sm:$0xff]  ;;  %v12226_v52 = vld [vmem:[#allocation47_spill] sm:$0xff] }
 0xd20   :  { %v6963_v62 = vmul.f32 %v11121_v23, %v12221_v10  ;;  %v7028_v45 = vadd.f32 %v11124_v59, %v6961_v6  ;;  %v7088_v61 = vadd.f32 %v7024_v21, %v12222_v27  ;;  %v7148_v35 = vmax.f32 %v7084_v4, 0.0  ;;  %7209 = vst [vmem:[#allocation9 + $0x38] sm:$0xff] %v7145_v44  ;;  %v12225_v19 = vld [vmem:[#allocation92_spill] sm:$0xff]  ;;  %v12229_v27 = vld [vmem:[#allocation53_spill] sm:$0xff] }
 0xd21   :  { %v6964_v42 = vmul.f32 %v11121_v23, %v12223_v63  ;;  %v7029_v32 = vadd.f32 %v11124_v59, %v6962_v5  ;;  %v7089_v8 = vadd.f32 %v7025_v33, %v12224_v15  ;;  %v7149_v26 = vmax.f32 %v7085_v9, 0.0  ;;  %7210 = vst [vmem:[#allocation9 + $0x40] sm:$0xff] %v7146_v50  ;;  %v12227_v4 = vld [vmem:[#allocation48_spill] sm:$0xff]  ;;  %v12231_v50 = vld [vmem:[#allocation57_spill] sm:$0xff] }
 0xd22   :  { %v6965_v14 = vmul.f32 %v11121_v23, %v12225_v19  ;;  %v7030_v55 = vadd.f32 %v11124_v59, %v6963_v62  ;;  %v7090_v6 = vadd.f32 %v7026_v13, %v12226_v52  ;;  %v7150_v22 = vmax.f32 %v7086_v48, 0.0  ;;  %7211 = vst [vmem:[#allocation9 + $0x48] sm:$0xff] %v7147_v53  ;;  %v12228_v33 = vld [vmem:[#allocation52_spill] sm:$0xff] }
 0xd23   :  { %v7031_v21 = vadd.f32 %v11124_v59, %v6964_v42  ;;  %v7091_v51 = vadd.f32 %v7027_v40, %v12227_v4  ;;  %v7151_v10 = vmax.f32 %v7087_v60, 0.0  ;;  %v7092_v9 = vadd.f32 %v7028_v45, %v12228_v33  ;;  %7212 = vst [vmem:[#allocation9 + $0x50] sm:$0xff] %v7148_v35  ;;  %v12230_v62 = vld [vmem:[#allocation56_spill] sm:$0xff]  ;;  %v12232_v40 = vld [vmem:[#allocation61_spill] sm:$0xff]  ;;  %v12234_v35 = vld [vmem:[#allocation67_spill] sm:$0xff] }
 0xd24   :  { %v7032_v5 = vadd.f32 %v11124_v59, %v6965_v14  ;;  %v7152_v44 = vmax.f32 %v7088_v61, 0.0  ;;  %v7093_v23 = vadd.f32 %v7029_v32, %v12229_v27  ;;  %v7153_v63 = vmax.f32 %v7089_v8, 0.0  ;;  %7213 = vst [vmem:[#allocation9 + $0x58] sm:$0xff] %v7149_v26  ;;  %v12233_v59 = vld [vmem:[#allocation62_spill] sm:$0xff]  ;;  %v12235_v26 = vld [vmem:[#allocation68_spill] sm:$0xff]  ;;  %v12238_v4 = vld [vmem:[#allocation79_spill] sm:$0xff] }
 0xd25   :  { %v7094_v13 = vadd.f32 %v7030_v55, %v12230_v62  ;;  %v7154_v48 = vmax.f32 %v7090_v6, 0.0  ;;  %7214 = vst [vmem:[#allocation9 + $0x60] sm:$0xff] %v7150_v22  ;;  %v7095_v42 = vadd.f32 %v7031_v21, %v12231_v50  ;;  %v7155_v15 = vmax.f32 %v7091_v51, 0.0  ;;  %v12236_v55 = vld [vmem:[#allocation73_spill] sm:$0xff]  ;;  %v12237_v22 = vld [vmem:[#allocation74_spill] sm:$0xff]  ;;  %v12240_v33 = vld [vmem:[#allocation104_spill] sm:$0xff] }
 0xd26   :  { %7215 = vst [vmem:[#allocation9 + $0x68] sm:$0xff] %v7151_v10  ;;  %v7096_v60 = vadd.f32 %v7032_v5, %v12232_v40  ;;  %v7156_v53 = vmax.f32 %v7092_v9, 0.0  ;;  %v7097_v45 = vadd.f32 %v11209_v34, %v12233_v59  ;;  %v7157_v61 = vmax.f32 %v7093_v23, 0.0  ;;  %v12239_v10 = vld [vmem:[#allocation80_spill] sm:$0xff]  ;;  %v12242_v23 = vld [vmem:[#allocation13_spill] sm:$0xff]  ;;  %v12243_v62 = vld [vmem:[#allocation14_spill] sm:$0xff] }
 0xd27   :  { %7216 = vst [vmem:[#allocation9 + $0x70] sm:$0xff] %v7152_v44  ;;  %v7098_v32 = vadd.f32 %v11212_v17, %v12234_v35  ;;  %v7158_v8 = vmax.f32 %v7094_v13, 0.0  ;;  %v7099_v19 = vadd.f32 %v11215_v36, %v12235_v26  ;;  %v7159_v14 = vmax.f32 %v7095_v42, 0.0  ;;  %v12241_v44 = vld [vmem:[#allocation105_spill] sm:$0xff]  ;;  %v12245_v42 = vld [vmem:[#allocation18_spill] sm:$0xff] }
 0xd28   :  { %7217 = vst [vmem:[#allocation9 + $0x78] sm:$0xff] %v7153_v63  ;;  %v7100_v52 = vadd.f32 %v11218_v12, %v12236_v55  ;;  %v7160_v6 = vmax.f32 %v7096_v60, 0.0  ;;  %v7101_v34 = vadd.f32 %v11221_v39, %v12237_v22  ;;  %v7161_v21 = vmax.f32 %v7097_v45, 0.0  ;;  %v12246_v40 = vld [vmem:[#allocation21_spill] sm:$0xff]  ;;  %v12249_v35 = vld [vmem:[#allocation26_spill] sm:$0xff] }
 0xd29   :  { %7218 = vst [vmem:[#allocation9 + $0x80] sm:$0xff] %v7154_v48  ;;  %v7102_v17 = vadd.f32 %v11224_v7, %v12238_v4  ;;  %v7162_v51 = vmax.f32 %v7098_v32, 0.0  ;;  %v7103_v36 = vadd.f32 %v11227_v41, %v12239_v10  ;;  %v7163_v5 = vmax.f32 %v7099_v19, 0.0  ;;  %v12244_v48 = vld [vmem:[#allocation17_spill] sm:$0xff]  ;;  %v12251_v19 = vld [vmem:[#allocation30_spill] sm:$0xff] }
 0xd2a   :  { %7219 = vst [vmem:[#allocation9 + $0x88] sm:$0xff] %v7155_v15  ;;  %v7104_v12 = vadd.f32 %v11230_v38, %v12240_v33  ;;  %v7164_v9 = vmax.f32 %v7100_v52, 0.0  ;;  %v7105_v39 = vadd.f32 %v11233_v54, %v12241_v44  ;;  %v7165_v27 = vmax.f32 %v7101_v34, 0.0  ;;  %v12248_v45 = vld [vmem:[#allocation25_spill] sm:$0xff]  ;;  %v12255_v4 = vld [vmem:[#allocation38_spill] sm:$0xff] }
 0xd2b   :  { %7220 = vst [vmem:[#allocation9 + $0x90] sm:$0xff] %v7156_v53  ;;  %v7106_v7 = vadd.f32 %v11236_v31, %v12242_v23  ;;  %v7166_v63 = vmax.f32 %v7102_v17, 0.0  ;;  %v7107_v41 = vadd.f32 %v11239_v11, %v12243_v62  ;;  %v7167_v13 = vmax.f32 %v7103_v36, 0.0  ;;  %v12247_v53 = vld [vmem:[#allocation22_spill] sm:$0xff]  ;;  %v12252_v55 = vld [vmem:[#allocation33_spill] sm:$0xff]  ;;  %v12261_v23 = vld [vmem:[#allocation51_spill] sm:$0xff] }
 0xd2c   :  { %7221 = vst [vmem:[#allocation9 + $0x98] sm:$0xff] %v7157_v61  ;;  %v7108_v38 = vadd.f32 %v11242_v20, %v12244_v48  ;;  %v7168_v50 = vmax.f32 %v7104_v12, 0.0  ;;  %v7109_v54 = vadd.f32 %v11245_v30, %v12245_v42  ;;  %v7169_v15 = vmax.f32 %v7105_v39, 0.0  ;;  %v12254_v34 = vld [vmem:[#allocation37_spill] sm:$0xff]  ;;  %v12257_v36 = vld [vmem:[#allocation42_spill] sm:$0xff]  ;;  %v12264_v48 = vld [vmem:[#allocation59_spill] sm:$0xff] }
 0xd2d   :  { %7222 = vst [vmem:[#allocation9 + $0xa0] sm:$0xff] %v7158_v8  ;;  %v7110_v31 = vadd.f32 %v11248_v2, %v12246_v40  ;;  %v7170_v60 = vmax.f32 %v7106_v7, 0.0  ;;  %v7111_v11 = vadd.f32 %v11251_v28, %v12247_v53  ;;  %v7171_v59 = vmax.f32 %v7107_v41, 0.0  ;;  %v12250_v8 = vld [vmem:[#allocation29_spill] sm:$0xff]  ;;  %v12260_v39 = vld [vmem:[#allocation50_spill] sm:$0xff]  ;;  %v12263_v41 = vld [vmem:[#allocation55_spill] sm:$0xff] }
 0xd2e   :  { %7223 = vst [vmem:[#allocation9 + $0xa8] sm:$0xff] %v7159_v14  ;;  %v7112_v20 = vadd.f32 %v11254_v25, %v12248_v45  ;;  %v7172_v61 = vmax.f32 %v7108_v38, 0.0  ;;  %v7113_v30 = vadd.f32 %v11257_v47, %v12249_v35  ;;  %v7173_v32 = vmax.f32 %v7109_v54, 0.0  ;;  %v12258_v33 = vld [vmem:[#allocation45_spill] sm:$0xff]  ;;  %v12265_v38 = vld [vmem:[#allocation99_spill] sm:$0xff]  ;;  %v12266_v42 = vld [vmem:[#allocation60_spill] sm:$0xff] }
 0xd2f   :  { %7224 = vst [vmem:[#allocation9 + $0xb0] sm:$0xff] %v7160_v6  ;;  %v7114_v2 = vadd.f32 %v11260_v49, %v12250_v8  ;;  %v7174_v26 = vmax.f32 %v7110_v31, 0.0  ;;  %v7115_v28 = vadd.f32 %v11263_v0, %v12251_v19  ;;  %v7175_v14 = vmax.f32 %v7111_v11, 0.0  ;;  %v12253_v6 = vld [vmem:[#allocation34_spill] sm:$0xff]  ;;  %v12267_v54 = vld [vmem:[#allocation100_spill] sm:$0xff]  ;;  %v12268_v40 = vld [vmem:[#allocation65_spill] sm:$0xff] }
 0xd30   :  { %7225 = vst [vmem:[#allocation9 + $0xb8] sm:$0xff] %v7161_v21  ;;  %v7116_v25 = vadd.f32 %v11266_v16, %v12252_v55  ;;  %v7176_v52 = vmax.f32 %v7112_v20, 0.0  ;;  %v7117_v47 = vadd.f32 %v11269_v1, %v12253_v6  ;;  %v7177_v22 = vmax.f32 %v7113_v30, 0.0  ;;  %v12269_v31 = vld [vmem:[#allocation101_spill] sm:$0xff]  ;;  %v12270_v53 = vld [vmem:[#allocation66_spill] sm:$0xff]  ;;  %v12272_v45 = vld [vmem:[#allocation71_spill] sm:$0xff] }
 0xd31   :  { %7226 = vst [vmem:[#allocation9 + $0xc0] sm:$0xff] %v7162_v51  ;;  %v7118_v49 = vadd.f32 %v11272_v24, %v12254_v34  ;;  %v7178_v21 = vmax.f32 %v7114_v2, 0.0  ;;  %v7119_v0 = vadd.f32 %v11275_v29, %v12255_v4  ;;  %v7179_v17 = vmax.f32 %v7115_v28, 0.0  ;;  %v12256_v51 = vld [vmem:[#allocation41_spill] sm:$0xff]  ;;  %v12271_v11 = vld [vmem:[#allocation102_spill] sm:$0xff]  ;;  %v12273_v20 = vld [vmem:[#allocation103_spill] sm:$0xff] }
 0xd32   :  { %7227 = vst [vmem:[#allocation9 + $0xc8] sm:$0xff] %v7163_v5  ;;  %v7120_v16 = vadd.f32 %v11278_v43, %v12256_v51  ;;  %v7180_v10 = vmax.f32 %v7116_v25, 0.0  ;;  %v7121_v1 = vadd.f32 %v11281_v56, %v12257_v36  ;;  %v7181_v5 = vmax.f32 %v7117_v47, 0.0  ;;  %v12274_v30 = vld [vmem:[#allocation72_spill] sm:$0xff]  ;;  %v12277_v19 = vld [vmem:[#allocation111_spill] sm:$0xff]  ;;  %v12278_v55 = vld [vmem:[#allocation78_spill] sm:$0xff] }
 0xd33   :  { %7228 = vst [vmem:[#allocation9 + $0xd0] sm:$0xff] %v7164_v9  ;;  %v7122_v24 = vadd.f32 %v11284_v18, %v12258_v33  ;;  %v7182_v12 = vmax.f32 %v7118_v49, 0.0  ;;  %v12259_v9 = vld [vmem:[#allocation46_spill] sm:$0xff]  ;;  %v7183_v44 = vmax.f32 %v7119_v0, 0.0  ;;  %v7124_v43 = vadd.f32 %v11290_v3, %v12260_v39  ;;  %v12279_v25 = vld [vmem:[#allocation112_spill] sm:$0xff] }
 0xd34   :  { %7229 = vst [vmem:[#allocation9 + $0xd8] sm:$0xff] %v7165_v27  ;;  %v7123_v29 = vadd.f32 %v11287_v37, %v12259_v9  ;;  %v7184_v27 = vmax.f32 %v7120_v16, 0.0  ;;  %v7125_v56 = vadd.f32 %v11293_v58, %v12261_v23  ;;  %v7185_v7 = vmax.f32 %v7121_v1, 0.0  ;;  %v12280_v47 = vld [vmem:[#allocation76_spill] sm:$0xff] }
 0xd35   :  { %7230 = vst [vmem:[#allocation9 + $0xe0] sm:$0xff] %v7166_v63  ;;  %v12262_v63 = vld [vmem:[#allocation54_spill] sm:$0xff]  ;;  %v7186_v62 = vmax.f32 %v7122_v24, 0.0  ;;  %v7127_v37 = vadd.f32 %v11299_v57, %v12263_v41  ;;  %v7128_v3 = vadd.f32 %v12265_v38, %v12264_v48  ;;  %v7129_v58 = vadd.f32 %v12267_v54, %v12266_v42 }
 0xd36   :  { %7231 = vst [vmem:[#allocation9 + $0xe8] sm:$0xff] %v7167_v13  ;;  %v7126_v18 = vadd.f32 %v11296_v46, %v12262_v63  ;;  %v7187_v13 = vmax.f32 %v7123_v29, 0.0  ;;  %v7130_v46 = vadd.f32 %v12269_v31, %v12268_v40  ;;  %v7131_v57 = vadd.f32 %v12271_v11, %v12270_v53 }
 0xd37   :  { %7232 = vst [vmem:[#allocation9 + $0xf0] sm:$0xff] %v7168_v50  ;;  %v7188_v50 = vmax.f32 %v7124_v43, 0.0  ;;  %v7192_v35 = vmax.f32 %v7128_v3, 0.0  ;;  %v7193_v2 = vmax.f32 %v7129_v58, 0.0 }
 0xd38   :  { %7233 = vst [vmem:[#allocation9 + $0xf8] sm:$0xff] %v7169_v15  ;;  %v7189_v15 = vmax.f32 %v7125_v56, 0.0  ;;  %v7195_v6 = vmax.f32 %v7131_v57, 0.0 }
 0xd39   :  { %7234 = vst [vmem:[#allocation9 + $0x100] sm:$0xff] %v7170_v60  ;;  %v7190_v60 = vmax.f32 %v7126_v18, 0.0 }
 0xd3a   :  { %7235 = vst [vmem:[#allocation9 + $0x108] sm:$0xff] %v7171_v59  ;;  %v7191_v59 = vmax.f32 %v7127_v37, 0.0 }
 0xd3b   :  { %7236 = vst [vmem:[#allocation9 + $0x110] sm:$0xff] %v7172_v61  ;;  %v7132_v61 = vadd.f32 %v12273_v20, %v12272_v45 }
 0xd3c   :  { %7237 = vst [vmem:[#allocation9 + $0x118] sm:$0xff] %v7173_v32  ;;  %v12275_v32 = vld [vmem:[#allocation110_spill] sm:$0xff] }
 0xd3d   :  { %7238 = vst [vmem:[#allocation9 + $0x120] sm:$0xff] %v7174_v26  ;;  %v7133_v8 = vadd.f32 %v12275_v32, %v12274_v30  ;;  %v12276_v26 = vld [vmem:[#allocation77_spill] sm:$0xff]  ;;  %v7196_v49 = vmax.f32 %v7132_v61, 0.0 }
 0xd3e   :  { %7239 = vst [vmem:[#allocation9 + $0x128] sm:$0xff] %v7175_v14  ;;  %v7134_v28 = vadd.f32 %v12277_v19, %v12276_v26  ;;  %v7194_v14 = vmax.f32 %v7130_v46, 0.0 }
 0xd3f   :  { %7240 = vst [vmem:[#allocation9 + $0x130] sm:$0xff] %v7176_v52  ;;  %v7135_v52 = vadd.f32 %v12279_v25, %v12278_v55 }
 0xd40   :  { %7241 = vst [vmem:[#allocation9 + $0x138] sm:$0xff] %v7177_v22  ;;  %v12281_v22 = vld [vmem:[#allocation113_spill] sm:$0xff]  ;;  %v7198_v4 = vmax.f32 %v7134_v28, 0.0 }
 0xd41   :  { %7242 = vst [vmem:[#allocation9 + $0x140] sm:$0xff] %v7178_v21  ;;  %v7136_v34 = vadd.f32 %v12281_v22, %v12280_v47  ;;  %v7197_v21 = vmax.f32 %v7133_v8, 0.0  ;;  %v7199_v0 = vmax.f32 %v7135_v52, 0.0 }
 0xd42   :  { %7243 = vst [vmem:[#allocation9 + $0x148] sm:$0xff] %v7179_v17 }
 0xd43   :  { %7244 = vst [vmem:[#allocation9 + $0x150] sm:$0xff] %v7180_v10  ;;  %v7200_v17 = vmax.f32 %v7136_v34, 0.0 }
 0xd44   :  { %7245 = vst [vmem:[#allocation9 + $0x158] sm:$0xff] %v7181_v5 }
 0xd45   :  { %7246 = vst [vmem:[#allocation9 + $0x160] sm:$0xff] %v7182_v12 }
 0xd46   :  { %7247 = vst [vmem:[#allocation9 + $0x168] sm:$0xff] %v7183_v44 }
 0xd47   :  { %7248 = vst [vmem:[#allocation9 + $0x170] sm:$0xff] %v7184_v27 }
 0xd48   :  { %7249 = vst [vmem:[#allocation9 + $0x178] sm:$0xff] %v7185_v7 }
 0xd49   :  { %7250 = vst [vmem:[#allocation9 + $0x180] sm:$0xff] %v7186_v62 }
 0xd4a   :  { %7251 = vst [vmem:[#allocation9 + $0x188] sm:$0xff] %v7187_v13 }
 0xd4b   :  { %7252 = vst [vmem:[#allocation9 + $0x190] sm:$0xff] %v7188_v50 }
 0xd4c   :  { %7253 = vst [vmem:[#allocation9 + $0x198] sm:$0xff] %v7189_v15 }
 0xd4d   :  { %7254 = vst [vmem:[#allocation9 + $0x1a0] sm:$0xff] %v7190_v60 }
 0xd4e   :  { %7255 = vst [vmem:[#allocation9 + $0x1a8] sm:$0xff] %v7191_v59 }
 0xd4f   :  { %7256 = vst [vmem:[#allocation9 + $0x1b0] sm:$0xff] %v7192_v35 }
 0xd50   :  { %7257 = vst [vmem:[#allocation9 + $0x1b8] sm:$0xff] %v7193_v2 }
 0xd51   :  { %7258 = vst [vmem:[#allocation9 + $0x1c0] sm:$0xff] %v7194_v14 }
 0xd52   :  { %7259 = vst [vmem:[#allocation9 + $0x1c8] sm:$0xff] %v7195_v6 }
 0xd53   :  { %7260 = vst [vmem:[#allocation9 + $0x1d0] sm:$0xff] %v7196_v49 }
 0xd54   :  { %7261 = vst [vmem:[#allocation9 + $0x1d8] sm:$0xff] %v7197_v21 }
 0xd55   :  { %7262 = vst [vmem:[#allocation9 + $0x1e0] sm:$0xff] %v7198_v4 }
 0xd56   :  { %7263 = vst [vmem:[#allocation9 + $0x1e8] sm:$0xff] %v7199_v0 }
 0xd57   :  { %7264 = vst [vmem:[#allocation9 + $0x1f0] sm:$0xff] %v7200_v17 }
 0xd58   :  { %7278 = dma.vmem_to_hbm [thread:$0]  %s7271_s6, 8192, %s7273_s25, [#allocation5], %s8144_s13, %s8144_s13, %s8145_s14  }
 0xd59   :  { %8138 = dma.done.wait [#allocation5], 8192  }
 0xd5a   :  { %8139 = vsyncadd [#allocation5], 4294959104 }
 0xd5b   :  { %7283 = vsyncpa [#allocation4], 1 }
 0xd5c   :  { %7284 = vsyncpa [#allocation7], 1 }
 0xd5d   :  { %7285 = vsyncpa [#allocation5], 1 }

</bundles_post_ra>
